<compile_context>
chip_gen: v6e
topology: v6e:2x2x1
jax: 0.10.0
libtpu: 0.0.40
codegen_flags: <defaults>
</compile_context>

<pallas_src>
import functools
import math

import jax
import jax.numpy as jnp
import numpy as np
from jax.experimental import pallas as pl
from jax.experimental.pallas import tpu as pltpu

EMBED_DIM = 512
HEAD_DIM = 64
N_HEADS = EMBED_DIM // HEAD_DIM      # transformer_width // 64 = 8
N_LAYERS = 3
CONTEXT_LENGTH = 77
LN_EPS = 1e-12                       # TF-style LayerNorm eps from the module

# Per-layer parameters, stacked along a leading layer axis, in kernel-arg order.
_STACK_ORDER = ("ln1_w", "ln1_b",
                "w_q", "w_k", "w_v", "b_q", "b_k", "b_v",
                "w_o", "b_o",
                "ln2_w", "ln2_b",
                "w_fc", "b_fc", "w_proj", "b_proj")
_BF16_WEIGHTS = frozenset({"w_q", "w_k", "w_v", "w_o", "w_fc", "w_proj"})


# ----------------------------------------------------------------------------
# Pallas kernel: one ResidualAttentionBlock per grid step (grid = layers)
# ----------------------------------------------------------------------------
def _layernorm(x, w, b):
    # TF-style LayerNorm (biased variance, eps inside the sqrt); rsqrt -> EUP.
    u = jnp.mean(x, axis=-1, keepdims=True)
    xc = x - u
    s = jnp.mean(xc * xc, axis=-1, keepdims=True)
    return w * (xc * jax.lax.rsqrt(s + LN_EPS)) + b


def _temporal_block_kernel(x_ref, pos_ref,
                           ln1w_ref, ln1b_ref,
                           wq_ref, wk_ref, wv_ref, bq_ref, bk_ref, bv_ref,
                           wo_ref, bo_ref,
                           ln2w_ref, ln2b_ref,
                           wfc_ref, bfc_ref, wproj_ref, bproj_ref,
                           o_ref, x_sc, ctx_sc):
    B, T, D = x_ref.shape
    BT = B * T
    dh = HEAD_DIM
    H = D // dh
    scale = 1.0 / math.sqrt(dh)
    f32, bf16 = jnp.float32, jnp.bfloat16
    layer = pl.program_id(0)

    # Frame position-embedding add on the very first layer; x persists in VMEM
    # scratch across the layer grid (never round-trips through HBM).
    @pl.when(layer == 0)
    def _():
        x_sc[...] = (x_ref[...] + pos_ref[...][None, :, :]).reshape(BT, D)

    x = x_sc[...]                                          # (B*T, D) f32

    # ---- x = x + attn(ln_1(x)) ----
    h = _layernorm(x, ln1w_ref[...], ln1b_ref[...]).astype(bf16)
    q = (jnp.dot(h, wq_ref[...], preferred_element_type=f32) + bq_ref[...]).reshape(B, T, D)
    k = (jnp.dot(h, wk_ref[...], preferred_element_type=f32) + bk_ref[...]).reshape(B, T, D)
    v = (jnp.dot(h, wv_ref[...], preferred_element_type=f32) + bv_ref[...]).reshape(B, T, D)

    for hh in range(H):                                    # static unroll, tiny per-head math
        sl = slice(hh * dh, (hh + 1) * dh)
        qh, kh, vh = q[..., sl], k[..., sl], v[..., sl]    # (B, T, dh)
        s = jnp.einsum("bqd,bkd->bqk", qh, kh,
                       preferred_element_type=f32) * scale            # (B, T, T)
        s = s - jnp.max(s, axis=-1, keepdims=True)
        e = jnp.exp(s)
        # approx reciprocal on EUP: documented small deviation from exact softmax.
        p = e * pl.reciprocal(jnp.sum(e, axis=-1, keepdims=True), approx=True)
        ctx_sc[:, :, sl] = jnp.einsum("bqk,bkd->bqd", p, vh,
                                      preferred_element_type=f32)     # (B, T, dh)

    # Single lane-dense output projection over all heads (one full-K MXU matmul).
    attn = jnp.dot(ctx_sc[...].reshape(BT, D).astype(bf16), wo_ref[...],
                   preferred_element_type=f32) + bo_ref[...]
    x = x + attn

    # ---- x = x + mlp(ln_2(x)) ----
    h2 = _layernorm(x, ln2w_ref[...], ln2b_ref[...]).astype(bf16)
    g = jnp.dot(h2, wfc_ref[...], preferred_element_type=f32) + bfc_ref[...]
    g = g * jax.nn.sigmoid(1.702 * g)                      # QuickGELU
    x = x + jnp.dot(g.astype(bf16), wproj_ref[...],
                    preferred_element_type=f32) + bproj_ref[...]

    x_sc[...] = x

    # Outer residual of temporal_modeling + flatten, emitted on the last layer.
    @pl.when(layer == pl.num_programs(0) - 1)
    def _():
        o_ref[...] = x + x_ref[...].reshape(BT, D)


# ----------------------------------------------------------------------------
# BasicClip pieces (glue in plain JAX, compute fully inside one Pallas call)
# ----------------------------------------------------------------------------
@functools.partial(jax.jit, static_argnames=("num_frames",))
def temporal_modeling(x_flat, pos_emb, params, num_frames):
    """Mirror of BasicClip.temporal_modeling: (B*T, D) -> (B*T, D).

    Note: larger num_clips per call amortizes the ~19 MB weight DMA (the kernel
    is weight-DMA bound) — per-token cost drops near-linearly with batch size.
    """
    d = x_flat.shape[-1]
    x = x_flat.reshape(-1, num_frames, d)                  # (B, T, D)
    B, T, D = x.shape
    BT = B * T

    def stacked_spec(arr):
        # (L, r, c) stacked param -> per-layer (r, c) block, leading dim squeezed.
        _, r, c = arr.shape
        return pl.BlockSpec((pl.Squeezed(), r, c), lambda l: (l, 0, 0))

    in_specs = [
        pl.BlockSpec((B, T, D), lambda l: (0, 0, 0)),      # x: resident across layers
        pl.BlockSpec((T, D), lambda l: (0, 0)),            # pos emb
    ] + [stacked_spec(params[name]) for name in _STACK_ORDER]

    return pl.pallas_call(
        _temporal_block_kernel,
        out_shape=jax.ShapeDtypeStruct((BT, D), jnp.float32),
        grid_spec=pltpu.PrefetchScalarGridSpec(
            num_scalar_prefetch=0,
            grid=(N_LAYERS,),                              # one ResidualAttentionBlock / step
            in_specs=in_specs,
            out_specs=pl.BlockSpec((BT, D), lambda l: (0, 0)),
            scratch_shapes=[pltpu.VMEM((BT, D), jnp.float32),   # persistent activation x
                            pltpu.VMEM((B, T, D), jnp.float32)],  # per-head ctx slab
        ),
        compiler_params=pltpu.CompilerParams(
            dimension_semantics=("arbitrary",),            # layer axis is sequential
            # Per-step footprint ~14 MB (2x double-buffered 6.3 MB bf16 weights
            # + <1 MB activations); 32 MiB fits v5e/v6e scope and v7x's 64 MiB VMEM.
            vmem_limit_bytes=32 * 1024 * 1024),
    )(x, pos_emb[:T], *[params[name] for name in _STACK_ORDER])


def basic_clip_forward(image_features, text_features, pos_emb, params, num_frames):
    # TODO(synk): self.model = clip.load(...) image/text encoders are a pretrained
    # checkpoint load; inputs here are the backbone's feature outputs and
    # encode_text is a pass-through.
    img_encode = temporal_modeling(image_features, pos_emb, params,
                                   num_frames=num_frames)
    cls_encode = text_features
    return img_encode, cls_encode


# ----------------------------------------------------------------------------
# Deterministic parameter init (shapes from the module's __init__)
# ----------------------------------------------------------------------------
def init_params(key, d=EMBED_DIM, layers=N_LAYERS, context_length=CONTEXT_LENGTH):
    n_per = 16
    keys = jax.random.split(key, 1 + n_per * layers)
    pos_emb = jax.random.normal(keys[0], (context_length, d), jnp.float32) * 0.02

    def nrm(k, shape, scale=0.02):
        return jax.random.normal(k, shape, jnp.float32) * scale

    per = {name: [] for name in _STACK_ORDER}
    for i in range(layers):
        ks = keys[1 + n_per * i: 1 + n_per * (i + 1)]
        per["ln1_w"].append(1.0 + nrm(ks[0], (1, d)))
        per["ln1_b"].append(nrm(ks[1], (1, d)))
        per["w_q"].append(nrm(ks[2], (d, d)))        # stored as (in, out): torch W^T
        per["w_k"].append(nrm(ks[3], (d, d)))
        per["w_v"].append(nrm(ks[4], (d, d)))
        per["b_q"].append(nrm(ks[5], (1, d)))
        per["b_k"].append(nrm(ks[6], (1, d)))
        per["b_v"].append(nrm(ks[7], (1, d)))
        per["w_o"].append(nrm(ks[8], (d, d)))
        per["b_o"].append(nrm(ks[9], (1, d)))
        per["ln2_w"].append(1.0 + nrm(ks[10], (1, d)))
        per["ln2_b"].append(nrm(ks[11], (1, d)))
        per["w_fc"].append(nrm(ks[12], (d, 4 * d)))
        per["b_fc"].append(nrm(ks[13], (1, 4 * d)))
        per["w_proj"].append(nrm(ks[14], (4 * d, d)))
        per["b_proj"].append(nrm(ks[15], (1, d)))

    params = {}
    for name, vals in per.items():
        arr = jnp.stack(vals)                        # (layers, r, c)
        if name in _BF16_WEIGHTS:
            arr = arr.astype(jnp.bfloat16)           # kernel is weight-DMA bound
        params[name] = arr
    return pos_emb, params


# ----------------------------------------------------------------------------
# Plain-JAX f32 reference (same bf16-stored weights, f32 math) for correctness
# ----------------------------------------------------------------------------
def _ref_ln(x, w, b):
    u = x.mean(-1, keepdims=True)
    s = ((x - u) ** 2).mean(-1, keepdims=True)
    return w * ((x - u) / jnp.sqrt(s + LN_EPS)) + b


def _ref_block(x, params, l):
    B, T, D = x.shape
    H, dh = N_HEADS, HEAD_DIM
    pp = lambda name: params[name][l].astype(jnp.float32)
    h = _ref_ln(x, pp("ln1_w"), pp("ln1_b"))
    q = (h @ pp("w_q") + pp("b_q")).reshape(B, T, H, dh).transpose(0, 2, 1, 3)
    k = (h @ pp("w_k") + pp("b_k")).reshape(B, T, H, dh).transpose(0, 2, 1, 3)
    v = (h @ pp("w_v") + pp("b_v")).reshape(B, T, H, dh).transpose(0, 2, 1, 3)
    s = jnp.einsum("bhqd,bhkd->bhqk", q, k) / math.sqrt(dh)
    a = jax.nn.softmax(s, axis=-1)
    ctx = jnp.einsum("bhqk,bhkd->bhqd", a, v).transpose(0, 2, 1, 3).reshape(B, T, D)
    x = x + ctx @ pp("w_o") + pp("b_o")
    h2 = _ref_ln(x, pp("ln2_w"), pp("ln2_b"))
    g = h2 @ pp("w_fc") + pp("b_fc")
    g = g * jax.nn.sigmoid(1.702 * g)
    return x + g @ pp("w_proj") + pp("b_proj")


def ref_temporal_modeling(x_flat, pos_emb, params, num_frames):
    d = x_flat.shape[-1]
    x = x_flat.reshape(-1, num_frames, d)
    x_original = x
    x = x + pos_emb[:num_frames][None, :, :]
    for l in range(params["w_q"].shape[0]):
        x = _ref_block(x, params, l)
    return (x + x_original).reshape(-1, d)


# ----------------------------------------------------------------------------
if __name__ == "__main__":
    num_clips = 2          # batch of video clips
    num_frames = 8         # config.data.num_segments
    d = EMBED_DIM

    key = jax.random.PRNGKey(0)
    k_feat, k_txt, k_par = jax.random.split(key, 3)

    # Stand-ins for CLIP backbone outputs (see TODO above).
    image_features = jax.random.normal(k_feat, (num_clips * num_frames, d), jnp.float32)
    text_features = jax.random.normal(k_txt, (num_clips, d), jnp.float32)

    pos_emb, params = init_params(k_par)

    img_encode, cls_encode = basic_clip_forward(
        image_features, text_features, pos_emb, params, num_frames)
    img_encode = jax.block_until_ready(img_encode)
    cls_encode = jax.block_until_ready(cls_encode)

    # Correctness check against a pure-JAX f32 reference using the same
    # (bf16-stored) weights; tolerance accounts for bf16 MXU inputs and the
    # approximate softmax reciprocal.
    ref = ref_temporal_modeling(image_features, pos_emb, params, num_frames)
    np.testing.assert_allclose(np.asarray(img_encode), np.asarray(ref),
                               rtol=2e-2, atol=2e-2)
    assert img_encode.shape == (num_clips * num_frames, d)
    assert cls_encode.shape == (num_clips, d)

    print("KERNEL_OK")
</pallas_src>

<mosaic_0001>
module attributes {stable_mosaic.version = 11 : i64} {
  func.func @_temporal_block_kernel(%arg0: i32, %arg1: memref<2x8x512xf32, #tpu.memory_space<vmem>>, %arg2: memref<8x512xf32, #tpu.memory_space<vmem>>, %arg3: memref<1x1x512xf32, #tpu.memory_space<vmem>>, %arg4: memref<1x1x512xf32, #tpu.memory_space<vmem>>, %arg5: memref<1x512x512xbf16, #tpu.memory_space<vmem>>, %arg6: memref<1x512x512xbf16, #tpu.memory_space<vmem>>, %arg7: memref<1x512x512xbf16, #tpu.memory_space<vmem>>, %arg8: memref<1x1x512xf32, #tpu.memory_space<vmem>>, %arg9: memref<1x1x512xf32, #tpu.memory_space<vmem>>, %arg10: memref<1x1x512xf32, #tpu.memory_space<vmem>>, %arg11: memref<1x512x512xbf16, #tpu.memory_space<vmem>>, %arg12: memref<1x1x512xf32, #tpu.memory_space<vmem>>, %arg13: memref<1x1x512xf32, #tpu.memory_space<vmem>>, %arg14: memref<1x1x512xf32, #tpu.memory_space<vmem>>, %arg15: memref<1x512x2048xbf16, #tpu.memory_space<vmem>>, %arg16: memref<1x1x2048xf32, #tpu.memory_space<vmem>>, %arg17: memref<1x2048x512xbf16, #tpu.memory_space<vmem>>, %arg18: memref<1x1x512xf32, #tpu.memory_space<vmem>>, %arg19: memref<16x512xf32, #tpu.memory_space<vmem>>, %arg20: memref<16x512xf32, #tpu.memory_space<vmem>>, %arg21: memref<2x8x512xf32, #tpu.memory_space<vmem>>) attributes {dimension_semantics = [#tpu.dimension_semantics<arbitrary>], iteration_bounds = array<i64: 3>, scalar_prefetch = 0 : i64, scratch_operands = 2 : i64, tpu.core_type = #tpu.core_type<tc>, window_params = [{pipeline_mode = #tpu.pipeline_mode<synchronous>, transform_indices = @transform_0, window_bounds = array<i64: 2, 8, 512>}, {pipeline_mode = #tpu.pipeline_mode<synchronous>, transform_indices = @transform_1, window_bounds = array<i64: 8, 512>}, {transform_indices = @transform_2, window_bounds = array<i64: 1, 1, 512>}, {transform_indices = @transform_3, window_bounds = array<i64: 1, 1, 512>}, {transform_indices = @transform_4, window_bounds = array<i64: 1, 512, 512>}, {transform_indices = @transform_5, window_bounds = array<i64: 1, 512, 512>}, {transform_indices = @transform_6, window_bounds = array<i64: 1, 512, 512>}, {transform_indices = @transform_7, window_bounds = array<i64: 1, 1, 512>}, {transform_indices = @transform_8, window_bounds = array<i64: 1, 1, 512>}, {transform_indices = @transform_9, window_bounds = array<i64: 1, 1, 512>}, {transform_indices = @transform_10, window_bounds = array<i64: 1, 512, 512>}, {transform_indices = @transform_11, window_bounds = array<i64: 1, 1, 512>}, {transform_indices = @transform_12, window_bounds = array<i64: 1, 1, 512>}, {transform_indices = @transform_13, window_bounds = array<i64: 1, 1, 512>}, {transform_indices = @transform_14, window_bounds = array<i64: 1, 512, 2048>}, {transform_indices = @transform_15, window_bounds = array<i64: 1, 1, 2048>}, {transform_indices = @transform_16, window_bounds = array<i64: 1, 2048, 512>}, {transform_indices = @transform_17, window_bounds = array<i64: 1, 1, 512>}, {pipeline_mode = #tpu.pipeline_mode<synchronous>, transform_indices = @transform_18, window_bounds = array<i64: 16, 512>}]} {
    %c0_i32 = arith.constant 0 : i32
    %0 = arith.cmpi eq, %arg0, %c0_i32 : i32
    %1 = arith.extui %0 : i1 to i32
    %c0_i32_0 = arith.constant 0 : i32
    %2 = arith.cmpi ne, %1, %c0_i32_0 : i32
    scf.if %2 {
      %c0_130 = arith.constant 0 : index
      %c0_131 = arith.constant 0 : index
      %c0_132 = arith.constant 0 : index
      %261 = vector.load %arg1[%c0_130, %c0_131, %c0_132] : memref<2x8x512xf32, #tpu.memory_space<vmem>>, vector<2x8x512xf32>
      %c0_133 = arith.constant 0 : index
      %c0_134 = arith.constant 0 : index
      %262 = vector.load %arg2[%c0_133, %c0_134] : memref<8x512xf32, #tpu.memory_space<vmem>>, vector<8x512xf32>
      %263 = vector.shape_cast %262 : vector<8x512xf32> to vector<1x8x512xf32>
      %264 = vector.broadcast %263 : vector<1x8x512xf32> to vector<2x8x512xf32>
      %265 = arith.addf %261, %264 : vector<2x8x512xf32>
      %266 = vector.shape_cast %265 : vector<2x8x512xf32> to vector<16x512xf32>
      %c0_135 = arith.constant 0 : index
      %c0_136 = arith.constant 0 : index
      %267 = vector.load %arg20[%c0_135, %c0_136] : memref<16x512xf32, #tpu.memory_space<vmem>>, vector<16x512xf32>
      tpu.vector_store %arg20[%c0_135, %c0_136], %266 {strides = array<i32>} : memref<16x512xf32, #tpu.memory_space<vmem>>, vector<16x512xf32>,
    } else {
    }
    %c0 = arith.constant 0 : index
    %c0_1 = arith.constant 0 : index
    %3 = vector.load %arg20[%c0, %c0_1] : memref<16x512xf32, #tpu.memory_space<vmem>>, vector<16x512xf32>
    %c0_2 = arith.constant 0 : index
    %c0_3 = arith.constant 0 : index
    %c0_4 = arith.constant 0 : index
    %4 = vector.load %arg3[%c0_2, %c0_3, %c0_4] : memref<1x1x512xf32, #tpu.memory_space<vmem>>, vector<1x1x512xf32>
    %5 = vector.shape_cast %4 : vector<1x1x512xf32> to vector<1x512xf32>
    %c0_5 = arith.constant 0 : index
    %c0_6 = arith.constant 0 : index
    %c0_7 = arith.constant 0 : index
    %6 = vector.load %arg4[%c0_5, %c0_6, %c0_7] : memref<1x1x512xf32, #tpu.memory_space<vmem>>, vector<1x1x512xf32>
    %7 = vector.shape_cast %6 : vector<1x1x512xf32> to vector<1x512xf32>
    %cst = arith.constant dense<0.000000e+00> : vector<16xf32>
    %8 = vector.multi_reduction <add>, %3, %cst [1] : vector<16x512xf32> to vector<16xf32>
    %9 = vector.shape_cast %8 : vector<16xf32> to vector<16x1xf32>
    %cst_8 = arith.constant 5.120000e+02 : f32
    %10 = vector.broadcast %cst_8 : f32 to vector<16x1xf32>
    %11 = arith.divf %9, %10 : vector<16x1xf32>
    %12 = vector.broadcast %11 : vector<16x1xf32> to vector<16x512xf32>
    %13 = arith.subf %3, %12 : vector<16x512xf32>
    %14 = arith.mulf %13, %13 : vector<16x512xf32>
    %cst_9 = arith.constant dense<0.000000e+00> : vector<16xf32>
    %15 = vector.multi_reduction <add>, %14, %cst_9 [1] : vector<16x512xf32> to vector<16xf32>
    %16 = vector.shape_cast %15 : vector<16xf32> to vector<16x1xf32>
    %cst_10 = arith.constant 5.120000e+02 : f32
    %17 = vector.broadcast %cst_10 : f32 to vector<16x1xf32>
    %18 = arith.divf %16, %17 : vector<16x1xf32>
    %cst_11 = arith.constant 9.99999996E-13 : f32
    %19 = vector.broadcast %cst_11 : f32 to vector<16x1xf32>
    %20 = arith.addf %18, %19 : vector<16x1xf32>
    %21 = math.rsqrt %20 : vector<16x1xf32>
    %22 = vector.broadcast %21 : vector<16x1xf32> to vector<16x512xf32>
    %23 = arith.mulf %13, %22 : vector<16x512xf32>
    %24 = vector.broadcast %5 : vector<1x512xf32> to vector<16x512xf32>
    %25 = arith.mulf %24, %23 : vector<16x512xf32>
    %26 = vector.broadcast %7 : vector<1x512xf32> to vector<16x512xf32>
    %27 = arith.addf %25, %26 : vector<16x512xf32>
    %28 = arith.truncf %27 : vector<16x512xf32> to vector<16x512xbf16>
    %c0_12 = arith.constant 0 : index
    %c0_13 = arith.constant 0 : index
    %c0_14 = arith.constant 0 : index
    %29 = vector.load %arg5[%c0_12, %c0_13, %c0_14] : memref<1x512x512xbf16, #tpu.memory_space<vmem>>, vector<1x512x512xbf16>
    %30 = vector.shape_cast %29 : vector<1x512x512xbf16> to vector<512x512xbf16>
    %cst_15 = arith.constant dense<0.000000e+00> : vector<16x512xf32>
    %31 = tpu.matmul %28, %30, %cst_15 {dimension_numbers = #tpu.dot_dimension_numbers<[1], [0], [0], [1], [0, 0, 1, 1], [], []>} : vector<16x512xbf16>, vector<512x512xbf16>, vector<16x512xf32> -> vector<16x512xf32>
    %c0_16 = arith.constant 0 : index
    %c0_17 = arith.constant 0 : index
    %c0_18 = arith.constant 0 : index
    %32 = vector.load %arg8[%c0_16, %c0_17, %c0_18] : memref<1x1x512xf32, #tpu.memory_space<vmem>>, vector<1x1x512xf32>
    %33 = vector.shape_cast %32 : vector<1x1x512xf32> to vector<1x512xf32>
    %34 = vector.broadcast %33 : vector<1x512xf32> to vector<16x512xf32>
    %35 = arith.addf %31, %34 : vector<16x512xf32>
    %36 = vector.shape_cast %35 : vector<16x512xf32> to vector<2x8x512xf32>
    %c0_19 = arith.constant 0 : index
    %c0_20 = arith.constant 0 : index
    %c0_21 = arith.constant 0 : index
    %37 = vector.load %arg6[%c0_19, %c0_20, %c0_21] : memref<1x512x512xbf16, #tpu.memory_space<vmem>>, vector<1x512x512xbf16>
    %38 = vector.shape_cast %37 : vector<1x512x512xbf16> to vector<512x512xbf16>
    %cst_22 = arith.constant dense<0.000000e+00> : vector<16x512xf32>
    %39 = tpu.matmul %28, %38, %cst_22 {dimension_numbers = #tpu.dot_dimension_numbers<[1], [0], [0], [1], [0, 0, 1, 1], [], []>} : vector<16x512xbf16>, vector<512x512xbf16>, vector<16x512xf32> -> vector<16x512xf32>
    %c0_23 = arith.constant 0 : index
    %c0_24 = arith.constant 0 : index
    %c0_25 = arith.constant 0 : index
    %40 = vector.load %arg9[%c0_23, %c0_24, %c0_25] : memref<1x1x512xf32, #tpu.memory_space<vmem>>, vector<1x1x512xf32>
    %41 = vector.shape_cast %40 : vector<1x1x512xf32> to vector<1x512xf32>
    %42 = vector.broadcast %41 : vector<1x512xf32> to vector<16x512xf32>
    %43 = arith.addf %39, %42 : vector<16x512xf32>
    %44 = vector.shape_cast %43 : vector<16x512xf32> to vector<2x8x512xf32>
    %c0_26 = arith.constant 0 : index
    %c0_27 = arith.constant 0 : index
    %c0_28 = arith.constant 0 : index
    %45 = vector.load %arg7[%c0_26, %c0_27, %c0_28] : memref<1x512x512xbf16, #tpu.memory_space<vmem>>, vector<1x512x512xbf16>
    %46 = vector.shape_cast %45 : vector<1x512x512xbf16> to vector<512x512xbf16>
    %cst_29 = arith.constant dense<0.000000e+00> : vector<16x512xf32>
    %47 = tpu.matmul %28, %46, %cst_29 {dimension_numbers = #tpu.dot_dimension_numbers<[1], [0], [0], [1], [0, 0, 1, 1], [], []>} : vector<16x512xbf16>, vector<512x512xbf16>, vector<16x512xf32> -> vector<16x512xf32>
    %c0_30 = arith.constant 0 : index
    %c0_31 = arith.constant 0 : index
    %c0_32 = arith.constant 0 : index
    %48 = vector.load %arg10[%c0_30, %c0_31, %c0_32] : memref<1x1x512xf32, #tpu.memory_space<vmem>>, vector<1x1x512xf32>
    %49 = vector.shape_cast %48 : vector<1x1x512xf32> to vector<1x512xf32>
    %50 = vector.broadcast %49 : vector<1x512xf32> to vector<16x512xf32>
    %51 = arith.addf %47, %50 : vector<16x512xf32>
    %52 = vector.shape_cast %51 : vector<16x512xf32> to vector<2x8x512xf32>
    %53 = vector.extract_strided_slice %36 {offsets = [0, 0, 0], sizes = [2, 8, 64], strides = [1, 1, 1]} : vector<2x8x512xf32> to vector<2x8x64xf32>
    %54 = vector.extract_strided_slice %44 {offsets = [0, 0, 0], sizes = [2, 8, 64], strides = [1, 1, 1]} : vector<2x8x512xf32> to vector<2x8x64xf32>
    %55 = vector.extract_strided_slice %52 {offsets = [0, 0, 0], sizes = [2, 8, 64], strides = [1, 1, 1]} : vector<2x8x512xf32> to vector<2x8x64xf32>
    "tpu.trace_start"() <{level = 10 : i32, message = "bqd,bkd->bqk"}> : () -> ()
    %cst_33 = arith.constant dense<0.000000e+00> : vector<2x8x8xf32>
    %56 = tpu.matmul %53, %54, %cst_33 {dimension_numbers = #tpu.dot_dimension_numbers<[2], [2], [1], [1], [0, 0, 0, 1, 1, 1], [0], [0]>} : vector<2x8x64xf32>, vector<2x8x64xf32>, vector<2x8x8xf32> -> vector<2x8x8xf32>
    "tpu.trace_stop"() : () -> ()
    %cst_34 = arith.constant 1.250000e-01 : f32
    %57 = vector.broadcast %cst_34 : f32 to vector<2x8x8xf32>
    %58 = arith.mulf %56, %57 : vector<2x8x8xf32>
    %cst_35 = arith.constant dense<0xFF800000> : vector<2x8xf32>
    %59 = vector.multi_reduction <maximumf>, %58, %cst_35 [2] : vector<2x8x8xf32> to vector<2x8xf32>
    %60 = vector.shape_cast %59 : vector<2x8xf32> to vector<2x8x1xf32>
    %61 = vector.broadcast %60 : vector<2x8x1xf32> to vector<2x8x8xf32>
    %62 = arith.subf %58, %61 : vector<2x8x8xf32>
    %63 = math.exp %62 : vector<2x8x8xf32>
    %cst_36 = arith.constant dense<0.000000e+00> : vector<2x8xf32>
    %64 = vector.multi_reduction <add>, %63, %cst_36 [2] : vector<2x8x8xf32> to vector<2x8xf32>
    %65 = vector.shape_cast %64 : vector<2x8xf32> to vector<2x8x1xf32>
    %66 = tpu.reciprocal %65 {approx = true} : vector<2x8x1xf32> -> vector<2x8x1xf32>
    %67 = vector.broadcast %66 : vector<2x8x1xf32> to vector<2x8x8xf32>
    %68 = arith.mulf %63, %67 : vector<2x8x8xf32>
    "tpu.trace_start"() <{level = 10 : i32, message = "bqk,bkd->bqd"}> : () -> ()
    %cst_37 = arith.constant dense<0.000000e+00> : vector<2x8x64xf32>
    %69 = tpu.matmul %68, %55, %cst_37 {dimension_numbers = #tpu.dot_dimension_numbers<[2], [1], [1], [2], [0, 0, 0, 1, 1, 2], [0], [0]>} : vector<2x8x8xf32>, vector<2x8x64xf32>, vector<2x8x64xf32> -> vector<2x8x64xf32>
    "tpu.trace_stop"() : () -> ()
    %c0_38 = arith.constant 0 : index
    %c0_39 = arith.constant 0 : index
    %c0_40 = arith.constant 0 : index
    %70 = vector.load %arg21[%c0_38, %c0_39, %c0_40] : memref<2x8x512xf32, #tpu.memory_space<vmem>>, vector<2x8x64xf32>
    tpu.vector_store %arg21[%c0_38, %c0_39, %c0_40], %69 {strides = array<i32>} : memref<2x8x512xf32, #tpu.memory_space<vmem>>, vector<2x8x64xf32>,
    %71 = vector.extract_strided_slice %36 {offsets = [0, 0, 64], sizes = [2, 8, 64], strides = [1, 1, 1]} : vector<2x8x512xf32> to vector<2x8x64xf32>
    %72 = vector.extract_strided_slice %44 {offsets = [0, 0, 64], sizes = [2, 8, 64], strides = [1, 1, 1]} : vector<2x8x512xf32> to vector<2x8x64xf32>
    %73 = vector.extract_strided_slice %52 {offsets = [0, 0, 64], sizes = [2, 8, 64], strides = [1, 1, 1]} : vector<2x8x512xf32> to vector<2x8x64xf32>
    "tpu.trace_start"() <{level = 10 : i32, message = "bqd,bkd->bqk"}> : () -> ()
    %cst_41 = arith.constant dense<0.000000e+00> : vector<2x8x8xf32>
    %74 = tpu.matmul %71, %72, %cst_41 {dimension_numbers = #tpu.dot_dimension_numbers<[2], [2], [1], [1], [0, 0, 0, 1, 1, 1], [0], [0]>} : vector<2x8x64xf32>, vector<2x8x64xf32>, vector<2x8x8xf32> -> vector<2x8x8xf32>
    "tpu.trace_stop"() : () -> ()
    %cst_42 = arith.constant 1.250000e-01 : f32
    %75 = vector.broadcast %cst_42 : f32 to vector<2x8x8xf32>
    %76 = arith.mulf %74, %75 : vector<2x8x8xf32>
    %cst_43 = arith.constant dense<0xFF800000> : vector<2x8xf32>
    %77 = vector.multi_reduction <maximumf>, %76, %cst_43 [2] : vector<2x8x8xf32> to vector<2x8xf32>
    %78 = vector.shape_cast %77 : vector<2x8xf32> to vector<2x8x1xf32>
    %79 = vector.broadcast %78 : vector<2x8x1xf32> to vector<2x8x8xf32>
    %80 = arith.subf %76, %79 : vector<2x8x8xf32>
    %81 = math.exp %80 : vector<2x8x8xf32>
    %cst_44 = arith.constant dense<0.000000e+00> : vector<2x8xf32>
    %82 = vector.multi_reduction <add>, %81, %cst_44 [2] : vector<2x8x8xf32> to vector<2x8xf32>
    %83 = vector.shape_cast %82 : vector<2x8xf32> to vector<2x8x1xf32>
    %84 = tpu.reciprocal %83 {approx = true} : vector<2x8x1xf32> -> vector<2x8x1xf32>
    %85 = vector.broadcast %84 : vector<2x8x1xf32> to vector<2x8x8xf32>
    %86 = arith.mulf %81, %85 : vector<2x8x8xf32>
    "tpu.trace_start"() <{level = 10 : i32, message = "bqk,bkd->bqd"}> : () -> ()
    %cst_45 = arith.constant dense<0.000000e+00> : vector<2x8x64xf32>
    %87 = tpu.matmul %86, %73, %cst_45 {dimension_numbers = #tpu.dot_dimension_numbers<[2], [1], [1], [2], [0, 0, 0, 1, 1, 2], [0], [0]>} : vector<2x8x8xf32>, vector<2x8x64xf32>, vector<2x8x64xf32> -> vector<2x8x64xf32>
    "tpu.trace_stop"() : () -> ()
    %c0_46 = arith.constant 0 : index
    %c0_47 = arith.constant 0 : index
    %c64 = arith.constant 64 : index
    %88 = vector.load %arg21[%c0_46, %c0_47, %c64] : memref<2x8x512xf32, #tpu.memory_space<vmem>>, vector<2x8x64xf32>
    tpu.vector_store %arg21[%c0_46, %c0_47, %c64], %87 {strides = array<i32>} : memref<2x8x512xf32, #tpu.memory_space<vmem>>, vector<2x8x64xf32>,
    %89 = vector.extract_strided_slice %36 {offsets = [0, 0, 128], sizes = [2, 8, 64], strides = [1, 1, 1]} : vector<2x8x512xf32> to vector<2x8x64xf32>
    %90 = vector.extract_strided_slice %44 {offsets = [0, 0, 128], sizes = [2, 8, 64], strides = [1, 1, 1]} : vector<2x8x512xf32> to vector<2x8x64xf32>
    %91 = vector.extract_strided_slice %52 {offsets = [0, 0, 128], sizes = [2, 8, 64], strides = [1, 1, 1]} : vector<2x8x512xf32> to vector<2x8x64xf32>
    "tpu.trace_start"() <{level = 10 : i32, message = "bqd,bkd->bqk"}> : () -> ()
    %cst_48 = arith.constant dense<0.000000e+00> : vector<2x8x8xf32>
    %92 = tpu.matmul %89, %90, %cst_48 {dimension_numbers = #tpu.dot_dimension_numbers<[2], [2], [1], [1], [0, 0, 0, 1, 1, 1], [0], [0]>} : vector<2x8x64xf32>, vector<2x8x64xf32>, vector<2x8x8xf32> -> vector<2x8x8xf32>
    "tpu.trace_stop"() : () -> ()
    %cst_49 = arith.constant 1.250000e-01 : f32
    %93 = vector.broadcast %cst_49 : f32 to vector<2x8x8xf32>
    %94 = arith.mulf %92, %93 : vector<2x8x8xf32>
    %cst_50 = arith.constant dense<0xFF800000> : vector<2x8xf32>
    %95 = vector.multi_reduction <maximumf>, %94, %cst_50 [2] : vector<2x8x8xf32> to vector<2x8xf32>
    %96 = vector.shape_cast %95 : vector<2x8xf32> to vector<2x8x1xf32>
    %97 = vector.broadcast %96 : vector<2x8x1xf32> to vector<2x8x8xf32>
    %98 = arith.subf %94, %97 : vector<2x8x8xf32>
    %99 = math.exp %98 : vector<2x8x8xf32>
    %cst_51 = arith.constant dense<0.000000e+00> : vector<2x8xf32>
    %100 = vector.multi_reduction <add>, %99, %cst_51 [2] : vector<2x8x8xf32> to vector<2x8xf32>
    %101 = vector.shape_cast %100 : vector<2x8xf32> to vector<2x8x1xf32>
    %102 = tpu.reciprocal %101 {approx = true} : vector<2x8x1xf32> -> vector<2x8x1xf32>
    %103 = vector.broadcast %102 : vector<2x8x1xf32> to vector<2x8x8xf32>
    %104 = arith.mulf %99, %103 : vector<2x8x8xf32>
    "tpu.trace_start"() <{level = 10 : i32, message = "bqk,bkd->bqd"}> : () -> ()
    %cst_52 = arith.constant dense<0.000000e+00> : vector<2x8x64xf32>
    %105 = tpu.matmul %104, %91, %cst_52 {dimension_numbers = #tpu.dot_dimension_numbers<[2], [1], [1], [2], [0, 0, 0, 1, 1, 2], [0], [0]>} : vector<2x8x8xf32>, vector<2x8x64xf32>, vector<2x8x64xf32> -> vector<2x8x64xf32>
    "tpu.trace_stop"() : () -> ()
    %c0_53 = arith.constant 0 : index
    %c0_54 = arith.constant 0 : index
    %c128 = arith.constant 128 : index
    %106 = vector.load %arg21[%c0_53, %c0_54, %c128] : memref<2x8x512xf32, #tpu.memory_space<vmem>>, vector<2x8x64xf32>
    tpu.vector_store %arg21[%c0_53, %c0_54, %c128], %105 {strides = array<i32>} : memref<2x8x512xf32, #tpu.memory_space<vmem>>, vector<2x8x64xf32>,
    %107 = vector.extract_strided_slice %36 {offsets = [0, 0, 192], sizes = [2, 8, 64], strides = [1, 1, 1]} : vector<2x8x512xf32> to vector<2x8x64xf32>
    %108 = vector.extract_strided_slice %44 {offsets = [0, 0, 192], sizes = [2, 8, 64], strides = [1, 1, 1]} : vector<2x8x512xf32> to vector<2x8x64xf32>
    %109 = vector.extract_strided_slice %52 {offsets = [0, 0, 192], sizes = [2, 8, 64], strides = [1, 1, 1]} : vector<2x8x512xf32> to vector<2x8x64xf32>
    "tpu.trace_start"() <{level = 10 : i32, message = "bqd,bkd->bqk"}> : () -> ()
    %cst_55 = arith.constant dense<0.000000e+00> : vector<2x8x8xf32>
    %110 = tpu.matmul %107, %108, %cst_55 {dimension_numbers = #tpu.dot_dimension_numbers<[2], [2], [1], [1], [0, 0, 0, 1, 1, 1], [0], [0]>} : vector<2x8x64xf32>, vector<2x8x64xf32>, vector<2x8x8xf32> -> vector<2x8x8xf32>
    "tpu.trace_stop"() : () -> ()
    %cst_56 = arith.constant 1.250000e-01 : f32
    %111 = vector.broadcast %cst_56 : f32 to vector<2x8x8xf32>
    %112 = arith.mulf %110, %111 : vector<2x8x8xf32>
    %cst_57 = arith.constant dense<0xFF800000> : vector<2x8xf32>
    %113 = vector.multi_reduction <maximumf>, %112, %cst_57 [2] : vector<2x8x8xf32> to vector<2x8xf32>
    %114 = vector.shape_cast %113 : vector<2x8xf32> to vector<2x8x1xf32>
    %115 = vector.broadcast %114 : vector<2x8x1xf32> to vector<2x8x8xf32>
    %116 = arith.subf %112, %115 : vector<2x8x8xf32>
    %117 = math.exp %116 : vector<2x8x8xf32>
    %cst_58 = arith.constant dense<0.000000e+00> : vector<2x8xf32>
    %118 = vector.multi_reduction <add>, %117, %cst_58 [2] : vector<2x8x8xf32> to vector<2x8xf32>
    %119 = vector.shape_cast %118 : vector<2x8xf32> to vector<2x8x1xf32>
    %120 = tpu.reciprocal %119 {approx = true} : vector<2x8x1xf32> -> vector<2x8x1xf32>
    %121 = vector.broadcast %120 : vector<2x8x1xf32> to vector<2x8x8xf32>
    %122 = arith.mulf %117, %121 : vector<2x8x8xf32>
    "tpu.trace_start"() <{level = 10 : i32, message = "bqk,bkd->bqd"}> : () -> ()
    %cst_59 = arith.constant dense<0.000000e+00> : vector<2x8x64xf32>
    %123 = tpu.matmul %122, %109, %cst_59 {dimension_numbers = #tpu.dot_dimension_numbers<[2], [1], [1], [2], [0, 0, 0, 1, 1, 2], [0], [0]>} : vector<2x8x8xf32>, vector<2x8x64xf32>, vector<2x8x64xf32> -> vector<2x8x64xf32>
    "tpu.trace_stop"() : () -> ()
    %c0_60 = arith.constant 0 : index
    %c0_61 = arith.constant 0 : index
    %c192 = arith.constant 192 : index
    %124 = vector.load %arg21[%c0_60, %c0_61, %c192] : memref<2x8x512xf32, #tpu.memory_space<vmem>>, vector<2x8x64xf32>
    tpu.vector_store %arg21[%c0_60, %c0_61, %c192], %123 {strides = array<i32>} : memref<2x8x512xf32, #tpu.memory_space<vmem>>, vector<2x8x64xf32>,
    %125 = vector.extract_strided_slice %36 {offsets = [0, 0, 256], sizes = [2, 8, 64], strides = [1, 1, 1]} : vector<2x8x512xf32> to vector<2x8x64xf32>
    %126 = vector.extract_strided_slice %44 {offsets = [0, 0, 256], sizes = [2, 8, 64], strides = [1, 1, 1]} : vector<2x8x512xf32> to vector<2x8x64xf32>
    %127 = vector.extract_strided_slice %52 {offsets = [0, 0, 256], sizes = [2, 8, 64], strides = [1, 1, 1]} : vector<2x8x512xf32> to vector<2x8x64xf32>
    "tpu.trace_start"() <{level = 10 : i32, message = "bqd,bkd->bqk"}> : () -> ()
    %cst_62 = arith.constant dense<0.000000e+00> : vector<2x8x8xf32>
    %128 = tpu.matmul %125, %126, %cst_62 {dimension_numbers = #tpu.dot_dimension_numbers<[2], [2], [1], [1], [0, 0, 0, 1, 1, 1], [0], [0]>} : vector<2x8x64xf32>, vector<2x8x64xf32>, vector<2x8x8xf32> -> vector<2x8x8xf32>
    "tpu.trace_stop"() : () -> ()
    %cst_63 = arith.constant 1.250000e-01 : f32
    %129 = vector.broadcast %cst_63 : f32 to vector<2x8x8xf32>
    %130 = arith.mulf %128, %129 : vector<2x8x8xf32>
    %cst_64 = arith.constant dense<0xFF800000> : vector<2x8xf32>
    %131 = vector.multi_reduction <maximumf>, %130, %cst_64 [2] : vector<2x8x8xf32> to vector<2x8xf32>
    %132 = vector.shape_cast %131 : vector<2x8xf32> to vector<2x8x1xf32>
    %133 = vector.broadcast %132 : vector<2x8x1xf32> to vector<2x8x8xf32>
    %134 = arith.subf %130, %133 : vector<2x8x8xf32>
    %135 = math.exp %134 : vector<2x8x8xf32>
    %cst_65 = arith.constant dense<0.000000e+00> : vector<2x8xf32>
    %136 = vector.multi_reduction <add>, %135, %cst_65 [2] : vector<2x8x8xf32> to vector<2x8xf32>
    %137 = vector.shape_cast %136 : vector<2x8xf32> to vector<2x8x1xf32>
    %138 = tpu.reciprocal %137 {approx = true} : vector<2x8x1xf32> -> vector<2x8x1xf32>
    %139 = vector.broadcast %138 : vector<2x8x1xf32> to vector<2x8x8xf32>
    %140 = arith.mulf %135, %139 : vector<2x8x8xf32>
    "tpu.trace_start"() <{level = 10 : i32, message = "bqk,bkd->bqd"}> : () -> ()
    %cst_66 = arith.constant dense<0.000000e+00> : vector<2x8x64xf32>
    %141 = tpu.matmul %140, %127, %cst_66 {dimension_numbers = #tpu.dot_dimension_numbers<[2], [1], [1], [2], [0, 0, 0, 1, 1, 2], [0], [0]>} : vector<2x8x8xf32>, vector<2x8x64xf32>, vector<2x8x64xf32> -> vector<2x8x64xf32>
    "tpu.trace_stop"() : () -> ()
    %c0_67 = arith.constant 0 : index
    %c0_68 = arith.constant 0 : index
    %c256 = arith.constant 256 : index
    %142 = vector.load %arg21[%c0_67, %c0_68, %c256] : memref<2x8x512xf32, #tpu.memory_space<vmem>>, vector<2x8x64xf32>
    tpu.vector_store %arg21[%c0_67, %c0_68, %c256], %141 {strides = array<i32>} : memref<2x8x512xf32, #tpu.memory_space<vmem>>, vector<2x8x64xf32>,
    %143 = vector.extract_strided_slice %36 {offsets = [0, 0, 320], sizes = [2, 8, 64], strides = [1, 1, 1]} : vector<2x8x512xf32> to vector<2x8x64xf32>
    %144 = vector.extract_strided_slice %44 {offsets = [0, 0, 320], sizes = [2, 8, 64], strides = [1, 1, 1]} : vector<2x8x512xf32> to vector<2x8x64xf32>
    %145 = vector.extract_strided_slice %52 {offsets = [0, 0, 320], sizes = [2, 8, 64], strides = [1, 1, 1]} : vector<2x8x512xf32> to vector<2x8x64xf32>
    "tpu.trace_start"() <{level = 10 : i32, message = "bqd,bkd->bqk"}> : () -> ()
    %cst_69 = arith.constant dense<0.000000e+00> : vector<2x8x8xf32>
    %146 = tpu.matmul %143, %144, %cst_69 {dimension_numbers = #tpu.dot_dimension_numbers<[2], [2], [1], [1], [0, 0, 0, 1, 1, 1], [0], [0]>} : vector<2x8x64xf32>, vector<2x8x64xf32>, vector<2x8x8xf32> -> vector<2x8x8xf32>
    "tpu.trace_stop"() : () -> ()
    %cst_70 = arith.constant 1.250000e-01 : f32
    %147 = vector.broadcast %cst_70 : f32 to vector<2x8x8xf32>
    %148 = arith.mulf %146, %147 : vector<2x8x8xf32>
    %cst_71 = arith.constant dense<0xFF800000> : vector<2x8xf32>
    %149 = vector.multi_reduction <maximumf>, %148, %cst_71 [2] : vector<2x8x8xf32> to vector<2x8xf32>
    %150 = vector.shape_cast %149 : vector<2x8xf32> to vector<2x8x1xf32>
    %151 = vector.broadcast %150 : vector<2x8x1xf32> to vector<2x8x8xf32>
    %152 = arith.subf %148, %151 : vector<2x8x8xf32>
    %153 = math.exp %152 : vector<2x8x8xf32>
    %cst_72 = arith.constant dense<0.000000e+00> : vector<2x8xf32>
    %154 = vector.multi_reduction <add>, %153, %cst_72 [2] : vector<2x8x8xf32> to vector<2x8xf32>
    %155 = vector.shape_cast %154 : vector<2x8xf32> to vector<2x8x1xf32>
    %156 = tpu.reciprocal %155 {approx = true} : vector<2x8x1xf32> -> vector<2x8x1xf32>
    %157 = vector.broadcast %156 : vector<2x8x1xf32> to vector<2x8x8xf32>
    %158 = arith.mulf %153, %157 : vector<2x8x8xf32>
    "tpu.trace_start"() <{level = 10 : i32, message = "bqk,bkd->bqd"}> : () -> ()
    %cst_73 = arith.constant dense<0.000000e+00> : vector<2x8x64xf32>
    %159 = tpu.matmul %158, %145, %cst_73 {dimension_numbers = #tpu.dot_dimension_numbers<[2], [1], [1], [2], [0, 0, 0, 1, 1, 2], [0], [0]>} : vector<2x8x8xf32>, vector<2x8x64xf32>, vector<2x8x64xf32> -> vector<2x8x64xf32>
    "tpu.trace_stop"() : () -> ()
    %c0_74 = arith.constant 0 : index
    %c0_75 = arith.constant 0 : index
    %c320 = arith.constant 320 : index
    %160 = vector.load %arg21[%c0_74, %c0_75, %c320] : memref<2x8x512xf32, #tpu.memory_space<vmem>>, vector<2x8x64xf32>
    tpu.vector_store %arg21[%c0_74, %c0_75, %c320], %159 {strides = array<i32>} : memref<2x8x512xf32, #tpu.memory_space<vmem>>, vector<2x8x64xf32>,
    %161 = vector.extract_strided_slice %36 {offsets = [0, 0, 384], sizes = [2, 8, 64], strides = [1, 1, 1]} : vector<2x8x512xf32> to vector<2x8x64xf32>
    %162 = vector.extract_strided_slice %44 {offsets = [0, 0, 384], sizes = [2, 8, 64], strides = [1, 1, 1]} : vector<2x8x512xf32> to vector<2x8x64xf32>
    %163 = vector.extract_strided_slice %52 {offsets = [0, 0, 384], sizes = [2, 8, 64], strides = [1, 1, 1]} : vector<2x8x512xf32> to vector<2x8x64xf32>
    "tpu.trace_start"() <{level = 10 : i32, message = "bqd,bkd->bqk"}> : () -> ()
    %cst_76 = arith.constant dense<0.000000e+00> : vector<2x8x8xf32>
    %164 = tpu.matmul %161, %162, %cst_76 {dimension_numbers = #tpu.dot_dimension_numbers<[2], [2], [1], [1], [0, 0, 0, 1, 1, 1], [0], [0]>} : vector<2x8x64xf32>, vector<2x8x64xf32>, vector<2x8x8xf32> -> vector<2x8x8xf32>
    "tpu.trace_stop"() : () -> ()
    %cst_77 = arith.constant 1.250000e-01 : f32
    %165 = vector.broadcast %cst_77 : f32 to vector<2x8x8xf32>
    %166 = arith.mulf %164, %165 : vector<2x8x8xf32>
    %cst_78 = arith.constant dense<0xFF800000> : vector<2x8xf32>
    %167 = vector.multi_reduction <maximumf>, %166, %cst_78 [2] : vector<2x8x8xf32> to vector<2x8xf32>
    %168 = vector.shape_cast %167 : vector<2x8xf32> to vector<2x8x1xf32>
    %169 = vector.broadcast %168 : vector<2x8x1xf32> to vector<2x8x8xf32>
    %170 = arith.subf %166, %169 : vector<2x8x8xf32>
    %171 = math.exp %170 : vector<2x8x8xf32>
    %cst_79 = arith.constant dense<0.000000e+00> : vector<2x8xf32>
    %172 = vector.multi_reduction <add>, %171, %cst_79 [2] : vector<2x8x8xf32> to vector<2x8xf32>
    %173 = vector.shape_cast %172 : vector<2x8xf32> to vector<2x8x1xf32>
    %174 = tpu.reciprocal %173 {approx = true} : vector<2x8x1xf32> -> vector<2x8x1xf32>
    %175 = vector.broadcast %174 : vector<2x8x1xf32> to vector<2x8x8xf32>
    %176 = arith.mulf %171, %175 : vector<2x8x8xf32>
    "tpu.trace_start"() <{level = 10 : i32, message = "bqk,bkd->bqd"}> : () -> ()
    %cst_80 = arith.constant dense<0.000000e+00> : vector<2x8x64xf32>
    %177 = tpu.matmul %176, %163, %cst_80 {dimension_numbers = #tpu.dot_dimension_numbers<[2], [1], [1], [2], [0, 0, 0, 1, 1, 2], [0], [0]>} : vector<2x8x8xf32>, vector<2x8x64xf32>, vector<2x8x64xf32> -> vector<2x8x64xf32>
    "tpu.trace_stop"() : () -> ()
    %c0_81 = arith.constant 0 : index
    %c0_82 = arith.constant 0 : index
    %c384 = arith.constant 384 : index
    %178 = vector.load %arg21[%c0_81, %c0_82, %c384] : memref<2x8x512xf32, #tpu.memory_space<vmem>>, vector<2x8x64xf32>
    tpu.vector_store %arg21[%c0_81, %c0_82, %c384], %177 {strides = array<i32>} : memref<2x8x512xf32, #tpu.memory_space<vmem>>, vector<2x8x64xf32>,
    %179 = vector.extract_strided_slice %36 {offsets = [0, 0, 448], sizes = [2, 8, 64], strides = [1, 1, 1]} : vector<2x8x512xf32> to vector<2x8x64xf32>
    %180 = vector.extract_strided_slice %44 {offsets = [0, 0, 448], sizes = [2, 8, 64], strides = [1, 1, 1]} : vector<2x8x512xf32> to vector<2x8x64xf32>
    %181 = vector.extract_strided_slice %52 {offsets = [0, 0, 448], sizes = [2, 8, 64], strides = [1, 1, 1]} : vector<2x8x512xf32> to vector<2x8x64xf32>
    "tpu.trace_start"() <{level = 10 : i32, message = "bqd,bkd->bqk"}> : () -> ()
    %cst_83 = arith.constant dense<0.000000e+00> : vector<2x8x8xf32>
    %182 = tpu.matmul %179, %180, %cst_83 {dimension_numbers = #tpu.dot_dimension_numbers<[2], [2], [1], [1], [0, 0, 0, 1, 1, 1], [0], [0]>} : vector<2x8x64xf32>, vector<2x8x64xf32>, vector<2x8x8xf32> -> vector<2x8x8xf32>
    "tpu.trace_stop"() : () -> ()
    %cst_84 = arith.constant 1.250000e-01 : f32
    %183 = vector.broadcast %cst_84 : f32 to vector<2x8x8xf32>
    %184 = arith.mulf %182, %183 : vector<2x8x8xf32>
    %cst_85 = arith.constant dense<0xFF800000> : vector<2x8xf32>
    %185 = vector.multi_reduction <maximumf>, %184, %cst_85 [2] : vector<2x8x8xf32> to vector<2x8xf32>
    %186 = vector.shape_cast %185 : vector<2x8xf32> to vector<2x8x1xf32>
    %187 = vector.broadcast %186 : vector<2x8x1xf32> to vector<2x8x8xf32>
    %188 = arith.subf %184, %187 : vector<2x8x8xf32>
    %189 = math.exp %188 : vector<2x8x8xf32>
    %cst_86 = arith.constant dense<0.000000e+00> : vector<2x8xf32>
    %190 = vector.multi_reduction <add>, %189, %cst_86 [2] : vector<2x8x8xf32> to vector<2x8xf32>
    %191 = vector.shape_cast %190 : vector<2x8xf32> to vector<2x8x1xf32>
    %192 = tpu.reciprocal %191 {approx = true} : vector<2x8x1xf32> -> vector<2x8x1xf32>
    %193 = vector.broadcast %192 : vector<2x8x1xf32> to vector<2x8x8xf32>
    %194 = arith.mulf %189, %193 : vector<2x8x8xf32>
    "tpu.trace_start"() <{level = 10 : i32, message = "bqk,bkd->bqd"}> : () -> ()
    %cst_87 = arith.constant dense<0.000000e+00> : vector<2x8x64xf32>
    %195 = tpu.matmul %194, %181, %cst_87 {dimension_numbers = #tpu.dot_dimension_numbers<[2], [1], [1], [2], [0, 0, 0, 1, 1, 2], [0], [0]>} : vector<2x8x8xf32>, vector<2x8x64xf32>, vector<2x8x64xf32> -> vector<2x8x64xf32>
    "tpu.trace_stop"() : () -> ()
    %c0_88 = arith.constant 0 : index
    %c0_89 = arith.constant 0 : index
    %c448 = arith.constant 448 : index
    %196 = vector.load %arg21[%c0_88, %c0_89, %c448] : memref<2x8x512xf32, #tpu.memory_space<vmem>>, vector<2x8x64xf32>
    tpu.vector_store %arg21[%c0_88, %c0_89, %c448], %195 {strides = array<i32>} : memref<2x8x512xf32, #tpu.memory_space<vmem>>, vector<2x8x64xf32>,
    %c0_90 = arith.constant 0 : index
    %c0_91 = arith.constant 0 : index
    %c0_92 = arith.constant 0 : index
    %197 = vector.load %arg21[%c0_90, %c0_91, %c0_92] : memref<2x8x512xf32, #tpu.memory_space<vmem>>, vector<2x8x512xf32>
    %198 = vector.shape_cast %197 : vector<2x8x512xf32> to vector<16x512xf32>
    %199 = arith.truncf %198 : vector<16x512xf32> to vector<16x512xbf16>
    %c0_93 = arith.constant 0 : index
    %c0_94 = arith.constant 0 : index
    %c0_95 = arith.constant 0 : index
    %200 = vector.load %arg11[%c0_93, %c0_94, %c0_95] : memref<1x512x512xbf16, #tpu.memory_space<vmem>>, vector<1x512x512xbf16>
    %201 = vector.shape_cast %200 : vector<1x512x512xbf16> to vector<512x512xbf16>
    %cst_96 = arith.constant dense<0.000000e+00> : vector<16x512xf32>
    %202 = tpu.matmul %199, %201, %cst_96 {dimension_numbers = #tpu.dot_dimension_numbers<[1], [0], [0], [1], [0, 0, 1, 1], [], []>} : vector<16x512xbf16>, vector<512x512xbf16>, vector<16x512xf32> -> vector<16x512xf32>
    %c0_97 = arith.constant 0 : index
    %c0_98 = arith.constant 0 : index
    %c0_99 = arith.constant 0 : index
    %203 = vector.load %arg12[%c0_97, %c0_98, %c0_99] : memref<1x1x512xf32, #tpu.memory_space<vmem>>, vector<1x1x512xf32>
    %204 = vector.shape_cast %203 : vector<1x1x512xf32> to vector<1x512xf32>
    %205 = vector.broadcast %204 : vector<1x512xf32> to vector<16x512xf32>
    %206 = arith.addf %202, %205 : vector<16x512xf32>
    %207 = arith.addf %3, %206 : vector<16x512xf32>
    %c0_100 = arith.constant 0 : index
    %c0_101 = arith.constant 0 : index
    %c0_102 = arith.constant 0 : index
    %208 = vector.load %arg13[%c0_100, %c0_101, %c0_102] : memref<1x1x512xf32, #tpu.memory_space<vmem>>, vector<1x1x512xf32>
    %209 = vector.shape_cast %208 : vector<1x1x512xf32> to vector<1x512xf32>
    %c0_103 = arith.constant 0 : index
    %c0_104 = arith.constant 0 : index
    %c0_105 = arith.constant 0 : index
    %210 = vector.load %arg14[%c0_103, %c0_104, %c0_105] : memref<1x1x512xf32, #tpu.memory_space<vmem>>, vector<1x1x512xf32>
    %211 = vector.shape_cast %210 : vector<1x1x512xf32> to vector<1x512xf32>
    %cst_106 = arith.constant dense<0.000000e+00> : vector<16xf32>
    %212 = vector.multi_reduction <add>, %207, %cst_106 [1] : vector<16x512xf32> to vector<16xf32>
    %213 = vector.shape_cast %212 : vector<16xf32> to vector<16x1xf32>
    %cst_107 = arith.constant 5.120000e+02 : f32
    %214 = vector.broadcast %cst_107 : f32 to vector<16x1xf32>
    %215 = arith.divf %213, %214 : vector<16x1xf32>
    %216 = vector.broadcast %215 : vector<16x1xf32> to vector<16x512xf32>
    %217 = arith.subf %207, %216 : vector<16x512xf32>
    %218 = arith.mulf %217, %217 : vector<16x512xf32>
    %cst_108 = arith.constant dense<0.000000e+00> : vector<16xf32>
    %219 = vector.multi_reduction <add>, %218, %cst_108 [1] : vector<16x512xf32> to vector<16xf32>
    %220 = vector.shape_cast %219 : vector<16xf32> to vector<16x1xf32>
    %cst_109 = arith.constant 5.120000e+02 : f32
    %221 = vector.broadcast %cst_109 : f32 to vector<16x1xf32>
    %222 = arith.divf %220, %221 : vector<16x1xf32>
    %cst_110 = arith.constant 9.99999996E-13 : f32
    %223 = vector.broadcast %cst_110 : f32 to vector<16x1xf32>
    %224 = arith.addf %222, %223 : vector<16x1xf32>
    %225 = math.rsqrt %224 : vector<16x1xf32>
    %226 = vector.broadcast %225 : vector<16x1xf32> to vector<16x512xf32>
    %227 = arith.mulf %217, %226 : vector<16x512xf32>
    %228 = vector.broadcast %209 : vector<1x512xf32> to vector<16x512xf32>
    %229 = arith.mulf %228, %227 : vector<16x512xf32>
    %230 = vector.broadcast %211 : vector<1x512xf32> to vector<16x512xf32>
    %231 = arith.addf %229, %230 : vector<16x512xf32>
    %232 = arith.truncf %231 : vector<16x512xf32> to vector<16x512xbf16>
    %c0_111 = arith.constant 0 : index
    %c0_112 = arith.constant 0 : index
    %c0_113 = arith.constant 0 : index
    %233 = vector.load %arg15[%c0_111, %c0_112, %c0_113] : memref<1x512x2048xbf16, #tpu.memory_space<vmem>>, vector<1x512x2048xbf16>
    %234 = vector.shape_cast %233 : vector<1x512x2048xbf16> to vector<512x2048xbf16>
    %cst_114 = arith.constant dense<0.000000e+00> : vector<16x2048xf32>
    %235 = tpu.matmul %232, %234, %cst_114 {dimension_numbers = #tpu.dot_dimension_numbers<[1], [0], [0], [1], [0, 0, 1, 1], [], []>} : vector<16x512xbf16>, vector<512x2048xbf16>, vector<16x2048xf32> -> vector<16x2048xf32>
    %c0_115 = arith.constant 0 : index
    %c0_116 = arith.constant 0 : index
    %c0_117 = arith.constant 0 : index
    %236 = vector.load %arg16[%c0_115, %c0_116, %c0_117] : memref<1x1x2048xf32, #tpu.memory_space<vmem>>, vector<1x1x2048xf32>
    %237 = vector.shape_cast %236 : vector<1x1x2048xf32> to vector<1x2048xf32>
    %238 = vector.broadcast %237 : vector<1x2048xf32> to vector<16x2048xf32>
    %239 = arith.addf %235, %238 : vector<16x2048xf32>
    %cst_118 = arith.constant 1.702000e+00 : f32
    %240 = vector.broadcast %cst_118 : f32 to vector<16x2048xf32>
    %241 = arith.mulf %240, %239 : vector<16x2048xf32>
    %242 = arith.negf %241 : vector<16x2048xf32>
    %243 = math.exp %242 : vector<16x2048xf32>
    %cst_119 = arith.constant 1.000000e+00 : f32
    %244 = vector.broadcast %cst_119 : f32 to vector<16x2048xf32>
    %245 = arith.addf %244, %243 : vector<16x2048xf32>
    %246 = arith.divf %244, %245 : vector<16x2048xf32>
    %247 = arith.mulf %239, %246 : vector<16x2048xf32>
    %248 = arith.truncf %247 : vector<16x2048xf32> to vector<16x2048xbf16>
    %c0_120 = arith.constant 0 : index
    %c0_121 = arith.constant 0 : index
    %c0_122 = arith.constant 0 : index
    %249 = vector.load %arg17[%c0_120, %c0_121, %c0_122] : memref<1x2048x512xbf16, #tpu.memory_space<vmem>>, vector<1x2048x512xbf16>
    %250 = vector.shape_cast %249 : vector<1x2048x512xbf16> to vector<2048x512xbf16>
    %cst_123 = arith.constant dense<0.000000e+00> : vector<16x512xf32>
    %251 = tpu.matmul %248, %250, %cst_123 {dimension_numbers = #tpu.dot_dimension_numbers<[1], [0], [0], [1], [0, 0, 1, 1], [], []>} : vector<16x2048xbf16>, vector<2048x512xbf16>, vector<16x512xf32> -> vector<16x512xf32>
    %252 = arith.addf %207, %251 : vector<16x512xf32>
    %c0_124 = arith.constant 0 : index
    %c0_125 = arith.constant 0 : index
    %c0_126 = arith.constant 0 : index
    %253 = vector.load %arg18[%c0_124, %c0_125, %c0_126] : memref<1x1x512xf32, #tpu.memory_space<vmem>>, vector<1x1x512xf32>
    %254 = vector.shape_cast %253 : vector<1x1x512xf32> to vector<1x512xf32>
    %255 = vector.broadcast %254 : vector<1x512xf32> to vector<16x512xf32>
    %256 = arith.addf %252, %255 : vector<16x512xf32>
    %c0_127 = arith.constant 0 : index
    %c0_128 = arith.constant 0 : index
    %257 = vector.load %arg20[%c0_127, %c0_128] : memref<16x512xf32, #tpu.memory_space<vmem>>, vector<16x512xf32>
    tpu.vector_store %arg20[%c0_127, %c0_128], %256 {strides = array<i32>} : memref<16x512xf32, #tpu.memory_space<vmem>>, vector<16x512xf32>,
    %c2_i32 = arith.constant 2 : i32
    %258 = arith.cmpi eq, %arg0, %c2_i32 : i32
    %259 = arith.extui %258 : i1 to i32
    %c0_i32_129 = arith.constant 0 : i32
    %260 = arith.cmpi ne, %259, %c0_i32_129 : i32
    scf.if %260 {
      %c0_130 = arith.constant 0 : index
      %c0_131 = arith.constant 0 : index
      %c0_132 = arith.constant 0 : index
      %261 = vector.load %arg1[%c0_130, %c0_131, %c0_132] : memref<2x8x512xf32, #tpu.memory_space<vmem>>, vector<2x8x512xf32>
      %262 = vector.shape_cast %261 : vector<2x8x512xf32> to vector<16x512xf32>
      %263 = arith.addf %256, %262 : vector<16x512xf32>
      %c0_133 = arith.constant 0 : index
      %c0_134 = arith.constant 0 : index
      %264 = vector.load %arg19[%c0_133, %c0_134] : memref<16x512xf32, #tpu.memory_space<vmem>>, vector<16x512xf32>
      tpu.vector_store %arg19[%c0_133, %c0_134], %263 {strides = array<i32>} : memref<16x512xf32, #tpu.memory_space<vmem>>, vector<16x512xf32>,
    } else {
    }
    return
  }
  func.func @transform_0(%arg0: i32) -> (i32, i32, i32) {
    %c0_i32 = arith.constant 0 : i32
    %c0_i32_0 = arith.constant 0 : i32
    %c0_i32_1 = arith.constant 0 : i32
    %c0_i32_2 = arith.constant 0 : i32
    return %c0_i32, %c0_i32_0, %c0_i32_1 : i32, i32, i32
  }
  func.func @transform_1(%arg0: i32) -> (i32, i32) {
    %c0_i32 = arith.constant 0 : i32
    %c0_i32_0 = arith.constant 0 : i32
    %c0_i32_1 = arith.constant 0 : i32
    return %c0_i32, %c0_i32_0 : i32, i32
  }
  func.func @transform_2(%arg0: i32) -> (i32, i32, i32) {
    %c0_i32 = arith.constant 0 : i32
    %c0_i32_0 = arith.constant 0 : i32
    %c0_i32_1 = arith.constant 0 : i32
    return %arg0, %c0_i32, %c0_i32_0 : i32, i32, i32
  }
  func.func @transform_3(%arg0: i32) -> (i32, i32, i32) {
    %c0_i32 = arith.constant 0 : i32
    %c0_i32_0 = arith.constant 0 : i32
    %c0_i32_1 = arith.constant 0 : i32
    return %arg0, %c0_i32, %c0_i32_0 : i32, i32, i32
  }
  func.func @transform_4(%arg0: i32) -> (i32, i32, i32) {
    %c0_i32 = arith.constant 0 : i32
    %c0_i32_0 = arith.constant 0 : i32
    %c0_i32_1 = arith.constant 0 : i32
    return %arg0, %c0_i32, %c0_i32_0 : i32, i32, i32
  }
  func.func @transform_5(%arg0: i32) -> (i32, i32, i32) {
    %c0_i32 = arith.constant 0 : i32
    %c0_i32_0 = arith.constant 0 : i32
    %c0_i32_1 = arith.constant 0 : i32
    return %arg0, %c0_i32, %c0_i32_0 : i32, i32, i32
  }
  func.func @transform_6(%arg0: i32) -> (i32, i32, i32) {
    %c0_i32 = arith.constant 0 : i32
    %c0_i32_0 = arith.constant 0 : i32
    %c0_i32_1 = arith.constant 0 : i32
    return %arg0, %c0_i32, %c0_i32_0 : i32, i32, i32
  }
  func.func @transform_7(%arg0: i32) -> (i32, i32, i32) {
    %c0_i32 = arith.constant 0 : i32
    %c0_i32_0 = arith.constant 0 : i32
    %c0_i32_1 = arith.constant 0 : i32
    return %arg0, %c0_i32, %c0_i32_0 : i32, i32, i32
  }
  func.func @transform_8(%arg0: i32) -> (i32, i32, i32) {
    %c0_i32 = arith.constant 0 : i32
    %c0_i32_0 = arith.constant 0 : i32
    %c0_i32_1 = arith.constant 0 : i32
    return %arg0, %c0_i32, %c0_i32_0 : i32, i32, i32
  }
  func.func @transform_9(%arg0: i32) -> (i32, i32, i32) {
    %c0_i32 = arith.constant 0 : i32
    %c0_i32_0 = arith.constant 0 : i32
    %c0_i32_1 = arith.constant 0 : i32
    return %arg0, %c0_i32, %c0_i32_0 : i32, i32, i32
  }
  func.func @transform_10(%arg0: i32) -> (i32, i32, i32) {
    %c0_i32 = arith.constant 0 : i32
    %c0_i32_0 = arith.constant 0 : i32
    %c0_i32_1 = arith.constant 0 : i32
    return %arg0, %c0_i32, %c0_i32_0 : i32, i32, i32
  }
  func.func @transform_11(%arg0: i32) -> (i32, i32, i32) {
    %c0_i32 = arith.constant 0 : i32
    %c0_i32_0 = arith.constant 0 : i32
    %c0_i32_1 = arith.constant 0 : i32
    return %arg0, %c0_i32, %c0_i32_0 : i32, i32, i32
  }
  func.func @transform_12(%arg0: i32) -> (i32, i32, i32) {
    %c0_i32 = arith.constant 0 : i32
    %c0_i32_0 = arith.constant 0 : i32
    %c0_i32_1 = arith.constant 0 : i32
    return %arg0, %c0_i32, %c0_i32_0 : i32, i32, i32
  }
  func.func @transform_13(%arg0: i32) -> (i32, i32, i32) {
    %c0_i32 = arith.constant 0 : i32
    %c0_i32_0 = arith.constant 0 : i32
    %c0_i32_1 = arith.constant 0 : i32
    return %arg0, %c0_i32, %c0_i32_0 : i32, i32, i32
  }
  func.func @transform_14(%arg0: i32) -> (i32, i32, i32) {
    %c0_i32 = arith.constant 0 : i32
    %c0_i32_0 = arith.constant 0 : i32
    %c0_i32_1 = arith.constant 0 : i32
    return %arg0, %c0_i32, %c0_i32_0 : i32, i32, i32
  }
  func.func @transform_15(%arg0: i32) -> (i32, i32, i32) {
    %c0_i32 = arith.constant 0 : i32
    %c0_i32_0 = arith.constant 0 : i32
    %c0_i32_1 = arith.constant 0 : i32
    return %arg0, %c0_i32, %c0_i32_0 : i32, i32, i32
  }
  func.func @transform_16(%arg0: i32) -> (i32, i32, i32) {
    %c0_i32 = arith.constant 0 : i32
    %c0_i32_0 = arith.constant 0 : i32
    %c0_i32_1 = arith.constant 0 : i32
    return %arg0, %c0_i32, %c0_i32_0 : i32, i32, i32
  }
  func.func @transform_17(%arg0: i32) -> (i32, i32, i32) {
    %c0_i32 = arith.constant 0 : i32
    %c0_i32_0 = arith.constant 0 : i32
    %c0_i32_1 = arith.constant 0 : i32
    return %arg0, %c0_i32, %c0_i32_0 : i32, i32, i32
  }
  func.func @transform_18(%arg0: i32) -> (i32, i32) {
    %c0_i32 = arith.constant 0 : i32
    %c0_i32_0 = arith.constant 0 : i32
    %c0_i32_1 = arith.constant 0 : i32
    return %c0_i32, %c0_i32_0 : i32, i32
  }
}

</mosaic_0001>

<bundles_post_ra>
// kernel: temporal_modeling.1
= control target key start
LH: loop header
LB: loop body
LE: loop exit
PB: predicated region body
PF: predicated region fallthrough
CT: control target
= control target key end

     0   :  { %s23970_s0 = inlined_call_operand.hbm [shape: f32[2,8,512], index: 0, kind: input, shape index: {}]   ;;  %s23971_s1 = inlined_call_operand.vmem [shape: f32[8,512], index: 1, kind: input, shape index: {}]   ;;  %s23972_s2 = inlined_call_operand.hbm [shape: f32[3,1,512], index: 2, kind: input, shape index: {}]   ;;  %s23973_s3 = inlined_call_operand.hbm [shape: f32[3,1,512], index: 3, kind: input, shape index: {}]   ;;  %s23974_s4 = inlined_call_operand.hbm [shape: bf16[3,512,512], index: 4, kind: input, shape index: {}]   ;;  %s23975_s5 = inlined_call_operand.hbm [shape: bf16[3,512,512], index: 5, kind: input, shape index: {}]   ;;  %s23976_s6 = inlined_call_operand.hbm [shape: bf16[3,512,512], index: 6, kind: input, shape index: {}]   ;;  %s23977_s7 = inlined_call_operand.hbm [shape: f32[3,1,512], index: 7, kind: input, shape index: {}]   ;;  %s23978_s8 = inlined_call_operand.hbm [shape: f32[3,1,512], index: 8, kind: input, shape index: {}]   ;;  %s23979_s9 = inlined_call_operand.hbm [shape: f32[3,1,512], index: 9, kind: input, shape index: {}]   ;;  %s23980_s10 = inlined_call_operand.hbm [shape: bf16[3,512,512], index: 10, kind: input, shape index: {}]   ;;  %s23981_s11 = inlined_call_operand.hbm [shape: f32[3,1,512], index: 11, kind: input, shape index: {}]   ;;  %s23982_s12 = inlined_call_operand.hbm [shape: f32[3,1,512], index: 12, kind: input, shape index: {}]   ;;  %s23983_s13 = inlined_call_operand.hbm [shape: f32[3,1,512], index: 13, kind: input, shape index: {}]   ;;  %s23984_s14 = inlined_call_operand.hbm [shape: bf16[3,512,2048], index: 14, kind: input, shape index: {}]   ;;  %s23985_s15 = inlined_call_operand.hbm [shape: f32[3,1,2048], index: 15, kind: input, shape index: {}]   ;;  %s23986_s16 = inlined_call_operand.hbm [shape: bf16[3,2048,512], index: 16, kind: input, shape index: {}]   ;;  %s23987_s17 = inlined_call_operand.hbm [shape: f32[3,1,512], index: 17, kind: input, shape index: {}]   ;;  %s23988_s18 = inlined_call_operand.hbm [shape: f32[16,512], index: 18, kind: output, shape index: {}]  }
   0x1   :  { %24017 = sst [smem:[#allocation49_spill]] %s23970_s0 }
   0x2   :  { %24018 = sst [smem:[#allocation50_spill]] %s23971_s1 }
   0x3   :  { %24019 = sst [smem:[#allocation51_spill]] %s23972_s2 }
   0x4   :  { %24020 = sst [smem:[#allocation52_spill]] %s23974_s4 }
   0x5   :  { %24021 = sst [smem:[#allocation53_spill]] %s23976_s6 }
   0x6   :  { %24022 = sst [smem:[#allocation54_spill]] %s23978_s8 }
   0x7   :  { %24023 = sst [smem:[#allocation55_spill]] %s23980_s10 }
   0x8   :  { %24024 = sst [smem:[#allocation56_spill]] %s23981_s11 }
   0x9   :  { %24025 = sst [smem:[#allocation57_spill]] %s23982_s12 }
   0xa   :  { %24026 = sst [smem:[#allocation58_spill]] %s23983_s13 }
   0xb   :  { %24027 = sst [smem:[#allocation59_spill]] %s23985_s15 }
   0xc   :  { %24028 = sst [smem:[#allocation60_spill]] %s23987_s17 }
   0xd   :  { %24029 = sst [smem:[#allocation61_spill]] %s23988_s18 }
   0xe   :  { %23 = vsyncpa [#allocation5], 0 }
   0xf   :  { %24 = vsyncpa [#allocation8], 0 }
  0x10   :  { %26 = vsyncpa [#allocation8 + $0x1], 0 }
  0x11   :  { %27 = vsyncpa [#allocation11], 0 }
  0x12   :  { %29 = vsyncpa [#allocation11 + $0x1], 0 }
  0x13   :  { %30 = vsyncpa [#allocation14], 0 }
  0x14   :  { %32 = vsyncpa [#allocation14 + $0x1], 0 }
  0x15   :  { %33 = vsyncpa [#allocation17], 0 }
  0x16   :  { %35 = vsyncpa [#allocation17 + $0x1], 0 }
  0x17   :  { %36 = vsyncpa [#allocation20], 0 }
  0x18   :  { %38 = vsyncpa [#allocation20 + $0x1], 0 }
  0x19   :  { %39 = vsyncpa [#allocation23], 0 }
  0x1a   :  { %41 = vsyncpa [#allocation23 + $0x1], 0 }
  0x1b   :  { %42 = vsyncpa [#allocation26], 0 }
  0x1c   :  { %44 = vsyncpa [#allocation26 + $0x1], 0 }
  0x1d   :  { %45 = vsyncpa [#allocation29], 0 }
  0x1e   :  { %47 = vsyncpa [#allocation29 + $0x1], 0 }
  0x1f   :  { %48 = vsyncpa [#allocation6], 0  ;;  %s20745_s27 = smov 0   ;;  %s20747_s28 = smov 0  }
  0x20   :  { %s20749_s29 = smov 0   ;;  %s20751_s30 = smov 0  }
  0x21 LB: > { %24030 = sst [smem:[#allocation42_spill]] %s20611_s28  ;;  %s20764_s0 = sadd.s32 4294967295, %s20619_s30   ;;  %s20619_s30 = sphi %s20751_s30, %s24083_s30   ;;  %s20615_s29 = sphi %s20749_s29, %s24086_s29   ;;  %s20611_s28 = sphi %s20747_s28, %s24085_s28   ;;  %s20607_s27 = sphi %s20745_s27, %s24084_s27  }
  0x22   : > { %24031 = sst [smem:[#allocation43_spill]] %s20615_s29  ;;  %s20767_s19 = sadd.s32 1, %s20619_s30  }
  0x23   : > { %24032 = sst [smem:[#allocation44_spill]] %s20764_s0  ;;  %s100_s1 = ssub.s32 %s20619_s30, %s20767_s19 }
  0x24   : > { %24033 = sst [smem:[#allocation45_spill]] %s20767_s19  ;;  %s103_s20 = sadd.s32 1, %s20615_s29 }
  0x25   : > { %p101_p0 = scmp.eq.s32.totalorder %s100_s1, 0  ;;  %p110_p1 = scmp.ne.s32.totalorder %s20615_s29, %s20611_s28 }
  0x26   : > { %p111_p2 = scmp.eq.s32.totalorder %s20619_s30, 0  ;;  %p116_p3 = scmp.ne.s32.totalorder %s20611_s28, %s20607_s27 }
  0x27   : > { %s20777_s21 = scalar_select %p101_p0, %s20615_s29, %s103_s20  }
  0x28   : > { %p20779_p4 = por %p111_p2, %p110_p1  ;;  %p24005_p5 = scmp.eq.s32.totalorder %s20764_s0, 0 }
  0x29   : > { %24034 = sst [smem:[#allocation46_spill]] %s20777_s21  ;;  %p16312_p6 = scmp.ge.s32.totalorder %s20619_s30, 1 }
  0x2a   : > { %p538_p7 = scmp.lt.s32.totalorder %s20619_s30, 4  ;;  %p20788_p8 = por %p24005_p5, %p116_p3 }
  0x2b   : > { %s20621_s24 = smov [#allocation4]  }
  0x2c   : > { %s24036_s2 = scalar_select %p20788_p8, 1, 0 }
  0x2d   : > { %p20793_p10 = pnand %p16312_p6, %p538_p7  ;;  %s550_s25 = sshll.u32 %s20621_s24, 4  ;;  %s551_s25 = int_to_ptr.vmem [resolvable:$true] %s550_s25 }
  0x2e   : > { %24037 = sst [smem:[#allocation47_spill]] %s24036_s2  ;;  %s20094_s26 = scalar_lea.vmem %s551_s25, 1024 }
  0x2f   : > { %s24038_s23 = scalar_select %p20793_p10, 1, 0 }
  0x30   : > { %p18283_p11 = pneg %p20793_p10  ;;  %p20095_p0 = scmp.ne.s32.totalorder %s551_s25, %s20094_s26 }
  0x31   : > { %24039 = sst [smem:[#allocation48_spill]] %s24038_s23  ;;  %p20102_p3 = scmp.lt.s32.totalorder %s551_s25, %s551_s25 }
  0x32   : > { %p18284_p12 = pnand %p18283_p11, %p24005_p5  ;;  %p20103_p8 = scmp.lt.s32.totalorder %s20094_s26, %s20094_s26 }
  0x34   : > { %p20085_p13 = pneg %p18284_p12  ;;  %p20104_p9 = por %p20103_p8, %p20102_p3 }
  0x36   : > { %p20097_p1 = pnand %p20095_p0, %p20085_p13 }
  0x38   : > { %p20098_p2 = pneg %p20097_p1 }
  0x3a   : > { %p20105_p6 = pnand %p20104_p9, %p20098_p2 }
  0x3c   : > { %20108 = shalt.err (!%p20105_p6)
}
  0x3d   : > { %s20622_s27 = smov 512   ;;  %s20623_s1 = smov 32  }
  0x3e   : > { %s24040_s24 = sld [smem:[#allocation49_spill]]  ;;  %p16314_p7 = scmp.ge.s32.totalorder %s20619_s30, 3 }
  0x3f   : > { %s20806_s19 = sand.u32 (!%p16314_p7), 1, %s20619_s30   ;;  %s20809_s26 = sand.u32 (!%p16314_p7), 1, %s20615_s29  }
  0x40   : > { %563 = sbr.rel (%p16314_p7) target bundleno = 480 (0x1e0), region = 24  ;;  %s20812_s18 = sshll.u32 (!%p16314_p7), %s20809_s26, 2 }
  0x41   : > { %s20815_s2 = sshll.u32 (!%p16314_p7), %s20619_s30, 6 }
  0x44   : > { %18286 = dma.hbm_to_vmem [thread:$0]  (!%p18284_p12), %s24040_s24, 1024, %s551_s25, [#allocation5], %s20622_s27, %s20622_s27, %s20623_s1  }
  0x45   : > { %s24041_s27 = sld [smem:[#allocation51_spill]]  ;;  %s571_s24 = scalar_lea.vmem [#allocation7], %s20812_s18 }
  0x46   : > { %s579_s28 = sshll.u32 %s571_s24, 4  ;;  %s580_s28 = int_to_ptr.vmem [resolvable:$true] %s579_s28 }
  0x4b   : > { %s24042_s1 = smov %s24041_s27  ;;  %s20821_s20 = scalar_lea.hbm %s24041_s27, %s20815_s2 }
  0x4c   : > { %s20109_s0 = scalar_lea.hbm %s20821_s20, 64  ;;  %s20113_s15 = scalar_lea.hbm %s24042_s1, 192 }
  0x4d   : > { %p20110_p8 = scmp.ne.s32.totalorder %s20821_s20, %s20109_s0  ;;  %p20114_p12 = scmp.lt.s32.totalorder %s20821_s20, %s24042_s1 }
  0x4e   : > { %p20115_p13 = scmp.lt.s32.totalorder %s20113_s15, %s20109_s0 }
  0x4f   : > { %p20111_p9 = pnand %p20110_p8, %p20779_p4 }
  0x50   : > { %p20116_p0 = por %p20115_p13, %p20114_p12 }
  0x51   : > { %p20112_p11 = pneg %p20111_p9 }
  0x53   : > { %p20117_p1 = pnand %p20116_p0, %p20112_p11 }
  0x55   : > { %20120 = shalt.err (!%p20117_p1)
}
  0x56   : > { %s20121_s25 = scalar_lea.vmem %s580_s28, 64  ;;  %s20624_s27 = smov [#allocation7]  }
  0x57   : > { %p20122_p2 = scmp.ne.s32.totalorder %s580_s28, %s20121_s25  ;;  %s20125_s24 = sshll.u32 %s20624_s27, 4  ;;  %s20126_s24 = int_to_ptr.vmem [resolvable:$false] %s20125_s24 }
  0x58   : > { %s20127_s29 = scalar_lea.vmem %s20126_s24, 128  ;;  %p20128_p7 = scmp.lt.s32.totalorder %s580_s28, %s20126_s24 }
  0x59   : > { %p20123_p3 = pnand %p20122_p2, %p20779_p4  ;;  %p20129_p8 = scmp.lt.s32.totalorder %s20127_s29, %s20121_s25 }
  0x5b   : > { %p20124_p6 = pneg %p20123_p3  ;;  %p20130_p9 = por %p20129_p8, %p20128_p7 }
  0x5d   : > { %p20131_p5 = pnand %p20130_p9, %p20124_p6 }
  0x5f   : > { %20134 = shalt.err (!%p20131_p5)
}
  0x60   : > { %s24043_s13 = scalar_lea.sflag [#allocation8], %s20806_s19  ;;  %s20844_s15 = sshll.u32 %s20809_s26, 10 }
  0x61   : > { %18245 = dma.hbm_to_vmem [thread:$0]  (%p20779_p4), %s20821_s20, 64, %s580_s28, %s24043_s13  }
  0x62   : > { %s20847_s17 = sshll.u32 %s20619_s30, 14  ;;  %s24044_s4 = sld [smem:[#allocation52_spill]] }
  0x63   : > { %s609_s21 = scalar_lea.vmem [#allocation10], %s20844_s15 }
  0x64   : > { %s616_s25 = sshll.u32 %s609_s21, 4  ;;  %s20856_s25 = int_to_ptr.vmem [resolvable:$true] %s616_s25 }
  0x68   : > { %s20853_s23 = scalar_lea.hbm %s24044_s4, %s20847_s17  ;;  %s20139_s13 = scalar_lea.hbm %s24044_s4, 49152 }
  0x69   : > { %s20135_s28 = scalar_lea.hbm %s20853_s23, 16384  ;;  %p20140_p13 = scmp.lt.s32.totalorder %s20853_s23, %s24044_s4 }
  0x6a   : > { %p20136_p5 = scmp.ne.s32.totalorder %s20853_s23, %s20135_s28  ;;  %p20141_p0 = scmp.lt.s32.totalorder %s20139_s13, %s20135_s28 }
  0x6c   : > { %p20137_p11 = pnand %p20136_p5, %p20779_p4  ;;  %p20142_p1 = por %p20141_p0, %p20140_p13 }
  0x6e   : > { %p20138_p12 = pneg %p20137_p11 }
  0x70   : > { %p20143_p2 = pnand %p20142_p1, %p20138_p12 }
  0x72   : > { %20146 = shalt.err (!%p20143_p2)
}
  0x73   : > { %s20147_s21 = scalar_lea.vmem %s20856_s25, 16384  ;;  %s20625_s27 = smov [#allocation10]  }
  0x74   : > { %p20148_p3 = scmp.ne.s32.totalorder %s20856_s25, %s20147_s21  ;;  %s20151_s20 = sshll.u32 %s20625_s27, 4  ;;  %s20152_s20 = int_to_ptr.vmem [resolvable:$false] %s20151_s20 }
  0x75   : > { %s20153_s24 = scalar_lea.vmem %s20152_s20, 32768  ;;  %p20154_p8 = scmp.lt.s32.totalorder %s20856_s25, %s20152_s20 }
  0x76   : > { %p20149_p6 = pnand %p20148_p3, %p20779_p4  ;;  %p20155_p9 = scmp.lt.s32.totalorder %s20153_s24, %s20147_s21 }
  0x78   : > { %p20150_p7 = pneg %p20149_p6  ;;  %p20156_p5 = por %p20155_p9, %p20154_p8 }
  0x7a   : > { %p20157_p11 = pnand %p20156_p5, %p20150_p7 }
  0x7c   : > { %20160 = shalt.err (!%p20157_p11)
}
  0x7d   : > { %s24009_s28 = smov 256   ;;  %s24013_s13 = smov 16  }
  0x7e   : > { %s24045_s27 = scalar_lea.sflag [#allocation11], %s20806_s19  ;;  %s24046_s6 = sld [smem:[#allocation53_spill]] }
  0x7f   : > { %18247 = dma.hbm_to_vmem [thread:$0]  (%p20779_p4), %s20853_s23, 16384, %s20856_s25, %s24045_s27, %s24009_s28, %s24009_s28, %s24013_s13  }
  0x80   : > { %s651_s20 = scalar_lea.vmem [#allocation13], %s20844_s15  ;;  %s24008_s1 = scalar_lea.sflag [#allocation14], %s20806_s19 }
  0x81   : > { %s658_s24 = sshll.u32 %s651_s20, 4  ;;  %s20891_s24 = int_to_ptr.vmem [resolvable:$true] %s658_s24 }
  0x84   : > { %s20888_s21 = scalar_lea.hbm %s24046_s6, %s20847_s17  ;;  %s20165_s25 = scalar_lea.hbm %s24046_s6, 49152 }
  0x85   : > { %s20161_s4 = scalar_lea.hbm %s20888_s21, 16384  ;;  %p20166_p1 = scmp.lt.s32.totalorder %s20888_s21, %s24046_s6 }
  0x86   : > { %p20162_p12 = scmp.ne.s32.totalorder %s20888_s21, %s20161_s4  ;;  %p20167_p2 = scmp.lt.s32.totalorder %s20165_s25, %s20161_s4 }
  0x88   : > { %p20163_p13 = pnand %p20162_p12, %p20779_p4  ;;  %p20168_p3 = por %p20167_p2, %p20166_p1 }
  0x8a   : > { %p20164_p0 = pneg %p20163_p13 }
  0x8c   : > { %p20169_p6 = pnand %p20168_p3, %p20164_p0 }
  0x8e   : > { %20172 = shalt.err (!%p20169_p6)
}
  0x8f   : > { %s20173_s0 = scalar_lea.vmem %s20891_s24, 16384  ;;  %s20628_s20 = smov [#allocation13]  }
  0x90   : > { %p20174_p7 = scmp.ne.s32.totalorder %s20891_s24, %s20173_s0  ;;  %s20177_s11 = sshll.u32 %s20628_s20, 4  ;;  %s20178_s11 = int_to_ptr.vmem [resolvable:$false] %s20177_s11 }
  0x91   : > { %s20179_s23 = scalar_lea.vmem %s20178_s11, 32768  ;;  %p20180_p5 = scmp.lt.s32.totalorder %s20891_s24, %s20178_s11 }
  0x92   : > { %p20175_p8 = pnand %p20174_p7, %p20779_p4  ;;  %p20181_p11 = scmp.lt.s32.totalorder %s20179_s23, %s20173_s0 }
  0x94   : > { %p20176_p9 = pneg %p20175_p8  ;;  %p20182_p12 = por %p20181_p11, %p20180_p5 }
  0x96   : > { %p20183_p13 = pnand %p20182_p12, %p20176_p9 }
  0x98   : > { %20186 = shalt.err (!%p20183_p13)
}
  0x99   : > { %18249 = dma.hbm_to_vmem [thread:$0]  (%p20779_p4), %s20888_s21, 16384, %s20891_s24, %s24008_s1, %s24009_s28, %s24009_s28, %s24013_s13  }
  0x9a   : > { %s24047_s8 = sld [smem:[#allocation54_spill]]  ;;  %s691_s29 = scalar_lea.vmem [#allocation16], %s20812_s18 }
  0x9b   : > { %s699_s0 = sshll.u32 %s691_s29, 4  ;;  %s24011_s20 = scalar_lea.sflag [#allocation17], %s20806_s19  ;;  %s700_s0 = int_to_ptr.vmem [resolvable:$true] %s699_s0 }
  0xa0   : > { %s20923_s27 = scalar_lea.hbm %s24047_s8, %s20815_s2  ;;  %s20191_s21 = scalar_lea.hbm %s24047_s8, 192 }
  0xa1   : > { %s20187_s11 = scalar_lea.hbm %s20923_s27, 64  ;;  %p20192_p3 = scmp.lt.s32.totalorder %s20923_s27, %s24047_s8 }
  0xa2   : > { %p20188_p0 = scmp.ne.s32.totalorder %s20923_s27, %s20187_s11  ;;  %p20193_p6 = scmp.lt.s32.totalorder %s20191_s21, %s20187_s11 }
  0xa4   : > { %p20189_p1 = pnand %p20188_p0, %p20779_p4  ;;  %p20194_p7 = por %p20193_p6, %p20192_p3 }
  0xa6   : > { %p20190_p2 = pneg %p20189_p1 }
  0xa8   : > { %p20195_p8 = pnand %p20194_p7, %p20190_p2 }
  0xaa   : > { %20198 = shalt.err (!%p20195_p8)
}
  0xab   : > { %s20199_s25 = scalar_lea.vmem %s700_s0, 64  ;;  %s20629_s29 = smov [#allocation16]  }
  0xac   : > { %p20200_p9 = scmp.ne.s32.totalorder %s700_s0, %s20199_s25  ;;  %s20203_s1 = sshll.u32 %s20629_s29, 4  ;;  %s20204_s1 = int_to_ptr.vmem [resolvable:$false] %s20203_s1 }
  0xad   : > { %s20205_s28 = scalar_lea.vmem %s20204_s1, 128  ;;  %p20206_p12 = scmp.lt.s32.totalorder %s700_s0, %s20204_s1 }
  0xae   : > { %p20201_p5 = pnand %p20200_p9, %p20779_p4  ;;  %p20207_p13 = scmp.lt.s32.totalorder %s20205_s28, %s20199_s25 }
  0xb0   : > { %p20202_p11 = pneg %p20201_p5  ;;  %p20208_p0 = por %p20207_p13, %p20206_p12 }
  0xb2   : > { %p20209_p1 = pnand %p20208_p0, %p20202_p11 }
  0xb4   : > { %20212 = shalt.err (!%p20209_p1)
}
  0xb5   : > { %18251 = dma.hbm_to_vmem [thread:$0]  (%p20779_p4), %s20923_s27, 64, %s700_s0, %s24011_s20  }
  0xb6   : > { %s24048_s10 = sld [smem:[#allocation55_spill]]  ;;  %s729_s1 = scalar_lea.vmem [#allocation19], %s20844_s15 }
  0xb7   : > { %s736_s28 = sshll.u32 %s729_s1, 4  ;;  %s24012_s21 = scalar_lea.sflag [#allocation20], %s20806_s19  ;;  %s20952_s28 = int_to_ptr.vmem [resolvable:$true] %s736_s28 }
  0xbc   : > { %s20949_s23 = scalar_lea.hbm %s24048_s10, %s20847_s17  ;;  %s20217_s0 = scalar_lea.hbm %s24048_s10, 49152 }
  0xbd   : > { %s20213_s24 = scalar_lea.hbm %s20949_s23, 16384  ;;  %p20218_p7 = scmp.lt.s32.totalorder %s20949_s23, %s24048_s10 }
  0xbe   : > { %p20214_p2 = scmp.ne.s32.totalorder %s20949_s23, %s20213_s24  ;;  %p20219_p8 = scmp.lt.s32.totalorder %s20217_s0, %s20213_s24 }
  0xc0   : > { %p20215_p3 = pnand %p20214_p2, %p20779_p4  ;;  %p20220_p9 = por %p20219_p8, %p20218_p7 }
  0xc2   : > { %p20216_p6 = pneg %p20215_p3 }
  0xc4   : > { %p20221_p5 = pnand %p20220_p9, %p20216_p6 }
  0xc6   : > { %20224 = shalt.err (!%p20221_p5)
}
  0xc7   : > { %s20225_s6 = scalar_lea.vmem %s20952_s28, 16384  ;;  %s20630_s11 = smov [#allocation19]  }
  0xc8   : > { %p20226_p11 = scmp.ne.s32.totalorder %s20952_s28, %s20225_s6  ;;  %s20229_s1 = sshll.u32 %s20630_s11, 4  ;;  %s20230_s1 = int_to_ptr.vmem [resolvable:$false] %s20229_s1 }
  0xc9   : > { %s20231_s4 = scalar_lea.vmem %s20230_s1, 32768  ;;  %p20232_p0 = scmp.lt.s32.totalorder %s20952_s28, %s20230_s1 }
  0xca   : > { %p20227_p12 = pnand %p20226_p11, %p20779_p4  ;;  %p20233_p1 = scmp.lt.s32.totalorder %s20231_s4, %s20225_s6 }
  0xcc   : > { %p20228_p13 = pneg %p20227_p12  ;;  %p20234_p2 = por %p20233_p1, %p20232_p0 }
  0xce   : > { %p20235_p3 = pnand %p20234_p2, %p20228_p13 }
  0xd0   : > { %20238 = shalt.err (!%p20235_p3)
}
  0xd1   : > { %s24049_s24 = smov 256   ;;  %s24050_s12 = sld [smem:[#allocation57_spill]] }
  0xd2   : > { %18253 = dma.hbm_to_vmem [thread:$0]  (%p20779_p4), %s20949_s23, 16384, %s20952_s28, %s24012_s21, %s24049_s24, %s24049_s24, %s24013_s13  }
  0xd3   : > { %s769_s29 = scalar_lea.vmem [#allocation22], %s20812_s18  ;;  %s24015_s1 = scalar_lea.sflag [#allocation23], %s20806_s19 }
  0xd4   : > { %s777_s6 = sshll.u32 %s769_s29, 4  ;;  %s778_s6 = int_to_ptr.vmem [resolvable:$true] %s777_s6 }
  0xd7   : > { %s20984_s25 = scalar_lea.hbm %s24050_s12, %s20815_s2  ;;  %s20243_s28 = scalar_lea.hbm %s24050_s12, 192 }
  0xd8   : > { %s20239_s4 = scalar_lea.hbm %s20984_s25, 64  ;;  %p20244_p9 = scmp.lt.s32.totalorder %s20984_s25, %s24050_s12 }
  0xd9   : > { %p20240_p6 = scmp.ne.s32.totalorder %s20984_s25, %s20239_s4  ;;  %p20245_p5 = scmp.lt.s32.totalorder %s20243_s28, %s20239_s4 }
  0xdb   : > { %p20241_p7 = pnand %p20240_p6, %p20779_p4  ;;  %p20246_p11 = por %p20245_p5, %p20244_p9 }
  0xdd   : > { %p20242_p8 = pneg %p20241_p7 }
  0xdf   : > { %p20247_p12 = pnand %p20246_p11, %p20242_p8 }
  0xe1   : > { %20250 = shalt.err (!%p20247_p12)
}
  0xe2   : > { %s20251_s29 = scalar_lea.vmem %s778_s6, 64  ;;  %s20631_s21 = smov [#allocation22]  }
  0xe3   : > { %p20252_p13 = scmp.ne.s32.totalorder %s778_s6, %s20251_s29  ;;  %s20255_s13 = sshll.u32 %s20631_s21, 4  ;;  %s20256_s13 = int_to_ptr.vmem [resolvable:$false] %s20255_s13 }
  0xe4   : > { %s20257_s11 = scalar_lea.vmem %s20256_s13, 128  ;;  %p20258_p2 = scmp.lt.s32.totalorder %s778_s6, %s20256_s13 }
  0xe5   : > { %p20253_p0 = pnand %p20252_p13, %p20779_p4  ;;  %p20259_p3 = scmp.lt.s32.totalorder %s20257_s11, %s20251_s29 }
  0xe7   : > { %p20254_p1 = pneg %p20253_p0  ;;  %p20260_p6 = por %p20259_p3, %p20258_p2 }
  0xe9   : > { %p20261_p7 = pnand %p20260_p6, %p20254_p1 }
  0xeb   : > { %20264 = shalt.err (!%p20261_p7)
}
  0xec   : > { %18255 = dma.hbm_to_vmem [thread:$0]  (%p20779_p4), %s20984_s25, 64, %s778_s6, %s24015_s1  }
  0xed   : > { %s18015_s20 = sshll.u32 %s20619_s30, 16  ;;  %s24051_s11 = sshll.u32 %s20809_s26, 12 }
  0xee   : > { %s21013_s13 = scalar_lea.hbm %s23984_s14, %s18015_s20  ;;  %s807_s23 = scalar_lea.vmem [#allocation25], %s24051_s11 }
  0xef   : > { %s814_s28 = sshll.u32 %s807_s23, 4  ;;  %s24016_s27 = scalar_lea.sflag [#allocation26], %s20806_s19  ;;  %s21017_s28 = int_to_ptr.vmem [resolvable:$true] %s814_s28 }
  0xf0   : > { %s20265_s0 = scalar_lea.hbm %s21013_s13, 65536  ;;  %s20269_s29 = scalar_lea.hbm %s23984_s14, 196608 }
  0xf1   : > { %p20266_p8 = scmp.ne.s32.totalorder %s21013_s13, %s20265_s0  ;;  %p20270_p11 = scmp.lt.s32.totalorder %s21013_s13, %s23984_s14 }
  0xf2   : > { %p20271_p12 = scmp.lt.s32.totalorder %s20269_s29, %s20265_s0 }
  0xf3   : > { %p20267_p9 = pnand %p20266_p8, %p20779_p4 }
  0xf4   : > { %p20272_p13 = por %p20271_p12, %p20270_p11 }
  0xf5   : > { %p20268_p5 = pneg %p20267_p9 }
  0xf7   : > { %p20273_p0 = pnand %p20272_p13, %p20268_p5 }
  0xf9   : > { %20276 = shalt.err (!%p20273_p0)
}
  0xfa   : > { %s20277_s11 = scalar_lea.vmem %s21017_s28, 65536  ;;  %s20632_s23 = smov [#allocation25]  }
  0xfb   : > { %p20278_p1 = scmp.ne.s32.totalorder %s21017_s28, %s20277_s11  ;;  %s20281_s25 = sshll.u32 %s20632_s23, 4  ;;  %s20282_s25 = int_to_ptr.vmem [resolvable:$false] %s20281_s25 }
  0xfc   : > { %s20283_s6 = scalar_lea.vmem %s20282_s25, 131072  ;;  %p20284_p6 = scmp.lt.s32.totalorder %s21017_s28, %s20282_s25 }
  0xfd   : > { %p20279_p2 = pnand %p20278_p1, %p20779_p4  ;;  %p20285_p7 = scmp.lt.s32.totalorder %s20283_s6, %s20277_s11 }
  0xff   : > { %p20280_p3 = pneg %p20279_p2  ;;  %p20286_p8 = por %p20285_p7, %p20284_p6 }
 0x101   : > { %p20287_p9 = pnand %p20286_p8, %p20280_p3 }
 0x103   : > { %20290 = shalt.err (!%p20287_p9)
}
 0x104   : > { %s20633_s0 = smov 1024   ;;  %s20634_s29 = smov 64  }
 0x105   : > { %18257 = dma.hbm_to_vmem [thread:$0]  (%p20779_p4), %s21013_s13, 65536, %s21017_s28, %s24016_s27, %s20633_s0, %s20633_s0, %s20634_s29  }
 0x106   : > { %s21047_s11 = scalar_lea.hbm %s23986_s16, %s18015_s20  ;;  %s24052_s23 = sshll.u32 %s20809_s26, 12 }
 0x107   : > { %s847_s25 = scalar_lea.vmem [#allocation28], %s24052_s23  ;;  %s21057_s10 = scalar_lea.hbm %s23973_s3, %s20815_s2 }
 0x108   : > { %s854_s6 = sshll.u32 %s847_s25, 4  ;;  %s844_s13 = scalar_lea.sflag [#allocation29], %s20806_s19  ;;  %s21051_s6 = int_to_ptr.vmem [resolvable:$true] %s854_s6 }
 0x109   : > { %s20291_s28 = scalar_lea.hbm %s21047_s11, 65536  ;;  %s20295_s29 = scalar_lea.hbm %s23986_s16, 196608 }
 0x10a   : > { %p20292_p5 = scmp.ne.s32.totalorder %s21047_s11, %s20291_s28  ;;  %p20296_p13 = scmp.lt.s32.totalorder %s21047_s11, %s23986_s16 }
 0x10b   : > { %p20297_p0 = scmp.lt.s32.totalorder %s20295_s29, %s20291_s28 }
 0x10c   : > { %p20293_p11 = pnand %p20292_p5, %p20779_p4 }
 0x10d   : > { %p20298_p1 = por %p20297_p0, %p20296_p13 }
 0x10e   : > { %p20294_p12 = pneg %p20293_p11 }
 0x110   : > { %p20299_p2 = pnand %p20298_p1, %p20294_p12 }
 0x112   : > { %20302 = shalt.err (!%p20299_p2)
}
 0x113   : > { %s20303_s8 = scalar_lea.vmem %s21051_s6, 65536  ;;  %s20635_s1 = smov [#allocation28]  }
 0x114   : > { %p20304_p3 = scmp.ne.s32.totalorder %s21051_s6, %s20303_s8  ;;  %s20307_s23 = sshll.u32 %s20635_s1, 4  ;;  %s20308_s23 = int_to_ptr.vmem [resolvable:$false] %s20307_s23 }
 0x115   : > { %s20309_s25 = scalar_lea.vmem %s20308_s23, 131072  ;;  %p20310_p8 = scmp.lt.s32.totalorder %s21051_s6, %s20308_s23 }
 0x116   : > { %p20305_p6 = pnand %p20304_p3, %p20779_p4  ;;  %p20311_p9 = scmp.lt.s32.totalorder %s20309_s25, %s20303_s8 }
 0x118   : > { %p20306_p7 = pneg %p20305_p6  ;;  %p20312_p5 = por %p20311_p9, %p20310_p8 }
 0x11a   : > { %p20313_p11 = pnand %p20312_p5, %p20306_p7 }
 0x11c   : > { %20316 = shalt.err (!%p20313_p11)
}
 0x11d   : > { %s24053_s28 = smov 16   ;;  %s590_s20 = scalar_lea.vmem [#allocation9], %s20812_s18 }
 0x11e   : > { %18259 = dma.hbm_to_vmem [thread:$0]  (%p20779_p4), %s21047_s11, 65536, %s21051_s6, %s844_s13, %s24049_s24, %s24049_s24, %s24053_s28  }
 0x11f   : > { %s598_s0 = sshll.u32 %s590_s20, 4  ;;  %s21090_s4 = scalar_lea.hbm %s23975_s5, %s20847_s17  ;;  %s599_s0 = int_to_ptr.vmem [resolvable:$true] %s598_s0 }
 0x120   : > { %s20317_s8 = scalar_lea.hbm %s21057_s10, 64  ;;  %s20321_s25 = scalar_lea.hbm %s23973_s3, 192 }
 0x121   : > { %p20318_p12 = scmp.ne.s32.totalorder %s21057_s10, %s20317_s8  ;;  %p20322_p1 = scmp.lt.s32.totalorder %s21057_s10, %s23973_s3 }
 0x122   : > { %p20323_p2 = scmp.lt.s32.totalorder %s20321_s25, %s20317_s8 }
 0x123   : > { %p20319_p13 = pnand %p20318_p12, %p20779_p4 }
 0x124   : > { %p20324_p3 = por %p20323_p2, %p20322_p1 }
 0x125   : > { %p20320_p0 = pneg %p20319_p13 }
 0x127   : > { %p20325_p6 = pnand %p20324_p3, %p20320_p0 }
 0x129   : > { %20328 = shalt.err (!%p20325_p6)
}
 0x12a   : > { %s20329_s11 = scalar_lea.vmem %s599_s0, 64  ;;  %s20636_s17 = smov [#allocation9]  }
 0x12b   : > { %p20330_p7 = scmp.ne.s32.totalorder %s599_s0, %s20329_s11  ;;  %s20333_s6 = sshll.u32 %s20636_s17, 4  ;;  %s20334_s6 = int_to_ptr.vmem [resolvable:$false] %s20333_s6 }
 0x12c   : > { %s20335_s20 = scalar_lea.vmem %s20334_s6, 128  ;;  %p20336_p5 = scmp.lt.s32.totalorder %s599_s0, %s20334_s6 }
 0x12d   : > { %p20331_p8 = pnand %p20330_p7, %p20779_p4  ;;  %p20337_p11 = scmp.lt.s32.totalorder %s20335_s20, %s20329_s11 }
 0x12f   : > { %p20332_p9 = pneg %p20331_p8  ;;  %p20338_p12 = por %p20337_p11, %p20336_p5 }
 0x131   : > { %p20339_p13 = pnand %p20338_p12, %p20332_p9 }
 0x133   : > { %20342 = shalt.err (!%p20339_p13)
}
 0x134   : > { %s24054_s12 = scalar_lea.sflag [#allocation8], %s20806_s19  ;;  %s630_s27 = scalar_lea.vmem [#allocation12], %s20844_s15 }
 0x135   : > { %18246 = dma.hbm_to_vmem [thread:$0]  (%p20779_p4), %s21057_s10, 64, %s599_s0, %s24054_s12  }
 0x136   : > { %s637_s29 = sshll.u32 %s630_s27, 4  ;;  %s21117_s1 = scalar_lea.hbm %s23977_s7, %s20815_s2  ;;  %s21111_s29 = int_to_ptr.vmem [resolvable:$true] %s637_s29 }
 0x137   : > { %s20343_s23 = scalar_lea.hbm %s21090_s4, 16384  ;;  %s20347_s17 = scalar_lea.hbm %s23975_s5, 49152 }
 0x138   : > { %p20344_p0 = scmp.ne.s32.totalorder %s21090_s4, %s20343_s23  ;;  %p20348_p3 = scmp.lt.s32.totalorder %s21090_s4, %s23975_s5 }
 0x139   : > { %p20349_p6 = scmp.lt.s32.totalorder %s20347_s17, %s20343_s23 }
 0x13a   : > { %p20345_p1 = pnand %p20344_p0, %p20779_p4 }
 0x13b   : > { %p20350_p7 = por %p20349_p6, %p20348_p3 }
 0x13c   : > { %p20346_p2 = pneg %p20345_p1 }
 0x13e   : > { %p20351_p8 = pnand %p20350_p7, %p20346_p2 }
 0x140   : > { %20354 = shalt.err (!%p20351_p8)
}
 0x141   : > { %s20355_s15 = scalar_lea.vmem %s21111_s29, 16384  ;;  %s20637_s0 = smov [#allocation12]  }
 0x142   : > { %p20356_p9 = scmp.ne.s32.totalorder %s21111_s29, %s20355_s15  ;;  %s20359_s20 = sshll.u32 %s20637_s0, 4  ;;  %s20360_s20 = int_to_ptr.vmem [resolvable:$false] %s20359_s20 }
 0x143   : > { %s20361_s12 = scalar_lea.vmem %s20360_s20, 32768  ;;  %p20362_p12 = scmp.lt.s32.totalorder %s21111_s29, %s20360_s20 }
 0x144   : > { %p20357_p5 = pnand %p20356_p9, %p20779_p4  ;;  %p20363_p13 = scmp.lt.s32.totalorder %s20361_s12, %s20355_s15 }
 0x146   : > { %p20358_p11 = pneg %p20357_p5  ;;  %p20364_p0 = por %p20363_p13, %p20362_p12 }
 0x148   : > { %p20365_p1 = pnand %p20364_p0, %p20358_p11 }
 0x14a   : > { %20368 = shalt.err (!%p20365_p1)
}
 0x14b   : > { %s24055_s27 = scalar_lea.sflag [#allocation11], %s20806_s19  ;;  %s672_s21 = scalar_lea.vmem [#allocation15], %s20812_s18 }
 0x14c   : > { %18248 = dma.hbm_to_vmem [thread:$0]  (%p20779_p4), %s21090_s4, 16384, %s21111_s29, %s24055_s27, %s24049_s24, %s24049_s24, %s24053_s28  }
 0x14d   : > { %s680_s8 = sshll.u32 %s672_s21, 4  ;;  %s21149_s11 = scalar_lea.hbm %s23979_s9, %s20815_s2  ;;  %s681_s8 = int_to_ptr.vmem [resolvable:$true] %s680_s8 }
 0x14e   : > { %s20369_s17 = scalar_lea.hbm %s21117_s1, 64  ;;  %s20373_s15 = scalar_lea.hbm %s23977_s7, 192 }
 0x14f   : > { %p20370_p2 = scmp.ne.s32.totalorder %s21117_s1, %s20369_s17  ;;  %p20374_p7 = scmp.lt.s32.totalorder %s21117_s1, %s23977_s7 }
 0x150   : > { %p20375_p8 = scmp.lt.s32.totalorder %s20373_s15, %s20369_s17 }
 0x151   : > { %p20371_p3 = pnand %p20370_p2, %p20779_p4 }
 0x152   : > { %p20376_p9 = por %p20375_p8, %p20374_p7 }
 0x153   : > { %p20372_p6 = pneg %p20371_p3 }
 0x155   : > { %p20377_p5 = pnand %p20376_p9, %p20372_p6 }
 0x157   : > { %20380 = shalt.err (!%p20377_p5)
}
 0x158   : > { %s20381_s24 = scalar_lea.vmem %s681_s8, 64  ;;  %s20638_s28 = smov [#allocation15]  }
 0x159   : > { %p20382_p11 = scmp.ne.s32.totalorder %s681_s8, %s20381_s24  ;;  %s20385_s4 = sshll.u32 %s20638_s28, 4  ;;  %s20386_s4 = int_to_ptr.vmem [resolvable:$false] %s20385_s4 }
 0x15a   : > { %s20387_s29 = scalar_lea.vmem %s20386_s4, 128  ;;  %p20388_p0 = scmp.lt.s32.totalorder %s681_s8, %s20386_s4 }
 0x15b   : > { %p20383_p12 = pnand %p20382_p11, %p20779_p4  ;;  %p20389_p1 = scmp.lt.s32.totalorder %s20387_s29, %s20381_s24 }
 0x15d   : > { %p20384_p13 = pneg %p20383_p12  ;;  %p20390_p2 = por %p20389_p1, %p20388_p0 }
 0x15f   : > { %p20391_p3 = pnand %p20390_p2, %p20384_p13 }
 0x161   : > { %20394 = shalt.err (!%p20391_p3)
}
 0x162   : > { %s24056_s12 = scalar_lea.sflag [#allocation14], %s20806_s19  ;;  %s710_s27 = scalar_lea.vmem [#allocation18], %s20812_s18 }
 0x163   : > { %18250 = dma.hbm_to_vmem [thread:$0]  (%p20779_p4), %s21117_s1, 64, %s681_s8, %s24056_s12  }
 0x164   : > { %s718_s21 = sshll.u32 %s710_s27, 4  ;;  %s24057_s17 = sld [smem:[#allocation56_spill]]  ;;  %s719_s21 = int_to_ptr.vmem [resolvable:$true] %s718_s21 }
 0x165   : > { %s20395_s10 = scalar_lea.hbm %s21149_s11, 64  ;;  %s20399_s20 = scalar_lea.hbm %s23979_s9, 192 }
 0x166   : > { %p20396_p6 = scmp.ne.s32.totalorder %s21149_s11, %s20395_s10  ;;  %p20400_p9 = scmp.lt.s32.totalorder %s21149_s11, %s23979_s9 }
 0x167   : > { %p20401_p5 = scmp.lt.s32.totalorder %s20399_s20, %s20395_s10 }
 0x168   : > { %p20397_p7 = pnand %p20396_p6, %p20779_p4 }
 0x169   : > { %p20402_p11 = por %p20401_p5, %p20400_p9 }
 0x16a   : > { %s21174_s6 = scalar_lea.hbm %s24057_s17, %s20815_s2  ;;  %p20398_p8 = pneg %p20397_p7 }
 0x16c   : > { %p20403_p12 = pnand %p20402_p11, %p20398_p8 }
 0x16e   : > { %20406 = shalt.err (!%p20403_p12)
}
 0x16f   : > { %s20407_s1 = scalar_lea.vmem %s719_s21, 64  ;;  %s20639_s8 = smov [#allocation18]  }
 0x170   : > { %p20408_p13 = scmp.ne.s32.totalorder %s719_s21, %s20407_s1  ;;  %s20411_s4 = sshll.u32 %s20639_s8, 4  ;;  %s20412_s4 = int_to_ptr.vmem [resolvable:$false] %s20411_s4 }
 0x171   : > { %s20413_s29 = scalar_lea.vmem %s20412_s4, 128  ;;  %p20414_p2 = scmp.lt.s32.totalorder %s719_s21, %s20412_s4 }
 0x172   : > { %p20409_p0 = pnand %p20408_p13, %p20779_p4  ;;  %p20415_p3 = scmp.lt.s32.totalorder %s20413_s29, %s20407_s1 }
 0x174   : > { %p20410_p1 = pneg %p20409_p0  ;;  %p20416_p6 = por %p20415_p3, %p20414_p2 }
 0x176   : > { %p20417_p7 = pnand %p20416_p6, %p20410_p1 }
 0x178   : > { %20420 = shalt.err (!%p20417_p7)
}
 0x179   : > { %s24058_s12 = scalar_lea.sflag [#allocation17], %s20806_s19  ;;  %s750_s27 = scalar_lea.vmem [#allocation21], %s20812_s18 }
 0x17a   : > { %18252 = dma.hbm_to_vmem [thread:$0]  (%p20779_p4), %s21149_s11, 64, %s719_s21, %s24058_s12  }
 0x17b   : > { %s758_s23 = sshll.u32 %s750_s27, 4  ;;  %s24059_s15 = sld [smem:[#allocation58_spill]]  ;;  %s759_s23 = int_to_ptr.vmem [resolvable:$true] %s758_s23 }
 0x17c   : > { %s20421_s20 = scalar_lea.hbm %s21174_s6, 64  ;;  %s20425_s1 = scalar_lea.hbm %s24057_s17, 192 }
 0x17d   : > { %p20422_p8 = scmp.ne.s32.totalorder %s21174_s6, %s20421_s20  ;;  %p20426_p11 = scmp.lt.s32.totalorder %s21174_s6, %s24057_s17 }
 0x17e   : > { %p20427_p12 = scmp.lt.s32.totalorder %s20425_s1, %s20421_s20 }
 0x17f   : > { %p20423_p9 = pnand %p20422_p8, %p20779_p4 }
 0x180   : > { %p20428_p13 = por %p20427_p12, %p20426_p11 }
 0x181   : > { %s21199_s0 = scalar_lea.hbm %s24059_s15, %s20815_s2  ;;  %p20424_p5 = pneg %p20423_p9 }
 0x183   : > { %p20429_p0 = pnand %p20428_p13, %p20424_p5 }
 0x185   : > { %20432 = shalt.err (!%p20429_p0)
}
 0x186   : > { %s20433_s11 = scalar_lea.vmem %s759_s23, 64  ;;  %s20640_s21 = smov [#allocation21]  }
 0x187   : > { %p20434_p1 = scmp.ne.s32.totalorder %s759_s23, %s20433_s11  ;;  %s20437_s29 = sshll.u32 %s20640_s21, 4  ;;  %s20438_s29 = int_to_ptr.vmem [resolvable:$false] %s20437_s29 }
 0x188   : > { %s20439_s12 = scalar_lea.vmem %s20438_s29, 128  ;;  %p20440_p6 = scmp.lt.s32.totalorder %s759_s23, %s20438_s29 }
 0x189   : > { %p20435_p2 = pnand %p20434_p1, %p20779_p4  ;;  %p20441_p7 = scmp.lt.s32.totalorder %s20439_s12, %s20433_s11 }
 0x18b   : > { %p20436_p3 = pneg %p20435_p2  ;;  %p20442_p8 = por %p20441_p7, %p20440_p6 }
 0x18d   : > { %p20443_p9 = pnand %p20442_p8, %p20436_p3 }
 0x18f   : > { %20446 = shalt.err (!%p20443_p9)
}
 0x190   : > { %s24060_s27 = scalar_lea.sflag [#allocation20], %s20806_s19  ;;  %s788_s25 = scalar_lea.vmem [#allocation24], %s20812_s18 }
 0x191   : > { %18254 = dma.hbm_to_vmem [thread:$0]  (%p20779_p4), %s21174_s6, 64, %s759_s23, %s24060_s27  }
 0x192   : > { %s796_s10 = sshll.u32 %s788_s25, 4  ;;  %s16354_s20 = sshll.u32 %s20809_s26, 4  ;;  %s797_s10 = int_to_ptr.vmem [resolvable:$true] %s796_s10 }
 0x193   : > { %s20447_s24 = scalar_lea.hbm %s21199_s0, 64  ;;  %s20451_s8 = scalar_lea.hbm %s24059_s15, 192 }
 0x194   : > { %p20448_p5 = scmp.ne.s32.totalorder %s21199_s0, %s20447_s24  ;;  %p20452_p13 = scmp.lt.s32.totalorder %s21199_s0, %s24059_s15 }
 0x195   : > { %p20453_p0 = scmp.lt.s32.totalorder %s20451_s8, %s20447_s24 }
 0x196   : > { %p20449_p11 = pnand %p20448_p5, %p20779_p4 }
 0x197   : > { %p20454_p1 = por %p20453_p0, %p20452_p13 }
 0x198   : > { %p20450_p12 = pneg %p20449_p11 }
 0x19a   : > { %p20455_p2 = pnand %p20454_p1, %p20450_p12 }
 0x19c   : > { %20458 = shalt.err (!%p20455_p2)
}
 0x19d   : > { %s20459_s6 = scalar_lea.vmem %s797_s10, 64  ;;  %s20641_s26 = smov [#allocation24]  }
 0x19e   : > { %p20460_p3 = scmp.ne.s32.totalorder %s797_s10, %s20459_s6  ;;  %s20463_s23 = sshll.u32 %s20641_s26, 4  ;;  %s20464_s23 = int_to_ptr.vmem [resolvable:$false] %s20463_s23 }
 0x19f   : > { %s20465_s21 = scalar_lea.vmem %s20464_s23, 128  ;;  %p20466_p8 = scmp.lt.s32.totalorder %s797_s10, %s20464_s23 }
 0x1a0   : > { %p20461_p6 = pnand %p20460_p3, %p20779_p4  ;;  %p20467_p9 = scmp.lt.s32.totalorder %s20465_s21, %s20459_s6 }
 0x1a2   : > { %p20462_p7 = pneg %p20461_p6  ;;  %p20468_p5 = por %p20467_p9, %p20466_p8 }
 0x1a4   : > { %p20469_p11 = pnand %p20468_p5, %p20462_p7 }
 0x1a6   : > { %20472 = shalt.err (!%p20469_p11)
}
 0x1a7   : > { %s24061_s29 = scalar_lea.sflag [#allocation23], %s20806_s19  ;;  %s18016_s12 = sshll.u32 %s20619_s30, 8 }
 0x1a8   : > { %18256 = dma.hbm_to_vmem [thread:$0]  (%p20779_p4), %s21199_s0, 64, %s797_s10, %s24061_s29  }
 0x1a9   : > { %s828_s27 = scalar_lea.vmem [#allocation27], %s16354_s20  ;;  %s24062_s1 = sld [smem:[#allocation59_spill]] }
 0x1aa   : > { %s836_s25 = sshll.u32 %s828_s27, 4  ;;  %s837_s25 = int_to_ptr.vmem [resolvable:$true] %s836_s25 }
 0x1af   : > { %s834_s8 = scalar_lea.hbm %s24062_s1, %s18016_s12  ;;  %s20477_s26 = scalar_lea.hbm %s24062_s1, 768 }
 0x1b0   : > { %s20473_s4 = scalar_lea.hbm %s834_s8, 256  ;;  %p20478_p1 = scmp.lt.s32.totalorder %s834_s8, %s24062_s1 }
 0x1b1   : > { %p20474_p12 = scmp.ne.s32.totalorder %s834_s8, %s20473_s4  ;;  %p20479_p2 = scmp.lt.s32.totalorder %s20477_s26, %s20473_s4 }
 0x1b3   : > { %p20475_p13 = pnand %p20474_p12, %p20779_p4  ;;  %p20480_p3 = por %p20479_p2, %p20478_p1 }
 0x1b5   : > { %p20476_p0 = pneg %p20475_p13 }
 0x1b7   : > { %p20481_p6 = pnand %p20480_p3, %p20476_p0 }
 0x1b9   : > { %20484 = shalt.err (!%p20481_p6)
}
 0x1ba   : > { %s20485_s30 = scalar_lea.vmem %s837_s25, 256  ;;  %s20642_s0 = smov [#allocation27]  }
 0x1bb   : > { %p20486_p7 = scmp.ne.s32.totalorder %s837_s25, %s20485_s30  ;;  %s20489_s10 = sshll.u32 %s20642_s0, 4  ;;  %s20490_s10 = int_to_ptr.vmem [resolvable:$false] %s20489_s10 }
 0x1bc   : > { %s20491_s20 = scalar_lea.vmem %s20490_s10, 512  ;;  %p20492_p5 = scmp.lt.s32.totalorder %s837_s25, %s20490_s10 }
 0x1bd   : > { %p20487_p8 = pnand %p20486_p7, %p20779_p4  ;;  %p20493_p11 = scmp.lt.s32.totalorder %s20491_s20, %s20485_s30 }
 0x1bf   : > { %p20488_p9 = pneg %p20487_p8  ;;  %p20494_p12 = por %p20493_p11, %p20492_p5 }
 0x1c1   : > { %p20495_p13 = pnand %p20494_p12, %p20488_p9 }
 0x1c3   : > { %20498 = shalt.err (!%p20495_p13)
}
 0x1c4   : > { %s24063_s29 = scalar_lea.sflag [#allocation26], %s20806_s19  ;;  %s24064_s24 = sld [smem:[#allocation60_spill]] }
 0x1c5   : > { %18258 = dma.hbm_to_vmem [thread:$0]  (%p20779_p4), %s834_s8, 256, %s837_s25, %s24063_s29  }
 0x1c6   : > { %s868_s4 = scalar_lea.vmem [#allocation30], %s20812_s18 }
 0x1c7   : > { %s876_s11 = sshll.u32 %s868_s4, 4  ;;  %s877_s11 = int_to_ptr.vmem [resolvable:$true] %s876_s11 }
 0x1ca   : > { %s874_s28 = scalar_lea.hbm %s24064_s24, %s20815_s2  ;;  %s20503_s21 = scalar_lea.hbm %s24064_s24, 192 }
 0x1cb   : > { %s20499_s6 = scalar_lea.hbm %s874_s28, 64  ;;  %p20504_p3 = scmp.lt.s32.totalorder %s874_s28, %s24064_s24 }
 0x1cc   : > { %p20500_p0 = scmp.ne.s32.totalorder %s874_s28, %s20499_s6  ;;  %p20505_p6 = scmp.lt.s32.totalorder %s20503_s21, %s20499_s6 }
 0x1ce   : > { %p20501_p1 = pnand %p20500_p0, %p20779_p4  ;;  %p20506_p7 = por %p20505_p6, %p20504_p3 }
 0x1d0   : > { %p20502_p2 = pneg %p20501_p1 }
 0x1d2   : > { %p20507_p8 = pnand %p20506_p7, %p20502_p2 }
 0x1d4   : > { %20510 = shalt.err (!%p20507_p8)
}
 0x1d5   : > { %s20511_s18 = scalar_lea.vmem %s877_s11, 64  ;;  %s20643_s2 = smov [#allocation30]  }
 0x1d6   : > { %p20512_p9 = scmp.ne.s32.totalorder %s877_s11, %s20511_s18  ;;  %s20515_s25 = sshll.u32 %s20643_s2, 4  ;;  %s20516_s25 = int_to_ptr.vmem [resolvable:$false] %s20515_s25 }
 0x1d7   : > { %s20517_s8 = scalar_lea.vmem %s20516_s25, 128  ;;  %p20518_p12 = scmp.lt.s32.totalorder %s877_s11, %s20516_s25 }
 0x1d8   : > { %p20513_p5 = pnand %p20512_p9, %p20779_p4  ;;  %p20519_p13 = scmp.lt.s32.totalorder %s20517_s8, %s20511_s18 }
 0x1da   : > { %p20514_p11 = pneg %p20513_p5  ;;  %p20520_p0 = por %p20519_p13, %p20518_p12 }
 0x1dc   : > { %p20521_p1 = pnand %p20520_p0, %p20514_p11 }
 0x1de   : > { %20524 = shalt.err (!%p20521_p1)
}
 0x1df   : > { %18260 = dma.hbm_to_vmem [thread:$0]  (%p20779_p4), %s874_s28, 64, %s877_s11, %s844_s13  }
 0x1e0 PF: > { %885 = sbr.rel (%p20793_p10) target bundleno = 7383 (0x1cd7), region = 92  ;;  %s24066_s20 = sld [smem:[#allocation44_spill]] (!%p20793_p10) }
 0x1e6   : > { %p24067_p2 = scmp.eq.s32.totalorder %s24066_s20, 0 }
 0x1e8   : > { %20566 = dma.done.wait (%p24067_p2), [#allocation5], 1024   ;;  %p24068_p3 = pmov %p24067_p2 }
 0x1e9   : > { %s24069_s29 = sld [smem:[#allocation42_spill]]  ;;  %s21283_s27 = sand.u32 1, %s24066_s20  }
 0x1ea   : > { %20568 = vsyncadd (%p24068_p3), [#allocation5], 4294966272  ;;  %s24070_s12 = sld [smem:[#allocation47_spill]]  ;;  %s892_s13 = scalar_lea.sflag [#allocation8], %s21283_s27 }
 0x1ef   : > { %s21286_s22 = sand.u32 1, %s24069_s29  }
 0x1f0   : > { %s21289_s19 = sshll.u32 %s21286_s22, 2  ;;  %p24071_p4 = scmp.ne.s32.totalorder %s24070_s12, 0 }
 0x1f1   : > { %s895_s28 = scalar_lea.vmem [#allocation7], %s21289_s19 }
 0x1f2   : > { %20570 = dma.done.wait (%p24071_p4), %s892_s13, 128  }
 0x1f3   : > { %20572 = vsyncadd (%p24071_p4), %s892_s13, 4294967168  ;;  %s16367_s4 = sshll.u32 %s21286_s22, 10  ;;  %s904_s11 = scalar_lea.vmem [#allocation9], %s21289_s19 }
 0x1f4   : > { %s910_s6 = scalar_lea.sflag [#allocation11], %s21283_s27  ;;  %s21300_s26 = scalar_lea.vmem [#allocation10], %s16367_s4 }
 0x1f5   : > { %20574 = dma.done.wait (%p24071_p4), %s910_s6, 32768  }
 0x1f6   : > { %20576 = vsyncadd (%p24071_p4), %s910_s6, 4294934528  ;;  %s21306_s23 = scalar_lea.vmem [#allocation12], %s16367_s4  ;;  %s928_s21 = scalar_lea.sflag [#allocation14], %s21283_s27 }
 0x1f7   : > { %s21309_s30 = scalar_lea.vmem [#allocation13], %s16367_s4 }
 0x1f8   : > { %20578 = dma.done.wait (%p24071_p4), %s928_s21, 16448  }
 0x1f9   : > { %20580 = vsyncadd (%p24071_p4), %s928_s21, 4294950848  ;;  %s946_s18 = scalar_lea.sflag [#allocation17], %s21283_s27 }
 0x1fa   : > { %20582 = dma.done.wait (%p24071_p4), %s946_s18, 128  }
 0x1fb   : > { %20584 = vsyncadd (%p24071_p4), %s946_s18, 4294967168  ;;  %s964_s8 = scalar_lea.sflag [#allocation20], %s21283_s27  ;;  %s21324_s10 = scalar_lea.vmem [#allocation19], %s16367_s4 }
 0x1fc   : > { %20586 = dma.done.wait (%p24071_p4), %s964_s8, 16448  }
 0x1fd   : > { %20588 = vsyncadd (%p24071_p4), %s964_s8, 4294950848  ;;  %s982_s13 = scalar_lea.sflag [#allocation23], %s21283_s27 }
 0x1fe   : > { %20590 = dma.done.wait (%p24071_p4), %s982_s13, 128  }
 0x1ff   : > { %20592 = vsyncadd (%p24071_p4), %s982_s13, 4294967168  ;;  %s16377_s4 = sshll.u32 %s21286_s22, 12  ;;  %s1000_s18 = scalar_lea.sflag [#allocation26], %s21283_s27 }
 0x200   : > { %s21340_s8 = scalar_lea.vmem [#allocation25], %s16377_s4 }
 0x201   : > { %20594 = dma.done.wait (%p24071_p4), %s1000_s18, 65792  }
 0x202   : > { %20596 = vsyncadd (%p24071_p4), %s1000_s18, 4294901504  ;;  %s16378_s6 = sshll.u32 %s21286_s22, 4  ;;  %s1018_s13 = scalar_lea.sflag [#allocation29], %s21283_s27 }
 0x203   : > { %s21347_s29 = scalar_lea.vmem [#allocation27], %s16378_s6  ;;  %s21350_s25 = scalar_lea.vmem [#allocation28], %s16377_s4 }
 0x204   : > { %20598 = dma.done.wait (%p24071_p4), %s1018_s13, 65600  }
 0x205   : > { %20600 = vsyncadd (%p24071_p4), %s1018_s13, 4294901696  ;;  %s1030_s21 = scalar_lea.vmem [#allocation30], %s21289_s19  ;;  %p24072_p10 = scmp.ne.s32.totalorder %s24066_s20, 0 }
 0x206   : > { %s24073_s0 = sld [smem:[#allocation50_spill]] (!%p24072_p10) }
 0x207   : > { %1156 = sbr.rel (%p24072_p10) target bundleno = 532 (0x214), region = 164 }
 0x20c   : > { %v1157_v0 = vld [vmem:[#allocation4] sm:$0xff]  ;;  %v1158_v2 = vld [vmem:[#allocation4 + $0x8] sm:$0xff]  ;;  %v1159_v5 = vld [vmem:[#allocation4 + $0x10] sm:$0xff] }
 0x20d   : > { %v1165_v1 = vld [vmem:[%s24073_s0] sm:$0xff]  ;;  %v1166_v4 = vld [vmem:[%s24073_s0 + $0x8] sm:$0xff]  ;;  %v1167_v6 = vld [vmem:[%s24073_s0 + $0x10] sm:$0xff] }
 0x20e   : > { %v1169_v3 = vadd.f32 %v1165_v1, %v1157_v0  ;;  %v1170_v7 = vadd.f32 %v1166_v4, %v1158_v2  ;;  %v1171_v8 = vadd.f32 %v1167_v6, %v1159_v5  ;;  %v1160_v9 = vld [vmem:[#allocation4 + $0x18] sm:$0xff]  ;;  %v1161_v11 = vld [vmem:[#allocation4 + $0x20] sm:$0xff]  ;;  %v1162_v14 = vld [vmem:[#allocation4 + $0x28] sm:$0xff] }
 0x20f   : > { %v1168_v10 = vld [vmem:[%s24073_s0 + $0x18] sm:$0xff]  ;;  %v1173_v13 = vadd.f32 %v1165_v1, %v1161_v11  ;;  %v1163_v15 = vld [vmem:[#allocation4 + $0x30] sm:$0xff]  ;;  %v1174_v17 = vadd.f32 %v1166_v4, %v1162_v14 }
 0x210   : > { %1177 = vst [vmem:[#allocation2 + $0x30] sm:$0xff] %v1169_v3  ;;  %v1172_v12 = vadd.f32 %v1168_v10, %v1160_v9  ;;  %v1164_v16 = vld [vmem:[#allocation4 + $0x38] sm:$0xff]  ;;  %1178 = vst [vmem:[#allocation2] sm:$0xff] %v1170_v7  ;;  %v1175_v18 = vadd.f32 %v1167_v6, %v1163_v15 }
 0x211   : > { %1179 = vst [vmem:[#allocation2 + $0x18] sm:$0xff] %v1171_v8  ;;  %v1176_v19 = vadd.f32 %v1168_v10, %v1164_v16  ;;  %1181 = vst [vmem:[#allocation2 + $0x8] sm:$0xff] %v1173_v13 }
 0x212   : > { %1180 = vst [vmem:[#allocation2 + $0x10] sm:$0xff] %v1172_v12  ;;  %1182 = vst [vmem:[#allocation2 + $0x20] sm:$0xff] %v1174_v17 }
 0x213   : > { %1183 = vst [vmem:[#allocation2 + $0x28] sm:$0xff] %v1175_v18  ;;  %1184 = vst [vmem:[#allocation2 + $0x38] sm:$0xff] %v1176_v19 }
 0x214 PF: > { %v18336_v34 = vld [vmem:[%s21300_s26 + $0xe4] ss:$16 sps:$4 sm:$0xff]   ;;  %v18340_v36 = vld [vmem:[%s21300_s26 + $0xe0] ss:$16 sps:$4 sm:$0xff]   ;;  %vm20645_vm0 = vmmov 0   ;;  %vm4196_vm1 = vcmask 523264  }
 0x215   : > { %v18338_v35 = vld [vmem:[%s21300_s26 + $0x2e4] ss:$16 sps:$4 sm:$0xff]   ;;  %v18341_v37 = vld [vmem:[%s21300_s26 + $0x2e0] ss:$16 sps:$4 sm:$0xff]   ;;  %2100 = vmatprep.subr.bf16.mxu0 %v18336_v34  ;;  %vm4351_vm2 = vcmask 64512   ;;  %vm4864_vm3 = vcmask 1048064  }
 0x216   : > { %v18342_v38 = vld [vmem:[%s21300_s26 + $0xc4] ss:$16 sps:$4 sm:$0xff]   ;;  %2143 = vmatprep.subr.bf16.mxu1 %v18338_v35  ;;  %2101 = vmatpush1.bf16.msra.mxu0 %v18340_v36  ;;  %v18346_v40 = vld [vmem:[%s21300_s26 + $0xc0] ss:$16 sps:$4 sm:$0xff]   ;;  %s24078_s2 = scalar_lea.vmem [#allocation22], %s21289_s19 }
 0x217   : > { %v21371_v20 = vld [vmem:[#allocation2 + $0x30] sm:$0xff]  ;;  %v21373_v21 = vld [vmem:[#allocation2] sm:$0xff]  ;;  %2144 = vmatpush1.bf16.msra.mxu1 %v18341_v37  ;;  %2102 = vmatprep.subr.bf16.mxu0 %v18342_v38 }
 0x218   : > { %v21375_v22 = vld [vmem:[#allocation2 + $0x18] sm:$0xff]  ;;  %v1195_v24 = vadd.f32 %v21373_v21, %v21371_v20  ;;  %v21381_v25 = vld [vmem:[#allocation2 + $0x8] sm:$0xff]  ;;  %v18344_v39 = vld [vmem:[%s21300_s26 + $0x2c4] ss:$16 sps:$4 sm:$0xff]  }
 0x219   : > { %v21377_v23 = vld [vmem:[#allocation2 + $0x10] sm:$0xff]  ;;  %v21383_v26 = vld [vmem:[#allocation2 + $0x20] sm:$0xff]  ;;  %2145 = vmatprep.subr.bf16.mxu1 %v18344_v39 }
 0x21a   : > { %v21385_v27 = vld [vmem:[#allocation2 + $0x28] sm:$0xff]  ;;  %v1192_v28 = vld [vmem:[#allocation2 + $0x38] sm:$0xff]  ;;  %v1200_v29 = vadd.f32 %v21383_v26, %v21381_v25  ;;  %v1196_v30 = vadd.f32 %v1195_v24, %v21375_v22  ;;  %v18347_v41 = vld [vmem:[%s21300_s26 + $0x2c0] ss:$16 sps:$4 sm:$0xff]   ;;  %2103 = vmatpush1.bf16.msra.mxu0 %v18346_v40 }
 0x21b   : > { %v18348_v42 = vld [vmem:[%s21300_s26 + $0xa4] ss:$16 sps:$4 sm:$0xff]   ;;  %2146 = vmatpush1.bf16.msra.mxu1 %v18347_v41  ;;  %v18352_v44 = vld [vmem:[%s21300_s26 + $0xa0] ss:$16 sps:$4 sm:$0xff]  }
 0x21c   : > { %v1201_v31 = vadd.f32 %v1200_v29, %v21385_v27  ;;  %v1197_v32 = vadd.f32 %v1196_v30, %v21377_v23  ;;  %v18350_v43 = vld [vmem:[%s21300_s26 + $0x2a4] ss:$16 sps:$4 sm:$0xff]   ;;  %v18353_v45 = vld [vmem:[%s21300_s26 + $0x2a0] ss:$16 sps:$4 sm:$0xff]   ;;  %2104 = vmatprep.subr.bf16.mxu0 %v18348_v42 }
 0x21d   : > { %2147 = vmatprep.subr.bf16.mxu1 %v18350_v43  ;;  %v18354_v46 = vld [vmem:[%s21300_s26 + $0x84] ss:$16 sps:$4 sm:$0xff]   ;;  %v18358_v48 = vld [vmem:[%s21300_s26 + $0x80] ss:$16 sps:$4 sm:$0xff]  }
 0x21e   : > { %1198 = vadd.xlane.f32.xlu0 %v1197_v32  ;;  %v1202_v33 = vadd.f32 %v1201_v31, %v1192_v28  ;;  %v18356_v47 = vld [vmem:[%s21300_s26 + $0x284] ss:$16 sps:$4 sm:$0xff]   ;;  %2105 = vmatpush1.bf16.msra.mxu0 %v18352_v44  ;;  %v18359_v49 = vld [vmem:[%s21300_s26 + $0x280] ss:$16 sps:$4 sm:$0xff]  }
 0x21f   : > { %2148 = vmatpush1.bf16.msra.mxu1 %v18353_v45  ;;  %v18360_v50 = vld [vmem:[%s21300_s26 + $0x64] ss:$16 sps:$4 sm:$0xff]   ;;  %2106 = vmatprep.subr.bf16.mxu0 %v18354_v46  ;;  %v18364_v52 = vld [vmem:[%s21300_s26 + $0x60] ss:$16 sps:$4 sm:$0xff]  }
 0x220   : > { %v18362_v51 = vld [vmem:[%s21300_s26 + $0x264] ss:$16 sps:$4 sm:$0xff]   ;;  %2149 = vmatprep.subr.bf16.mxu1 %v18356_v47  ;;  %v18365_v53 = vld [vmem:[%s21300_s26 + $0x260] ss:$16 sps:$4 sm:$0xff]  }
 0x221   : > { %v18366_v54 = vld [vmem:[%s21300_s26 + $0x44] ss:$16 sps:$4 sm:$0xff]   ;;  %v18370_v56 = vld [vmem:[%s21300_s26 + $0x40] ss:$16 sps:$4 sm:$0xff]  }
 0x222   : > { %1203 = vadd.xlane.f32.xlu0 %v1202_v33  ;;  %v18368_v55 = vld [vmem:[%s21300_s26 + $0x244] ss:$16 sps:$4 sm:$0xff]   ;;  %2107 = vmatpush1.bf16.msra.mxu0 %v18358_v48  ;;  %v18371_v57 = vld [vmem:[%s21300_s26 + $0x240] ss:$16 sps:$4 sm:$0xff]  }
 0x223   : > { %2150 = vmatpush1.bf16.msra.mxu1 %v18359_v49  ;;  %2108 = vmatprep.subr.bf16.mxu0 %v18360_v50  ;;  %v18372_v58 = vld [vmem:[%s21300_s26 + $0x24] ss:$16 sps:$4 sm:$0xff]   ;;  %v18376_v60 = vld [vmem:[%s21300_s26 + $0x20] ss:$16 sps:$4 sm:$0xff]  }
 0x224   : > { %2151 = vmatprep.subr.bf16.mxu1 %v18362_v51  ;;  %v18374_v59 = vld [vmem:[%s21300_s26 + $0x224] ss:$16 sps:$4 sm:$0xff]   ;;  %v18377_v61 = vld [vmem:[%s21300_s26 + $0x220] ss:$16 sps:$4 sm:$0xff]  }
 0x225   : > { %v18378_v62 = vld [vmem:[%s21300_s26 + $0x4] ss:$16 sps:$4 sm:$0xff]   ;;  %v18382_v0 = vld [vmem:[%s21300_s26] ss:$16 sps:$4 sm:$0xff]  }
 0x226   : > { %2109 = vmatpush1.bf16.msra.mxu0 %v18364_v52  ;;  %v18380_v63 = vld [vmem:[%s21300_s26 + $0x204] ss:$16 sps:$4 sm:$0xff]   ;;  %v18383_v1 = vld [vmem:[%s21300_s26 + $0x200] ss:$16 sps:$4 sm:$0xff]  }
 0x227   : > { %2152 = vmatpush1.bf16.msra.mxu1 %v18365_v53  ;;  %2110 = vmatprep.subr.bf16.mxu0 %v18366_v54  ;;  %v18384_v2 = vld [vmem:[%s21300_s26 + $0x1e4] ss:$16 sps:$4 sm:$0xff]   ;;  %v18388_v4 = vld [vmem:[%s21300_s26 + $0x1e0] ss:$16 sps:$4 sm:$0xff]  }
 0x228   : > { %2153 = vmatprep.subr.bf16.mxu1 %v18368_v55  ;;  %v18386_v3 = vld [vmem:[%s21300_s26 + $0x3e4] ss:$16 sps:$4 sm:$0xff]   ;;  %v18389_v5 = vld [vmem:[%s21300_s26 + $0x3e0] ss:$16 sps:$4 sm:$0xff]  }
 0x229   : > { %v18390_v33 = vld [vmem:[%s21300_s26 + $0x1c4] ss:$16 sps:$4 sm:$0xff]   ;;  %v18394_v35 = vld [vmem:[%s21300_s26 + $0x1c0] ss:$16 sps:$4 sm:$0xff]  }
 0x22a   : > { %2111 = vmatpush1.bf16.msra.mxu0 %v18370_v56  ;;  %v18392_v34 = vld [vmem:[%s21300_s26 + $0x3c4] ss:$16 sps:$4 sm:$0xff]   ;;  %v18395_v36 = vld [vmem:[%s21300_s26 + $0x3c0] ss:$16 sps:$4 sm:$0xff]  }
 0x22b   : > { %2154 = vmatpush1.bf16.msra.mxu1 %v18371_v57  ;;  %2112 = vmatprep.subr.bf16.mxu0 %v18372_v58  ;;  %v18396_v37 = vld [vmem:[%s21300_s26 + $0x1a4] ss:$16 sps:$4 sm:$0xff]   ;;  %v18400_v39 = vld [vmem:[%s21300_s26 + $0x1a0] ss:$16 sps:$4 sm:$0xff]  }
 0x22c   : > { %2155 = vmatprep.subr.bf16.mxu1 %v18374_v59  ;;  %v18398_v38 = vld [vmem:[%s21300_s26 + $0x3a4] ss:$16 sps:$4 sm:$0xff]   ;;  %v18401_v40 = vld [vmem:[%s21300_s26 + $0x3a0] ss:$16 sps:$4 sm:$0xff]  }
 0x22d   : > { %v18402_v41 = vld [vmem:[%s21300_s26 + $0x184] ss:$16 sps:$4 sm:$0xff]   ;;  %v18406_v43 = vld [vmem:[%s21300_s26 + $0x180] ss:$16 sps:$4 sm:$0xff]  }
 0x22e   : > { %2113 = vmatpush1.bf16.msra.mxu0 %v18376_v60  ;;  %v18404_v42 = vld [vmem:[%s21300_s26 + $0x384] ss:$16 sps:$4 sm:$0xff]   ;;  %v18407_v44 = vld [vmem:[%s21300_s26 + $0x380] ss:$16 sps:$4 sm:$0xff]  }
 0x22f   : > { %2156 = vmatpush1.bf16.msra.mxu1 %v18377_v61  ;;  %2114 = vmatprep.subr.bf16.mxu0 %v18378_v62  ;;  %v18408_v45 = vld [vmem:[%s21300_s26 + $0x164] ss:$16 sps:$4 sm:$0xff]   ;;  %v18412_v47 = vld [vmem:[%s21300_s26 + $0x160] ss:$16 sps:$4 sm:$0xff]   ;;  %v18434_v61 = vld [vmem:[%s21300_s26 + $0xec] ss:$16 sps:$4 sm:$0xff]  }
 0x230   : > { %2157 = vmatprep.subr.bf16.mxu1 %v18380_v63  ;;  %v18410_v46 = vld [vmem:[%s21300_s26 + $0x364] ss:$16 sps:$4 sm:$0xff]   ;;  %v18413_v48 = vld [vmem:[%s21300_s26 + $0x360] ss:$16 sps:$4 sm:$0xff]   ;;  %v18437_v62 = vld [vmem:[%s21300_s26 + $0x2ec] ss:$16 sps:$4 sm:$0xff]  }
 0x231   : > { %v18414_v49 = vld [vmem:[%s21300_s26 + $0x144] ss:$16 sps:$4 sm:$0xff]   ;;  %v18418_v51 = vld [vmem:[%s21300_s26 + $0x140] ss:$16 sps:$4 sm:$0xff]  }
 0x232   : > { %2115 = vmatpush1.bf16.msra.mxu0 %v18382_v0  ;;  %v18416_v50 = vld [vmem:[%s21300_s26 + $0x344] ss:$16 sps:$4 sm:$0xff]   ;;  %v18419_v52 = vld [vmem:[%s21300_s26 + $0x340] ss:$16 sps:$4 sm:$0xff]  }
 0x233   : > { %2158 = vmatpush1.bf16.msra.mxu1 %v18383_v1  ;;  %2116 = vmatprep.subr.bf16.mxu0 %v18384_v2  ;;  %v18420_v53 = vld [vmem:[%s21300_s26 + $0x124] ss:$16 sps:$4 sm:$0xff]   ;;  %v18424_v55 = vld [vmem:[%s21300_s26 + $0x120] ss:$16 sps:$4 sm:$0xff]  }
 0x234   : > { %2159 = vmatprep.subr.bf16.mxu1 %v18386_v3  ;;  %v18422_v54 = vld [vmem:[%s21300_s26 + $0x324] ss:$16 sps:$4 sm:$0xff]   ;;  %v18425_v56 = vld [vmem:[%s21300_s26 + $0x320] ss:$16 sps:$4 sm:$0xff]  }
 0x235   : > { %v18426_v57 = vld [vmem:[%s21300_s26 + $0x104] ss:$16 sps:$4 sm:$0xff]   ;;  %v18430_v59 = vld [vmem:[%s21300_s26 + $0x100] ss:$16 sps:$4 sm:$0xff]  }
 0x236   : > { %2117 = vmatpush2.bf16.msra.mxu0 %v18388_v4  ;;  %v18428_v58 = vld [vmem:[%s21300_s26 + $0x304] ss:$16 sps:$4 sm:$0xff]   ;;  %v18431_v60 = vld [vmem:[%s21300_s26 + $0x300] ss:$16 sps:$4 sm:$0xff]  }
 0x237   : > { %2160 = vmatpush2.bf16.msra.mxu1 %v18389_v5  ;;  %2118 = vmatprep.subr.bf16.mxu0 %v18390_v33  ;;  %v1249_v5 = vlaneseq }
 0x238   : > { %2161 = vmatprep.subr.bf16.mxu1 %v18392_v34 }
 0x23a   : > { %2119 = vmatpush2.bf16.msra.mxu0 %v18394_v35 }
 0x23b   : > { %2162 = vmatpush2.bf16.msra.mxu1 %v18395_v36  ;;  %2120 = vmatprep.subr.bf16.mxu0 %v18396_v37 }
 0x23c   : > { %2163 = vmatprep.subr.bf16.mxu1 %v18398_v38 }
 0x23e   : > { %2121 = vmatpush2.bf16.msra.mxu0 %v18400_v39 }
 0x23f   : > { %2164 = vmatpush2.bf16.msra.mxu1 %v18401_v40  ;;  %2122 = vmatprep.subr.bf16.mxu0 %v18402_v41 }
 0x240   : > { %2165 = vmatprep.subr.bf16.mxu1 %v18404_v42 }
 0x242   : > { %2123 = vmatpush2.bf16.msra.mxu0 %v18406_v43 }
 0x243   : > { %2166 = vmatpush2.bf16.msra.mxu1 %v18407_v44  ;;  %2124 = vmatprep.subr.bf16.mxu0 %v18408_v45 }
 0x244   : > { %2167 = vmatprep.subr.bf16.mxu1 %v18410_v46  ;;  %v18435_v46 = vld [vmem:[%s21300_s26 + $0x2e8] ss:$16 sps:$4 sm:$0xff]  }
 0x246   : > { %2125 = vmatpush2.bf16.msra.mxu0 %v18412_v47 }
 0x247   : > { %2168 = vmatpush2.bf16.msra.mxu1 %v18413_v48  ;;  %2126 = vmatprep.subr.bf16.mxu0 %v18414_v49 }
 0x248   : > { %2169 = vmatprep.subr.bf16.mxu1 %v18416_v50 }
 0x24a   : > { %2127 = vmatpush2.bf16.msra.mxu0 %v18418_v51  ;;  %v18440_v51 = vld [vmem:[%s21300_s26 + $0xcc] ss:$16 sps:$4 sm:$0xff]  }
 0x24b   : > { %2170 = vmatpush2.bf16.msra.mxu1 %v18419_v52  ;;  %2128 = vmatprep.subr.bf16.mxu0 %v18420_v53 }
 0x24c   : > { %2171 = vmatprep.subr.bf16.mxu1 %v18422_v54  ;;  %v18438_v54 = vld [vmem:[%s21300_s26 + $0xc8] ss:$16 sps:$4 sm:$0xff]  }
 0x24e   : > { %2129 = vmatpush2.bf16.msra.mxu0 %v18424_v55  ;;  %v18441_v55 = vld [vmem:[%s21300_s26 + $0x2c8] ss:$16 sps:$4 sm:$0xff]  }
 0x24f   : > { %2172 = vmatpush2.bf16.msra.mxu1 %v18425_v56  ;;  %2130 = vmatprep.subr.bf16.mxu0 %v18426_v57  ;;  %v18443_v56 = vld [vmem:[%s21300_s26 + $0x2cc] ss:$16 sps:$4 sm:$0xff]  }
 0x250   : > { %2173 = vmatprep.subr.bf16.mxu1 %v18428_v58  ;;  %v18446_v57 = vld [vmem:[%s21300_s26 + $0xac] ss:$16 sps:$4 sm:$0xff]  }
 0x251   : > { %v18449_v58 = vld [vmem:[%s21300_s26 + $0x2ac] ss:$16 sps:$4 sm:$0xff]  }
 0x252   : > { %2131 = vmatpush2.bf16.msra.mxu0 %v18430_v59  ;;  %v18444_v59 = vld [vmem:[%s21300_s26 + $0xa8] ss:$16 sps:$4 sm:$0xff]  }
 0x253   : > { %2174 = vmatpush2.bf16.msra.mxu1 %v18431_v60  ;;  %2186 = vmatprep.subr.bf16.mxu0 %v18434_v61  ;;  %v18447_v60 = vld [vmem:[%s21300_s26 + $0x2a8] ss:$16 sps:$4 sm:$0xff]   ;;  %v18452_v61 = vld [vmem:[%s21300_s26 + $0x8c] ss:$16 sps:$4 sm:$0xff]  }
 0x254   : > { %2229 = vmatprep.subr.bf16.mxu1 %v18437_v62  ;;  %v18455_v62 = vld [vmem:[%s21300_s26 + $0x28c] ss:$16 sps:$4 sm:$0xff]  }
 0x2a7   : > { %v1199_v6 = vpop.xlane.xlu0 %1198 }
 0x2a8   : > { %v1206_v7 = vmul.f32 0.001953125, %v1199_v6  ;;  %v21497_v6 = vshrl.u32 %v1249_v5, 7  ;;  %v18464_v5 = vld [vmem:[%s21300_s26 + $0x4c] ss:$16 sps:$4 sm:$0xff]  }
 0x2aa   : > { %v21429_v8 = vsub.f32 %v21371_v20, %v1206_v7  ;;  %v21432_v9 = vsub.f32 %v21373_v21, %v1206_v7  ;;  %v21435_v10 = vsub.f32 %v21375_v22, %v1206_v7  ;;  %v21438_v12 = vsub.f32 %v21377_v23, %v1206_v7  ;;  %v20072_v23 = vld [vmem:[#allocation2 + $0x38] sm:$0xff]  ;;  %v1193_v7 = vld [vmem:[%s895_s28] sm:$0xf]  ;;  %s24074_s28 = scalar_lea.vmem [#allocation15], %s21289_s19 }
 0x2ab   : > { %v1204_v11 = vpop.xlane.xlu0 %1203 }
 0x2ac   : > { %v1207_v13 = vmul.f32 0.001953125, %v1204_v11  ;;  %v1216_v14 = vmul.f32 %v21429_v8, %v21429_v8  ;;  %v1217_v15 = vmul.f32 %v21432_v9, %v21432_v9  ;;  %v1218_v16 = vmul.f32 %v21435_v10, %v21435_v10 }
 0x2ad   : > { %v1219_v21 = vmul.f32 %v21438_v12, %v21438_v12  ;;  %v21502_v11 = vsub.s32 1, %v21497_v6 }
 0x2ae   : > { %v21447_v17 = vsub.f32 %v21381_v25, %v1207_v13  ;;  %v21450_v18 = vsub.f32 %v21383_v26, %v1207_v13  ;;  %v1224_v19 = vadd.f32 %v1217_v15, %v1216_v14  ;;  %v21453_v20 = vsub.f32 %v21385_v27, %v1207_v13 }
 0x2af   : > { %v21457_v24 = vsub.f32 %v20072_v23, %v1207_v13  ;;  %v21505_v13 = vsub.s32 3, %v21497_v6  ;;  %v21508_v14 = vsub.s32 0, %v21497_v6  ;;  %v21511_v15 = vsub.s32 2, %v21497_v6 }
 0x2b0   : > { %v1225_v22 = vadd.f32 %v1224_v19, %v1218_v16  ;;  %v1220_v25 = vmul.f32 %v21447_v17, %v21447_v17  ;;  %v1221_v26 = vmul.f32 %v21450_v18, %v21450_v18  ;;  %v1222_v27 = vmul.f32 %v21453_v20, %v21453_v20  ;;  %v1194_v19 = vld [vmem:[%s904_s11] sm:$0xf]  ;;  %s24075_s11 = scalar_lea.vmem [#allocation16], %s21289_s19 }
 0x2b1   : > { %v1223_v30 = vmul.f32 %v21457_v24, %v21457_v24  ;;  %v1289_v33 = vrot.slane %v1194_v19, %v21511_v15 }
 0x2b2   : > { %v1226_v28 = vadd.f32 %v1225_v22, %v1219_v21  ;;  %v1229_v29 = vadd.f32 %v1221_v26, %v1220_v25  ;;  %v1256_v22 = vrot.slane %v1193_v7, %v21502_v11  ;;  %v1264_v25 = vrot.slane %v1193_v7, %v21505_v13 }
 0x2b4   : > { %1227 = vadd.xlane.f32.xlu1 %v1226_v28  ;;  %v1230_v31 = vadd.f32 %v1229_v29, %v1222_v27  ;;  %v1252_v28 = vrot.slane %v1193_v7, %v21508_v14  ;;  %v1260_v29 = vrot.slane %v1193_v7, %v21511_v15  ;;  %v18467_v7 = vld [vmem:[%s21300_s26 + $0x24c] ss:$16 sps:$4 sm:$0xff]  }
 0x2b6   : > { %v1231_v32 = vadd.f32 %v1230_v31, %v1223_v30  ;;  %v1285_v31 = vrot.slane %v1194_v19, %v21502_v11 }
 0x2b8   : > { %1232 = vadd.xlane.f32.xlu1 %v1231_v32  ;;  %v1293_v32 = vrot.slane %v1194_v19, %v21505_v13 }
 0x33d   : > { %v1228_v63 = vpop.xlane.xlu1 %1227 }
 0x33e   : > { %v1234_v0 = vmul.f32 0.001953125, %v1228_v63  ;;  %v18450_v63 = vld [vmem:[%s21300_s26 + $0x88] ss:$16 sps:$4 sm:$0xff]  }
 0x340   : > { %v1236_v1 = vadd.f32 1e-12, %v1234_v0  ;;  %v18453_v0 = vld [vmem:[%s21300_s26 + $0x288] ss:$16 sps:$4 sm:$0xff]  }
 0x341   : > { %v1233_v2 = vpop.xlane.xlu1 %1232 }
 0x342   : > { %19872 = vrsqrt.f32 %v1236_v1  ;;  %v1235_v3 = vmul.f32 0.001953125, %v1233_v2  ;;  %v18458_v1 = vld [vmem:[%s21300_s26 + $0x6c] ss:$16 sps:$4 sm:$0xff]  }
 0x343   : > { %v18461_v2 = vld [vmem:[%s21300_s26 + $0x26c] ss:$16 sps:$4 sm:$0xff]  }
 0x344   : > { %v1237_v4 = vadd.f32 1e-12, %v1235_v3  ;;  %v18456_v3 = vld [vmem:[%s21300_s26 + $0x68] ss:$16 sps:$4 sm:$0xff]  }
 0x346   : > { %19874 = vrsqrt.f32 %v1237_v4  ;;  %v18459_v4 = vld [vmem:[%s21300_s26 + $0x268] ss:$16 sps:$4 sm:$0xff]  }
 0x34f   : > { %v19873_v16 = vpop.eup %19872 }
 0x350   : > { %v1241_v21 = vmul.f32 %v19873_v16, %v21432_v9  ;;  %v1243_v23 = vmul.f32 %v19873_v16, %v21438_v12  ;;  %v1240_v26 = vmul.f32 %v19873_v16, %v21429_v8  ;;  %v1242_v27 = vmul.f32 %v19873_v16, %v21435_v10  ;;  %v18462_v16 = vld [vmem:[%s21300_s26 + $0x48] ss:$16 sps:$4 sm:$0xff]  }
 0x351   : > { %v1281_v9 = vrot.slane %v1194_v19, %v21508_v14  ;;  %v18465_v19 = vld [vmem:[%s21300_s26 + $0x248] ss:$16 sps:$4 sm:$0xff]  }
 0x352   : > { %v1270_v34 = vmul.f32 %v1256_v22, %v1241_v21  ;;  %v1272_v35 = vmul.f32 %v1264_v25, %v1243_v23  ;;  %v1269_v36 = vmul.f32 %v1252_v28, %v1240_v26  ;;  %v1271_v38 = vmul.f32 %v1260_v29, %v1242_v27  ;;  %v18470_v21 = vld [vmem:[%s21300_s26 + $0x2c] ss:$16 sps:$4 sm:$0xff]   ;;  %v18468_v23 = vld [vmem:[%s21300_s26 + $0x28] ss:$16 sps:$4 sm:$0xff]  }
 0x353   : > { %v19875_v30 = vpop.eup %19874  ;;  %v18476_v26 = vld [vmem:[%s21300_s26 + $0xc] ss:$16 sps:$4 sm:$0xff]   ;;  %v18474_v27 = vld [vmem:[%s21300_s26 + $0x8] ss:$16 sps:$4 sm:$0xff]  }
 0x354   : > { %v1245_v12 = vmul.f32 %v19875_v30, %v21450_v18  ;;  %v1247_v8 = vmul.f32 %v19875_v30, %v21457_v24  ;;  %v1244_v10 = vmul.f32 %v19875_v30, %v21447_v17  ;;  %v1246_v37 = vmul.f32 %v19875_v30, %v21453_v20  ;;  %v18432_v24 = vld [vmem:[%s21300_s26 + $0xe8] ss:$16 sps:$4 sm:$0xff]   ;;  %v18482_v30 = vld [vmem:[%s21300_s26 + $0x1ec] ss:$16 sps:$4 sm:$0xff]  }
 0x355   : > { %v1299_v43 = vadd.f32 %v1285_v31, %v1270_v34  ;;  %v1301_v18 = vadd.f32 %v1293_v32, %v1272_v35  ;;  %v1298_v47 = vadd.f32 %v1281_v9, %v1269_v36  ;;  %v1300_v20 = vadd.f32 %v1289_v33, %v1271_v38  ;;  %v18486_v34 = vld [vmem:[%s21300_s26 + $0x1c8] ss:$16 sps:$4 sm:$0xff]   ;;  %v18494_v35 = vld [vmem:[%s21300_s26 + $0x1ac] ss:$16 sps:$4 sm:$0xff]  }
 0x356   : > { %v1274_v39 = vmul.f32 %v1256_v22, %v1245_v12  ;;  %v1276_v40 = vmul.f32 %v1264_v25, %v1247_v8  ;;  %v1273_v41 = vmul.f32 %v1252_v28, %v1244_v10  ;;  %v1275_v42 = vmul.f32 %v1260_v29, %v1246_v37  ;;  %v18473_v22 = vld [vmem:[%s21300_s26 + $0x22c] ss:$16 sps:$4 sm:$0xff]   ;;  %v18471_v25 = vld [vmem:[%s21300_s26 + $0x228] ss:$16 sps:$4 sm:$0xff]  }
 0x357   : > { %v18479_v28 = vld [vmem:[%s21300_s26 + $0x20c] ss:$16 sps:$4 sm:$0xff]   ;;  %v18477_v29 = vld [vmem:[%s21300_s26 + $0x208] ss:$16 sps:$4 sm:$0xff]  }
 0x358   : > { %v1303_v44 = vadd.f32 %v1285_v31, %v1274_v39  ;;  %v1305_v45 = vadd.f32 %v1293_v32, %v1276_v40  ;;  %v1302_v17 = vadd.f32 %v1281_v9, %v1273_v41  ;;  %v1304_v48 = vadd.f32 %v1289_v33, %v1275_v42  ;;  %v18485_v31 = vld [vmem:[%s21300_s26 + $0x3ec] ss:$16 sps:$4 sm:$0xff]   ;;  %v18480_v32 = vld [vmem:[%s21300_s26 + $0x1e8] ss:$16 sps:$4 sm:$0xff]  }
 0x359   : > { %v18483_v9 = vld [vmem:[%s21300_s26 + $0x3e8] ss:$16 sps:$4 sm:$0xff]   ;;  %v18488_v33 = vld [vmem:[%s21300_s26 + $0x1cc] ss:$16 sps:$4 sm:$0xff]  }
 0x35a   : > { %v21533_v49 = vpack.c.bf16 %v1303_v44, %v1299_v43  ;;  %v21535_v50 = vpack.c.bf16 %v1305_v45, %v1301_v18  ;;  %v21538_v52 = vpack.c.bf16 %v1302_v17, %v1298_v47  ;;  %v21540_v53 = vpack.c.bf16 %v1304_v48, %v1300_v20  ;;  %v18491_v12 = vld [vmem:[%s21300_s26 + $0x3cc] ss:$16 sps:$4 sm:$0xff]   ;;  %v18489_v8 = vld [vmem:[%s21300_s26 + $0x3c8] ss:$16 sps:$4 sm:$0xff]  }
 0x35b   : > { %v18497_v10 = vld [vmem:[%s21300_s26 + $0x3ac] ss:$16 sps:$4 sm:$0xff]   ;;  %v18492_v36 = vld [vmem:[%s21300_s26 + $0x1a8] ss:$16 sps:$4 sm:$0xff]  }
 0x35c   : > { %2132 = vmatprep.mubr.bf16.mxu0 %v21533_v49  ;;  %2175 = vmatprep.mubr.bf16.mxu1 %v21535_v50  ;;  %v18495_v37 = vld [vmem:[%s21300_s26 + $0x3a8] ss:$16 sps:$4 sm:$0xff]   ;;  %v18500_v38 = vld [vmem:[%s21300_s26 + $0x18c] ss:$16 sps:$4 sm:$0xff]  }
 0x35d   : > { %2133 = vmatmul.mubr.bf16.vlgmr.msra.gmra.mxu0 %v21538_v52  ;;  %2176 = vmatmul.mubr.bf16.vlgmr.msra.gmra.mxu1 %v21540_v53  ;;  %v18503_v39 = vld [vmem:[%s21300_s26 + $0x38c] ss:$16 sps:$4 sm:$0xff]   ;;  %v18498_v40 = vld [vmem:[%s21300_s26 + $0x188] ss:$16 sps:$4 sm:$0xff]  }
 0x35e   : > { %2187 = vmatpush1.bf16.msra.mxu0 %v18432_v24  ;;  %2230 = vmatpush1.bf16.msra.mxu1 %v18435_v46  ;;  %v18501_v41 = vld [vmem:[%s21300_s26 + $0x388] ss:$16 sps:$4 sm:$0xff]   ;;  %v18506_v42 = vld [vmem:[%s21300_s26 + $0x16c] ss:$16 sps:$4 sm:$0xff]  }
 0x35f   : > { %2218 = vmatprep.mubr.bf16.mxu0 %v21533_v49  ;;  %2261 = vmatprep.mubr.bf16.mxu1 %v21535_v50  ;;  %v18509_v43 = vld [vmem:[%s21300_s26 + $0x36c] ss:$16 sps:$4 sm:$0xff]   ;;  %v18504_v44 = vld [vmem:[%s21300_s26 + $0x168] ss:$16 sps:$4 sm:$0xff]  }
 0x360   : > { %2188 = vmatprep.subr.bf16.mxu0 %v18440_v51  ;;  %2231 = vmatprep.subr.bf16.mxu1 %v18443_v56  ;;  %v18507_v18 = vld [vmem:[%s21300_s26 + $0x368] ss:$16 sps:$4 sm:$0xff]   ;;  %v18512_v45 = vld [vmem:[%s21300_s26 + $0x14c] ss:$16 sps:$4 sm:$0xff]  }
 0x361   : > { %v18515_v24 = vld [vmem:[%s21300_s26 + $0x34c] ss:$16 sps:$4 sm:$0xff]   ;;  %v18510_v46 = vld [vmem:[%s21300_s26 + $0x148] ss:$16 sps:$4 sm:$0xff]  }
 0x362   : > { %2189 = vmatpush1.bf16.msra.mxu0 %v18438_v54  ;;  %2232 = vmatpush1.bf16.msra.mxu1 %v18441_v55  ;;  %v18513_v47 = vld [vmem:[%s21300_s26 + $0x348] ss:$16 sps:$4 sm:$0xff]   ;;  %v18518_v17 = vld [vmem:[%s21300_s26 + $0x12c] ss:$16 sps:$4 sm:$0xff]  }
 0x363   : > { %2190 = vmatprep.subr.bf16.mxu0 %v18446_v57  ;;  %2233 = vmatprep.subr.bf16.mxu1 %v18449_v58  ;;  %v18521_v20 = vld [vmem:[%s21300_s26 + $0x32c] ss:$16 sps:$4 sm:$0xff]   ;;  %v18516_v48 = vld [vmem:[%s21300_s26 + $0x128] ss:$16 sps:$4 sm:$0xff]   ;;  %v18530_v58 = vld [vmem:[%s21306_s23 + $0xe4] ss:$16 sps:$4 sm:$0xff]  }
 0x364   : > { %v18519_v51 = vld [vmem:[%s21300_s26 + $0x328] ss:$16 sps:$4 sm:$0xff]   ;;  %v18524_v54 = vld [vmem:[%s21300_s26 + $0x10c] ss:$16 sps:$4 sm:$0xff]  }
 0x365   : > { %v18527_v55 = vld [vmem:[%s21300_s26 + $0x30c] ss:$16 sps:$4 sm:$0xff]   ;;  %v18522_v56 = vld [vmem:[%s21300_s26 + $0x108] ss:$16 sps:$4 sm:$0xff]  }
 0x366   : > { %2191 = vmatpush1.bf16.msra.mxu0 %v18444_v59  ;;  %2234 = vmatpush1.bf16.msra.mxu1 %v18447_v60  ;;  %v18525_v57 = vld [vmem:[%s21300_s26 + $0x308] ss:$16 sps:$4 sm:$0xff]   ;;  %v18533_v59 = vld [vmem:[%s21306_s23 + $0x2e4] ss:$16 sps:$4 sm:$0xff]   ;;  %v18528_v60 = vld [vmem:[%s21306_s23 + $0xe0] ss:$16 sps:$4 sm:$0xff]  }
 0x367   : > { %2192 = vmatprep.subr.bf16.mxu0 %v18452_v61  ;;  %2235 = vmatprep.subr.bf16.mxu1 %v18455_v62  ;;  %v18531_v61 = vld [vmem:[%s21306_s23 + $0x2e0] ss:$16 sps:$4 sm:$0xff]   ;;  %v18536_v62 = vld [vmem:[%s21306_s23 + $0xc4] ss:$16 sps:$4 sm:$0xff]   ;;  %s24076_s26 = scalar_lea.vmem [#allocation18], %s21289_s19 }
 0x36a   : > { %2193 = vmatpush1.bf16.msra.mxu0 %v18450_v63  ;;  %2236 = vmatpush1.bf16.msra.mxu1 %v18453_v0  ;;  %v18539_v63 = vld [vmem:[%s21306_s23 + $0x2c4] ss:$16 sps:$4 sm:$0xff]   ;;  %v18534_v0 = vld [vmem:[%s21306_s23 + $0xc0] ss:$16 sps:$4 sm:$0xff]  }
 0x36b   : > { %2194 = vmatprep.subr.bf16.mxu0 %v18458_v1  ;;  %2237 = vmatprep.subr.bf16.mxu1 %v18461_v2  ;;  %v18537_v1 = vld [vmem:[%s21306_s23 + $0x2c0] ss:$16 sps:$4 sm:$0xff]   ;;  %v18542_v2 = vld [vmem:[%s21306_s23 + $0xa4] ss:$16 sps:$4 sm:$0xff]  }
 0x36e   : > { %2195 = vmatpush1.bf16.msra.mxu0 %v18456_v3  ;;  %2238 = vmatpush1.bf16.msra.mxu1 %v18459_v4  ;;  %v18545_v3 = vld [vmem:[%s21306_s23 + $0x2a4] ss:$16 sps:$4 sm:$0xff]   ;;  %v18540_v4 = vld [vmem:[%s21306_s23 + $0xa0] ss:$16 sps:$4 sm:$0xff]  }
 0x36f   : > { %2196 = vmatprep.subr.bf16.mxu0 %v18464_v5  ;;  %2239 = vmatprep.subr.bf16.mxu1 %v18467_v7  ;;  %v18543_v5 = vld [vmem:[%s21306_s23 + $0x2a0] ss:$16 sps:$4 sm:$0xff]   ;;  %v18548_v7 = vld [vmem:[%s21306_s23 + $0x84] ss:$16 sps:$4 sm:$0xff]  }
 0x372   : > { %2197 = vmatpush1.bf16.msra.mxu0 %v18462_v16  ;;  %2240 = vmatpush1.bf16.msra.mxu1 %v18465_v19  ;;  %v18551_v16 = vld [vmem:[%s21306_s23 + $0x284] ss:$16 sps:$4 sm:$0xff]   ;;  %v18546_v19 = vld [vmem:[%s21306_s23 + $0x80] ss:$16 sps:$4 sm:$0xff]  }
 0x373   : > { %2198 = vmatprep.subr.bf16.mxu0 %v18470_v21  ;;  %2241 = vmatprep.subr.bf16.mxu1 %v18473_v22  ;;  %v18549_v21 = vld [vmem:[%s21306_s23 + $0x280] ss:$16 sps:$4 sm:$0xff]   ;;  %v18554_v22 = vld [vmem:[%s21306_s23 + $0x64] ss:$16 sps:$4 sm:$0xff]  }
 0x376   : > { %2199 = vmatpush1.bf16.msra.mxu0 %v18468_v23  ;;  %2242 = vmatpush1.bf16.msra.mxu1 %v18471_v25  ;;  %v18552_v23 = vld [vmem:[%s21306_s23 + $0x60] ss:$16 sps:$4 sm:$0xff]   ;;  %v18557_v25 = vld [vmem:[%s21306_s23 + $0x264] ss:$16 sps:$4 sm:$0xff]  }
 0x377   : > { %2200 = vmatprep.subr.bf16.mxu0 %v18476_v26  ;;  %2243 = vmatprep.subr.bf16.mxu1 %v18479_v28  ;;  %v18555_v26 = vld [vmem:[%s21306_s23 + $0x260] ss:$16 sps:$4 sm:$0xff]   ;;  %v18560_v28 = vld [vmem:[%s21306_s23 + $0x44] ss:$16 sps:$4 sm:$0xff]  }
 0x37a   : > { %2201 = vmatpush1.bf16.msra.mxu0 %v18474_v27  ;;  %2244 = vmatpush1.bf16.msra.mxu1 %v18477_v29  ;;  %v18558_v27 = vld [vmem:[%s21306_s23 + $0x40] ss:$16 sps:$4 sm:$0xff]   ;;  %v18563_v29 = vld [vmem:[%s21306_s23 + $0x244] ss:$16 sps:$4 sm:$0xff]  }
 0x37b   : > { %2202 = vmatprep.subr.bf16.mxu0 %v18482_v30  ;;  %2245 = vmatprep.subr.bf16.mxu1 %v18485_v31  ;;  %v18561_v30 = vld [vmem:[%s21306_s23 + $0x240] ss:$16 sps:$4 sm:$0xff]   ;;  %v18566_v31 = vld [vmem:[%s21306_s23 + $0x24] ss:$16 sps:$4 sm:$0xff]  }
 0x37e   : > { %2203 = vmatpush2.bf16.msra.mxu0 %v18480_v32  ;;  %2246 = vmatpush2.bf16.msra.mxu1 %v18483_v9  ;;  %v18564_v32 = vld [vmem:[%s21306_s23 + $0x20] ss:$16 sps:$4 sm:$0xff]   ;;  %v18569_v9 = vld [vmem:[%s21306_s23 + $0x224] ss:$16 sps:$4 sm:$0xff]  }
 0x37f   : > { %2204 = vmatprep.subr.bf16.mxu0 %v18488_v33  ;;  %2247 = vmatprep.subr.bf16.mxu1 %v18491_v12  ;;  %v18567_v33 = vld [vmem:[%s21306_s23 + $0x220] ss:$16 sps:$4 sm:$0xff]   ;;  %v18572_v12 = vld [vmem:[%s21306_s23 + $0x4] ss:$16 sps:$4 sm:$0xff]  }
 0x382   : > { %2205 = vmatpush2.bf16.msra.mxu0 %v18486_v34  ;;  %2248 = vmatpush2.bf16.msra.mxu1 %v18489_v8  ;;  %v18570_v34 = vld [vmem:[%s21306_s23] ss:$16 sps:$4 sm:$0xff]   ;;  %v18575_v8 = vld [vmem:[%s21306_s23 + $0x204] ss:$16 sps:$4 sm:$0xff]  }
 0x383   : > { %2206 = vmatprep.subr.bf16.mxu0 %v18494_v35  ;;  %2249 = vmatprep.subr.bf16.mxu1 %v18497_v10  ;;  %v18573_v35 = vld [vmem:[%s21306_s23 + $0x200] ss:$16 sps:$4 sm:$0xff]   ;;  %v18578_v10 = vld [vmem:[%s21306_s23 + $0x1e4] ss:$16 sps:$4 sm:$0xff]  }
 0x386   : > { %2207 = vmatpush2.bf16.msra.mxu0 %v18492_v36  ;;  %2250 = vmatpush2.bf16.msra.mxu1 %v18495_v37  ;;  %v18576_v36 = vld [vmem:[%s21306_s23 + $0x1e0] ss:$16 sps:$4 sm:$0xff]   ;;  %v18581_v37 = vld [vmem:[%s21306_s23 + $0x3e4] ss:$16 sps:$4 sm:$0xff]  }
 0x387   : > { %2208 = vmatprep.subr.bf16.mxu0 %v18500_v38  ;;  %2251 = vmatprep.subr.bf16.mxu1 %v18503_v39  ;;  %v18579_v38 = vld [vmem:[%s21306_s23 + $0x3e0] ss:$16 sps:$4 sm:$0xff]   ;;  %v18584_v39 = vld [vmem:[%s21306_s23 + $0x1c4] ss:$16 sps:$4 sm:$0xff]  }
 0x38a   : > { %2209 = vmatpush2.bf16.msra.mxu0 %v18498_v40  ;;  %2252 = vmatpush2.bf16.msra.mxu1 %v18501_v41  ;;  %v18582_v40 = vld [vmem:[%s21306_s23 + $0x1c0] ss:$16 sps:$4 sm:$0xff]   ;;  %v18587_v41 = vld [vmem:[%s21306_s23 + $0x3c4] ss:$16 sps:$4 sm:$0xff]  }
 0x38b   : > { %2210 = vmatprep.subr.bf16.mxu0 %v18506_v42  ;;  %2253 = vmatprep.subr.bf16.mxu1 %v18509_v43  ;;  %v18585_v42 = vld [vmem:[%s21306_s23 + $0x3c0] ss:$16 sps:$4 sm:$0xff]   ;;  %v18590_v43 = vld [vmem:[%s21306_s23 + $0x1a4] ss:$16 sps:$4 sm:$0xff]  }
 0x38e   : > { %2211 = vmatpush2.bf16.msra.mxu0 %v18504_v44  ;;  %2254 = vmatpush2.bf16.msra.mxu1 %v18507_v18  ;;  %v18588_v44 = vld [vmem:[%s21306_s23 + $0x1a0] ss:$16 sps:$4 sm:$0xff]   ;;  %v18593_v18 = vld [vmem:[%s21306_s23 + $0x3a4] ss:$16 sps:$4 sm:$0xff]  }
 0x38f   : > { %2212 = vmatprep.subr.bf16.mxu0 %v18512_v45  ;;  %2255 = vmatprep.subr.bf16.mxu1 %v18515_v24  ;;  %v18591_v45 = vld [vmem:[%s21306_s23 + $0x3a0] ss:$16 sps:$4 sm:$0xff]   ;;  %v18596_v24 = vld [vmem:[%s21306_s23 + $0x184] ss:$16 sps:$4 sm:$0xff]  }
 0x392   : > { %2213 = vmatpush2.bf16.msra.mxu0 %v18510_v46  ;;  %2256 = vmatpush2.bf16.msra.mxu1 %v18513_v47  ;;  %v18594_v46 = vld [vmem:[%s21306_s23 + $0x180] ss:$16 sps:$4 sm:$0xff]   ;;  %v18599_v47 = vld [vmem:[%s21306_s23 + $0x384] ss:$16 sps:$4 sm:$0xff]  }
 0x393   : > { %2214 = vmatprep.subr.bf16.mxu0 %v18518_v17  ;;  %2257 = vmatprep.subr.bf16.mxu1 %v18521_v20  ;;  %v18597_v17 = vld [vmem:[%s21306_s23 + $0x380] ss:$16 sps:$4 sm:$0xff]   ;;  %v18602_v20 = vld [vmem:[%s21306_s23 + $0x164] ss:$16 sps:$4 sm:$0xff]  }
 0x396   : > { %2215 = vmatpush2.bf16.msra.mxu0 %v18516_v48  ;;  %2258 = vmatpush2.bf16.msra.mxu1 %v18519_v51  ;;  %v18600_v48 = vld [vmem:[%s21306_s23 + $0x160] ss:$16 sps:$4 sm:$0xff]   ;;  %v18605_v51 = vld [vmem:[%s21306_s23 + $0x364] ss:$16 sps:$4 sm:$0xff]  }
 0x397   : > { %2216 = vmatprep.subr.bf16.mxu0 %v18524_v54  ;;  %2259 = vmatprep.subr.bf16.mxu1 %v18527_v55  ;;  %v18603_v54 = vld [vmem:[%s21306_s23 + $0x360] ss:$16 sps:$4 sm:$0xff]   ;;  %v18608_v55 = vld [vmem:[%s21306_s23 + $0x144] ss:$16 sps:$4 sm:$0xff]  }
 0x39a   : > { %2217 = vmatpush2.bf16.msra.mxu0 %v18522_v56  ;;  %2260 = vmatpush2.bf16.msra.mxu1 %v18525_v57  ;;  %v18606_v56 = vld [vmem:[%s21306_s23 + $0x140] ss:$16 sps:$4 sm:$0xff]   ;;  %v18611_v57 = vld [vmem:[%s21306_s23 + $0x344] ss:$16 sps:$4 sm:$0xff]  }
 0x39b   : > { %3062 = vmatprep.subr.bf16.mxu0 %v18530_v58  ;;  %3105 = vmatprep.subr.bf16.mxu1 %v18533_v59  ;;  %v18609_v58 = vld [vmem:[%s21306_s23 + $0x340] ss:$16 sps:$4 sm:$0xff]   ;;  %v18614_v59 = vld [vmem:[%s21306_s23 + $0x124] ss:$16 sps:$4 sm:$0xff]  }
 0x39d   : > { %2219 = vmatmul.mubr.bf16.vlgmr.msra.gmra.mxu0 %v21538_v52  ;;  %2262 = vmatmul.mubr.bf16.vlgmr.msra.gmra.mxu1 %v21540_v53 }
 0x39e   : > { %3063 = vmatpush1.bf16.msra.mxu0 %v18528_v60  ;;  %3094 = vmatprep.mubr.bf16.mxu0 %v21533_v49  ;;  %v18612_v60 = vld [vmem:[%s21306_s23 + $0x120] ss:$16 sps:$4 sm:$0xff]  }
 0x39f   : > { %3106 = vmatpush1.bf16.msra.mxu1 %v18531_v61  ;;  %3137 = vmatprep.mubr.bf16.mxu1 %v21535_v50  ;;  %v18617_v61 = vld [vmem:[%s21306_s23 + $0x324] ss:$16 sps:$4 sm:$0xff]  }
 0x3a0   : > { %3064 = vmatprep.subr.bf16.mxu0 %v18536_v62  ;;  %3107 = vmatprep.subr.bf16.mxu1 %v18539_v63  ;;  %v18615_v62 = vld [vmem:[%s21306_s23 + $0x320] ss:$16 sps:$4 sm:$0xff]   ;;  %v18620_v63 = vld [vmem:[%s21306_s23 + $0x104] ss:$16 sps:$4 sm:$0xff]  }
 0x3a2   : > { %3065 = vmatpush1.bf16.msra.mxu0 %v18534_v0  ;;  %v18618_v0 = vld [vmem:[%s21306_s23 + $0x100] ss:$16 sps:$4 sm:$0xff]  }
 0x3a3   : > { %3108 = vmatpush1.bf16.msra.mxu1 %v18537_v1  ;;  %3066 = vmatprep.subr.bf16.mxu0 %v18542_v2  ;;  %v18623_v1 = vld [vmem:[%s21306_s23 + $0x304] ss:$16 sps:$4 sm:$0xff]   ;;  %v18621_v2 = vld [vmem:[%s21306_s23 + $0x300] ss:$16 sps:$4 sm:$0xff]  }
 0x3a4   : > { %3109 = vmatprep.subr.bf16.mxu1 %v18545_v3  ;;  %v18626_v3 = vld [vmem:[%s21306_s23 + $0xec] ss:$16 sps:$4 sm:$0xff]  }
 0x3a6   : > { %3067 = vmatpush1.bf16.msra.mxu0 %v18540_v4  ;;  %v18629_v4 = vld [vmem:[%s21306_s23 + $0x2ec] ss:$16 sps:$4 sm:$0xff]  }
 0x3a7   : > { %3110 = vmatpush1.bf16.msra.mxu1 %v18543_v5  ;;  %3068 = vmatprep.subr.bf16.mxu0 %v18548_v7  ;;  %v18624_v5 = vld [vmem:[%s21306_s23 + $0xe8] ss:$16 sps:$4 sm:$0xff]  }
 0x3a8   : > { %3111 = vmatprep.subr.bf16.mxu1 %v18551_v16  ;;  %v18627_v7 = vld [vmem:[%s21306_s23 + $0x2e8] ss:$16 sps:$4 sm:$0xff]   ;;  %v18632_v16 = vld [vmem:[%s21306_s23 + $0xcc] ss:$16 sps:$4 sm:$0xff]  }
 0x3aa   : > { %3069 = vmatpush1.bf16.msra.mxu0 %v18546_v19  ;;  %v18635_v19 = vld [vmem:[%s21306_s23 + $0x2cc] ss:$16 sps:$4 sm:$0xff]  }
 0x3ab   : > { %3112 = vmatpush1.bf16.msra.mxu1 %v18549_v21  ;;  %3070 = vmatprep.subr.bf16.mxu0 %v18554_v22  ;;  %v18630_v21 = vld [vmem:[%s21306_s23 + $0xc8] ss:$16 sps:$4 sm:$0xff]  }
 0x3ac   : > { %3113 = vmatprep.subr.bf16.mxu1 %v18557_v25  ;;  %v18633_v22 = vld [vmem:[%s21306_s23 + $0x2c8] ss:$16 sps:$4 sm:$0xff]   ;;  %v18641_v25 = vld [vmem:[%s21306_s23 + $0x2ac] ss:$16 sps:$4 sm:$0xff]  }
 0x3ae   : > { %3071 = vmatpush1.bf16.msra.mxu0 %v18552_v23  ;;  %v18638_v23 = vld [vmem:[%s21306_s23 + $0xac] ss:$16 sps:$4 sm:$0xff]  }
 0x3af   : > { %3114 = vmatpush1.bf16.msra.mxu1 %v18555_v26  ;;  %3072 = vmatprep.subr.bf16.mxu0 %v18560_v28  ;;  %v18636_v26 = vld [vmem:[%s21306_s23 + $0xa8] ss:$16 sps:$4 sm:$0xff]  }
 0x3b0   : > { %3115 = vmatprep.subr.bf16.mxu1 %v18563_v29  ;;  %v18639_v28 = vld [vmem:[%s21306_s23 + $0x2a8] ss:$16 sps:$4 sm:$0xff]   ;;  %v18647_v29 = vld [vmem:[%s21306_s23 + $0x28c] ss:$16 sps:$4 sm:$0xff]  }
 0x3b2   : > { %3073 = vmatpush1.bf16.msra.mxu0 %v18558_v27  ;;  %v18644_v27 = vld [vmem:[%s21306_s23 + $0x8c] ss:$16 sps:$4 sm:$0xff]  }
 0x3b3   : > { %3116 = vmatpush1.bf16.msra.mxu1 %v18561_v30  ;;  %3074 = vmatprep.subr.bf16.mxu0 %v18566_v31  ;;  %v18642_v30 = vld [vmem:[%s21306_s23 + $0x88] ss:$16 sps:$4 sm:$0xff]  }
 0x3b4   : > { %3117 = vmatprep.subr.bf16.mxu1 %v18569_v9  ;;  %v18645_v31 = vld [vmem:[%s21306_s23 + $0x288] ss:$16 sps:$4 sm:$0xff]   ;;  %v18653_v9 = vld [vmem:[%s21306_s23 + $0x26c] ss:$16 sps:$4 sm:$0xff]  }
 0x3b6   : > { %3075 = vmatpush1.bf16.msra.mxu0 %v18564_v32  ;;  %v18650_v32 = vld [vmem:[%s21306_s23 + $0x6c] ss:$16 sps:$4 sm:$0xff]  }
 0x3b7   : > { %3118 = vmatpush1.bf16.msra.mxu1 %v18567_v33  ;;  %3076 = vmatprep.subr.bf16.mxu0 %v18572_v12  ;;  %v18648_v33 = vld [vmem:[%s21306_s23 + $0x68] ss:$16 sps:$4 sm:$0xff]  }
 0x3b8   : > { %3119 = vmatprep.subr.bf16.mxu1 %v18575_v8  ;;  %v18651_v12 = vld [vmem:[%s21306_s23 + $0x268] ss:$16 sps:$4 sm:$0xff]   ;;  %v18659_v8 = vld [vmem:[%s21306_s23 + $0x24c] ss:$16 sps:$4 sm:$0xff]  }
 0x3ba   : > { %3077 = vmatpush1.bf16.msra.mxu0 %v18570_v34  ;;  %v18656_v34 = vld [vmem:[%s21306_s23 + $0x4c] ss:$16 sps:$4 sm:$0xff]  }
 0x3bb   : > { %3120 = vmatpush1.bf16.msra.mxu1 %v18573_v35  ;;  %3078 = vmatprep.subr.bf16.mxu0 %v18578_v10  ;;  %v18654_v35 = vld [vmem:[%s21306_s23 + $0x48] ss:$16 sps:$4 sm:$0xff]  }
 0x3bc   : > { %3121 = vmatprep.subr.bf16.mxu1 %v18581_v37  ;;  %v18657_v10 = vld [vmem:[%s21306_s23 + $0x248] ss:$16 sps:$4 sm:$0xff]   ;;  %v18665_v37 = vld [vmem:[%s21306_s23 + $0x22c] ss:$16 sps:$4 sm:$0xff]  }
 0x3be   : > { %3079 = vmatpush2.bf16.msra.mxu0 %v18576_v36  ;;  %v18662_v36 = vld [vmem:[%s21306_s23 + $0x2c] ss:$16 sps:$4 sm:$0xff]  }
 0x3bf   : > { %3122 = vmatpush2.bf16.msra.mxu1 %v18579_v38  ;;  %3080 = vmatprep.subr.bf16.mxu0 %v18584_v39  ;;  %v18660_v38 = vld [vmem:[%s21306_s23 + $0x28] ss:$16 sps:$4 sm:$0xff]  }
 0x3c0   : > { %3123 = vmatprep.subr.bf16.mxu1 %v18587_v41  ;;  %v18663_v39 = vld [vmem:[%s21306_s23 + $0x228] ss:$16 sps:$4 sm:$0xff]   ;;  %v18671_v41 = vld [vmem:[%s21306_s23 + $0x20c] ss:$16 sps:$4 sm:$0xff]  }
 0x3c2   : > { %3081 = vmatpush2.bf16.msra.mxu0 %v18582_v40  ;;  %v18668_v40 = vld [vmem:[%s21306_s23 + $0xc] ss:$16 sps:$4 sm:$0xff]  }
 0x3c3   : > { %3124 = vmatpush2.bf16.msra.mxu1 %v18585_v42  ;;  %3082 = vmatprep.subr.bf16.mxu0 %v18590_v43  ;;  %v18666_v42 = vld [vmem:[%s21306_s23 + $0x8] ss:$16 sps:$4 sm:$0xff]  }
 0x3c4   : > { %3125 = vmatprep.subr.bf16.mxu1 %v18593_v18  ;;  %v18669_v43 = vld [vmem:[%s21306_s23 + $0x208] ss:$16 sps:$4 sm:$0xff]   ;;  %v18677_v18 = vld [vmem:[%s21306_s23 + $0x3ec] ss:$16 sps:$4 sm:$0xff]  }
 0x3c6   : > { %3083 = vmatpush2.bf16.msra.mxu0 %v18588_v44  ;;  %v18674_v44 = vld [vmem:[%s21306_s23 + $0x1ec] ss:$16 sps:$4 sm:$0xff]  }
 0x3c7   : > { %3126 = vmatpush2.bf16.msra.mxu1 %v18591_v45  ;;  %3084 = vmatprep.subr.bf16.mxu0 %v18596_v24  ;;  %v18672_v45 = vld [vmem:[%s21306_s23 + $0x1e8] ss:$16 sps:$4 sm:$0xff]  }
 0x3c8   : > { %3127 = vmatprep.subr.bf16.mxu1 %v18599_v47  ;;  %v18675_v24 = vld [vmem:[%s21306_s23 + $0x3e8] ss:$16 sps:$4 sm:$0xff]   ;;  %v18683_v47 = vld [vmem:[%s21306_s23 + $0x3cc] ss:$16 sps:$4 sm:$0xff]  }
 0x3ca   : > { %3085 = vmatpush2.bf16.msra.mxu0 %v18594_v46  ;;  %v18680_v46 = vld [vmem:[%s21306_s23 + $0x1cc] ss:$16 sps:$4 sm:$0xff]  }
 0x3cb   : > { %3128 = vmatpush2.bf16.msra.mxu1 %v18597_v17  ;;  %3086 = vmatprep.subr.bf16.mxu0 %v18602_v20  ;;  %v18678_v17 = vld [vmem:[%s21306_s23 + $0x1c8] ss:$16 sps:$4 sm:$0xff]  }
 0x3cc   : > { %3129 = vmatprep.subr.bf16.mxu1 %v18605_v51  ;;  %v18681_v20 = vld [vmem:[%s21306_s23 + $0x3c8] ss:$16 sps:$4 sm:$0xff]   ;;  %v18689_v51 = vld [vmem:[%s21306_s23 + $0x3ac] ss:$16 sps:$4 sm:$0xff]  }
 0x3ce   : > { %3087 = vmatpush2.bf16.msra.mxu0 %v18600_v48  ;;  %v18686_v48 = vld [vmem:[%s21306_s23 + $0x1ac] ss:$16 sps:$4 sm:$0xff]  }
 0x3cf   : > { %3130 = vmatpush2.bf16.msra.mxu1 %v18603_v54  ;;  %3088 = vmatprep.subr.bf16.mxu0 %v18608_v55  ;;  %v18684_v54 = vld [vmem:[%s21306_s23 + $0x1a8] ss:$16 sps:$4 sm:$0xff]  }
 0x3d0   : > { %3131 = vmatprep.subr.bf16.mxu1 %v18611_v57  ;;  %v18687_v55 = vld [vmem:[%s21306_s23 + $0x3a8] ss:$16 sps:$4 sm:$0xff]   ;;  %v18695_v57 = vld [vmem:[%s21306_s23 + $0x38c] ss:$16 sps:$4 sm:$0xff]  }
 0x3d2   : > { %3089 = vmatpush2.bf16.msra.mxu0 %v18606_v56  ;;  %v18692_v56 = vld [vmem:[%s21306_s23 + $0x18c] ss:$16 sps:$4 sm:$0xff]  }
 0x3d3   : > { %3132 = vmatpush2.bf16.msra.mxu1 %v18609_v58  ;;  %3090 = vmatprep.subr.bf16.mxu0 %v18614_v59  ;;  %v18690_v58 = vld [vmem:[%s21306_s23 + $0x188] ss:$16 sps:$4 sm:$0xff]  }
 0x3d4   : > { %3133 = vmatprep.subr.bf16.mxu1 %v18617_v61  ;;  %v18693_v59 = vld [vmem:[%s21306_s23 + $0x388] ss:$16 sps:$4 sm:$0xff]   ;;  %v18701_v61 = vld [vmem:[%s21306_s23 + $0x36c] ss:$16 sps:$4 sm:$0xff]  }
 0x3d6   : > { %3091 = vmatpush2.bf16.msra.mxu0 %v18612_v60  ;;  %v18698_v60 = vld [vmem:[%s21306_s23 + $0x16c] ss:$16 sps:$4 sm:$0xff]  }
 0x3d7   : > { %3134 = vmatpush2.bf16.msra.mxu1 %v18615_v62  ;;  %3092 = vmatprep.subr.bf16.mxu0 %v18620_v63  ;;  %v18696_v62 = vld [vmem:[%s21306_s23 + $0x168] ss:$16 sps:$4 sm:$0xff]  }
 0x3d8   : > { %3135 = vmatprep.subr.bf16.mxu1 %v18623_v1  ;;  %v18699_v63 = vld [vmem:[%s21306_s23 + $0x368] ss:$16 sps:$4 sm:$0xff]   ;;  %v18707_v1 = vld [vmem:[%s21306_s23 + $0x34c] ss:$16 sps:$4 sm:$0xff]  }
 0x3da   : > { %3093 = vmatpush2.bf16.msra.mxu0 %v18618_v0  ;;  %v18704_v0 = vld [vmem:[%s21306_s23 + $0x14c] ss:$16 sps:$4 sm:$0xff]  }
 0x3db   : > { %3136 = vmatpush2.bf16.msra.mxu1 %v18621_v2  ;;  %3148 = vmatprep.subr.bf16.mxu0 %v18626_v3  ;;  %v18702_v2 = vld [vmem:[%s21306_s23 + $0x148] ss:$16 sps:$4 sm:$0xff]  }
 0x3dc   : > { %3191 = vmatprep.subr.bf16.mxu1 %v18629_v4  ;;  %v18705_v3 = vld [vmem:[%s21306_s23 + $0x348] ss:$16 sps:$4 sm:$0xff]   ;;  %v18710_v4 = vld [vmem:[%s21306_s23 + $0x12c] ss:$16 sps:$4 sm:$0xff]  }
 0x3dd   : > { %3095 = vmatmul.mubr.bf16.vlgmr.msra.gmra.mxu0 %v21538_v52 }
 0x3de   : > { %3138 = vmatmul.mubr.bf16.vlgmr.msra.gmra.mxu1 %v21540_v53  ;;  %3149 = vmatpush1.bf16.msra.mxu0 %v18624_v5  ;;  %v18713_v5 = vld [vmem:[%s21306_s23 + $0x32c] ss:$16 sps:$4 sm:$0xff]  }
 0x3df   : > { %3180 = vmatprep.mubr.bf16.mxu0 %v21533_v49  ;;  %3192 = vmatpush1.bf16.msra.mxu1 %v18627_v7  ;;  %v18708_v7 = vld [vmem:[%s21306_s23 + $0x128] ss:$16 sps:$4 sm:$0xff]  }
 0x3e0   : > { %3223 = vmatprep.mubr.bf16.mxu1 %v21535_v50  ;;  %3150 = vmatprep.subr.bf16.mxu0 %v18632_v16  ;;  %v18711_v16 = vld [vmem:[%s21306_s23 + $0x328] ss:$16 sps:$4 sm:$0xff]  }
 0x3e1   : > { %3193 = vmatprep.subr.bf16.mxu1 %v18635_v19  ;;  %v18716_v19 = vld [vmem:[%s21306_s23 + $0x10c] ss:$16 sps:$4 sm:$0xff]  }
 0x3e2   : > { %3151 = vmatpush1.bf16.msra.mxu0 %v18630_v21  ;;  %v18719_v21 = vld [vmem:[%s21306_s23 + $0x30c] ss:$16 sps:$4 sm:$0xff]  }
 0x3e3   : > { %3194 = vmatpush1.bf16.msra.mxu1 %v18633_v22  ;;  %3152 = vmatprep.subr.bf16.mxu0 %v18638_v23  ;;  %v18714_v22 = vld [vmem:[%s21306_s23 + $0x108] ss:$16 sps:$4 sm:$0xff]  }
 0x3e4   : > { %3195 = vmatprep.subr.bf16.mxu1 %v18641_v25  ;;  %v18717_v23 = vld [vmem:[%s21306_s23 + $0x308] ss:$16 sps:$4 sm:$0xff]   ;;  %v18722_v25 = vld [vmem:[%s21309_s30 + $0xe4] ss:$16 sps:$4 sm:$0xff]   ;;  %s20646_s23 = smov 64  }
 0x3e6   : > { %3153 = vmatpush1.bf16.msra.mxu0 %v18636_v26  ;;  %v18725_v26 = vld [vmem:[%s21309_s30 + $0x2e4] ss:$16 sps:$4 sm:$0xff]  }
 0x3e7   : > { %3196 = vmatpush1.bf16.msra.mxu1 %v18639_v28  ;;  %3154 = vmatprep.subr.bf16.mxu0 %v18644_v27  ;;  %v18720_v28 = vld [vmem:[%s21309_s30 + $0xe0] ss:$16 sps:$4 sm:$0xff]  }
 0x3e8   : > { %3197 = vmatprep.subr.bf16.mxu1 %v18647_v29  ;;  %v18723_v27 = vld [vmem:[%s21309_s30 + $0x2e0] ss:$16 sps:$4 sm:$0xff]  }
 0x3e9   : > { %v21749_v29 = vld [vmem:[%s24074_s28] sm:$0xf] }
 0x3ea   : > { %3155 = vmatpush1.bf16.msra.mxu0 %v18642_v30  ;;  %v21753_v30 = vrot.slane %v21749_v29, %v21502_v11 }
 0x3eb   : > { %3198 = vmatpush1.bf16.msra.mxu1 %v18645_v31  ;;  %3156 = vmatprep.subr.bf16.mxu0 %v18650_v32  ;;  %v18728_v31 = vld [vmem:[%s21309_s30 + $0xc4] ss:$16 sps:$4 sm:$0xff]  }
 0x3ec   : > { %3199 = vmatprep.subr.bf16.mxu1 %v18653_v9 }
 0x3ee   : > { %3157 = vmatpush1.bf16.msra.mxu0 %v18648_v33  ;;  %v18731_v33 = vld [vmem:[%s21309_s30 + $0x2c4] ss:$16 sps:$4 sm:$0xff]  }
 0x3ef   : > { %3200 = vmatpush1.bf16.msra.mxu1 %v18651_v12  ;;  %3158 = vmatprep.subr.bf16.mxu0 %v18656_v34  ;;  %v18726_v12 = vld [vmem:[%s21309_s30 + $0xc0] ss:$16 sps:$4 sm:$0xff]  }
 0x3f0   : > { %3201 = vmatprep.subr.bf16.mxu1 %v18659_v8  ;;  %v18729_v8 = vld [vmem:[%s21309_s30 + $0x2c0] ss:$16 sps:$4 sm:$0xff]  }
 0x3f2   : > { %3159 = vmatpush1.bf16.msra.mxu0 %v18654_v35  ;;  %v18734_v35 = vld [vmem:[%s21309_s30 + $0xa4] ss:$16 sps:$4 sm:$0xff]  }
 0x3f3   : > { %3202 = vmatpush1.bf16.msra.mxu1 %v18657_v10  ;;  %3160 = vmatprep.subr.bf16.mxu0 %v18662_v36  ;;  %v18737_v36 = vld [vmem:[%s21309_s30 + $0x2a4] ss:$16 sps:$4 sm:$0xff]  }
 0x3f4   : > { %3203 = vmatprep.subr.bf16.mxu1 %v18665_v37 }
 0x3f6   : > { %3161 = vmatpush1.bf16.msra.mxu0 %v18660_v38 }
 0x3f7   : > { %3204 = vmatpush1.bf16.msra.mxu1 %v18663_v39  ;;  %3162 = vmatprep.subr.bf16.mxu0 %v18668_v40  ;;  %v18732_v39 = vld [vmem:[%s21309_s30 + $0xa0] ss:$16 sps:$4 sm:$0xff]  }
 0x3f8   : > { %3205 = vmatprep.subr.bf16.mxu1 %v18671_v41  ;;  %v18735_v40 = vld [vmem:[%s21309_s30 + $0x2a0] ss:$16 sps:$4 sm:$0xff]   ;;  %v18740_v41 = vld [vmem:[%s21309_s30 + $0x84] ss:$16 sps:$4 sm:$0xff]  }
 0x3fa   : > { %3163 = vmatpush1.bf16.msra.mxu0 %v18666_v42  ;;  %v18743_v42 = vld [vmem:[%s21309_s30 + $0x284] ss:$16 sps:$4 sm:$0xff]  }
 0x3fb   : > { %3206 = vmatpush1.bf16.msra.mxu1 %v18669_v43  ;;  %3164 = vmatprep.subr.bf16.mxu0 %v18674_v44  ;;  %v18738_v43 = vld [vmem:[%s21309_s30 + $0x80] ss:$16 sps:$4 sm:$0xff]  }
 0x3fc   : > { %3207 = vmatprep.subr.bf16.mxu1 %v18677_v18  ;;  %v18741_v44 = vld [vmem:[%s21309_s30 + $0x280] ss:$16 sps:$4 sm:$0xff]   ;;  %v18746_v18 = vld [vmem:[%s21309_s30 + $0x64] ss:$16 sps:$4 sm:$0xff]  }
 0x3fe   : > { %3165 = vmatpush2.bf16.msra.mxu0 %v18672_v45  ;;  %v18749_v45 = vld [vmem:[%s21309_s30 + $0x264] ss:$16 sps:$4 sm:$0xff]  }
 0x3ff   : > { %3208 = vmatpush2.bf16.msra.mxu1 %v18675_v24  ;;  %3166 = vmatprep.subr.bf16.mxu0 %v18680_v46  ;;  %v18744_v24 = vld [vmem:[%s21309_s30 + $0x60] ss:$16 sps:$4 sm:$0xff]  }
 0x400   : > { %3209 = vmatprep.subr.bf16.mxu1 %v18683_v47  ;;  %v18747_v46 = vld [vmem:[%s21309_s30 + $0x260] ss:$16 sps:$4 sm:$0xff]   ;;  %v18752_v47 = vld [vmem:[%s21309_s30 + $0x44] ss:$16 sps:$4 sm:$0xff]  }
 0x402   : > { %3167 = vmatpush2.bf16.msra.mxu0 %v18678_v17  ;;  %v18755_v17 = vld [vmem:[%s21309_s30 + $0x244] ss:$16 sps:$4 sm:$0xff]  }
 0x403   : > { %3210 = vmatpush2.bf16.msra.mxu1 %v18681_v20  ;;  %3168 = vmatprep.subr.bf16.mxu0 %v18686_v48  ;;  %v18750_v20 = vld [vmem:[%s21309_s30 + $0x40] ss:$16 sps:$4 sm:$0xff]  }
 0x404   : > { %3211 = vmatprep.subr.bf16.mxu1 %v18689_v51  ;;  %v18753_v48 = vld [vmem:[%s21309_s30 + $0x240] ss:$16 sps:$4 sm:$0xff]   ;;  %v18758_v51 = vld [vmem:[%s21309_s30 + $0x24] ss:$16 sps:$4 sm:$0xff]  }
 0x406   : > { %3169 = vmatpush2.bf16.msra.mxu0 %v18684_v54  ;;  %v18761_v54 = vld [vmem:[%s21309_s30 + $0x224] ss:$16 sps:$4 sm:$0xff]  }
 0x407   : > { %3212 = vmatpush2.bf16.msra.mxu1 %v18687_v55  ;;  %3170 = vmatprep.subr.bf16.mxu0 %v18692_v56  ;;  %v18756_v55 = vld [vmem:[%s21309_s30 + $0x20] ss:$16 sps:$4 sm:$0xff]  }
 0x408   : > { %3213 = vmatprep.subr.bf16.mxu1 %v18695_v57  ;;  %v18759_v56 = vld [vmem:[%s21309_s30 + $0x220] ss:$16 sps:$4 sm:$0xff]   ;;  %v18764_v57 = vld [vmem:[%s21309_s30 + $0x4] ss:$16 sps:$4 sm:$0xff]  }
 0x40a   : > { %3171 = vmatpush2.bf16.msra.mxu0 %v18690_v58  ;;  %v18767_v58 = vld [vmem:[%s21309_s30 + $0x204] ss:$16 sps:$4 sm:$0xff]  }
 0x40b   : > { %3214 = vmatpush2.bf16.msra.mxu1 %v18693_v59  ;;  %3172 = vmatprep.subr.bf16.mxu0 %v18698_v60  ;;  %v18762_v59 = vld [vmem:[%s21309_s30] ss:$16 sps:$4 sm:$0xff]  }
 0x40c   : > { %3215 = vmatprep.subr.bf16.mxu1 %v18701_v61  ;;  %v18765_v60 = vld [vmem:[%s21309_s30 + $0x200] ss:$16 sps:$4 sm:$0xff]   ;;  %v18770_v61 = vld [vmem:[%s21309_s30 + $0x1e4] ss:$16 sps:$4 sm:$0xff]  }
 0x40e   : > { %3173 = vmatpush2.bf16.msra.mxu0 %v18696_v62  ;;  %v18773_v62 = vld [vmem:[%s21309_s30 + $0x3e4] ss:$16 sps:$4 sm:$0xff]  }
 0x40f   : > { %3216 = vmatpush2.bf16.msra.mxu1 %v18699_v63  ;;  %3174 = vmatprep.subr.bf16.mxu0 %v18704_v0  ;;  %v18768_v63 = vld [vmem:[%s21309_s30 + $0x1e0] ss:$16 sps:$4 sm:$0xff]  }
 0x410   : > { %3217 = vmatprep.subr.bf16.mxu1 %v18707_v1  ;;  %v18771_v0 = vld [vmem:[%s21309_s30 + $0x3e0] ss:$16 sps:$4 sm:$0xff]   ;;  %v18776_v1 = vld [vmem:[%s21309_s30 + $0x1c4] ss:$16 sps:$4 sm:$0xff]  }
 0x412   : > { %3175 = vmatpush2.bf16.msra.mxu0 %v18702_v2  ;;  %v18779_v2 = vld [vmem:[%s21309_s30 + $0x3c4] ss:$16 sps:$4 sm:$0xff]  }
 0x413   : > { %3218 = vmatpush2.bf16.msra.mxu1 %v18705_v3  ;;  %3176 = vmatprep.subr.bf16.mxu0 %v18710_v4  ;;  %v18774_v3 = vld [vmem:[%s21309_s30 + $0x1c0] ss:$16 sps:$4 sm:$0xff]  }
 0x414   : > { %3219 = vmatprep.subr.bf16.mxu1 %v18713_v5  ;;  %v18777_v4 = vld [vmem:[%s21309_s30 + $0x3c0] ss:$16 sps:$4 sm:$0xff]   ;;  %v18782_v5 = vld [vmem:[%s21309_s30 + $0x1a4] ss:$16 sps:$4 sm:$0xff]  }
 0x416   : > { %3177 = vmatpush2.bf16.msra.mxu0 %v18708_v7  ;;  %v18785_v7 = vld [vmem:[%s21309_s30 + $0x3a4] ss:$16 sps:$4 sm:$0xff]  }
 0x417   : > { %3220 = vmatpush2.bf16.msra.mxu1 %v18711_v16  ;;  %3178 = vmatprep.subr.bf16.mxu0 %v18716_v19  ;;  %v18780_v16 = vld [vmem:[%s21309_s30 + $0x1a0] ss:$16 sps:$4 sm:$0xff]  }
 0x418   : > { %3221 = vmatprep.subr.bf16.mxu1 %v18719_v21  ;;  %v18783_v19 = vld [vmem:[%s21309_s30 + $0x3a0] ss:$16 sps:$4 sm:$0xff]   ;;  %v18788_v21 = vld [vmem:[%s21309_s30 + $0x184] ss:$16 sps:$4 sm:$0xff]  }
 0x41a   : > { %3179 = vmatpush2.bf16.msra.mxu0 %v18714_v22  ;;  %v18791_v22 = vld [vmem:[%s21309_s30 + $0x384] ss:$16 sps:$4 sm:$0xff]  }
 0x41b   : > { %3222 = vmatpush2.bf16.msra.mxu1 %v18717_v23  ;;  %4024 = vmatprep.subr.bf16.mxu0 %v18722_v25  ;;  %v18786_v23 = vld [vmem:[%s21309_s30 + $0x180] ss:$16 sps:$4 sm:$0xff]  }
 0x41c   : > { %4067 = vmatprep.subr.bf16.mxu1 %v18725_v26  ;;  %v18789_v25 = vld [vmem:[%s21309_s30 + $0x380] ss:$16 sps:$4 sm:$0xff]   ;;  %v18794_v26 = vld [vmem:[%s21309_s30 + $0x164] ss:$16 sps:$4 sm:$0xff]  }
 0x41d   : > { %3181 = vmatmul.mubr.bf16.vlgmr.msra.gmra.mxu0 %v21538_v52  ;;  %v21757_v32 = vpop.f32.mrf.mxu0  ;;  %v21759_v9 = vpop.f32.mrf.mxu1 }
 0x41e   : > { %3224 = vmatmul.mubr.bf16.vlgmr.msra.gmra.mxu1 %v21540_v53  ;;  %4025 = vmatpush1.bf16.msra.mxu0 %v18720_v28  ;;  %v18797_v28 = vld [vmem:[%s21309_s30 + $0x364] ss:$16 sps:$4 sm:$0xff]  }
 0x41f   : > { %4056 = vmatprep.mubr.bf16.mxu0 %v21533_v49  ;;  %4068 = vmatpush1.bf16.msra.mxu1 %v18723_v27  ;;  %v2136_v34 = vpop.f32.mrf.mxu0  ;;  %v2179_v37 = vpop.f32.mrf.mxu1  ;;  %v18792_v27 = vld [vmem:[%s21309_s30 + $0x160] ss:$16 sps:$4 sm:$0xff]  }
 0x420   : > { %4099 = vmatprep.mubr.bf16.mxu1 %v21535_v50  ;;  %v2137_v10 = vadd.f32 %v2136_v34, %v21753_v30  ;;  %4026 = vmatprep.subr.bf16.mxu0 %v18728_v31  ;;  %v18795_v31 = vld [vmem:[%s21309_s30 + $0x360] ss:$16 sps:$4 sm:$0xff]  }
 0x421   : > { %4069 = vmatprep.subr.bf16.mxu1 %v18731_v33  ;;  %v18800_v33 = vld [vmem:[%s21309_s30 + $0x144] ss:$16 sps:$4 sm:$0xff]   ;;  %v18798_v34 = vld [vmem:[%s21309_s30 + $0x140] ss:$16 sps:$4 sm:$0xff]  }
 0x422   : > { %v21770_v38 = vadd.f32 %v2179_v37, %v2137_v10  ;;  %4027 = vmatpush1.bf16.msra.mxu0 %v18726_v12  ;;  %v18803_v12 = vld [vmem:[%s21309_s30 + $0x344] ss:$16 sps:$4 sm:$0xff]   ;;  %v18807_v37 = vld [vmem:[%s21309_s30 + $0x320] ss:$16 sps:$4 sm:$0xff]  }
 0x423   : > { %4070 = vmatpush1.bf16.msra.mxu1 %v18729_v8  ;;  %4028 = vmatprep.subr.bf16.mxu0 %v18734_v35  ;;  %v18801_v8 = vld [vmem:[%s21309_s30 + $0x340] ss:$16 sps:$4 sm:$0xff]   ;;  %v18806_v35 = vld [vmem:[%s21309_s30 + $0x124] ss:$16 sps:$4 sm:$0xff]  }
 0x424   : > { %4071 = vmatprep.subr.bf16.mxu1 %v18737_v36  ;;  %v18809_v10 = vld [vmem:[%s21309_s30 + $0x324] ss:$16 sps:$4 sm:$0xff]   ;;  %v18804_v36 = vld [vmem:[%s21309_s30 + $0x120] ss:$16 sps:$4 sm:$0xff]  }
 0x426   : > { %4029 = vmatpush1.bf16.msra.mxu0 %v18732_v39  ;;  %v18812_v39 = vld [vmem:[%s21309_s30 + $0x104] ss:$16 sps:$4 sm:$0xff]  }
 0x427   : > { %4072 = vmatpush1.bf16.msra.mxu1 %v18735_v40  ;;  %4030 = vmatprep.subr.bf16.mxu0 %v18740_v41  ;;  %v18815_v40 = vld [vmem:[%s21309_s30 + $0x304] ss:$16 sps:$4 sm:$0xff]   ;;  %v18810_v41 = vld [vmem:[%s21309_s30 + $0x100] ss:$16 sps:$4 sm:$0xff]  }
 0x428   : > { %4073 = vmatprep.subr.bf16.mxu1 %v18743_v42  ;;  %v21825_v42 = vpop.f32.mrf.mxu0 }
 0x42a   : > { %4031 = vmatpush1.bf16.msra.mxu0 %v18738_v43  ;;  %v21827_v43 = vpop.f32.mrf.mxu1 }
 0x42b   : > { %4074 = vmatpush1.bf16.msra.mxu1 %v18741_v44  ;;  %4032 = vmatprep.subr.bf16.mxu0 %v18746_v18  ;;  %v18813_v44 = vld [vmem:[%s21309_s30 + $0x300] ss:$16 sps:$4 sm:$0xff]   ;;  %v18818_v18 = vld [vmem:[%s21309_s30 + $0xec] ss:$16 sps:$4 sm:$0xff]  }
 0x42c   : > { %4075 = vmatprep.subr.bf16.mxu1 %v18749_v45  ;;  %v18821_v45 = vld [vmem:[%s21309_s30 + $0x2ec] ss:$16 sps:$4 sm:$0xff]  }
 0x42e   : > { %4033 = vmatpush1.bf16.msra.mxu0 %v18744_v24  ;;  %v1451_v24 = vrot.slane %v21749_v29, %v21511_v15 }
 0x42f   : > { %4076 = vmatpush1.bf16.msra.mxu1 %v18747_v46  ;;  %4034 = vmatprep.subr.bf16.mxu0 %v18752_v47  ;;  %v18816_v46 = vld [vmem:[%s21309_s30 + $0xe8] ss:$16 sps:$4 sm:$0xff]   ;;  %v21835_v47 = vpop.f32.mrf.mxu0 }
 0x430   : > { %4077 = vmatprep.subr.bf16.mxu1 %v18755_v17  ;;  %v21837_v17 = vpop.f32.mrf.mxu1 }
 0x432   : > { %4035 = vmatpush1.bf16.msra.mxu0 %v18750_v20  ;;  %v18819_v20 = vld [vmem:[%s21309_s30 + $0x2e8] ss:$16 sps:$4 sm:$0xff]  }
 0x433   : > { %4078 = vmatpush1.bf16.msra.mxu1 %v18753_v48  ;;  %4036 = vmatprep.subr.bf16.mxu0 %v18758_v51  ;;  %v21842_v48 = vrot.slane %v21749_v29, %v21505_v13  ;;  %v18824_v51 = vld [vmem:[%s21309_s30 + $0xcc] ss:$16 sps:$4 sm:$0xff]  }
 0x434   : > { %4079 = vmatprep.subr.bf16.mxu1 %v18761_v54 }
 0x436   : > { %4037 = vmatpush1.bf16.msra.mxu0 %v18756_v55 }
 0x437   : > { %4080 = vmatpush1.bf16.msra.mxu1 %v18759_v56  ;;  %4038 = vmatprep.subr.bf16.mxu0 %v18764_v57  ;;  %v18827_v56 = vld [vmem:[%s21309_s30 + $0x2cc] ss:$16 sps:$4 sm:$0xff]  }
 0x438   : > { %4081 = vmatprep.subr.bf16.mxu1 %v18767_v58  ;;  %v18822_v58 = vld [vmem:[%s21309_s30 + $0xc8] ss:$16 sps:$4 sm:$0xff]  }
 0x43a   : > { %4039 = vmatpush1.bf16.msra.mxu0 %v18762_v59 }
 0x43b   : > { %4082 = vmatpush1.bf16.msra.mxu1 %v18765_v60  ;;  %4040 = vmatprep.subr.bf16.mxu0 %v18770_v61  ;;  %v18825_v61 = vld [vmem:[%s21309_s30 + $0x2c8] ss:$16 sps:$4 sm:$0xff]  }
 0x43c   : > { %4083 = vmatprep.subr.bf16.mxu1 %v18773_v62  ;;  %v18830_v62 = vld [vmem:[%s21309_s30 + $0xac] ss:$16 sps:$4 sm:$0xff]  }
 0x43e   : > { %4041 = vmatpush2.bf16.msra.mxu0 %v18768_v63 }
 0x43f   : > { %4084 = vmatpush2.bf16.msra.mxu1 %v18771_v0  ;;  %4042 = vmatprep.subr.bf16.mxu0 %v18776_v1  ;;  %v18833_v1 = vld [vmem:[%s21309_s30 + $0x2ac] ss:$16 sps:$4 sm:$0xff]  }
 0x440   : > { %4085 = vmatprep.subr.bf16.mxu1 %v18779_v2 }
 0x442   : > { %4043 = vmatpush2.bf16.msra.mxu0 %v18774_v3 }
 0x443   : > { %4086 = vmatpush2.bf16.msra.mxu1 %v18777_v4  ;;  %4044 = vmatprep.subr.bf16.mxu0 %v18782_v5  ;;  %v18828_v4 = vld [vmem:[%s21309_s30 + $0xa8] ss:$16 sps:$4 sm:$0xff]  }
 0x444   : > { %4087 = vmatprep.subr.bf16.mxu1 %v18785_v7  ;;  %v18836_v7 = vld [vmem:[%s21309_s30 + $0x8c] ss:$16 sps:$4 sm:$0xff]  }
 0x446   : > { %4045 = vmatpush2.bf16.msra.mxu0 %v18780_v16 }
 0x447   : > { %4088 = vmatpush2.bf16.msra.mxu1 %v18783_v19  ;;  %4046 = vmatprep.subr.bf16.mxu0 %v18788_v21  ;;  %v18839_v19 = vld [vmem:[%s21309_s30 + $0x28c] ss:$16 sps:$4 sm:$0xff]   ;;  %v18834_v21 = vld [vmem:[%s21309_s30 + $0x88] ss:$16 sps:$4 sm:$0xff]  }
 0x448   : > { %4089 = vmatprep.subr.bf16.mxu1 %v18791_v22  ;;  %v18837_v22 = vld [vmem:[%s21309_s30 + $0x288] ss:$16 sps:$4 sm:$0xff]  }
 0x44a   : > { %4047 = vmatpush2.bf16.msra.mxu0 %v18786_v23  ;;  %v18842_v23 = vld [vmem:[%s21309_s30 + $0x6c] ss:$16 sps:$4 sm:$0xff]  }
 0x44b   : > { %4090 = vmatpush2.bf16.msra.mxu1 %v18789_v25  ;;  %4048 = vmatprep.subr.bf16.mxu0 %v18794_v26  ;;  %v18845_v25 = vld [vmem:[%s21309_s30 + $0x26c] ss:$16 sps:$4 sm:$0xff]   ;;  %v18840_v26 = vld [vmem:[%s21309_s30 + $0x68] ss:$16 sps:$4 sm:$0xff]  }
 0x44c   : > { %4091 = vmatprep.subr.bf16.mxu1 %v18797_v28  ;;  %v18843_v28 = vld [vmem:[%s21309_s30 + $0x268] ss:$16 sps:$4 sm:$0xff]  }
 0x44e   : > { %4049 = vmatpush2.bf16.msra.mxu0 %v18792_v27  ;;  %v18848_v27 = vld [vmem:[%s21309_s30 + $0x4c] ss:$16 sps:$4 sm:$0xff]  }
 0x44f   : > { %4092 = vmatpush2.bf16.msra.mxu1 %v18795_v31  ;;  %4050 = vmatprep.subr.bf16.mxu0 %v18800_v33  ;;  %v18851_v31 = vld [vmem:[%s21309_s30 + $0x24c] ss:$16 sps:$4 sm:$0xff]   ;;  %v18846_v33 = vld [vmem:[%s21309_s30 + $0x48] ss:$16 sps:$4 sm:$0xff]  }
 0x450   : > { %4093 = vmatprep.subr.bf16.mxu1 %v18803_v12  ;;  %v18849_v12 = vld [vmem:[%s21309_s30 + $0x248] ss:$16 sps:$4 sm:$0xff]  }
 0x452   : > { %4051 = vmatpush2.bf16.msra.mxu0 %v18798_v34  ;;  %v18854_v34 = vld [vmem:[%s21309_s30 + $0x2c] ss:$16 sps:$4 sm:$0xff]  }
 0x453   : > { %4094 = vmatpush2.bf16.msra.mxu1 %v18801_v8  ;;  %4052 = vmatprep.subr.bf16.mxu0 %v18806_v35  ;;  %v18857_v8 = vld [vmem:[%s21309_s30 + $0x22c] ss:$16 sps:$4 sm:$0xff]   ;;  %v18852_v35 = vld [vmem:[%s21309_s30 + $0x28] ss:$16 sps:$4 sm:$0xff]  }
 0x454   : > { %4095 = vmatprep.subr.bf16.mxu1 %v18809_v10  ;;  %v18855_v10 = vld [vmem:[%s21309_s30 + $0x228] ss:$16 sps:$4 sm:$0xff]  }
 0x456   : > { %4053 = vmatpush2.bf16.msra.mxu0 %v18804_v36  ;;  %v18860_v36 = vld [vmem:[%s21309_s30 + $0xc] ss:$16 sps:$4 sm:$0xff]  }
 0x457   : > { %4096 = vmatpush2.bf16.msra.mxu1 %v18807_v37  ;;  %4054 = vmatprep.subr.bf16.mxu0 %v18812_v39  ;;  %v18863_v37 = vld [vmem:[%s21309_s30 + $0x20c] ss:$16 sps:$4 sm:$0xff]   ;;  %v18858_v39 = vld [vmem:[%s21309_s30 + $0x8] ss:$16 sps:$4 sm:$0xff]  }
 0x458   : > { %4097 = vmatprep.subr.bf16.mxu1 %v18815_v40  ;;  %v18861_v40 = vld [vmem:[%s21309_s30 + $0x208] ss:$16 sps:$4 sm:$0xff]  }
 0x45a   : > { %4055 = vmatpush2.bf16.msra.mxu0 %v18810_v41  ;;  %v18866_v41 = vld [vmem:[%s21309_s30 + $0x1ec] ss:$16 sps:$4 sm:$0xff]  }
 0x45b   : > { %4098 = vmatpush2.bf16.msra.mxu1 %v18813_v44  ;;  %4110 = vmatprep.subr.bf16.mxu0 %v18818_v18  ;;  %v18869_v44 = vld [vmem:[%s21309_s30 + $0x3ec] ss:$16 sps:$4 sm:$0xff]   ;;  %v18864_v18 = vld [vmem:[%s21309_s30 + $0x1e8] ss:$16 sps:$4 sm:$0xff]  }
 0x45c   : > { %4153 = vmatprep.subr.bf16.mxu1 %v18821_v45  ;;  %v18867_v45 = vld [vmem:[%s21309_s30 + $0x3e8] ss:$16 sps:$4 sm:$0xff]  }
 0x45d   : > { %v2220_v54 = vpop.f32.mrf.mxu0  ;;  %v2263_v55 = vpop.f32.mrf.mxu1  ;;  %4057 = vmatmul.mubr.bf16.vlgmr.msra.gmra.mxu0 %v21538_v52 }
 0x45e   : > { %v2221_v57 = vadd.f32 %v2220_v54, %v1451_v24  ;;  %4100 = vmatmul.mubr.bf16.vlgmr.msra.gmra.mxu1 %v21540_v53  ;;  %4111 = vmatpush1.bf16.msra.mxu0 %v18816_v46  ;;  %v18875_v46 = vld [vmem:[%s21309_s30 + $0x3cc] ss:$16 sps:$4 sm:$0xff]  }
 0x45f   : > { %4142 = vmatprep.mubr.bf16.mxu0 %v21533_v49  ;;  %4154 = vmatpush1.bf16.msra.mxu1 %v18819_v20  ;;  %v2222_v59 = vpop.f32.mrf.mxu0  ;;  %v2265_v60 = vpop.f32.mrf.mxu1  ;;  %v18870_v20 = vld [vmem:[%s21309_s30 + $0x1c8] ss:$16 sps:$4 sm:$0xff]   ;;  %v18878_v54 = vld [vmem:[%s21309_s30 + $0x1ac] ss:$16 sps:$4 sm:$0xff]  }
 0x460   : > { %v21852_v63 = vadd.f32 %v2263_v55, %v2221_v57  ;;  %4185 = vmatprep.mubr.bf16.mxu1 %v21535_v50  ;;  %v2223_v0 = vadd.f32 %v2222_v59, %v21842_v48  ;;  %4112 = vmatprep.subr.bf16.mxu0 %v18824_v51  ;;  %v18831_v50 = vld [vmem:[%s21309_s30 + $0x2a8] ss:$16 sps:$4 sm:$0xff]   ;;  %v18881_v55 = vld [vmem:[%s21309_s30 + $0x3ac] ss:$16 sps:$4 sm:$0xff]  }
 0x461   : > { %v2224_v2 = vpop.f32.mrf.mxu0  ;;  %4155 = vmatprep.subr.bf16.mxu1 %v18827_v56  ;;  %v2267_v5 = vpop.f32.mrf.mxu1  ;;  %v18873_v51 = vld [vmem:[%s21309_s30 + $0x3c8] ss:$16 sps:$4 sm:$0xff]   ;;  %v18887_v59 = vld [vmem:[%s21309_s30 + $0x38c] ss:$16 sps:$4 sm:$0xff]  }
 0x462   : > { %v21857_v49 = vadd.f32 %v2265_v60, %v2223_v0  ;;  %v2225_v3 = vadd.f32 %v2224_v2, %v1451_v24  ;;  %4113 = vmatpush1.bf16.msra.mxu0 %v18822_v58  ;;  %v18872_v24 = vld [vmem:[%s21309_s30 + $0x1cc] ss:$16 sps:$4 sm:$0xff]   ;;  %v18876_v56 = vld [vmem:[%s21309_s30 + $0x1a8] ss:$16 sps:$4 sm:$0xff]  }
 0x463   : > { %4156 = vmatpush1.bf16.msra.mxu1 %v18825_v61  ;;  %4114 = vmatprep.subr.bf16.mxu0 %v18830_v62  ;;  %v18879_v57 = vld [vmem:[%s21309_s30 + $0x3a8] ss:$16 sps:$4 sm:$0xff]   ;;  %v18884_v58 = vld [vmem:[%s21309_s30 + $0x18c] ss:$16 sps:$4 sm:$0xff]  }
 0x464   : > { %v21862_v16 = vadd.f32 %v2267_v5, %v2225_v3  ;;  %4157 = vmatprep.subr.bf16.mxu1 %v18833_v1  ;;  %v18882_v60 = vld [vmem:[%s21309_s30 + $0x188] ss:$16 sps:$4 sm:$0xff]   ;;  %v18890_v62 = vld [vmem:[%s21309_s30 + $0x16c] ss:$16 sps:$4 sm:$0xff]  }
 0x465   : > { %v18885_v61 = vld [vmem:[%s21309_s30 + $0x388] ss:$16 sps:$4 sm:$0xff]   ;;  %v18893_v0 = vld [vmem:[%s21309_s30 + $0x36c] ss:$16 sps:$4 sm:$0xff]  }
 0x466   : > { %4115 = vmatpush1.bf16.msra.mxu0 %v18828_v4  ;;  %v18888_v1 = vld [vmem:[%s21309_s30 + $0x168] ss:$16 sps:$4 sm:$0xff]   ;;  %v18896_v3 = vld [vmem:[%s21309_s30 + $0x14c] ss:$16 sps:$4 sm:$0xff]  }
 0x467   : > { %4158 = vmatpush1.bf16.msra.mxu1 %v18831_v50  ;;  %4116 = vmatprep.subr.bf16.mxu0 %v18836_v7  ;;  %v18891_v2 = vld [vmem:[%s21309_s30 + $0x368] ss:$16 sps:$4 sm:$0xff]   ;;  %v18899_v4 = vld [vmem:[%s21309_s30 + $0x34c] ss:$16 sps:$4 sm:$0xff]  }
 0x468   : > { %4159 = vmatprep.subr.bf16.mxu1 %v18839_v19  ;;  %v18894_v5 = vld [vmem:[%s21309_s30 + $0x148] ss:$16 sps:$4 sm:$0xff]   ;;  %v18902_v7 = vld [vmem:[%s21309_s30 + $0x12c] ss:$16 sps:$4 sm:$0xff]  }
 0x469   : > { %v18897_v50 = vld [vmem:[%s21309_s30 + $0x348] ss:$16 sps:$4 sm:$0xff]   ;;  %v18905_v19 = vld [vmem:[%s21309_s30 + $0x32c] ss:$16 sps:$4 sm:$0xff]  }
 0x46a   : > { %4117 = vmatpush1.bf16.msra.mxu0 %v18834_v21  ;;  %v18900_v21 = vld [vmem:[%s21309_s30 + $0x128] ss:$16 sps:$4 sm:$0xff]  }
 0x46b   : > { %4160 = vmatpush1.bf16.msra.mxu1 %v18837_v22  ;;  %4118 = vmatprep.subr.bf16.mxu0 %v18842_v23  ;;  %v18903_v22 = vld [vmem:[%s21309_s30 + $0x328] ss:$16 sps:$4 sm:$0xff]   ;;  %v18908_v23 = vld [vmem:[%s21309_s30 + $0x10c] ss:$16 sps:$4 sm:$0xff]  }
 0x46c   : > { %4161 = vmatprep.subr.bf16.mxu1 %v18845_v25  ;;  %v18911_v25 = vld [vmem:[%s21309_s30 + $0x30c] ss:$16 sps:$4 sm:$0xff]  }
 0x46e   : > { %4119 = vmatpush1.bf16.msra.mxu0 %v18840_v26  ;;  %v18906_v26 = vld [vmem:[%s21309_s30 + $0x108] ss:$16 sps:$4 sm:$0xff]  }
 0x46f   : > { %4162 = vmatpush1.bf16.msra.mxu1 %v18843_v28  ;;  %4120 = vmatprep.subr.bf16.mxu0 %v18848_v27  ;;  %v18909_v28 = vld [vmem:[%s21309_s30 + $0x308] ss:$16 sps:$4 sm:$0xff]   ;;  %s24077_s30 = scalar_lea.vmem [#allocation21], %s21289_s19 }
 0x470   : > { %4163 = vmatprep.subr.bf16.mxu1 %v18851_v31  ;;  %v2400_v27 = vld [vmem:[%s24075_s11] sm:$0xf] }
 0x471   : > { %v2405_v31 = vrot.slane %v2400_v27, %v21508_v14 }
 0x472   : > { %4121 = vmatpush1.bf16.msra.mxu0 %v18846_v33  ;;  %v1443_v33 = vrot.slane %v21749_v29, %v21508_v14 }
 0x473   : > { %4164 = vmatpush1.bf16.msra.mxu1 %v18849_v12  ;;  %4122 = vmatprep.subr.bf16.mxu0 %v18854_v34  ;;  %v21920_v12 = vpop.f32.mrf.mxu0  ;;  %v20644_v34 = vmov 0.0  }
 0x474   : > { %4165 = vmatprep.subr.bf16.mxu1 %v18857_v8  ;;  %v21923_v8 = vpop.f32.mrf.mxu1  ;;  %v2135_v29 = vadd.f32 %v21757_v32, %v1443_v33  ;;  %v2139_v32 = vadd.f32 %v21825_v42, %v1443_v33 }
 0x476   : > { %4123 = vmatpush1.bf16.msra.mxu0 %v18852_v35  ;;  %v21926_v35 = vrot.slane %v2400_v27, %v21502_v11 }
 0x477   : > { %4166 = vmatpush1.bf16.msra.mxu1 %v18855_v10  ;;  %4124 = vmatprep.subr.bf16.mxu0 %v18860_v36 }
 0x478   : > { %4167 = vmatprep.subr.bf16.mxu1 %v18863_v37 }
 0x47a   : > { %4125 = vmatpush1.bf16.msra.mxu0 %v18858_v39 }
 0x47b   : > { %4168 = vmatpush1.bf16.msra.mxu1 %v18861_v40  ;;  %4126 = vmatprep.subr.bf16.mxu0 %v18866_v41 }
 0x47c   : > { %4169 = vmatprep.subr.bf16.mxu1 %v18869_v44 }
 0x47e   : > { %4127 = vmatpush2.bf16.msra.mxu0 %v18864_v18 }
 0x47f   : > { %4170 = vmatpush2.bf16.msra.mxu1 %v18867_v45  ;;  %4128 = vmatprep.subr.bf16.mxu0 %v18872_v24  ;;  %v21944_v45 = vadd.f32 %v21759_v9, %v2135_v29  ;;  %v2413_v9 = vrot.slane %v2400_v27, %v21511_v15 }
 0x480   : > { %4171 = vmatprep.subr.bf16.mxu1 %v18875_v46 }
 0x482   : > { %4129 = vmatpush2.bf16.msra.mxu0 %v18870_v20  ;;  %v21957_v20 = vadd.f32 %v21827_v43, %v2139_v32 }
 0x483   : > { %4172 = vmatpush2.bf16.msra.mxu1 %v18873_v51  ;;  %4130 = vmatprep.subr.bf16.mxu0 %v18878_v54  ;;  %v21970_v54 = vrot.slane %v2400_v27, %v21505_v13 }
 0x484   : > { %4173 = vmatprep.subr.bf16.mxu1 %v18881_v55 }
 0x486   : > { %4131 = vmatpush2.bf16.msra.mxu0 %v18876_v56 }
 0x487   : > { %4174 = vmatpush2.bf16.msra.mxu1 %v18879_v57  ;;  %4132 = vmatprep.subr.bf16.mxu0 %v18884_v58 }
 0x488   : > { %4175 = vmatprep.subr.bf16.mxu1 %v18887_v59 }
 0x48a   : > { %4133 = vmatpush2.bf16.msra.mxu0 %v18882_v60 }
 0x48b   : > { %4176 = vmatpush2.bf16.msra.mxu1 %v18885_v61  ;;  %4134 = vmatprep.subr.bf16.mxu0 %v18890_v62 }
 0x48c   : > { %4177 = vmatprep.subr.bf16.mxu1 %v18893_v0 }
 0x48e   : > { %4135 = vmatpush2.bf16.msra.mxu0 %v18888_v1 }
 0x48f   : > { %4178 = vmatpush2.bf16.msra.mxu1 %v18891_v2  ;;  %4136 = vmatprep.subr.bf16.mxu0 %v18896_v3  ;;  %v3362_v3 = vld [vmem:[%s24076_s26] sm:$0xf] }
 0x490   : > { %4179 = vmatprep.subr.bf16.mxu1 %v18899_v4  ;;  %v3367_v4 = vrot.slane %v3362_v3, %v21508_v14 }
 0x492   : > { %4137 = vmatpush2.bf16.msra.mxu0 %v18894_v5 }
 0x493   : > { %4180 = vmatpush2.bf16.msra.mxu1 %v18897_v50  ;;  %4138 = vmatprep.subr.bf16.mxu0 %v18902_v7  ;;  %v3371_v7 = vrot.slane %v3362_v3, %v21502_v11 }
 0x494   : > { %4181 = vmatprep.subr.bf16.mxu1 %v18905_v19 }
 0x496   : > { %4139 = vmatpush2.bf16.msra.mxu0 %v18900_v21 }
 0x497   : > { %4182 = vmatpush2.bf16.msra.mxu1 %v18903_v22  ;;  %4140 = vmatprep.subr.bf16.mxu0 %v18908_v23 }
 0x498   : > { %4183 = vmatprep.subr.bf16.mxu1 %v18911_v25 }
 0x49a   : > { %4141 = vmatpush2.bf16.msra.mxu0 %v18906_v26 }
 0x49b   : > { %4184 = vmatpush2.bf16.msra.mxu1 %v18909_v28  ;;  %18083 = vmatprep.subr.mxu0 %v20644_v34 }
 0x49c   : > { %18088 = vmatprep.subr.mxu1 %v20644_v34 }
 0x49d   : > { %v3096_v10 = vpop.f32.mrf.mxu0  ;;  %4143 = vmatmul.mubr.bf16.vlgmr.msra.gmra.mxu0 %v21538_v52 }
 0x49e   : > { %v3097_v36 = vadd.f32 %v3096_v10, %v2405_v31  ;;  %v3139_v37 = vpop.f32.mrf.mxu1  ;;  %4186 = vmatmul.mubr.bf16.vlgmr.msra.gmra.mxu1 %v21540_v53  ;;  %18085 = vmatprep.mubr.msk.f32.mxu0 %vm20645_vm0, %v20644_v34 }
 0x49f   : > { %v3098_v39 = vpop.f32.mrf.mxu0  ;;  %18090 = vmatprep.mubr.msk.f32.mxu1 %vm20645_vm0, %v20644_v34 }
 0x4a0   : > { %v21936_v40 = vadd.f32 %v3139_v37, %v3097_v36  ;;  %v3099_v41 = vadd.f32 %v3098_v39, %v21926_v35  ;;  %v3141_v52 = vpop.f32.mrf.mxu1 }
 0x4a1   : > { %v3100_v44 = vpop.f32.mrf.mxu0 }
 0x4a2   : > { %v21939_v18 = vadd.f32 %v3141_v52, %v3099_v41  ;;  %v3101_v53 = vadd.f32 %v3100_v44, %v2405_v31  ;;  %18084 = vmatpush3.xpose.msk.msra.mxu0 %vm4196_vm1, %v21936_v40  ;;  %v3143_v24 = vpop.f32.mrf.mxu1  ;;  %v3375_v52 = vrot.slane %v3362_v3, %v21511_v15  ;;  %v3379_v44 = vrot.slane %v3362_v3, %v21505_v13 }
 0x4a3   : > { %18093 = vmatprep.subr.mxu0 %v20644_v34  ;;  %v21965_v42 = vpop.f32.mrf.mxu0 }
 0x4a4   : > { %v21948_v46 = vadd.f32 %v3143_v24, %v3101_v53  ;;  %v21967_v51 = vpop.f32.mrf.mxu1 }
 0x4a5   : > { %18086 = vmatmul.mubr.msk.f32.vlgmr.msra.gmra.mxu0 %vm4196_vm1, %v21944_v45 }
 0x4a6   : > { %18089 = vmatpush3.xpose.msk.msra.mxu1 %vm4196_vm1, %v21948_v46  ;;  %18095 = vmatprep.mubr.msk.f32.mxu0 %vm20645_vm0, %v20644_v34 }
 0x4a7   : > { %18098 = vmatprep.subr.mxu1 %v20644_v34 }
 0x4a9   : > { %18091 = vmatmul.mubr.msk.f32.vlgmr.msra.gmra.mxu1 %vm4196_vm1, %v21957_v20 }
 0x4aa   : > { %18100 = vmatprep.mubr.msk.f32.mxu1 %vm20645_vm0, %v20644_v34 }
 0x4dd   : > { %v3182_v43 = vpop.f32.mrf.mxu0 }
 0x4de   : > { %v3183_v55 = vadd.f32 %v3182_v43, %v2413_v9  ;;  %v3225_v56 = vpop.f32.mrf.mxu1 }
 0x4df   : > { %v3184_v57 = vpop.f32.mrf.mxu0 }
 0x4e0   : > { %v21972_v58 = vadd.f32 %v3225_v56, %v3183_v55  ;;  %v3185_v59 = vadd.f32 %v3184_v57, %v21970_v54  ;;  %v3227_v60 = vpop.f32.mrf.mxu1 }
 0x4e1   : > { %v3186_v61 = vpop.f32.mrf.mxu0 }
 0x4e2   : > { %v21975_v62 = vadd.f32 %v3227_v60, %v3185_v59  ;;  %v3187_v0 = vadd.f32 %v3186_v61, %v2413_v9  ;;  %v3229_v1 = vpop.f32.mrf.mxu1 }
 0x4e3   : > { %v21982_v5 = vpop.f32.mrf.mxu0 }
 0x4e4   : > { %v21977_v2 = vadd.f32 %v3229_v1, %v3187_v0  ;;  %v21984_v50 = vpop.f32.mrf.mxu1 }
 0x51d   : > { %v4058_v19 = vpop.f32.mrf.mxu0 }
 0x51e   : > { %v4059_v21 = vadd.f32 %v4058_v19, %v3367_v4  ;;  %v4101_v22 = vpop.f32.mrf.mxu1 }
 0x51f   : > { %v4060_v23 = vpop.f32.mrf.mxu0 }
 0x520   : > { %v21987_v25 = vadd.f32 %v4101_v22, %v4059_v21  ;;  %v4061_v26 = vadd.f32 %v4060_v23, %v3371_v7  ;;  %v4103_v28 = vpop.f32.mrf.mxu1 }
 0x521   : > { %v4062_v27 = vpop.f32.mrf.mxu0 }
 0x522   : > { %v21989_v31 = vadd.f32 %v4103_v28, %v4061_v26  ;;  %v4063_v33 = vadd.f32 %v4062_v27, %v3367_v4  ;;  %v4105_v10 = vpop.f32.mrf.mxu1  ;;  %18094 = vmatpush3.msra.mxu0 %v21987_v25 }
 0x523   : > { %v4064_v36 = vpop.f32.mrf.mxu0  ;;  %18103 = vmatprep.subr.mxu0 %v20644_v34 }
 0x524   : > { %v21993_v37 = vadd.f32 %v4105_v10, %v4063_v33  ;;  %v4065_v29 = vadd.f32 %v4064_v36, %v3371_v7  ;;  %v4107_v39 = vpop.f32.mrf.mxu1 }
 0x526   : > { %v21995_v41 = vadd.f32 %v4107_v39, %v4065_v29  ;;  %18099 = vmatpush3.msra.mxu1 %v21993_v37 }
 0x527   : > { %18108 = vmatprep.subr.mxu1 %v20644_v34 }
 0x55d   : > { %v4144_v53 = vpop.f32.mrf.mxu0 }
 0x55e   : > { %v4145_v32 = vadd.f32 %v4144_v53, %v3375_v52  ;;  %v4187_v24 = vpop.f32.mrf.mxu1 }
 0x55f   : > { %v4146_v9 = vpop.f32.mrf.mxu0 }
 0x560   : > { %v22001_v43 = vadd.f32 %v4187_v24, %v4145_v32  ;;  %v4147_v55 = vadd.f32 %v4146_v9, %v3379_v44  ;;  %v4189_v56 = vpop.f32.mrf.mxu1 }
 0x561   : > { %v4148_v57 = vpop.f32.mrf.mxu0 }
 0x562   : > { %v22003_v59 = vadd.f32 %v4189_v56, %v4147_v55  ;;  %v4149_v60 = vadd.f32 %v4148_v57, %v3375_v52  ;;  %v4191_v61 = vpop.f32.mrf.mxu1 }
 0x563   : > { %v4150_v0 = vpop.f32.mrf.mxu0 }
 0x564   : > { %v22005_v1 = vadd.f32 %v4191_v61, %v4149_v60  ;;  %v4151_v4 = vadd.f32 %v4150_v0, %v3379_v44  ;;  %v4193_v7 = vpop.f32.mrf.mxu1 }
 0x565   : > { %v4269_v19 = vpop.f32.mrf.mxu0 }
 0x566   : > { %v22007_v3 = vadd.f32 %v4193_v7, %v4151_v4  ;;  %v4349_v21 = vmul.f32 0.125, %v4269_v19 }
 0x567   : > { %v18087_v22 = vpop.f32.mrf.mxu0 }
 0x568   : > { %v4352_v23 = vsel %vm4351_vm2, %v4349_v21, -inf }
 0x569   : > { %v4345_v26 = vpop.f32.mrf.mxu1  ;;  %4353 = vmax.xlane.f32.xlu0 %v4352_v23 }
 0x56a   : > { %v4350_v28 = vmul.f32 0.125, %v4345_v26 }
 0x56b   : > { %v18092_v27 = vpop.f32.mrf.mxu1 }
 0x56c   : > { %v4355_v33 = vsel %vm4351_vm2, %v4350_v28, -inf }
 0x56d   : > { %4356 = vmax.xlane.f32.xlu1 %v4355_v33 }
 0x57e   : > { %4602 = vrot.lane.b32.xlu1 %v21948_v46, %s20646_s23 }
 0x582   : > { %4522 = vrot.lane.b32.xlu1 %v21944_v45, %s20646_s23 }
 0x5f2   : > { %v4354_v10 = vpop.xlane.xlu0 %4353 }
 0x5f3   : > { %v4358_v36 = vsub.f32 %v4349_v21, %v4354_v10 }
 0x5f5   : > { %v4360_v29 = vmul.f32 1.442695, %v4358_v36 }
 0x5f6   : > { %v4357_v39 = vpop.xlane.xlu1 %4356 }
 0x5f7   : > { %19876 = vpow2.f32 %v4360_v29  ;;  %v4359_v52 = vsub.f32 %v4350_v28, %v4357_v39 }
 0x5f9   : > { %v4362_v44 = vmul.f32 1.442695, %v4359_v52 }
 0x5fa   : > { %v4603_v45 = vpop.permute.xlu1 %4602 }
 0x5fb   : > { %19878 = vpow2.f32 %v4362_v44 }
 0x5fe   : > { %v4523_v46 = vpop.permute.xlu1 %4522 }
 0x604   : > { %v19877_v53 = vpop.eup %19876 }
 0x605   : > { %v4364_v32 = vsel %vm4351_vm2, %v19877_v53, 0.0 }
 0x606   : > { %4365 = vadd.xlane.f32.xlu0 %v4364_v32 }
 0x608   : > { %v19879_v24 = vpop.eup %19878 }
 0x609   : > { %v4367_v9 = vsel %vm4351_vm2, %v19879_v24, 0.0 }
 0x60a   : > { %4368 = vadd.xlane.f32.xlu1 %v4367_v9 }
 0x61b   : > { %4600 = vrot.lane.b32.xlu1 %v21957_v20, %s20646_s23 }
 0x61c   : > { %4524 = vrot.lane.b32.xlu0 %v21936_v40, %s20646_s23 }
 0x68f   : > { %v4366_v55 = vpop.xlane.xlu0 %4365 }
 0x690   : > { %19880 = vrcp.f32 %v4366_v55 }
 0x693   : > { %v4369_v56 = vpop.xlane.xlu1 %4368  ;;  %v4525_v61 = vpop.permute.xlu0 %4524 }
 0x694   : > { %19882 = vrcp.f32 %v4369_v56 }
 0x697   : > { %v4601_v40 = vpop.permute.xlu1 %4600 }
 0x69d   : > { %v19881_v57 = vpop.eup %19880 }
 0x69e   : > { %v4372_v60 = vmul.f32 %v19881_v57, %v19877_v53 }
 0x6a0   : > { %18096 = vmatmul.mubr.msk.f32.vlgmr.msra.gmra.mxu0 %vm4351_vm2, %v4372_v60 }
 0x6a1   : > { %v19883_v0 = vpop.eup %19882  ;;  %18104 = vmatpush3.xpose.msk.msra.mxu0 %vm4196_vm1, %v4525_v61  ;;  %18105 = vmatprep.mubr.msk.f32.mxu0 %vm20645_vm0, %v20644_v34 }
 0x6a2   : > { %v4373_v20 = vmul.f32 %v19883_v0, %v19879_v24  ;;  %18113 = vmatprep.subr.mxu0 %v20644_v34  ;;  %v3103_v0 = vadd.f32 %v21965_v42, %v21926_v35 }
 0x6a4   : > { %18101 = vmatmul.mubr.msk.f32.vlgmr.msra.gmra.mxu1 %vm4351_vm2, %v4373_v20  ;;  %18106 = vmatmul.mubr.msk.f32.vlgmr.msra.gmra.mxu0 %vm4196_vm1, %v4523_v46 }
 0x6a5   : > { %18109 = vmatpush3.xpose.msk.msra.mxu1 %vm4196_vm1, %v4603_v45  ;;  %18110 = vmatprep.mubr.msk.f32.mxu1 %vm20645_vm0, %v20644_v34 }
 0x6a6   : > { %18118 = vmatprep.subr.mxu1 %v20644_v34  ;;  %18115 = vmatprep.mubr.msk.f32.mxu0 %vm20645_vm0, %v20644_v34 }
 0x6a8   : > { %18111 = vmatmul.mubr.msk.f32.vlgmr.msra.gmra.mxu1 %vm4196_vm1, %v4601_v40 }
 0x6a9   : > { %18120 = vmatprep.mubr.msk.f32.mxu1 %vm20645_vm0, %v20644_v34 }
 0x760   : > { %v4443_v4 = vpop.f32.mrf.mxu0 }
 0x761   : > { %4520 = vst.msk [vmem:[#allocation3] sm:$0xff] %vm4196_vm1, %v4443_v4  ;;  %v3146_v4 = vadd.f32 %v21967_v51, %v3103_v0 }
 0x762   : > { %v18097_v7 = vpop.f32.mrf.mxu0 }
 0x764   : > { %v4516_v19 = vpop.f32.mrf.mxu1  ;;  %v4596_v21 = vpop.f32.mrf.mxu0 }
 0x765   : > { %4521 = vst.msk [vmem:[#allocation3 + $0x20] sm:$0xff] %vm4196_vm1, %v4516_v19  ;;  %v4678_v22 = vmul.f32 0.125, %v4596_v21 }
 0x766   : > { %v18102_v23 = vpop.f32.mrf.mxu1  ;;  %v18107_v26 = vpop.f32.mrf.mxu0 }
 0x767   : > { %v4680_v28 = vsel %vm4351_vm2, %v4678_v22, -inf }
 0x768   : > { %v4674_v27 = vpop.f32.mrf.mxu1  ;;  %4681 = vmax.xlane.f32.xlu0 %v4680_v28 }
 0x769   : > { %v4679_v33 = vmul.f32 0.125, %v4674_v27 }
 0x76a   : > { %v18112_v10 = vpop.f32.mrf.mxu1 }
 0x76b   : > { %v4683_v36 = vsel %vm4351_vm2, %v4679_v33, -inf }
 0x76c   : > { %4684 = vmax.xlane.f32.xlu1 %v4683_v36 }
 0x77d   : > { %4780 = vrot.lane.b32.xlu1 %v21993_v37, %s20646_s23 }
 0x7f1   : > { %v4682_v29 = vpop.xlane.xlu0 %4681 }
 0x7f2   : > { %v4686_v39 = vsub.f32 %v4678_v22, %v4682_v29 }
 0x7f4   : > { %v4688_v52 = vmul.f32 1.442695, %v4686_v39 }
 0x7f5   : > { %v4685_v44 = vpop.xlane.xlu1 %4684 }
 0x7f6   : > { %19884 = vpow2.f32 %v4688_v52  ;;  %v4687_v53 = vsub.f32 %v4679_v33, %v4685_v44 }
 0x7f8   : > { %v4690_v32 = vmul.f32 1.442695, %v4687_v53 }
 0x7f9   : > { %v4781_v24 = vpop.permute.xlu1 %4780 }
 0x7fa   : > { %19886 = vpow2.f32 %v4690_v32  ;;  %18119 = vmatpush3.msra.mxu1 %v4781_v24 }
 0x7fb   : > { %18128 = vmatprep.subr.mxu1 %v20644_v34 }
 0x803   : > { %v19885_v9 = vpop.eup %19884 }
 0x804   : > { %v4692_v45 = vsel %vm4351_vm2, %v19885_v9, 0.0 }
 0x805   : > { %4693 = vadd.xlane.f32.xlu0 %v4692_v45 }
 0x807   : > { %v19887_v46 = vpop.eup %19886 }
 0x808   : > { %v4695_v55 = vsel %vm4351_vm2, %v19887_v46, 0.0 }
 0x809   : > { %4696 = vadd.xlane.f32.xlu0 %v4695_v55 }
 0x81f   : > { %4703 = vrot.lane.b32.xlu0 %v21987_v25, %s20646_s23  ;;  %v2141_v25 = vadd.f32 %v21835_v47, %v21753_v30 }
 0x821   : > { %v2184_v35 = vadd.f32 %v21837_v17, %v2141_v25 }
 0x88e   : > { %v4694_v37 = vpop.xlane.xlu0 %4693 }
 0x88f   : > { %19888 = vrcp.f32 %v4694_v37 }
 0x892   : > { %v4697_v56 = vpop.xlane.xlu0 %4696 }
 0x893   : > { %19890 = vrcp.f32 %v4697_v56 }
 0x896   : > { %v4704_v57 = vpop.permute.xlu0 %4703 }
 0x897   : > { %18114 = vmatpush3.msra.mxu0 %v4704_v57 }
 0x898   : > { %18123 = vmatprep.subr.mxu0 %v20644_v34 }
 0x89c   : > { %v19889_v60 = vpop.eup %19888 }
 0x89d   : > { %v4700_v61 = vmul.f32 %v19889_v60, %v19885_v9 }
 0x89f   : > { %18116 = vmatmul.mubr.msk.f32.vlgmr.msra.gmra.mxu0 %vm4351_vm2, %v4700_v61 }
 0x8a0   : > { %v19891_v20 = vpop.eup %19890  ;;  %18124 = vmatpush3.xpose.msk.msra.mxu0 %vm4196_vm1, %v21939_v18  ;;  %18125 = vmatprep.mubr.msk.f32.mxu0 %vm20645_vm0, %v20644_v34 }
 0x8a1   : > { %18133 = vmatprep.subr.mxu0 %v20644_v34  ;;  %v4701_v40 = vmul.f32 %v19891_v20, %v19887_v46 }
 0x8a3   : > { %18121 = vmatmul.mubr.msk.f32.vlgmr.msra.gmra.mxu1 %vm4351_vm2, %v4701_v40  ;;  %18126 = vmatmul.mubr.msk.f32.vlgmr.msra.gmra.mxu0 %vm4196_vm1, %v21770_v38 }
 0x8a4   : > { %18129 = vmatpush3.xpose.msk.msra.mxu1 %vm4196_vm1, %v3146_v4  ;;  %18134 = vmatpush3.msra.mxu0 %v21989_v31 }
 0x8a5   : > { %18130 = vmatprep.mubr.msk.f32.mxu1 %vm20645_vm0, %v20644_v34  ;;  %18138 = vmatprep.subr.mxu1 %v20644_v34 }
 0x8a6   : > { %18135 = vmatprep.mubr.msk.f32.mxu0 %vm20645_vm0, %v20644_v34  ;;  %18143 = vmatprep.subr.mxu0 %v20644_v34 }
 0x8a7   : > { %18131 = vmatmul.mubr.msk.f32.vlgmr.msra.gmra.mxu1 %vm4196_vm1, %v2184_v35 }
 0x8a8   : > { %18139 = vmatpush3.msra.mxu1 %v21995_v41  ;;  %18140 = vmatprep.mubr.msk.f32.mxu1 %vm20645_vm0, %v20644_v34 }
 0x8a9   : > { %18148 = vmatprep.subr.mxu1 %v20644_v34 }
 0x95f   : > { %v22077_v30 = vpop.f32.mrf.mxu0 }
 0x961   : > { %v18117_v47 = vpop.f32.mrf.mxu0 }
 0x963   : > { %v22079_v17 = vpop.f32.mrf.mxu1  ;;  %v4939_v42 = vpop.f32.mrf.mxu0 }
 0x964   : > { %v5019_v51 = vmul.f32 0.125, %v4939_v42 }
 0x965   : > { %v18122_v7 = vpop.f32.mrf.mxu1  ;;  %v18127_v19 = vpop.f32.mrf.mxu0 }
 0x966   : > { %v5021_v21 = vsel %vm4351_vm2, %v5019_v51, -inf }
 0x967   : > { %v5015_v22 = vpop.f32.mrf.mxu1  ;;  %5022 = vmax.xlane.f32.xlu1 %v5021_v21 }
 0x968   : > { %v5020_v23 = vmul.f32 0.125, %v5015_v22 }
 0x969   : > { %v18132_v26 = vpop.f32.mrf.mxu1 }
 0x96a   : > { %v5024_v28 = vsel %vm4351_vm2, %v5020_v23, -inf }
 0x96b   : > { %5025 = vmax.xlane.f32.xlu0 %v5024_v28 }
 0x978   : > { %5271 = vrot.lane.b32.xlu1 %v3146_v4, %s20646_s23 }
 0x97c   : > { %5191 = vrot.lane.b32.xlu1 %v21770_v38, %s20646_s23 }
 0x9f0   : > { %v5023_v27 = vpop.xlane.xlu1 %5022 }
 0x9f1   : > { %v5027_v33 = vsub.f32 %v5019_v51, %v5023_v27 }
 0x9f3   : > { %v5029_v10 = vmul.f32 1.442695, %v5027_v33 }
 0x9f4   : > { %v5026_v36 = vpop.xlane.xlu0 %5025  ;;  %v5272_v38 = vpop.permute.xlu1 %5271 }
 0x9f5   : > { %19892 = vpow2.f32 %v5029_v10  ;;  %v5028_v29 = vsub.f32 %v5020_v23, %v5026_v36 }
 0x9f7   : > { %v5031_v39 = vmul.f32 1.442695, %v5028_v29 }
 0x9f8   : > { %v5192_v24 = vpop.permute.xlu1 %5191 }
 0x9f9   : > { %19894 = vpow2.f32 %v5031_v39 }
 0xa02   : > { %v19893_v52 = vpop.eup %19892 }
 0xa03   : > { %v5033_v44 = vsel %vm4351_vm2, %v19893_v52, 0.0 }
 0xa04   : > { %5034 = vadd.xlane.f32.xlu0 %v5033_v44 }
 0xa06   : > { %v19895_v53 = vpop.eup %19894 }
 0xa07   : > { %v5036_v32 = vsel %vm4351_vm2, %v19895_v53, 0.0 }
 0xa08   : > { %5037 = vadd.xlane.f32.xlu1 %v5036_v32 }
 0xa19   : > { %5269 = vrot.lane.b32.xlu1 %v2184_v35, %s20646_s23 }
 0xa1a   : > { %5193 = vrot.lane.b32.xlu0 %v21939_v18, %s20646_s23 }
 0xa8d   : > { %v5035_v9 = vpop.xlane.xlu0 %5034 }
 0xa8e   : > { %19896 = vrcp.f32 %v5035_v9 }
 0xa91   : > { %v5038_v45 = vpop.xlane.xlu1 %5037  ;;  %v5194_v37 = vpop.permute.xlu0 %5193 }
 0xa92   : > { %19898 = vrcp.f32 %v5038_v45 }
 0xa95   : > { %v5270_v18 = vpop.permute.xlu1 %5269 }
 0xa9b   : > { %v19897_v46 = vpop.eup %19896 }
 0xa9c   : > { %v5041_v55 = vmul.f32 %v19897_v46, %v19893_v52 }
 0xa9e   : > { %18136 = vmatmul.mubr.msk.f32.vlgmr.msra.gmra.mxu0 %vm4351_vm2, %v5041_v55 }
 0xa9f   : > { %v19899_v56 = vpop.eup %19898  ;;  %18144 = vmatpush3.xpose.msk.msra.mxu0 %vm4196_vm1, %v5194_v37  ;;  %18145 = vmatprep.mubr.msk.f32.mxu0 %vm20645_vm0, %v20644_v34 }
 0xaa0   : > { %v5042_v57 = vmul.f32 %v19899_v56, %v19895_v53  ;;  %18153 = vmatprep.subr.mxu0 %v20644_v34 }
 0xaa2   : > { %18141 = vmatmul.mubr.msk.f32.vlgmr.msra.gmra.mxu1 %vm4351_vm2, %v5042_v57  ;;  %18146 = vmatmul.mubr.msk.f32.vlgmr.msra.gmra.mxu0 %vm4196_vm1, %v5192_v24 }
 0xaa3   : > { %18149 = vmatpush3.xpose.msk.msra.mxu1 %vm4196_vm1, %v5272_v38  ;;  %18150 = vmatprep.mubr.msk.f32.mxu1 %vm20645_vm0, %v20644_v34 }
 0xaa4   : > { %18158 = vmatprep.subr.mxu1 %v20644_v34  ;;  %18155 = vmatprep.mubr.msk.f32.mxu0 %vm20645_vm0, %v20644_v34 }
 0xaa6   : > { %18151 = vmatmul.mubr.msk.f32.vlgmr.msra.gmra.mxu1 %vm4196_vm1, %v5270_v18 }
 0xaa7   : > { %18160 = vmatprep.mubr.msk.f32.mxu1 %vm20645_vm0, %v20644_v34 }
 0xb5e   : > { %v5112_v60 = vpop.f32.mrf.mxu0 }
 0xb5f   : > { %5189 = vst.msk [vmem:[#allocation3 + $0x8] sm:$0xff] %vm4196_vm1, %v5112_v60 }
 0xb60   : > { %v18137_v61 = vpop.f32.mrf.mxu0 }
 0xb62   : > { %v5185_v0 = vpop.f32.mrf.mxu1  ;;  %v5265_v20 = vpop.f32.mrf.mxu0 }
 0xb63   : > { %5190 = vst.msk [vmem:[#allocation3 + $0x28] sm:$0xff] %vm4196_vm1, %v5185_v0  ;;  %v5347_v25 = vmul.f32 0.125, %v5265_v20 }
 0xb64   : > { %v18142_v40 = vpop.f32.mrf.mxu1  ;;  %v18147_v4 = vpop.f32.mrf.mxu0 }
 0xb65   : > { %v5349_v35 = vsel %vm4351_vm2, %v5347_v25, -inf }
 0xb66   : > { %v5343_v47 = vpop.f32.mrf.mxu1  ;;  %5350 = vmax.xlane.f32.xlu0 %v5349_v35 }
 0xb67   : > { %v5348_v42 = vmul.f32 0.125, %v5343_v47 }
 0xb68   : > { %v18152_v51 = vpop.f32.mrf.mxu1 }
 0xb69   : > { %v5352_v7 = vsel %vm4351_vm2, %v5348_v42, -inf }
 0xb6a   : > { %5353 = vmax.xlane.f32.xlu1 %v5352_v7 }
 0xb7b   : > { %5449 = vrot.lane.b32.xlu1 %v21995_v41, %s20646_s23 }
 0xbef   : > { %v5351_v19 = vpop.xlane.xlu0 %5350 }
 0xbf0   : > { %v5355_v21 = vsub.f32 %v5347_v25, %v5351_v19 }
 0xbf2   : > { %v5357_v22 = vmul.f32 1.442695, %v5355_v21 }
 0xbf3   : > { %v5354_v23 = vpop.xlane.xlu1 %5353 }
 0xbf4   : > { %19900 = vpow2.f32 %v5357_v22  ;;  %v5356_v26 = vsub.f32 %v5348_v42, %v5354_v23 }
 0xbf6   : > { %v5359_v28 = vmul.f32 1.442695, %v5356_v26 }
 0xbf7   : > { %v5450_v27 = vpop.permute.xlu1 %5449 }
 0xbf8   : > { %19902 = vpow2.f32 %v5359_v28  ;;  %18159 = vmatpush3.msra.mxu1 %v5450_v27 }
 0xbf9   : > { %18168 = vmatprep.subr.mxu1 %v20644_v34 }
 0xc01   : > { %v19901_v33 = vpop.eup %19900 }
 0xc02   : > { %v5361_v10 = vsel %vm4351_vm2, %v19901_v33, 0.0 }
 0xc03   : > { %5362 = vadd.xlane.f32.xlu0 %v5361_v10 }
 0xc05   : > { %v19903_v36 = vpop.eup %19902 }
 0xc06   : > { %v5364_v29 = vsel %vm4351_vm2, %v19903_v36, 0.0 }
 0xc07   : > { %5365 = vadd.xlane.f32.xlu0 %v5364_v29 }
 0xc1d   : > { %5372 = vrot.lane.b32.xlu0 %v21989_v31, %s20646_s23 }
 0xc8c   : > { %v5363_v41 = vpop.xlane.xlu0 %5362 }
 0xc8d   : > { %19904 = vrcp.f32 %v5363_v41 }
 0xc90   : > { %v5366_v39 = vpop.xlane.xlu0 %5365 }
 0xc91   : > { %19906 = vrcp.f32 %v5366_v39 }
 0xc94   : > { %v5373_v52 = vpop.permute.xlu0 %5372 }
 0xc95   : > { %18154 = vmatpush3.msra.mxu0 %v5373_v52 }
 0xc96   : > { %18163 = vmatprep.subr.mxu0 %v20644_v34 }
 0xc9a   : > { %v19905_v44 = vpop.eup %19904 }
 0xc9b   : > { %v5369_v53 = vmul.f32 %v19905_v44, %v19901_v33 }
 0xc9d   : > { %18156 = vmatmul.mubr.msk.f32.vlgmr.msra.gmra.mxu0 %vm4351_vm2, %v5369_v53 }
 0xc9e   : > { %v19907_v32 = vpop.eup %19906  ;;  %18164 = vmatpush3.xpose.msk.msra.mxu0 %vm4196_vm1, %v21972_v58  ;;  %18165 = vmatprep.mubr.msk.f32.mxu0 %vm20645_vm0, %v20644_v34 }
 0xc9f   : > { %18173 = vmatprep.subr.mxu0 %v20644_v34  ;;  %v5370_v31 = vmul.f32 %v19907_v32, %v19903_v36 }
 0xca1   : > { %18161 = vmatmul.mubr.msk.f32.vlgmr.msra.gmra.mxu1 %vm4351_vm2, %v5370_v31  ;;  %18166 = vmatmul.mubr.msk.f32.vlgmr.msra.gmra.mxu0 %vm4196_vm1, %v21852_v63 }
 0xca2   : > { %18169 = vmatpush3.xpose.msk.msra.mxu1 %vm4196_vm1, %v21977_v2  ;;  %18174 = vmatpush3.msra.mxu0 %v22001_v43 }
 0xca3   : > { %18170 = vmatprep.mubr.msk.f32.mxu1 %vm20645_vm0, %v20644_v34  ;;  %18178 = vmatprep.subr.mxu1 %v20644_v34 }
 0xca4   : > { %18175 = vmatprep.mubr.msk.f32.mxu0 %vm20645_vm0, %v20644_v34  ;;  %18183 = vmatprep.subr.mxu0 %v20644_v34 }
 0xca5   : > { %18171 = vmatmul.mubr.msk.f32.vlgmr.msra.gmra.mxu1 %vm4196_vm1, %v21862_v16 }
 0xca6   : > { %18179 = vmatpush3.msra.mxu1 %v22005_v1  ;;  %18180 = vmatprep.mubr.msk.f32.mxu1 %vm20645_vm0, %v20644_v34 }
 0xca7   : > { %18188 = vmatprep.subr.mxu1 %v20644_v34 }
 0xd5d   : > { %v22143_v38 = vpop.f32.mrf.mxu0 }
 0xd5f   : > { %v18157_v24 = vpop.f32.mrf.mxu0 }
 0xd61   : > { %v22145_v9 = vpop.f32.mrf.mxu1  ;;  %v5607_v45 = vpop.f32.mrf.mxu0 }
 0xd62   : > { %v5687_v46 = vmul.f32 0.125, %v5607_v45 }
 0xd63   : > { %v18162_v55 = vpop.f32.mrf.mxu1  ;;  %v18167_v37 = vpop.f32.mrf.mxu0 }
 0xd64   : > { %v5689_v56 = vsel %vm4351_vm2, %v5687_v46, -inf }
 0xd65   : > { %v5683_v57 = vpop.f32.mrf.mxu1  ;;  %5690 = vmax.xlane.f32.xlu1 %v5689_v56 }
 0xd66   : > { %v5688_v18 = vmul.f32 0.125, %v5683_v57 }
 0xd67   : > { %v18172_v60 = vpop.f32.mrf.mxu1 }
 0xd68   : > { %v5692_v61 = vsel %vm4351_vm2, %v5688_v18, -inf }
 0xd69   : > { %5693 = vmax.xlane.f32.xlu0 %v5692_v61 }
 0xd76   : > { %5939 = vrot.lane.b32.xlu1 %v21977_v2, %s20646_s23 }
 0xd7a   : > { %5859 = vrot.lane.b32.xlu1 %v21852_v63, %s20646_s23 }
 0xdee   : > { %v5691_v0 = vpop.xlane.xlu1 %5690 }
 0xdef   : > { %v5695_v20 = vsub.f32 %v5687_v46, %v5691_v0 }
 0xdf1   : > { %v5697_v25 = vmul.f32 1.442695, %v5695_v20 }
 0xdf2   : > { %v5694_v40 = vpop.xlane.xlu0 %5693  ;;  %v5940_v63 = vpop.permute.xlu1 %5939 }
 0xdf3   : > { %19908 = vpow2.f32 %v5697_v25  ;;  %v5696_v4 = vsub.f32 %v5688_v18, %v5694_v40 }
 0xdf5   : > { %v5699_v35 = vmul.f32 1.442695, %v5696_v4 }
 0xdf6   : > { %v5860_v2 = vpop.permute.xlu1 %5859 }
 0xdf7   : > { %19910 = vpow2.f32 %v5699_v35  ;;  %v3189_v35 = vadd.f32 %v21982_v5, %v21970_v54 }
 0xe00   : > { %v19909_v47 = vpop.eup %19908 }
 0xe01   : > { %v5701_v42 = vsel %vm4351_vm2, %v19909_v47, 0.0 }
 0xe02   : > { %5702 = vadd.xlane.f32.xlu0 %v5701_v42 }
 0xe04   : > { %v19911_v51 = vpop.eup %19910 }
 0xe05   : > { %v5704_v7 = vsel %vm4351_vm2, %v19911_v51, 0.0 }
 0xe06   : > { %5705 = vadd.xlane.f32.xlu1 %v5704_v7 }
 0xe17   : > { %5937 = vrot.lane.b32.xlu1 %v21862_v16, %s20646_s23 }
 0xe18   : > { %5861 = vrot.lane.b32.xlu0 %v21972_v58, %s20646_s23 }
 0xe8b   : > { %v5703_v19 = vpop.xlane.xlu0 %5702 }
 0xe8c   : > { %19912 = vrcp.f32 %v5703_v19 }
 0xe8f   : > { %v5706_v21 = vpop.xlane.xlu1 %5705  ;;  %v5862_v26 = vpop.permute.xlu0 %5861 }
 0xe90   : > { %19914 = vrcp.f32 %v5706_v21 }
 0xe93   : > { %v5938_v58 = vpop.permute.xlu1 %5937 }
 0xe99   : > { %v19913_v22 = vpop.eup %19912 }
 0xe9a   : > { %v5709_v23 = vmul.f32 %v19913_v22, %v19909_v47 }
 0xe9c   : > { %18176 = vmatmul.mubr.msk.f32.vlgmr.msra.gmra.mxu0 %vm4351_vm2, %v5709_v23 }
 0xe9d   : > { %v19915_v28 = vpop.eup %19914  ;;  %18184 = vmatpush3.xpose.msk.msra.mxu0 %vm4196_vm1, %v5862_v26  ;;  %18185 = vmatprep.mubr.msk.f32.mxu0 %vm20645_vm0, %v20644_v34 }
 0xe9e   : > { %v5710_v16 = vmul.f32 %v19915_v28, %v19911_v51  ;;  %18193 = vmatprep.subr.mxu0 %v20644_v34  ;;  %v3232_v51 = vadd.f32 %v21984_v50, %v3189_v35 }
 0xea0   : > { %18181 = vmatmul.mubr.msk.f32.vlgmr.msra.gmra.mxu1 %vm4351_vm2, %v5710_v16  ;;  %18186 = vmatmul.mubr.msk.f32.vlgmr.msra.gmra.mxu0 %vm4196_vm1, %v5860_v2 }
 0xea1   : > { %18189 = vmatpush3.xpose.msk.msra.mxu1 %vm4196_vm1, %v5940_v63  ;;  %18190 = vmatprep.mubr.msk.f32.mxu1 %vm20645_vm0, %v20644_v34 }
 0xea2   : > { %18198 = vmatprep.subr.mxu1 %v20644_v34  ;;  %18195 = vmatprep.mubr.msk.f32.mxu0 %vm20645_vm0, %v20644_v34 }
 0xea4   : > { %18191 = vmatmul.mubr.msk.f32.vlgmr.msra.gmra.mxu1 %vm4196_vm1, %v5938_v58 }
 0xea5   : > { %18200 = vmatprep.mubr.msk.f32.mxu1 %vm20645_vm0, %v20644_v34 }
 0xf5c   : > { %v5780_v27 = vpop.f32.mrf.mxu0 }
 0xf5d   : > { %5857 = vst.msk [vmem:[#allocation3 + $0x10] sm:$0xff] %vm4196_vm1, %v5780_v27 }
 0xf5e   : > { %v18177_v33 = vpop.f32.mrf.mxu0 }
 0xf60   : > { %v5853_v10 = vpop.f32.mrf.mxu1  ;;  %v5933_v36 = vpop.f32.mrf.mxu0 }
 0xf61   : > { %5858 = vst.msk [vmem:[#allocation3 + $0x30] sm:$0xff] %vm4196_vm1, %v5853_v10  ;;  %v6015_v29 = vmul.f32 0.125, %v5933_v36 }
 0xf62   : > { %v18182_v41 = vpop.f32.mrf.mxu1  ;;  %v18187_v39 = vpop.f32.mrf.mxu0 }
 0xf63   : > { %v6017_v52 = vsel %vm4351_vm2, %v6015_v29, -inf }
 0xf64   : > { %v6011_v44 = vpop.f32.mrf.mxu1  ;;  %6018 = vmax.xlane.f32.xlu0 %v6017_v52 }
 0xf65   : > { %v6016_v53 = vmul.f32 0.125, %v6011_v44 }
 0xf66   : > { %v18192_v32 = vpop.f32.mrf.mxu1 }
 0xf67   : > { %v6020_v31 = vsel %vm4351_vm2, %v6016_v53, -inf }
 0xf68   : > { %6021 = vmax.xlane.f32.xlu1 %v6020_v31 }
 0xf79   : > { %6117 = vrot.lane.b32.xlu1 %v22005_v1, %s20646_s23 }
 0xfed   : > { %v6019_v24 = vpop.xlane.xlu0 %6018 }
 0xfee   : > { %v6023_v45 = vsub.f32 %v6015_v29, %v6019_v24 }
 0xff0   : > { %v6025_v46 = vmul.f32 1.442695, %v6023_v45 }
 0xff1   : > { %v6022_v55 = vpop.xlane.xlu1 %6021 }
 0xff2   : > { %19916 = vpow2.f32 %v6025_v46  ;;  %v6024_v37 = vsub.f32 %v6016_v53, %v6022_v55 }
 0xff4   : > { %v6027_v56 = vmul.f32 1.442695, %v6024_v37 }
 0xff5   : > { %v6118_v57 = vpop.permute.xlu1 %6117 }
 0xff6   : > { %19918 = vpow2.f32 %v6027_v56  ;;  %18199 = vmatpush3.msra.mxu1 %v6118_v57 }
 0xff7   : > { %18208 = vmatprep.subr.mxu1 %v20644_v34 }
 0xfff   : > { %v19917_v18 = vpop.eup %19916 }
0x1000   : > { %v6029_v60 = vsel %vm4351_vm2, %v19917_v18, 0.0 }
0x1001   : > { %6030 = vadd.xlane.f32.xlu0 %v6029_v60 }
0x1003   : > { %v19919_v61 = vpop.eup %19918 }
0x1004   : > { %v6032_v0 = vsel %vm4351_vm2, %v19919_v61, 0.0 }
0x1005   : > { %6033 = vadd.xlane.f32.xlu0 %v6032_v0 }
0x101b   : > { %6040 = vrot.lane.b32.xlu0 %v22001_v43, %s20646_s23  ;;  %v2227_v43 = vadd.f32 %v21920_v12, %v21842_v48 }
0x101d   : > { %v2270_v54 = vadd.f32 %v21923_v8, %v2227_v43 }
0x108a   : > { %v6031_v1 = vpop.xlane.xlu0 %6030 }
0x108b   : > { %19920 = vrcp.f32 %v6031_v1 }
0x108e   : > { %v6034_v20 = vpop.xlane.xlu0 %6033 }
0x108f   : > { %19922 = vrcp.f32 %v6034_v20 }
0x1092   : > { %v6041_v25 = vpop.permute.xlu0 %6040 }
0x1093   : > { %18194 = vmatpush3.msra.mxu0 %v6041_v25 }
0x1094   : > { %18203 = vmatprep.subr.mxu0 %v20644_v34 }
0x1098   : > { %v19921_v40 = vpop.eup %19920 }
0x1099   : > { %v6037_v4 = vmul.f32 %v19921_v40, %v19917_v18 }
0x109b   : > { %18196 = vmatmul.mubr.msk.f32.vlgmr.msra.gmra.mxu0 %vm4351_vm2, %v6037_v4 }
0x109c   : > { %v19923_v47 = vpop.eup %19922  ;;  %18204 = vmatpush3.xpose.msk.msra.mxu0 %vm4196_vm1, %v21975_v62  ;;  %18205 = vmatprep.mubr.msk.f32.mxu0 %vm20645_vm0, %v20644_v34 }
0x109d   : > { %18213 = vmatprep.subr.mxu0 %v20644_v34  ;;  %v6038_v42 = vmul.f32 %v19923_v47, %v19919_v61 }
0x109f   : > { %18201 = vmatmul.mubr.msk.f32.vlgmr.msra.gmra.mxu1 %vm4351_vm2, %v6038_v42  ;;  %18206 = vmatmul.mubr.msk.f32.vlgmr.msra.gmra.mxu0 %vm4196_vm1, %v21857_v49 }
0x10a0   : > { %18209 = vmatpush3.xpose.msk.msra.mxu1 %vm4196_vm1, %v3232_v51  ;;  %18214 = vmatpush3.msra.mxu0 %v22003_v59 }
0x10a1   : > { %18210 = vmatprep.mubr.msk.f32.mxu1 %vm20645_vm0, %v20644_v34  ;;  %18218 = vmatprep.subr.mxu1 %v20644_v34 }
0x10a2   : > { %18215 = vmatprep.mubr.msk.f32.mxu0 %vm20645_vm0, %v20644_v34  ;;  %18223 = vmatprep.subr.mxu0 %v20644_v34 }
0x10a3   : > { %18211 = vmatmul.mubr.msk.f32.vlgmr.msra.gmra.mxu1 %vm4196_vm1, %v2270_v54 }
0x10a4   : > { %18219 = vmatpush3.msra.mxu1 %v22007_v3  ;;  %18220 = vmatprep.mubr.msk.f32.mxu1 %vm20645_vm0, %v20644_v34 }
0x10a5   : > { %18228 = vmatprep.subr.mxu1 %v20644_v34 }
0x115b   : > { %v22215_v48 = vpop.f32.mrf.mxu0 }
0x115d   : > { %v18197_v12 = vpop.f32.mrf.mxu0 }
0x115f   : > { %v22217_v8 = vpop.f32.mrf.mxu1  ;;  %v6275_v5 = vpop.f32.mrf.mxu0 }
0x1160   : > { %v6355_v50 = vmul.f32 0.125, %v6275_v5 }
0x1161   : > { %v18202_v7 = vpop.f32.mrf.mxu1  ;;  %v18207_v63 = vpop.f32.mrf.mxu0 }
0x1162   : > { %v6357_v2 = vsel %vm4351_vm2, %v6355_v50, -inf  ;;  %v18914_v7 = vld [vmem:[%s21324_s10 + $0xe4] ss:$16 sps:$4 sm:$0xff]  }
0x1163   : > { %v6351_v19 = vpop.f32.mrf.mxu1  ;;  %6358 = vmax.xlane.f32.xlu1 %v6357_v2 }
0x1164   : > { %v6356_v21 = vmul.f32 0.125, %v6351_v19 }
0x1165   : > { %v18212_v22 = vpop.f32.mrf.mxu1 }
0x1166   : > { %v6360_v23 = vsel %vm4351_vm2, %v6356_v21, -inf }
0x1167   : > { %6361 = vmax.xlane.f32.xlu0 %v6360_v23  ;;  %v18917_v23 = vld [vmem:[%s21324_s10 + $0xc4] ss:$16 sps:$4 sm:$0xff]  }
0x1174   : > { %6607 = vrot.lane.b32.xlu1 %v3232_v51, %s20646_s23 }
0x1178   : > { %6527 = vrot.lane.b32.xlu1 %v21857_v49, %s20646_s23 }
0x11ec   : > { %v6359_v26 = vpop.xlane.xlu1 %6358 }
0x11ed   : > { %v6363_v28 = vsub.f32 %v6355_v50, %v6359_v26 }
0x11ef   : > { %v6365_v16 = vmul.f32 1.442695, %v6363_v28 }
0x11f0   : > { %v6362_v58 = vpop.xlane.xlu0 %6361  ;;  %v6608_v49 = vpop.permute.xlu1 %6607 }
0x11f1   : > { %19924 = vpow2.f32 %v6365_v16  ;;  %v6364_v27 = vsub.f32 %v6356_v21, %v6362_v58  ;;  %v18915_v16 = vld [vmem:[%s21324_s10 + $0xc0] ss:$16 sps:$4 sm:$0xff]  }
0x11f3   : > { %v6367_v33 = vmul.f32 1.442695, %v6364_v27  ;;  %v18920_v27 = vld [vmem:[%s21324_s10 + $0xa4] ss:$16 sps:$4 sm:$0xff]  }
0x11f4   : > { %v6528_v39 = vpop.permute.xlu1 %6527 }
0x11f5   : > { %19926 = vpow2.f32 %v6367_v33  ;;  %v18918_v33 = vld [vmem:[%s21324_s10 + $0xa0] ss:$16 sps:$4 sm:$0xff]  }
0x11fe   : > { %v19925_v10 = vpop.eup %19924 }
0x11ff   : > { %v6369_v36 = vsel %vm4351_vm2, %v19925_v10, 0.0 }
0x1200   : > { %6370 = vadd.xlane.f32.xlu0 %v6369_v36  ;;  %v18921_v36 = vld [vmem:[%s21324_s10 + $0x80] ss:$16 sps:$4 sm:$0xff]  }
0x1202   : > { %v19927_v29 = vpop.eup %19926 }
0x1203   : > { %v6372_v41 = vsel %vm4351_vm2, %v19927_v29, 0.0 }
0x1204   : > { %6373 = vadd.xlane.f32.xlu1 %v6372_v41  ;;  %v18924_v41 = vld [vmem:[%s21324_s10 + $0x60] ss:$16 sps:$4 sm:$0xff]  }
0x1215   : > { %6605 = vrot.lane.b32.xlu1 %v2270_v54, %s20646_s23 }
0x1216   : > { %6529 = vrot.lane.b32.xlu0 %v21975_v62, %s20646_s23 }
0x1289   : > { %v6371_v52 = vpop.xlane.xlu0 %6370 }
0x128a   : > { %19928 = vrcp.f32 %v6371_v52  ;;  %v18932_v52 = vld [vmem:[%s21324_s10 + $0x24] ss:$16 sps:$4 sm:$0xff]  }
0x128d   : > { %v6374_v44 = vpop.xlane.xlu1 %6373  ;;  %v6530_v31 = vpop.permute.xlu0 %6529 }
0x128e   : > { %19930 = vrcp.f32 %v6374_v44  ;;  %v18930_v44 = vld [vmem:[%s21324_s10 + $0x20] ss:$16 sps:$4 sm:$0xff]  }
0x1291   : > { %v6606_v62 = vpop.permute.xlu1 %6605 }
0x1297   : > { %v19929_v53 = vpop.eup %19928 }
0x1298   : > { %v6377_v32 = vmul.f32 %v19929_v53, %v19925_v10  ;;  %v18923_v10 = vld [vmem:[%s21324_s10 + $0x84] ss:$16 sps:$4 sm:$0xff]  }
0x1299   : > { %v18935_v53 = vld [vmem:[%s21324_s10 + $0x4] ss:$16 sps:$4 sm:$0xff]  }
0x129a   : > { %18216 = vmatmul.mubr.msk.f32.vlgmr.msra.gmra.mxu0 %vm4351_vm2, %v6377_v32  ;;  %v18933_v32 = vld [vmem:[%s21324_s10] ss:$16 sps:$4 sm:$0xff]  }
0x129b   : > { %v19931_v24 = vpop.eup %19930  ;;  %18224 = vmatpush3.xpose.msk.msra.mxu0 %vm4196_vm1, %v6530_v31  ;;  %18225 = vmatprep.mubr.msk.f32.mxu0 %vm20645_vm0, %v20644_v34  ;;  %v18938_v31 = vld [vmem:[%s21324_s10 + $0x1e4] ss:$16 sps:$4 sm:$0xff]  }
0x129c   : > { %v6378_v45 = vmul.f32 %v19931_v24, %v19927_v29  ;;  %18233 = vmatprep.subr.mxu0 %v20644_v34  ;;  %v18926_v29 = vld [vmem:[%s21324_s10 + $0x64] ss:$16 sps:$4 sm:$0xff]   ;;  %v18936_v24 = vld [vmem:[%s21324_s10 + $0x1e0] ss:$16 sps:$4 sm:$0xff]  }
0x129e   : > { %18221 = vmatmul.mubr.msk.f32.vlgmr.msra.gmra.mxu1 %vm4351_vm2, %v6378_v45  ;;  %18226 = vmatmul.mubr.msk.f32.vlgmr.msra.gmra.mxu0 %vm4196_vm1, %v6528_v39  ;;  %v18927_v39 = vld [vmem:[%s21324_s10 + $0x40] ss:$16 sps:$4 sm:$0xff]   ;;  %v18941_v45 = vld [vmem:[%s21324_s10 + $0x1c4] ss:$16 sps:$4 sm:$0xff]  }
0x129f   : > { %18229 = vmatpush3.xpose.msk.msra.mxu1 %vm4196_vm1, %v6608_v49  ;;  %18230 = vmatprep.mubr.msk.f32.mxu1 %vm20645_vm0, %v20644_v34  ;;  %v18929_v49 = vld [vmem:[%s21324_s10 + $0x44] ss:$16 sps:$4 sm:$0xff]  }
0x12a0   : > { %18238 = vmatprep.subr.mxu1 %v20644_v34  ;;  %18235 = vmatprep.mubr.msk.f32.mxu0 %vm20645_vm0, %v20644_v34 }
0x12a2   : > { %18231 = vmatmul.mubr.msk.f32.vlgmr.msra.gmra.mxu1 %vm4196_vm1, %v6606_v62  ;;  %v18939_v62 = vld [vmem:[%s21324_s10 + $0x1c0] ss:$16 sps:$4 sm:$0xff]  }
0x12a3   : > { %18240 = vmatprep.mubr.msk.f32.mxu1 %vm20645_vm0, %v20644_v34 }
0x135a   : > { %v6448_v46 = vpop.f32.mrf.mxu0 }
0x135b   : > { %6525 = vst.msk [vmem:[#allocation3 + $0x18] sm:$0xff] %vm4196_vm1, %v6448_v46  ;;  %v18944_v46 = vld [vmem:[%s21324_s10 + $0x1a4] ss:$16 sps:$4 sm:$0xff]  }
0x135c   : > { %v18217_v55 = vpop.f32.mrf.mxu0 }
0x135d   : > { %v18942_v55 = vld [vmem:[%s21324_s10 + $0x1a0] ss:$16 sps:$4 sm:$0xff]  }
0x135e   : > { %v6521_v37 = vpop.f32.mrf.mxu1  ;;  %v6601_v56 = vpop.f32.mrf.mxu0 }
0x135f   : > { %6526 = vst.msk [vmem:[#allocation3 + $0x38] sm:$0xff] %vm4196_vm1, %v6521_v37  ;;  %v6683_v57 = vmul.f32 0.125, %v6601_v56  ;;  %v18947_v37 = vld [vmem:[%s21324_s10 + $0x184] ss:$16 sps:$4 sm:$0xff]   ;;  %v18945_v56 = vld [vmem:[%s21324_s10 + $0x180] ss:$16 sps:$4 sm:$0xff]  }
0x1360   : > { %v18222_v18 = vpop.f32.mrf.mxu1  ;;  %v18227_v60 = vpop.f32.mrf.mxu0 }
0x1361   : > { %v6685_v61 = vsel %vm4351_vm2, %v6683_v57, -inf  ;;  %v18948_v18 = vld [vmem:[%s21324_s10 + $0x160] ss:$16 sps:$4 sm:$0xff]   ;;  %v18953_v60 = vld [vmem:[%s21324_s10 + $0x144] ss:$16 sps:$4 sm:$0xff]  }
0x1362   : > { %v6679_v0 = vpop.f32.mrf.mxu1  ;;  %6686 = vmax.xlane.f32.xlu0 %v6685_v61  ;;  %v18951_v61 = vld [vmem:[%s21324_s10 + $0x140] ss:$16 sps:$4 sm:$0xff]  }
0x1363   : > { %v6684_v1 = vmul.f32 0.125, %v6679_v0  ;;  %v18956_v0 = vld [vmem:[%s21324_s10 + $0x124] ss:$16 sps:$4 sm:$0xff]  }
0x1364   : > { %v18232_v20 = vpop.f32.mrf.mxu1 }
0x1365   : > { %v6688_v25 = vsel %vm4351_vm2, %v6684_v1, -inf  ;;  %v18959_v20 = vld [vmem:[%s21324_s10 + $0x104] ss:$16 sps:$4 sm:$0xff]  }
0x1366   : > { %6689 = vmax.xlane.f32.xlu1 %v6688_v25  ;;  %v18957_v25 = vld [vmem:[%s21324_s10 + $0x100] ss:$16 sps:$4 sm:$0xff]  }
0x1377   : > { %6785 = vrot.lane.b32.xlu1 %v22007_v3, %s20646_s23 }
0x137b   : > { %5527 = vrot.lane.b32.xlu1 %v22143_v38, %s20646_s23 }
0x137f   : > { %5529 = vrot.lane.b32.xlu1 %v22145_v9, %s20646_s23 }
0x1383   : > { %4860 = vrot.lane.b32.xlu1 %v22079_v17, %s20646_s23 }
0x13eb   : > { %v6687_v34 = vpop.xlane.xlu0 %6686 }
0x13ec   : > { %v6691_v40 = vsub.f32 %v6683_v57, %v6687_v34  ;;  %v18950_v57 = vld [vmem:[%s21324_s10 + $0x164] ss:$16 sps:$4 sm:$0xff]   ;;  %v18962_v34 = vld [vmem:[%s21324_s10 + $0xec] ss:$16 sps:$4 sm:$0xff]  }
0x13ee   : > { %v6693_v4 = vmul.f32 1.442695, %v6691_v40 }
0x13ef   : > { %v6690_v35 = vpop.xlane.xlu1 %6689 }
0x13f0   : > { %19932 = vpow2.f32 %v6693_v4  ;;  %v6692_v47 = vsub.f32 %v6684_v1, %v6690_v35  ;;  %v18954_v1 = vld [vmem:[%s21324_s10 + $0x120] ss:$16 sps:$4 sm:$0xff]   ;;  %v18960_v35 = vld [vmem:[%s21324_s10 + $0xe8] ss:$16 sps:$4 sm:$0xff]  }
0x13f2   : > { %v6695_v43 = vmul.f32 1.442695, %v6692_v47 }
0x13f3   : > { %v6786_v42 = vpop.permute.xlu1 %6785 }
0x13f4   : > { %19934 = vpow2.f32 %v6695_v43  ;;  %18239 = vmatpush3.msra.mxu1 %v6786_v42  ;;  %v18965_v43 = vld [vmem:[%s21324_s10 + $0xcc] ss:$16 sps:$4 sm:$0xff]   ;;  %v18963_v42 = vld [vmem:[%s21324_s10 + $0xc8] ss:$16 sps:$4 sm:$0xff]  }
0x13f7   : > { %v5528_v3 = vpop.permute.xlu1 %5527 }
0x13f8   : > { %5533 = vst.msk [vmem:[#allocation3 + $0x8] sm:$0xff] %vm4864_vm3, %v5528_v3  ;;  %v18968_v3 = vld [vmem:[%s21324_s10 + $0xac] ss:$16 sps:$4 sm:$0xff]  }
0x13fb   : > { %v5530_v38 = vpop.permute.xlu1 %5529 }
0x13fc   : > { %5534 = vst.msk [vmem:[#allocation3 + $0x28] sm:$0xff] %vm4864_vm3, %v5530_v38  ;;  %v18966_v38 = vld [vmem:[%s21324_s10 + $0xa8] ss:$16 sps:$4 sm:$0xff]  }
0x13fd   : > { %v19933_v9 = vpop.eup %19932 }
0x13fe   : > { %v6697_v17 = vsel %vm4351_vm2, %v19933_v9, 0.0 }
0x13ff   : > { %v4861_v51 = vpop.permute.xlu1 %4860  ;;  %6698 = vadd.xlane.f32.xlu0 %v6697_v17  ;;  %v18969_v17 = vld [vmem:[%s21324_s10 + $0x88] ss:$16 sps:$4 sm:$0xff]  }
0x1400   : > { %4866 = vst.msk [vmem:[#allocation3 + $0x20] sm:$0xff] %vm4864_vm3, %v4861_v51  ;;  %v18974_v51 = vld [vmem:[%s21324_s10 + $0x6c] ss:$16 sps:$4 sm:$0xff]  }
0x1401   : > { %v19935_v54 = vpop.eup %19934 }
0x1402   : > { %v6700_v12 = vsel %vm4351_vm2, %v19935_v54, 0.0 }
0x1403   : > { %6701 = vadd.xlane.f32.xlu0 %v6700_v12  ;;  %v6876_v19 = vld [vmem:[#allocation3 + $0x28] sm:$0xff]  ;;  %v18977_v12 = vld [vmem:[%s21324_s10 + $0x4c] ss:$16 sps:$4 sm:$0xff]  }
0x1407   : > { %v6875_v4 = vld [vmem:[#allocation3 + $0x20] sm:$0xff] }
0x1419   : > { %6708 = vrot.lane.b32.xlu0 %v22003_v59, %s20646_s23  ;;  %v18912_v59 = vld [vmem:[%s21324_s10 + $0xe0] ss:$16 sps:$4 sm:$0xff]  }
0x141d   : > { %4858 = vrot.lane.b32.xlu0 %v22077_v30, %s20646_s23  ;;  %v6872_v30 = vld [vmem:[#allocation3 + $0x8] sm:$0xff] }
0x141e   : > { %v22270_v26 = vpack.c.bf16 %v6876_v19, %v6872_v30  ;;  %v18986_v19 = vld [vmem:[%s21324_s10 + $0x1ec] ss:$16 sps:$4 sm:$0xff]  }
0x141f   : > { %v18992_v30 = vld [vmem:[%s21324_s10 + $0x1ac] ss:$16 sps:$4 sm:$0xff]  }
0x1488   : > { %v6699_v5 = vpop.xlane.xlu0 %6698 }
0x1489   : > { %19936 = vrcp.f32 %v6699_v5  ;;  %v18975_v5 = vld [vmem:[%s21324_s10 + $0x48] ss:$16 sps:$4 sm:$0xff]  }
0x148c   : > { %v6702_v50 = vpop.xlane.xlu0 %6701 }
0x148d   : > { %19938 = vrcp.f32 %v6702_v50  ;;  %v18980_v50 = vld [vmem:[%s21324_s10 + $0x2c] ss:$16 sps:$4 sm:$0xff]  }
0x1490   : > { %v6709_v63 = vpop.permute.xlu0 %6708 }
0x1491   : > { %18234 = vmatpush3.msra.mxu0 %v6709_v63  ;;  %v18983_v63 = vld [vmem:[%s21324_s10 + $0xc] ss:$16 sps:$4 sm:$0xff]  }
0x1492   : > { %7673 = vmatprep.subr.bf16.mxu0 %v18914_v7  ;;  %v18978_v7 = vld [vmem:[%s21324_s10 + $0x28] ss:$16 sps:$4 sm:$0xff]  }
0x1494   : > { %v4859_v2 = vpop.permute.xlu0 %4858 }
0x1495   : > { %4865 = vst.msk [vmem:[#allocation3] sm:$0xff] %vm4864_vm3, %v4859_v2  ;;  %v18981_v2 = vld [vmem:[%s21324_s10 + $0x8] ss:$16 sps:$4 sm:$0xff]  }
0x1496   : > { %v19937_v21 = vpop.eup %19936 }
0x1497   : > { %v6705_v22 = vmul.f32 %v19937_v21, %v19933_v9  ;;  %v18971_v9 = vld [vmem:[%s21324_s10 + $0x8c] ss:$16 sps:$4 sm:$0xff]   ;;  %v18984_v21 = vld [vmem:[%s21324_s10 + $0x1e8] ss:$16 sps:$4 sm:$0xff]  }
0x1499   : > { %18236 = vmatmul.mubr.msk.f32.vlgmr.msra.gmra.mxu0 %vm4351_vm2, %v6705_v22  ;;  %v18987_v22 = vld [vmem:[%s21324_s10 + $0x1c8] ss:$16 sps:$4 sm:$0xff]  }
0x149a   : > { %v19939_v28 = vpop.eup %19938  ;;  %7674 = vmatpush1.bf16.msra.mxu0 %v18912_v59  ;;  %7705 = vmatprep.mubr.bf16.mxu0 %v22270_v26  ;;  %v18989_v59 = vld [vmem:[%s21324_s10 + $0x1cc] ss:$16 sps:$4 sm:$0xff]  }
0x149b   : > { %7675 = vmatprep.subr.bf16.mxu0 %v18917_v23  ;;  %v6706_v58 = vmul.f32 %v19939_v28, %v19935_v54  ;;  %v18972_v54 = vld [vmem:[%s21324_s10 + $0x68] ss:$16 sps:$4 sm:$0xff]  }
0x149c   : > { %v6871_v40 = vld [vmem:[#allocation3] sm:$0xff] }
0x149d   : > { %18241 = vmatmul.mubr.msk.f32.vlgmr.msra.gmra.mxu1 %vm4351_vm2, %v6706_v58  ;;  %v22306_v47 = vpack.c.bf16 %v6875_v4, %v6871_v40  ;;  %v18990_v23 = vld [vmem:[%s21324_s10 + $0x1a8] ss:$16 sps:$4 sm:$0xff]   ;;  %v19041_v40 = vld [vmem:[%s21324_s10 + $0x380] ss:$16 sps:$4 sm:$0xff]  }
0x149e   : > { %7676 = vmatpush1.bf16.msra.mxu0 %v18915_v16  ;;  %v18993_v28 = vld [vmem:[%s21324_s10 + $0x188] ss:$16 sps:$4 sm:$0xff]   ;;  %v18998_v16 = vld [vmem:[%s21324_s10 + $0x16c] ss:$16 sps:$4 sm:$0xff]   ;;  %v19044_v4 = vld [vmem:[%s21324_s10 + $0x360] ss:$16 sps:$4 sm:$0xff]  }
0x149f   : > { %7677 = vmatprep.subr.bf16.mxu0 %v18920_v27  ;;  %v18996_v58 = vld [vmem:[%s21324_s10 + $0x168] ss:$16 sps:$4 sm:$0xff]   ;;  %v19001_v27 = vld [vmem:[%s21324_s10 + $0x14c] ss:$16 sps:$4 sm:$0xff]  }
0x14a2   : > { %7678 = vmatpush1.bf16.msra.mxu0 %v18918_v33  ;;  %v18999_v33 = vld [vmem:[%s21324_s10 + $0x148] ss:$16 sps:$4 sm:$0xff]  }
0x14a3   : > { %7679 = vmatprep.subr.bf16.mxu0 %v18923_v10  ;;  %v19004_v10 = vld [vmem:[%s21324_s10 + $0x12c] ss:$16 sps:$4 sm:$0xff]  }
0x14a6   : > { %7680 = vmatpush1.bf16.msra.mxu0 %v18921_v36  ;;  %v19002_v36 = vld [vmem:[%s21324_s10 + $0x128] ss:$16 sps:$4 sm:$0xff]  }
0x14a7   : > { %7681 = vmatprep.subr.bf16.mxu0 %v18926_v29  ;;  %v19007_v29 = vld [vmem:[%s21324_s10 + $0x10c] ss:$16 sps:$4 sm:$0xff]  }
0x14aa   : > { %7682 = vmatpush1.bf16.msra.mxu0 %v18924_v41  ;;  %v19005_v41 = vld [vmem:[%s21324_s10 + $0x108] ss:$16 sps:$4 sm:$0xff]  }
0x14ab   : > { %7683 = vmatprep.subr.bf16.mxu0 %v18929_v49  ;;  %v19010_v49 = vld [vmem:[%s21324_s10 + $0x2e4] ss:$16 sps:$4 sm:$0xff]  }
0x14ac   : > { %7716 = vmatprep.subr.bf16.mxu1 %v19010_v49  ;;  %v19074_v49 = vld [vmem:[%s21324_s10 + $0x228] ss:$16 sps:$4 sm:$0xff]  }
0x14ae   : > { %7684 = vmatpush1.bf16.msra.mxu0 %v18927_v39  ;;  %v19008_v39 = vld [vmem:[%s21324_s10 + $0x2e0] ss:$16 sps:$4 sm:$0xff]  }
0x14af   : > { %7685 = vmatprep.subr.bf16.mxu0 %v18932_v52  ;;  %v19013_v52 = vld [vmem:[%s21324_s10 + $0x2c4] ss:$16 sps:$4 sm:$0xff]   ;;  %7717 = vmatpush1.bf16.msra.mxu1 %v19008_v39  ;;  %v19079_v39 = vld [vmem:[%s21324_s10 + $0x20c] ss:$16 sps:$4 sm:$0xff]  }
0x14b0   : > { %7718 = vmatprep.subr.bf16.mxu1 %v19013_v52  ;;  %v19077_v52 = vld [vmem:[%s21324_s10 + $0x208] ss:$16 sps:$4 sm:$0xff]  }
0x14b2   : > { %7686 = vmatpush1.bf16.msra.mxu0 %v18930_v44  ;;  %v19011_v44 = vld [vmem:[%s21324_s10 + $0x2c0] ss:$16 sps:$4 sm:$0xff]  }
0x14b3   : > { %7687 = vmatprep.subr.bf16.mxu0 %v18935_v53  ;;  %v19016_v53 = vld [vmem:[%s21324_s10 + $0x2a4] ss:$16 sps:$4 sm:$0xff]   ;;  %7719 = vmatpush1.bf16.msra.mxu1 %v19011_v44  ;;  %v19082_v44 = vld [vmem:[%s21324_s10 + $0x3ec] ss:$16 sps:$4 sm:$0xff]  }
0x14b4   : > { %7720 = vmatprep.subr.bf16.mxu1 %v19016_v53  ;;  %v19080_v53 = vld [vmem:[%s21324_s10 + $0x3e8] ss:$16 sps:$4 sm:$0xff]  }
0x14b6   : > { %7688 = vmatpush1.bf16.msra.mxu0 %v18933_v32  ;;  %v19014_v32 = vld [vmem:[%s21324_s10 + $0x2a0] ss:$16 sps:$4 sm:$0xff]  }
0x14b7   : > { %7689 = vmatprep.subr.bf16.mxu0 %v18938_v31  ;;  %v19019_v31 = vld [vmem:[%s21324_s10 + $0x284] ss:$16 sps:$4 sm:$0xff]   ;;  %7721 = vmatpush1.bf16.msra.mxu1 %v19014_v32  ;;  %v19085_v32 = vld [vmem:[%s21324_s10 + $0x3cc] ss:$16 sps:$4 sm:$0xff]  }
0x14b8   : > { %7722 = vmatprep.subr.bf16.mxu1 %v19019_v31  ;;  %v19083_v31 = vld [vmem:[%s21324_s10 + $0x3c8] ss:$16 sps:$4 sm:$0xff]  }
0x14ba   : > { %7690 = vmatpush2.bf16.msra.mxu0 %v18936_v24  ;;  %v19017_v24 = vld [vmem:[%s21324_s10 + $0x280] ss:$16 sps:$4 sm:$0xff]  }
0x14bb   : > { %7691 = vmatprep.subr.bf16.mxu0 %v18941_v45  ;;  %v19022_v45 = vld [vmem:[%s21324_s10 + $0x264] ss:$16 sps:$4 sm:$0xff]   ;;  %7723 = vmatpush1.bf16.msra.mxu1 %v19017_v24  ;;  %v19088_v24 = vld [vmem:[%s21324_s10 + $0x3ac] ss:$16 sps:$4 sm:$0xff]  }
0x14bc   : > { %7724 = vmatprep.subr.bf16.mxu1 %v19022_v45  ;;  %v19086_v45 = vld [vmem:[%s21324_s10 + $0x3a8] ss:$16 sps:$4 sm:$0xff]  }
0x14be   : > { %7692 = vmatpush2.bf16.msra.mxu0 %v18939_v62  ;;  %v19020_v62 = vld [vmem:[%s21324_s10 + $0x260] ss:$16 sps:$4 sm:$0xff]  }
0x14bf   : > { %7693 = vmatprep.subr.bf16.mxu0 %v18944_v46  ;;  %v19025_v46 = vld [vmem:[%s21324_s10 + $0x244] ss:$16 sps:$4 sm:$0xff]   ;;  %7725 = vmatpush1.bf16.msra.mxu1 %v19020_v62  ;;  %v19091_v62 = vld [vmem:[%s21324_s10 + $0x38c] ss:$16 sps:$4 sm:$0xff]  }
0x14c0   : > { %7726 = vmatprep.subr.bf16.mxu1 %v19025_v46  ;;  %v19089_v46 = vld [vmem:[%s21324_s10 + $0x388] ss:$16 sps:$4 sm:$0xff]  }
0x14c2   : > { %7694 = vmatpush2.bf16.msra.mxu0 %v18942_v55  ;;  %v19023_v55 = vld [vmem:[%s21324_s10 + $0x240] ss:$16 sps:$4 sm:$0xff]  }
0x14c3   : > { %7695 = vmatprep.subr.bf16.mxu0 %v18947_v37  ;;  %v19028_v37 = vld [vmem:[%s21324_s10 + $0x224] ss:$16 sps:$4 sm:$0xff]   ;;  %7727 = vmatpush1.bf16.msra.mxu1 %v19023_v55  ;;  %v19094_v55 = vld [vmem:[%s21324_s10 + $0x36c] ss:$16 sps:$4 sm:$0xff]  }
0x14c4   : > { %7728 = vmatprep.subr.bf16.mxu1 %v19028_v37  ;;  %v19092_v37 = vld [vmem:[%s21324_s10 + $0x368] ss:$16 sps:$4 sm:$0xff]  }
0x14c6   : > { %7696 = vmatpush2.bf16.msra.mxu0 %v18945_v56  ;;  %v19026_v56 = vld [vmem:[%s21324_s10 + $0x220] ss:$16 sps:$4 sm:$0xff]  }
0x14c7   : > { %7697 = vmatprep.subr.bf16.mxu0 %v18950_v57  ;;  %v19031_v57 = vld [vmem:[%s21324_s10 + $0x204] ss:$16 sps:$4 sm:$0xff]   ;;  %7729 = vmatpush1.bf16.msra.mxu1 %v19026_v56  ;;  %v19097_v56 = vld [vmem:[%s21324_s10 + $0x34c] ss:$16 sps:$4 sm:$0xff]  }
0x14c8   : > { %7730 = vmatprep.subr.bf16.mxu1 %v19031_v57  ;;  %v19095_v57 = vld [vmem:[%s21324_s10 + $0x348] ss:$16 sps:$4 sm:$0xff]  }
0x14ca   : > { %7698 = vmatpush2.bf16.msra.mxu0 %v18948_v18  ;;  %v19029_v18 = vld [vmem:[%s21324_s10 + $0x200] ss:$16 sps:$4 sm:$0xff]  }
0x14cb   : > { %7699 = vmatprep.subr.bf16.mxu0 %v18953_v60  ;;  %v19034_v60 = vld [vmem:[%s21324_s10 + $0x3e4] ss:$16 sps:$4 sm:$0xff]   ;;  %7731 = vmatpush1.bf16.msra.mxu1 %v19029_v18  ;;  %v19100_v18 = vld [vmem:[%s21324_s10 + $0x32c] ss:$16 sps:$4 sm:$0xff]  }
0x14cc   : > { %7732 = vmatprep.subr.bf16.mxu1 %v19034_v60  ;;  %v19098_v60 = vld [vmem:[%s21324_s10 + $0x328] ss:$16 sps:$4 sm:$0xff]  }
0x14ce   : > { %7700 = vmatpush2.bf16.msra.mxu0 %v18951_v61  ;;  %v19032_v61 = vld [vmem:[%s21324_s10 + $0x3e0] ss:$16 sps:$4 sm:$0xff]  }
0x14cf   : > { %7701 = vmatprep.subr.bf16.mxu0 %v18956_v0  ;;  %v19037_v0 = vld [vmem:[%s21324_s10 + $0x3c4] ss:$16 sps:$4 sm:$0xff]   ;;  %7733 = vmatpush2.bf16.msra.mxu1 %v19032_v61  ;;  %v19103_v61 = vld [vmem:[%s21324_s10 + $0x30c] ss:$16 sps:$4 sm:$0xff]  }
0x14d0   : > { %7734 = vmatprep.subr.bf16.mxu1 %v19037_v0  ;;  %v19101_v0 = vld [vmem:[%s21324_s10 + $0x308] ss:$16 sps:$4 sm:$0xff]  }
0x14d2   : > { %7702 = vmatpush2.bf16.msra.mxu0 %v18954_v1  ;;  %v19035_v1 = vld [vmem:[%s21324_s10 + $0x3c0] ss:$16 sps:$4 sm:$0xff]  }
0x14d3   : > { %7703 = vmatprep.subr.bf16.mxu0 %v18959_v20  ;;  %v19040_v20 = vld [vmem:[%s21324_s10 + $0x3a4] ss:$16 sps:$4 sm:$0xff]   ;;  %7735 = vmatpush2.bf16.msra.mxu1 %v19035_v1 }
0x14d4   : > { %7736 = vmatprep.subr.bf16.mxu1 %v19040_v20 }
0x14d6   : > { %7704 = vmatpush2.bf16.msra.mxu0 %v18957_v25  ;;  %v19038_v25 = vld [vmem:[%s21324_s10 + $0x3a0] ss:$16 sps:$4 sm:$0xff]  }
0x14d7   : > { %7759 = vmatprep.subr.bf16.mxu0 %v18962_v34  ;;  %v19043_v34 = vld [vmem:[%s21324_s10 + $0x384] ss:$16 sps:$4 sm:$0xff]   ;;  %7737 = vmatpush2.bf16.msra.mxu1 %v19038_v25 }
0x14d8   : > { %7738 = vmatprep.subr.bf16.mxu1 %v19043_v34 }
0x14d9   : > { %7706 = vmatmul.mubr.bf16.vlgmr.msra.gmra.mxu0 %v22306_v47 }
0x14da   : > { %7760 = vmatpush1.bf16.msra.mxu0 %v18960_v35  ;;  %7791 = vmatprep.mubr.bf16.mxu0 %v22270_v26  ;;  %v18995_v26 = vld [vmem:[%s21324_s10 + $0x18c] ss:$16 sps:$4 sm:$0xff]   ;;  %v19046_v35 = vld [vmem:[%s21324_s10 + $0x364] ss:$16 sps:$4 sm:$0xff]  }
0x14db   : > { %7761 = vmatprep.subr.bf16.mxu0 %v18965_v43  ;;  %7739 = vmatpush2.bf16.msra.mxu1 %v19041_v40  ;;  %v19049_v43 = vld [vmem:[%s21324_s10 + $0x344] ss:$16 sps:$4 sm:$0xff]  }
0x14dc   : > { %7740 = vmatprep.subr.bf16.mxu1 %v19046_v35 }
0x14de   : > { %7762 = vmatpush1.bf16.msra.mxu0 %v18963_v42  ;;  %v19050_v42 = vld [vmem:[%s21324_s10 + $0x320] ss:$16 sps:$4 sm:$0xff]  }
0x14df   : > { %7763 = vmatprep.subr.bf16.mxu0 %v18968_v3  ;;  %7741 = vmatpush2.bf16.msra.mxu1 %v19044_v4  ;;  %v19052_v3 = vld [vmem:[%s21324_s10 + $0x324] ss:$16 sps:$4 sm:$0xff]  }
0x14e0   : > { %7742 = vmatprep.subr.bf16.mxu1 %v19049_v43  ;;  %v7011_v4 = vld [vmem:[%s24077_s30] sm:$0xf] }
0x14e2   : > { %7764 = vmatpush1.bf16.msra.mxu0 %v18966_v38 }
0x14e3   : > { %7765 = vmatprep.subr.bf16.mxu0 %v18971_v9  ;;  %v19053_v9 = vld [vmem:[%s21324_s10 + $0x300] ss:$16 sps:$4 sm:$0xff]  }
0x14e6   : > { %7766 = vmatpush1.bf16.msra.mxu0 %v18969_v17  ;;  %v19055_v17 = vld [vmem:[%s21324_s10 + $0x304] ss:$16 sps:$4 sm:$0xff]  }
0x14e7   : > { %7767 = vmatprep.subr.bf16.mxu0 %v18974_v51 }
0x14ea   : > { %7768 = vmatpush1.bf16.msra.mxu0 %v18972_v54 }
0x14eb   : > { %7769 = vmatprep.subr.bf16.mxu0 %v18977_v12  ;;  %v19058_v12 = vld [vmem:[%s21324_s10 + $0x2ec] ss:$16 sps:$4 sm:$0xff]  }
0x14ee   : > { %7770 = vmatpush1.bf16.msra.mxu0 %v18975_v5 }
0x14ef   : > { %7771 = vmatprep.subr.bf16.mxu0 %v18980_v50 }
0x14f2   : > { %7772 = vmatpush1.bf16.msra.mxu0 %v18978_v7 }
0x14f3   : > { %7773 = vmatprep.subr.bf16.mxu0 %v18983_v63 }
0x14f6   : > { %7774 = vmatpush1.bf16.msra.mxu0 %v18981_v2 }
0x14f7   : > { %7775 = vmatprep.subr.bf16.mxu0 %v18986_v19 }
0x14fa   : > { %7776 = vmatpush2.bf16.msra.mxu0 %v18984_v21 }
0x14fb   : > { %7777 = vmatprep.subr.bf16.mxu0 %v18989_v59 }
0x14fe   : > { %7778 = vmatpush2.bf16.msra.mxu0 %v18987_v22 }
0x14ff   : > { %7779 = vmatprep.subr.bf16.mxu0 %v18992_v30 }
0x1502   : > { %7780 = vmatpush2.bf16.msra.mxu0 %v18990_v23  ;;  %v19061_v23 = vld [vmem:[%s21324_s10 + $0x2cc] ss:$16 sps:$4 sm:$0xff]  }
0x1503   : > { %7781 = vmatprep.subr.bf16.mxu0 %v18995_v26  ;;  %v19059_v26 = vld [vmem:[%s21324_s10 + $0x2c8] ss:$16 sps:$4 sm:$0xff]  }
0x1506   : > { %7782 = vmatpush2.bf16.msra.mxu0 %v18993_v28  ;;  %v19064_v28 = vld [vmem:[%s21324_s10 + $0x2ac] ss:$16 sps:$4 sm:$0xff]  }
0x1507   : > { %7783 = vmatprep.subr.bf16.mxu0 %v18998_v16  ;;  %v19062_v16 = vld [vmem:[%s21324_s10 + $0x2a8] ss:$16 sps:$4 sm:$0xff]  }
0x150a   : > { %7784 = vmatpush2.bf16.msra.mxu0 %v18996_v58  ;;  %v19067_v58 = vld [vmem:[%s21324_s10 + $0x28c] ss:$16 sps:$4 sm:$0xff]  }
0x150b   : > { %7785 = vmatprep.subr.bf16.mxu0 %v19001_v27  ;;  %v19065_v27 = vld [vmem:[%s21324_s10 + $0x288] ss:$16 sps:$4 sm:$0xff]  }
0x150e   : > { %7786 = vmatpush2.bf16.msra.mxu0 %v18999_v33  ;;  %v19070_v33 = vld [vmem:[%s21324_s10 + $0x26c] ss:$16 sps:$4 sm:$0xff]  }
0x150f   : > { %7787 = vmatprep.subr.bf16.mxu0 %v19004_v10  ;;  %v19068_v10 = vld [vmem:[%s21324_s10 + $0x268] ss:$16 sps:$4 sm:$0xff]  }
0x1512   : > { %7788 = vmatpush2.bf16.msra.mxu0 %v19002_v36  ;;  %v19073_v36 = vld [vmem:[%s21324_s10 + $0x24c] ss:$16 sps:$4 sm:$0xff]  }
0x1513   : > { %7789 = vmatprep.subr.bf16.mxu0 %v19007_v29  ;;  %v19071_v29 = vld [vmem:[%s21324_s10 + $0x248] ss:$16 sps:$4 sm:$0xff]  }
0x1516   : > { %7790 = vmatpush2.bf16.msra.mxu0 %v19005_v41  ;;  %v19076_v41 = vld [vmem:[%s21324_s10 + $0x22c] ss:$16 sps:$4 sm:$0xff]  }
0x1519   : > { %7792 = vmatmul.mubr.bf16.vlgmr.msra.gmra.mxu0 %v22306_v47  ;;  %v19047_v47 = vld [vmem:[%s21324_s10 + $0x340] ss:$16 sps:$4 sm:$0xff]  }
0x151a   : > { %7743 = vmatpush2.bf16.msra.mxu1 %v19047_v47  ;;  %v7020_v47 = vrot.slane %v7011_v4, %v21502_v11 }
0x151b   : > { %7744 = vmatprep.subr.bf16.mxu1 %v19052_v3 }
0x151e   : > { %7745 = vmatpush2.bf16.msra.mxu1 %v19050_v42  ;;  %v7016_v42 = vrot.slane %v7011_v4, %v21508_v14 }
0x151f   : > { %7746 = vmatprep.subr.bf16.mxu1 %v19055_v17 }
0x1522   : > { %7747 = vmatpush2.bf16.msra.mxu1 %v19053_v9 }
0x1523   : > { %7802 = vmatprep.subr.bf16.mxu1 %v19058_v12 }
0x1559   : > { %v6780_v38 = vpop.f32.mrf.mxu0 }
0x155a   : > { %6863 = vrot.lane.b32.xlu0 %v6780_v38, %s20646_s23 }
0x155b   : > { %v18237_v51 = vpop.f32.mrf.mxu0 }
0x155c   : > { %v7024_v51 = vrot.slane %v7011_v4, %v21511_v15 }
0x155d   : > { %v6857_v54 = vpop.f32.mrf.mxu1 }
0x155e   : > { %6865 = vrot.lane.b32.xlu1 %v6857_v54, %s20646_s23  ;;  %6195 = vrot.lane.b32.xlu0 %v22215_v48, %s20646_s23 }
0x155f   : > { %v18242_v5 = vpop.f32.mrf.mxu1 }
0x1562   : > { %6197 = vrot.lane.b32.xlu1 %v22217_v8, %s20646_s23  ;;  %v19056_v8 = vld [vmem:[%s21324_s10 + $0x2e8] ss:$16 sps:$4 sm:$0xff]   ;;  %s24079_s10 = scalar_lea.vmem [#allocation24], %s21289_s19  ;;  %s24080_s19 = sld [smem:[#allocation44_spill]] }
0x1568   : > { %p17998_p6 = scmp.ne.s32.totalorder %s24080_s19, 2 }
0x1599   : > { %v7707_v1 = vpop.f32.mrf.mxu0 }
0x159a   : > { %v7708_v17 = vadd.f32 %v7707_v1, %v7016_v42  ;;  %v8081_v1 = vld [vmem:[%s21340_s8 + $0x380] sm:$0xff] }
0x159b   : > { %v7709_v20 = vpop.f32.mrf.mxu0 }
0x159c   : > { %v7710_v38 = vadd.f32 %v7709_v20, %v7020_v47  ;;  %v8089_v20 = vld [vmem:[%s21340_s8 + $0x3c0] sm:$0xff] }
0x159d   : > { %v7711_v25 = vpop.f32.mrf.mxu0 }
0x159f   : > { %v7713_v40 = vpop.f32.mrf.mxu0 }
0x15a0   : > { %v7714_v5 = vadd.f32 %v7713_v40, %v7020_v47  ;;  %v17055_v40 = vcombine.high %v8081_v1, %v8089_v20  ;;  %v8073_v47 = vld [vmem:[%s21340_s8 + $0x340] sm:$0xff] }
0x15a2   : > { %11125 = vmatprep.subr.bf16.mxu0 %v17055_v40  ;;  %v7977_v40 = vld [vmem:[%s21340_s8 + $0x40] sm:$0xff] }
0x15cc   : > { %v6864_v50 = vpop.permute.xlu0 %6863 }
0x15cd   : > { %6869 = vst.msk [vmem:[#allocation3 + $0x18] sm:$0xff] %vm4864_vm3, %v6864_v50  ;;  %v7028_v50 = vrot.slane %v7011_v4, %v21505_v13  ;;  %v8345_v4 = vld [vmem:[%s21340_s8 + $0xbc0] sm:$0xff] }
0x15d0   : > { %v6866_v7 = vpop.permute.xlu1 %6865  ;;  %v6196_v63 = vpop.permute.xlu0 %6195 }
0x15d1   : > { %6870 = vst.msk [vmem:[#allocation3 + $0x38] sm:$0xff] %vm4864_vm3, %v6866_v7  ;;  %6201 = vst.msk [vmem:[#allocation3 + $0x10] sm:$0xff] %vm4864_vm3, %v6196_v63 }
0x15d4   : > { %v6198_v2 = vpop.permute.xlu1 %6197  ;;  %v6874_v48 = vld [vmem:[#allocation3 + $0x18] sm:$0xff] }
0x15d5   : > { %6202 = vst.msk [vmem:[#allocation3 + $0x30] sm:$0xff] %vm4864_vm3, %v6198_v2  ;;  %v7712_v2 = vadd.f32 %v7711_v25, %v7016_v42  ;;  %v8337_v25 = vld [vmem:[%s21340_s8 + $0xb80] sm:$0xff] }
0x15d6   : > { %v17311_v42 = vcombine.high %v8337_v25, %v8345_v4 }
0x15d8   : > { %v6878_v19 = vld [vmem:[#allocation3 + $0x38] sm:$0xff]  ;;  %v6873_v59 = vld [vmem:[#allocation3 + $0x10] sm:$0xff] }
0x15d9   : > { %v6882_v21 = vpack.c.bf16 %v6878_v19, %v6874_v48  ;;  %v7793_v43 = vpop.f32.mrf.mxu0  ;;  %v20073_v19 = vld [vmem:[#allocation2] sm:$0xff] }
0x15da   : > { %v7794_v48 = vadd.f32 %v7793_v43, %v7024_v51  ;;  %v17310_v43 = vcombine.low %v8337_v25, %v8345_v4  ;;  %v8225_v4 = vld [vmem:[%s21340_s8 + $0x800] sm:$0xff] }
0x15db   : > { %7748 = vmatprep.mubr.bf16.mxu1 %v6882_v21  ;;  %v7795_v9 = vpop.f32.mrf.mxu0 }
0x15dc   : > { %v6877_v22 = vld [vmem:[#allocation3 + $0x30] sm:$0xff] }
0x15dd   : > { %v22385_v30 = vpack.c.bf16 %v6877_v22, %v6873_v59  ;;  %v7797_v7 = vpop.f32.mrf.mxu0  ;;  %v7796_v22 = vadd.f32 %v7795_v9, %v7028_v50  ;;  %v8329_v9 = vld [vmem:[%s21340_s8 + $0xb40] sm:$0xff] }
0x15df   : > { %7749 = vmatmul.mubr.bf16.vlgmr.msra.gmra.mxu1 %v22385_v30 }
0x15e0   : > { %7803 = vmatpush1.bf16.msra.mxu1 %v19056_v8  ;;  %7834 = vmatprep.mubr.bf16.mxu1 %v6882_v21 }
0x15e1   : > { %7804 = vmatprep.subr.bf16.mxu1 %v19061_v23  ;;  %v20074_v23 = vld [vmem:[#allocation2 + $0x30] sm:$0xff] }
0x15e4   : > { %7805 = vmatpush1.bf16.msra.mxu1 %v19059_v26 }
0x15e5   : > { %7806 = vmatprep.subr.bf16.mxu1 %v19064_v28 }
0x15e8   : > { %7807 = vmatpush1.bf16.msra.mxu1 %v19062_v16 }
0x15e9   : > { %7808 = vmatprep.subr.bf16.mxu1 %v19067_v58  ;;  %v7798_v58 = vadd.f32 %v7797_v7, %v7024_v51 }
0x15ec   : > { %7809 = vmatpush1.bf16.msra.mxu1 %v19065_v27 }
0x15ed   : > { %7810 = vmatprep.subr.bf16.mxu1 %v19070_v33  ;;  %v20075_v33 = vld [vmem:[#allocation2 + $0x20] sm:$0xff] }
0x15f0   : > { %7811 = vmatpush1.bf16.msra.mxu1 %v19068_v10 }
0x15f1   : > { %7812 = vmatprep.subr.bf16.mxu1 %v19073_v36  ;;  %v20076_v36 = vld [vmem:[#allocation2 + $0x18] sm:$0xff] }
0x15f4   : > { %7813 = vmatpush1.bf16.msra.mxu1 %v19071_v29 }
0x15f5   : > { %7814 = vmatprep.subr.bf16.mxu1 %v19076_v41 }
0x15f8   : > { %7815 = vmatpush1.bf16.msra.mxu1 %v19074_v49 }
0x15f9   : > { %7816 = vmatprep.subr.bf16.mxu1 %v19079_v39 }
0x15fc   : > { %7817 = vmatpush1.bf16.msra.mxu1 %v19077_v52 }
0x15fd   : > { %7818 = vmatprep.subr.bf16.mxu1 %v19082_v44  ;;  %v20077_v44 = vld [vmem:[#allocation2 + $0x8] sm:$0xff] }
0x1600   : > { %7819 = vmatpush2.bf16.msra.mxu1 %v19080_v53 }
0x1601   : > { %7820 = vmatprep.subr.bf16.mxu1 %v19085_v32  ;;  %v20078_v32 = vld [vmem:[#allocation2 + $0x10] sm:$0xff] }
0x1604   : > { %7821 = vmatpush2.bf16.msra.mxu1 %v19083_v31 }
0x1605   : > { %7822 = vmatprep.subr.bf16.mxu1 %v19088_v24 }
0x1608   : > { %7823 = vmatpush2.bf16.msra.mxu1 %v19086_v45 }
0x1609   : > { %7824 = vmatprep.subr.bf16.mxu1 %v19091_v62 }
0x160c   : > { %7825 = vmatpush2.bf16.msra.mxu1 %v19089_v46  ;;  %v20079_v46 = vld [vmem:[#allocation2 + $0x28] sm:$0xff] }
0x160d   : > { %7826 = vmatprep.subr.bf16.mxu1 %v19094_v55 }
0x1610   : > { %7827 = vmatpush2.bf16.msra.mxu1 %v19092_v37 }
0x1611   : > { %7828 = vmatprep.subr.bf16.mxu1 %v19097_v56 }
0x1614   : > { %7829 = vmatpush2.bf16.msra.mxu1 %v19095_v57 }
0x1615   : > { %7830 = vmatprep.subr.bf16.mxu1 %v19100_v18  ;;  %v20080_v18 = vld [vmem:[#allocation2 + $0x38] sm:$0xff] }
0x1618   : > { %7831 = vmatpush2.bf16.msra.mxu1 %v19098_v60 }
0x1619   : > { %7832 = vmatprep.subr.bf16.mxu1 %v19103_v61 }
0x161c   : > { %7833 = vmatpush2.bf16.msra.mxu1 %v19101_v0 }
0x161d   : > { %11168 = vmatprep.subr.bf16.mxu1 %v17311_v42 }
0x161f   : > { %7835 = vmatmul.mubr.bf16.vlgmr.msra.gmra.mxu1 %v22385_v30  ;;  %v7799_v30 = vpop.f32.mrf.mxu0 }
0x1620   : > { %v7800_v39 = vadd.f32 %v7799_v30, %v7028_v50  ;;  %11169 = vmatpush1.bf16.msra.mxu1 %v17310_v43 }
0x169f   : > { %v7750_v34 = vpop.f32.mrf.mxu1 }
0x16a0   : > { %v7751_v63 = vadd.f32 %v7750_v34, %v7708_v17  ;;  %v17054_v34 = vcombine.low %v8081_v1, %v8089_v20  ;;  %v8049_v17 = vld [vmem:[%s21340_s8 + $0x280] sm:$0xff] }
0x16a1   : > { %v7752_v35 = vpop.f32.mrf.mxu1 }
0x16a2   : > { %v7753_v54 = vadd.f32 %v7752_v35, %v7710_v38  ;;  %v22427_v26 = vadd.f32 %v20074_v23, %v7751_v63  ;;  %v8065_v35 = vld [vmem:[%s21340_s8 + $0x300] sm:$0xff]  ;;  %11126 = vmatpush1.bf16.msra.mxu0 %v17054_v34 }
0x16a3   : > { %v7754_v3 = vpop.f32.mrf.mxu1  ;;  %v8321_v38 = vld [vmem:[%s21340_s8 + $0xb00] sm:$0xff]  ;;  %v17038_v50 = vcombine.low %v8065_v35, %v8073_v47 }
0x16a4   : > { %v22425_v21 = vadd.f32 %v20073_v19, %v7753_v54  ;;  %v7755_v28 = vadd.f32 %v7754_v3, %v7712_v2  ;;  %v17039_v3 = vcombine.high %v8065_v35, %v8073_v47  ;;  %v17295_v51 = vcombine.high %v8321_v38, %v8329_v9  ;;  %v8057_v54 = vld [vmem:[%s21340_s8 + $0x2c0] sm:$0xff] }
0x16a5   : > { %v7756_v12 = vpop.f32.mrf.mxu1  ;;  %v17294_v7 = vcombine.low %v8321_v38, %v8329_v9  ;;  %v17023_v63 = vcombine.high %v8049_v17, %v8057_v54  ;;  %v8041_v19 = vld [vmem:[%s21340_s8 + $0x240] sm:$0xff] }
0x16a6   : > { %v7757_v8 = vadd.f32 %v7756_v12, %v7714_v5  ;;  %v7855_v49 = vadd.f32 %v22425_v21, %v22427_v26  ;;  %v22435_v53 = vadd.f32 %v20077_v44, %v7755_v28  ;;  %v8305_v12 = vld [vmem:[%s21340_s8 + $0xa80] sm:$0xff]  ;;  %11127 = vmatprep.subr.bf16.mxu0 %v17039_v3  ;;  %11170 = vmatprep.subr.bf16.mxu1 %v17295_v51 }
0x16a7   : > { %v8313_v5 = vld [vmem:[%s21340_s8 + $0xac0] sm:$0xff]  ;;  %11128 = vmatpush1.bf16.msra.mxu0 %v17038_v50  ;;  %11171 = vmatpush1.bf16.msra.mxu1 %v17294_v7 }
0x16a8   : > { %v22429_v10 = vadd.f32 %v20075_v33, %v7757_v8  ;;  %v17279_v2 = vcombine.high %v8305_v12, %v8313_v5  ;;  %v8289_v8 = vld [vmem:[%s21340_s8 + $0xa00] sm:$0xff]  ;;  %11129 = vmatprep.subr.bf16.mxu0 %v17023_v63  ;;  %v17278_v30 = vcombine.low %v8305_v12, %v8313_v5 }
0x16a9   : > { %v8281_v33 = vld [vmem:[%s21340_s8 + $0x9c0] sm:$0xff] }
0x16aa   : > { %v7860_v57 = vadd.f32 %v22429_v10, %v22435_v53  ;;  %11172 = vmatprep.subr.bf16.mxu1 %v17279_v2  ;;  %v8009_v44 = vld [vmem:[%s21340_s8 + $0x140] sm:$0xff] }
0x16ab   : > { %11173 = vmatpush1.bf16.msra.mxu1 %v17278_v30  ;;  %v7969_v34 = vld [vmem:[%s21340_s8] sm:$0xff] }
0x16ac   : > { %v8233_v35 = vld [vmem:[%s21340_s8 + $0x840] sm:$0xff]  ;;  %v16943_v42 = vcombine.high %v7969_v34, %v7977_v40 }
0x16ad   : > { %v17199_v3 = vcombine.high %v8225_v4, %v8233_v35  ;;  %v8209_v38 = vld [vmem:[%s21340_s8 + $0x780] sm:$0xff]  ;;  %v17198_v12 = vcombine.low %v8225_v4, %v8233_v35 }
0x16ae   : > { %v8217_v9 = vld [vmem:[%s21340_s8 + $0x7c0] sm:$0xff] }
0x16af   : > { %v8473_v51 = vld [vmem:[%s21340_s8 + $0xfc0] sm:$0xff]  ;;  %v17183_v5 = vcombine.high %v8209_v38, %v8217_v9  ;;  %v17182_v7 = vcombine.low %v8209_v38, %v8217_v9 }
0x16b0   : > { %v8185_v4 = vld [vmem:[%s21340_s8 + $0x6c0] sm:$0xff] }
0x16b1   : > { %v8433_v35 = vld [vmem:[%s21340_s8 + $0xe80] sm:$0xff] }
0x16b2   : > { %v8161_v9 = vld [vmem:[%s21340_s8 + $0x600] sm:$0xff] }
0x16df   : > { %v7836_v59 = vpop.f32.mrf.mxu1 }
0x16e0   : > { %v7837_v16 = vadd.f32 %v7836_v59, %v7794_v48  ;;  %v8033_v48 = vld [vmem:[%s21340_s8 + $0x200] sm:$0xff] }
0x16e1   : > { %v7838_v27 = vpop.f32.mrf.mxu1  ;;  %v8297_v59 = vld [vmem:[%s21340_s8 + $0xa40] sm:$0xff]  ;;  %v17007_v23 = vcombine.high %v8033_v48, %v8041_v19 }
0x16e2   : > { %v22431_v29 = vadd.f32 %v20076_v36, %v7837_v16  ;;  %v7839_v41 = vadd.f32 %v7838_v27, %v7796_v22  ;;  %v17022_v22 = vcombine.low %v8049_v17, %v8057_v54  ;;  %v17263_v28 = vcombine.high %v8289_v8, %v8297_v59  ;;  %v8017_v16 = vld [vmem:[%s21340_s8 + $0x180] sm:$0xff] }
0x16e3   : > { %v7840_v52 = vpop.f32.mrf.mxu1  ;;  %v8273_v27 = vld [vmem:[%s21340_s8 + $0x980] sm:$0xff]  ;;  %v17006_v36 = vcombine.low %v8033_v48, %v8041_v19  ;;  %v16942_v54 = vcombine.low %v7969_v34, %v7977_v40 }
0x16e4   : > { %v22437_v31 = vadd.f32 %v20078_v32, %v7839_v41  ;;  %v7841_v24 = vadd.f32 %v7840_v52, %v7798_v58  ;;  %v7856_v45 = vadd.f32 %v7855_v49, %v22431_v29  ;;  %v8025_v58 = vld [vmem:[%s21340_s8 + $0x1c0] sm:$0xff]  ;;  %11130 = vmatpush1.bf16.msra.mxu0 %v17022_v22  ;;  %v17262_v41 = vcombine.low %v8289_v8, %v8297_v59 }
0x16e5   : > { %v7842_v62 = vpop.f32.mrf.mxu1  ;;  %11131 = vmatprep.subr.bf16.mxu0 %v17007_v23  ;;  %v16991_v49 = vcombine.high %v8017_v16, %v8025_v58  ;;  %11174 = vmatprep.subr.bf16.mxu1 %v17263_v28  ;;  %v8001_v52 = vld [vmem:[%s21340_s8 + $0x100] sm:$0xff] }
0x16e6   : > { %v22440_v55 = vadd.f32 %v20079_v46, %v7841_v24  ;;  %v7843_v37 = vadd.f32 %v7842_v62, %v7800_v39  ;;  %v7857_v56 = vadd.f32 %v7856_v45, %v22437_v31  ;;  %v17247_v39 = vcombine.high %v8273_v27, %v8281_v33  ;;  %v8257_v32 = vld [vmem:[%s21340_s8 + $0x900] sm:$0xff]  ;;  %11175 = vmatpush1.bf16.msra.mxu1 %v17262_v41 }
0x16e7   : > { %v8265_v24 = vld [vmem:[%s21340_s8 + $0x940] sm:$0xff]  ;;  %v16990_v45 = vcombine.low %v8017_v16, %v8025_v58  ;;  %v17246_v62 = vcombine.low %v8273_v27, %v8281_v33  ;;  %v16975_v46 = vcombine.high %v8001_v52, %v8009_v44 }
0x16e8   : > { %v22445_v60 = vadd.f32 %v20080_v18, %v7843_v37  ;;  %7858 = vadd.xlane.f32.xlu0 %v7857_v56  ;;  %v7861_v61 = vadd.f32 %v7860_v57, %v22440_v55  ;;  %11132 = vmatpush1.bf16.msra.mxu0 %v17006_v36  ;;  %v17231_v37 = vcombine.high %v8257_v32, %v8265_v24  ;;  %v7985_v56 = vld [vmem:[%s21340_s8 + $0x80] sm:$0xff] }
0x16e9   : > { %11133 = vmatprep.subr.bf16.mxu0 %v16991_v49  ;;  %11176 = vmatprep.subr.bf16.mxu1 %v17247_v39  ;;  %v7993_v57 = vld [vmem:[%s21340_s8 + $0xc0] sm:$0xff]  ;;  %v17230_v1 = vcombine.low %v8257_v32, %v8265_v24 }
0x16ea   : > { %v7862_v0 = vadd.f32 %v7861_v61, %v22445_v60  ;;  %v8241_v18 = vld [vmem:[%s21340_s8 + $0x880] sm:$0xff]  ;;  %11177 = vmatpush1.bf16.msra.mxu1 %v17246_v62  ;;  %v16959_v20 = vcombine.high %v7985_v56, %v7993_v57  ;;  %v16958_v47 = vcombine.low %v7985_v56, %v7993_v57 }
0x16eb   : > { %v8249_v61 = vld [vmem:[%s21340_s8 + $0x8c0] sm:$0xff]  ;;  %11178 = vmatprep.subr.bf16.mxu1 %v17231_v37 }
0x16ec   : > { %7863 = vadd.xlane.f32.xlu1 %v7862_v0  ;;  %11134 = vmatpush1.bf16.msra.mxu0 %v16990_v45  ;;  %v16974_v0 = vcombine.low %v8001_v52, %v8009_v44  ;;  %v17215_v25 = vcombine.high %v8241_v18, %v8249_v61  ;;  %v17214_v43 = vcombine.low %v8241_v18, %v8249_v61  ;;  %v8465_v17 = vld [vmem:[%s21340_s8 + $0xf80] sm:$0xff] }
0x16ed   : > { %11135 = vmatprep.subr.bf16.mxu0 %v16975_v46  ;;  %v17439_v50 = vcombine.high %v8465_v17, %v8473_v51  ;;  %v17438_v63 = vcombine.low %v8465_v17, %v8473_v51  ;;  %v8193_v57 = vld [vmem:[%s21340_s8 + $0x700] sm:$0xff] }
0x16ee   : > { %11179 = vmatpush1.bf16.msra.mxu1 %v17230_v1  ;;  %v8201_v18 = vld [vmem:[%s21340_s8 + $0x740] sm:$0xff] }
0x16ef   : > { %11180 = vmatprep.subr.bf16.mxu1 %v17215_v25  ;;  %v8449_v61 = vld [vmem:[%s21340_s8 + $0xf00] sm:$0xff] }
0x16f0   : > { %11136 = vmatpush1.bf16.msra.mxu0 %v16974_v0  ;;  %v17167_v0 = vcombine.high %v8193_v57, %v8201_v18  ;;  %v8457_v1 = vld [vmem:[%s21340_s8 + $0xf40] sm:$0xff] }
0x16f1   : > { %11137 = vmatprep.subr.bf16.mxu0 %v16959_v20  ;;  %v17166_v20 = vcombine.low %v8193_v57, %v8201_v18  ;;  %v17422_v25 = vcombine.low %v8449_v61, %v8457_v1  ;;  %v17423_v34 = vcombine.high %v8449_v61, %v8457_v1  ;;  %v8177_v40 = vld [vmem:[%s21340_s8 + $0x680] sm:$0xff] }
0x16f2   : > { %11181 = vmatpush1.bf16.msra.mxu1 %v17214_v43  ;;  %v8441_v43 = vld [vmem:[%s21340_s8 + $0xec0] sm:$0xff] }
0x16f3   : > { %11182 = vmatprep.subr.bf16.mxu1 %v17199_v3  ;;  %v17406_v3 = vcombine.low %v8433_v35, %v8441_v43  ;;  %v17407_v38 = vcombine.high %v8433_v35, %v8441_v43  ;;  %v8169_v17 = vld [vmem:[%s21340_s8 + $0x640] sm:$0xff] }
0x16f4   : > { %11138 = vmatpush1.bf16.msra.mxu0 %v16958_v47  ;;  %v17151_v47 = vcombine.high %v8177_v40, %v8185_v4  ;;  %v8417_v51 = vld [vmem:[%s21340_s8 + $0xe00] sm:$0xff] }
0x16f5   : > { %11139 = vmatprep.subr.bf16.mxu0 %v16943_v42  ;;  %v17150_v42 = vcombine.low %v8177_v40, %v8185_v4  ;;  %v8105_v1 = vld [vmem:[%s21340_s8 + $0x440] sm:$0xff] }
0x16f6   : > { %11183 = vmatpush1.bf16.msra.mxu1 %v17198_v12  ;;  %v17135_v12 = vcombine.high %v8161_v9, %v8169_v17 }
0x16f7   : > { %11184 = vmatprep.subr.bf16.mxu1 %v17439_v50  ;;  %v8145_v50 = vld [vmem:[%s21340_s8 + $0x580] sm:$0xff] }
0x16f8   : > { %11140 = vmatpush1.bf16.msra.mxu0 %v16942_v54  ;;  %v17134_v54 = vcombine.low %v8161_v9, %v8169_v17  ;;  %v22565_v17 = vld [vmem:[%s21340_s8 + $0xbc8] sm:$0xff] }
0x16f9   : > { %11141 = vmatprep.subr.bf16.mxu0 %v17183_v5  ;;  %v8425_v5 = vld [vmem:[%s21340_s8 + $0xe40] sm:$0xff] }
0x16fa   : > { %11185 = vmatpush2.bf16.msra.mxu1 %v17438_v63  ;;  %v17390_v63 = vcombine.low %v8417_v51, %v8425_v5 }
0x16fb   : > { %11186 = vmatprep.subr.bf16.mxu1 %v17423_v34 }
0x16fc   : > { %11142 = vmatpush2.bf16.msra.mxu0 %v17182_v7  ;;  %v8153_v7 = vld [vmem:[%s21340_s8 + $0x5c0] sm:$0xff] }
0x16fd   : > { %11143 = vmatprep.subr.bf16.mxu0 %v17167_v0  ;;  %v8097_v0 = vld [vmem:[%s21340_s8 + $0x400] sm:$0xff] }
0x16fe   : > { %11187 = vmatpush2.bf16.msra.mxu1 %v17422_v25  ;;  %v8361_v25 = vld [vmem:[%s21340_s8 + $0xc40] sm:$0xff]  ;;  %v17071_v4 = vcombine.high %v8097_v0, %v8105_v1 }
0x16ff   : > { %11188 = vmatprep.subr.bf16.mxu1 %v17407_v38  ;;  %v22560_v38 = vld [vmem:[%s21340_s8 + $0xb88] sm:$0xff] }
0x1700   : > { %11144 = vmatpush2.bf16.msra.mxu0 %v17166_v20  ;;  %v8353_v20 = vld [vmem:[%s21340_s8 + $0xc00] sm:$0xff] }
0x1701   : > { %11145 = vmatprep.subr.bf16.mxu0 %v17151_v47  ;;  %v17327_v35 = vcombine.high %v8353_v20, %v8361_v25  ;;  %v17070_v47 = vcombine.low %v8097_v0, %v8105_v1  ;;  %v17326_v43 = vcombine.low %v8353_v20, %v8361_v25 }
0x1702   : > { %11189 = vmatpush2.bf16.msra.mxu1 %v17406_v3  ;;  %v22557_v3 = vld [vmem:[%s21340_s8 + $0x3c8] sm:$0xff] }
0x1704   : > { %11146 = vmatpush2.bf16.msra.mxu0 %v17150_v42  ;;  %v22554_v42 = vld [vmem:[%s21340_s8 + $0x388] sm:$0xff] }
0x1705   : > { %11147 = vmatprep.subr.bf16.mxu0 %v17135_v12  ;;  %v17057_v9 = vcombine.high %v22554_v42, %v22557_v3  ;;  %v17313_v12 = vcombine.high %v22560_v38, %v22565_v17 }
0x1708   : > { %11148 = vmatpush2.bf16.msra.mxu0 %v17134_v54  ;;  %v17312_v54 = vcombine.low %v22560_v38, %v22565_v17 }
0x1771   : > { %v7859_v2 = vpop.xlane.xlu0 %7858 }
0x1772   : > { %v7865_v48 = vmul.f32 0.001953125, %v7859_v2  ;;  %v17391_v2 = vcombine.high %v8417_v51, %v8425_v5  ;;  %v17056_v51 = vcombine.low %v22554_v42, %v22557_v3  ;;  %v8042_v42 = vld [vmem:[%s21340_s8 + $0x248] sm:$0xff] }
0x1773   : > { %v8290_v3 = vld [vmem:[%s21340_s8 + $0xa08] sm:$0xff] }
0x1774   : > { %v22486_v19 = vsub.f32 %v22427_v26, %v7865_v48  ;;  %v22489_v8 = vsub.f32 %v22425_v21, %v7865_v48  ;;  %v22492_v59 = vsub.f32 %v22431_v29, %v7865_v48  ;;  %v22495_v30 = vsub.f32 %v22437_v31, %v7865_v48  ;;  %11190 = vmatprep.subr.bf16.mxu1 %v17391_v2 }
0x1775   : > { %v7864_v22 = vpop.xlane.xlu1 %7863  ;;  %v17119_v48 = vcombine.high %v8145_v50, %v8153_v7  ;;  %11191 = vmatpush2.bf16.msra.mxu1 %v17390_v63 }
0x1776   : > { %v7866_v23 = vmul.f32 0.001953125, %v7864_v22  ;;  %v7875_v28 = vmul.f32 %v22486_v19, %v22486_v19  ;;  %v7876_v16 = vmul.f32 %v22489_v8, %v22489_v8  ;;  %v7877_v58 = vmul.f32 %v22492_v59, %v22492_v59  ;;  %v8401_v22 = vld [vmem:[%s21340_s8 + $0xd80] sm:$0xff] }
0x1777   : > { %v7878_v49 = vmul.f32 %v22495_v30, %v22495_v30  ;;  %11149 = vmatprep.subr.bf16.mxu0 %v17119_v48 }
0x1778   : > { %v22504_v27 = vsub.f32 %v22435_v53, %v7866_v23  ;;  %v22507_v33 = vsub.f32 %v22429_v10, %v7866_v23  ;;  %v7883_v36 = vadd.f32 %v7876_v16, %v7875_v28  ;;  %v22510_v41 = vsub.f32 %v22440_v55, %v7866_v23  ;;  %v8129_v28 = vld [vmem:[%s21340_s8 + $0x500] sm:$0xff] }
0x1779   : > { %v22515_v52 = vsub.f32 %v22445_v60, %v7866_v23  ;;  %v8409_v23 = vld [vmem:[%s21340_s8 + $0xdc0] sm:$0xff] }
0x177a   : > { %v7884_v39 = vadd.f32 %v7883_v36, %v7877_v58  ;;  %v7879_v44 = vmul.f32 %v22504_v27, %v22504_v27  ;;  %v7880_v32 = vmul.f32 %v22507_v33, %v22507_v33  ;;  %v7881_v45 = vmul.f32 %v22510_v41, %v22510_v41  ;;  %v8137_v58 = vld [vmem:[%s21340_s8 + $0x540] sm:$0xff] }
0x177b   : > { %v7882_v46 = vmul.f32 %v22515_v52, %v22515_v52  ;;  %v17375_v16 = vcombine.high %v8401_v22, %v8409_v23  ;;  %v8385_v36 = vld [vmem:[%s21340_s8 + $0xd00] sm:$0xff] }
0x177c   : > { %v7885_v24 = vadd.f32 %v7884_v39, %v7878_v49  ;;  %v7888_v62 = vadd.f32 %v7880_v32, %v7879_v44  ;;  %v8393_v49 = vld [vmem:[%s21340_s8 + $0xd40] sm:$0xff]  ;;  %v17118_v39 = vcombine.low %v8145_v50, %v8153_v7  ;;  %v17374_v44 = vcombine.low %v8401_v22, %v8409_v23  ;;  %v7853_v22 = vld [vmem:[%s24078_s2] sm:$0xf] }
0x177d   : > { %v17103_v32 = vcombine.high %v8129_v28, %v8137_v58  ;;  %11192 = vmatprep.subr.bf16.mxu1 %v17375_v16  ;;  %v17358_v57 = vcombine.low %v8385_v36, %v8393_v49 }
0x177e   : > { %7886 = vadd.xlane.f32.xlu0 %v7885_v24  ;;  %v7889_v37 = vadd.f32 %v7888_v62, %v7881_v45  ;;  %v17359_v24 = vcombine.high %v8385_v36, %v8393_v49  ;;  %v8113_v45 = vld [vmem:[%s21340_s8 + $0x480] sm:$0xff]  ;;  %11150 = vmatpush2.bf16.msra.mxu0 %v17118_v39  ;;  %v7923_v49 = vrot.slane %v7853_v22, %v21505_v13 }
0x177f   : > { %v8121_v62 = vld [vmem:[%s21340_s8 + $0x4c0] sm:$0xff]  ;;  %11193 = vmatpush2.bf16.msra.mxu1 %v17374_v44  ;;  %11151 = vmatprep.subr.bf16.mxu0 %v17103_v32  ;;  %v7911_v44 = vrot.slane %v7853_v22, %v21508_v14 }
0x1780   : > { %v7890_v56 = vadd.f32 %v7889_v37, %v7882_v46  ;;  %v8369_v46 = vld [vmem:[%s21340_s8 + $0xc80] sm:$0xff]  ;;  %v17087_v18 = vcombine.high %v8113_v45, %v8121_v62  ;;  %11194 = vmatprep.subr.bf16.mxu1 %v17359_v24  ;;  %v17086_v34 = vcombine.low %v8113_v45, %v8121_v62  ;;  %v7919_v24 = vrot.slane %v7853_v22, %v21511_v15 }
0x1781   : > { %v8377_v37 = vld [vmem:[%s21340_s8 + $0xcc0] sm:$0xff] }
0x1782   : > { %7891 = vadd.xlane.f32.xlu0 %v7890_v56  ;;  %v17102_v56 = vcombine.low %v8129_v28, %v8137_v58  ;;  %v17343_v61 = vcombine.high %v8369_v46, %v8377_v37  ;;  %v17342_v40 = vcombine.low %v8369_v46, %v8377_v37  ;;  %v7854_v28 = vld [vmem:[%s24079_s10] sm:$0xf]  ;;  %v7915_v58 = vrot.slane %v7853_v22, %v21502_v11 }
0x1783   : > { %11195 = vmatpush2.bf16.msra.mxu1 %v17358_v57  ;;  %v7944_v62 = vrot.slane %v7854_v28, %v21502_v11  ;;  %v7952_v46 = vrot.slane %v7854_v28, %v21505_v13  ;;  %v7948_v37 = vrot.slane %v7854_v28, %v21511_v15 }
0x1784   : > { %11152 = vmatpush2.bf16.msra.mxu0 %v17102_v56  ;;  %11196 = vmatprep.subr.bf16.mxu1 %v17343_v61 }
0x1785   : > { %11153 = vmatprep.subr.bf16.mxu0 %v17087_v18 }
0x1787   : > { %11197 = vmatpush2.bf16.msra.mxu1 %v17342_v40 }
0x1788   : > { %11154 = vmatpush2.bf16.msra.mxu0 %v17086_v34  ;;  %11198 = vmatprep.subr.bf16.mxu1 %v17327_v35 }
0x1789   : > { %11155 = vmatprep.subr.bf16.mxu0 %v17071_v4 }
0x178b   : > { %11199 = vmatpush2.bf16.msra.mxu1 %v17326_v43 }
0x178c   : > { %11156 = vmatpush2.bf16.msra.mxu0 %v17070_v47  ;;  %11254 = vmatprep.subr.bf16.mxu1 %v17313_v12  ;;  %v8322_v12 = vld [vmem:[%s21340_s8 + $0xb08] sm:$0xff] }
0x178d   : > { %11211 = vmatprep.subr.bf16.mxu0 %v17057_v9  ;;  %v8074_v9 = vld [vmem:[%s21340_s8 + $0x348] sm:$0xff] }
0x1807   : > { %v7887_v5 = vpop.xlane.xlu0 %7886 }
0x1808   : > { %v7893_v50 = vmul.f32 0.001953125, %v7887_v5  ;;  %v8330_v5 = vld [vmem:[%s21340_s8 + $0xb48] sm:$0xff] }
0x180a   : > { %v7895_v7 = vadd.f32 1e-12, %v7893_v50 }
0x180b   : > { %v7892_v63 = vpop.xlane.xlu0 %7891 }
0x180c   : > { %19940 = vrsqrt.f32 %v7895_v7  ;;  %v7894_v2 = vmul.f32 0.001953125, %v7892_v63 }
0x180e   : > { %v7896_v48 = vadd.f32 1e-12, %v7894_v2 }
0x1810   : > { %19942 = vrsqrt.f32 %v7896_v48  ;;  %v8050_v48 = vld [vmem:[%s21340_s8 + $0x288] sm:$0xff] }
0x1819   : > { %v19941_v23 = vpop.eup %19940 }
0x181a   : > { %v7900_v16 = vmul.f32 %v19941_v23, %v22489_v8  ;;  %v7902_v36 = vmul.f32 %v19941_v23, %v22495_v30  ;;  %v7899_v39 = vmul.f32 %v19941_v23, %v22486_v19  ;;  %v7901_v32 = vmul.f32 %v19941_v23, %v22492_v59 }
0x181b   : > { %v7940_v8 = vrot.slane %v7854_v28, %v21508_v14  ;;  %v17297_v23 = vcombine.high %v8322_v12, %v8330_v5  ;;  %v8058_v28 = vld [vmem:[%s21340_s8 + $0x2c8] sm:$0xff] }
0x181c   : > { %v7929_v56 = vmul.f32 %v7915_v58, %v7900_v16  ;;  %v7931_v57 = vmul.f32 %v7923_v49, %v7902_v36  ;;  %v7928_v18 = vmul.f32 %v7911_v44, %v7899_v39  ;;  %v7930_v0 = vmul.f32 %v7919_v24, %v7901_v32  ;;  %v8306_v16 = vld [vmem:[%s21340_s8 + $0xa88] sm:$0xff] }
0x181d   : > { %v19943_v45 = vpop.eup %19942  ;;  %v17025_v39 = vcombine.high %v8050_v48, %v8058_v28  ;;  %v8034_v32 = vld [vmem:[%s21340_s8 + $0x208] sm:$0xff]  ;;  %v17024_v38 = vcombine.low %v8050_v48, %v8058_v28 }
0x181e   : > { %v7904_v30 = vmul.f32 %v19943_v45, %v22507_v33  ;;  %v7906_v19 = vmul.f32 %v19943_v45, %v22515_v52  ;;  %v7903_v59 = vmul.f32 %v19943_v45, %v22504_v27  ;;  %v7905_v61 = vmul.f32 %v19943_v45, %v22510_v41  ;;  %v8066_v52 = vld [vmem:[%s21340_s8 + $0x308] sm:$0xff] }
0x181f   : > { %v7958_v40 = vadd.f32 %v7944_v62, %v7929_v56  ;;  %v7960_v4 = vadd.f32 %v7952_v46, %v7931_v57  ;;  %v7957_v47 = vadd.f32 %v7940_v8, %v7928_v18  ;;  %v7959_v43 = vadd.f32 %v7948_v37, %v7930_v0  ;;  %v8018_v45 = vld [vmem:[%s21340_s8 + $0x188] sm:$0xff] }
0x1820   : > { %v7933_v1 = vmul.f32 %v7915_v58, %v7904_v30  ;;  %v7935_v20 = vmul.f32 %v7923_v49, %v7906_v19  ;;  %v7932_v25 = vmul.f32 %v7911_v44, %v7903_v59  ;;  %v7934_v34 = vmul.f32 %v7919_v24, %v7905_v61  ;;  %v8314_v58 = vld [vmem:[%s21340_s8 + $0xac8] sm:$0xff] }
0x1821   : > { %v17041_v22 = vcombine.high %v8066_v52, %v8074_v9  ;;  %v17040_v36 = vcombine.low %v8066_v52, %v8074_v9  ;;  %v17296_v49 = vcombine.low %v8322_v12, %v8330_v5  ;;  %v17281_v44 = vcombine.high %v8306_v16, %v8314_v58  ;;  %v8002_v57 = vld [vmem:[%s21340_s8 + $0x108] sm:$0xff] }
0x1822   : > { %v7962_v33 = vadd.f32 %v7944_v62, %v7933_v1  ;;  %v7964_v35 = vadd.f32 %v7952_v46, %v7935_v20  ;;  %v7961_v27 = vadd.f32 %v7940_v8, %v7932_v25  ;;  %v7963_v41 = vadd.f32 %v7948_v37, %v7934_v34  ;;  %v8026_v62 = vld [vmem:[%s21340_s8 + $0x1c8] sm:$0xff] }
0x1823   : > { %v17280_v17 = vcombine.low %v8306_v16, %v8314_v58  ;;  %v8274_v46 = vld [vmem:[%s21340_s8 + $0x988] sm:$0xff]  ;;  %v17008_v37 = vcombine.low %v8034_v32, %v8042_v42  ;;  %v16993_v56 = vcombine.high %v8018_v45, %v8026_v62  ;;  %v16992_v0 = vcombine.low %v8018_v45, %v8026_v62 }
0x1824   : > { %v22597_v50 = vpack.c.bf16 %v7962_v33, %v7958_v40  ;;  %v22599_v7 = vpack.c.bf16 %v7964_v35, %v7960_v4  ;;  %v22601_v63 = vpack.c.bf16 %v7961_v27, %v7957_v47  ;;  %v22603_v2 = vpack.c.bf16 %v7963_v41, %v7959_v43  ;;  %v8282_v8 = vld [vmem:[%s21340_s8 + $0x9c8] sm:$0xff] }
0x1825   : > { %v17249_v19 = vcombine.high %v8274_v46, %v8282_v8  ;;  %v8010_v59 = vld [vmem:[%s21340_s8 + $0x148] sm:$0xff]  ;;  %v17248_v1 = vcombine.low %v8274_v46, %v8282_v8 }
0x1826   : > { %11157 = vmatprep.mubr.bf16.mxu0 %v22597_v50  ;;  %11200 = vmatprep.mubr.bf16.mxu1 %v22599_v7  ;;  %v8258_v18 = vld [vmem:[%s21340_s8 + $0x908] sm:$0xff]  ;;  %v16977_v20 = vcombine.high %v8002_v57, %v8010_v59  ;;  %v16976_v35 = vcombine.low %v8002_v57, %v8010_v59 }
0x1827   : > { %11158 = vmatmul.mubr.bf16.vlgmr.msra.gmra.mxu0 %v22601_v63  ;;  %11201 = vmatmul.mubr.bf16.vlgmr.msra.gmra.mxu1 %v22603_v2  ;;  %v8266_v61 = vld [vmem:[%s21340_s8 + $0x948] sm:$0xff] }
0x1828   : > { %11212 = vmatpush1.bf16.msra.mxu0 %v17056_v51  ;;  %11255 = vmatpush1.bf16.msra.mxu1 %v17312_v54  ;;  %v8298_v51 = vld [vmem:[%s21340_s8 + $0xa48] sm:$0xff]  ;;  %v17009_v54 = vcombine.high %v8034_v32, %v8042_v42  ;;  %v17233_v25 = vcombine.high %v8258_v18, %v8266_v61  ;;  %v17232_v52 = vcombine.low %v8258_v18, %v8266_v61 }
0x1829   : > { %11243 = vmatprep.mubr.bf16.mxu0 %v22597_v50  ;;  %11286 = vmatprep.mubr.bf16.mxu1 %v22599_v7  ;;  %v17265_v24 = vcombine.high %v8290_v3, %v8298_v51  ;;  %v17264_v30 = vcombine.low %v8290_v3, %v8298_v51  ;;  %v7986_v34 = vld [vmem:[%s21340_s8 + $0x88] sm:$0xff] }
0x182a   : > { %11213 = vmatprep.subr.bf16.mxu0 %v17041_v22  ;;  %11256 = vmatprep.subr.bf16.mxu1 %v17297_v23  ;;  %v7994_v40 = vld [vmem:[%s21340_s8 + $0xc8] sm:$0xff] }
0x182b   : > { %v8242_v33 = vld [vmem:[%s21340_s8 + $0x888] sm:$0xff]  ;;  %v16961_v47 = vcombine.high %v7986_v34, %v7994_v40  ;;  %v16960_v5 = vcombine.low %v7986_v34, %v7994_v40 }
0x182c   : > { %11214 = vmatpush1.bf16.msra.mxu0 %v17040_v36  ;;  %11257 = vmatpush1.bf16.msra.mxu1 %v17296_v49  ;;  %v8250_v4 = vld [vmem:[%s21340_s8 + $0x8c8] sm:$0xff] }
0x182d   : > { %11215 = vmatprep.subr.bf16.mxu0 %v17025_v39  ;;  %11258 = vmatprep.subr.bf16.mxu1 %v17281_v44  ;;  %v17217_v27 = vcombine.high %v8242_v33, %v8250_v4  ;;  %v7970_v43 = vld [vmem:[%s21340_s8 + $0x8] sm:$0xff]  ;;  %v17216_v48 = vcombine.low %v8242_v33, %v8250_v4 }
0x182e   : > { %v7978_v41 = vld [vmem:[%s21340_s8 + $0x48] sm:$0xff] }
0x182f   : > { %v8226_v9 = vld [vmem:[%s21340_s8 + $0x808] sm:$0xff]  ;;  %v16945_v22 = vcombine.high %v7970_v43, %v7978_v41  ;;  %v16944_v49 = vcombine.low %v7970_v43, %v7978_v41 }
0x1830   : > { %11216 = vmatpush1.bf16.msra.mxu0 %v17024_v38  ;;  %11259 = vmatpush1.bf16.msra.mxu1 %v17280_v17  ;;  %v8234_v12 = vld [vmem:[%s21340_s8 + $0x848] sm:$0xff] }
0x1831   : > { %11217 = vmatprep.subr.bf16.mxu0 %v17009_v54  ;;  %11260 = vmatprep.subr.bf16.mxu1 %v17265_v24  ;;  %v17201_v23 = vcombine.high %v8226_v9, %v8234_v12  ;;  %v8210_v28 = vld [vmem:[%s21340_s8 + $0x788] sm:$0xff]  ;;  %v17200_v39 = vcombine.low %v8226_v9, %v8234_v12 }
0x1832   : > { %v8218_v16 = vld [vmem:[%s21340_s8 + $0x7c8] sm:$0xff] }
0x1833   : > { %v8466_v58 = vld [vmem:[%s21340_s8 + $0xf88] sm:$0xff]  ;;  %v17185_v44 = vcombine.high %v8210_v28, %v8218_v16  ;;  %v17184_v17 = vcombine.low %v8210_v28, %v8218_v16 }
0x1834   : > { %11218 = vmatpush1.bf16.msra.mxu0 %v17008_v37  ;;  %11261 = vmatpush1.bf16.msra.mxu1 %v17264_v30  ;;  %v8474_v36 = vld [vmem:[%s21340_s8 + $0xfc8] sm:$0xff] }
0x1835   : > { %11219 = vmatprep.subr.bf16.mxu0 %v16993_v56  ;;  %11262 = vmatprep.subr.bf16.mxu1 %v17249_v19  ;;  %v17441_v32 = vcombine.high %v8466_v58, %v8474_v36  ;;  %v8194_v42 = vld [vmem:[%s21340_s8 + $0x708] sm:$0xff]  ;;  %v17440_v54 = vcombine.low %v8466_v58, %v8474_v36 }
0x1836   : > { %v8202_v3 = vld [vmem:[%s21340_s8 + $0x748] sm:$0xff] }
0x1837   : > { %v8450_v51 = vld [vmem:[%s21340_s8 + $0xf08] sm:$0xff]  ;;  %v17169_v24 = vcombine.high %v8194_v42, %v8202_v3  ;;  %v17168_v30 = vcombine.low %v8194_v42, %v8202_v3 }
0x1838   : > { %11220 = vmatpush1.bf16.msra.mxu0 %v16992_v0  ;;  %11263 = vmatpush1.bf16.msra.mxu1 %v17248_v1  ;;  %v8458_v38 = vld [vmem:[%s21340_s8 + $0xf48] sm:$0xff] }
0x1839   : > { %11221 = vmatprep.subr.bf16.mxu0 %v16977_v20  ;;  %11264 = vmatprep.subr.bf16.mxu1 %v17233_v25  ;;  %v17425_v45 = vcombine.high %v8450_v51, %v8458_v38  ;;  %v8178_v62 = vld [vmem:[%s21340_s8 + $0x688] sm:$0xff]  ;;  %v17424_v56 = vcombine.low %v8450_v51, %v8458_v38 }
0x183a   : > { %v8186_v46 = vld [vmem:[%s21340_s8 + $0x6c8] sm:$0xff] }
0x183b   : > { %v8434_v8 = vld [vmem:[%s21340_s8 + $0xe88] sm:$0xff]  ;;  %v17153_v19 = vcombine.high %v8178_v62, %v8186_v46  ;;  %v17152_v1 = vcombine.low %v8178_v62, %v8186_v46  ;;  %v8083_v46 = vld [vmem:[%s21340_s8 + $0x390] sm:$0xff] }
0x183c   : > { %11222 = vmatpush1.bf16.msra.mxu0 %v16976_v35  ;;  %11265 = vmatpush1.bf16.msra.mxu1 %v17232_v52  ;;  %v8442_v37 = vld [vmem:[%s21340_s8 + $0xec8] sm:$0xff] }
0x183d   : > { %11223 = vmatprep.subr.bf16.mxu0 %v16961_v47  ;;  %11266 = vmatprep.subr.bf16.mxu1 %v17217_v27  ;;  %v17409_v57 = vcombine.high %v8434_v8, %v8442_v37  ;;  %v8162_v59 = vld [vmem:[%s21340_s8 + $0x608] sm:$0xff]  ;;  %v17408_v20 = vcombine.low %v8434_v8, %v8442_v37  ;;  %v8091_v8 = vld [vmem:[%s21340_s8 + $0x3d0] sm:$0xff] }
0x183e   : > { %v8170_v18 = vld [vmem:[%s21340_s8 + $0x648] sm:$0xff]  ;;  %v8339_v37 = vld [vmem:[%s21340_s8 + $0xb90] sm:$0xff] }
0x183f   : > { %v8418_v61 = vld [vmem:[%s21340_s8 + $0xe08] sm:$0xff]  ;;  %v17137_v25 = vcombine.high %v8162_v59, %v8170_v18  ;;  %v17136_v52 = vcombine.low %v8162_v59, %v8170_v18  ;;  %v8067_v18 = vld [vmem:[%s21340_s8 + $0x310] sm:$0xff] }
0x1840   : > { %11224 = vmatpush1.bf16.msra.mxu0 %v16960_v5  ;;  %11267 = vmatpush1.bf16.msra.mxu1 %v17216_v48  ;;  %v8426_v0 = vld [vmem:[%s21340_s8 + $0xe48] sm:$0xff] }
0x1841   : > { %11225 = vmatprep.subr.bf16.mxu0 %v16945_v22  ;;  %11268 = vmatprep.subr.bf16.mxu1 %v17201_v23  ;;  %v17393_v34 = vcombine.high %v8418_v61, %v8426_v0  ;;  %v8146_v40 = vld [vmem:[%s21340_s8 + $0x588] sm:$0xff]  ;;  %v17392_v47 = vcombine.low %v8418_v61, %v8426_v0  ;;  %v8075_v61 = vld [vmem:[%s21340_s8 + $0x350] sm:$0xff] }
0x1842   : > { %v8154_v33 = vld [vmem:[%s21340_s8 + $0x5c8] sm:$0xff]  ;;  %v8323_v0 = vld [vmem:[%s21340_s8 + $0xb10] sm:$0xff] }
0x1843   : > { %v8402_v4 = vld [vmem:[%s21340_s8 + $0xd88] sm:$0xff]  ;;  %v17121_v27 = vcombine.high %v8146_v40, %v8154_v33  ;;  %v17120_v48 = vcombine.low %v8146_v40, %v8154_v33  ;;  %v8051_v33 = vld [vmem:[%s21340_s8 + $0x290] sm:$0xff] }
0x1844   : > { %11226 = vmatpush1.bf16.msra.mxu0 %v16944_v49  ;;  %11269 = vmatpush1.bf16.msra.mxu1 %v17200_v39  ;;  %v8410_v35 = vld [vmem:[%s21340_s8 + $0xdc8] sm:$0xff] }
0x1845   : > { %11227 = vmatprep.subr.bf16.mxu0 %v17185_v44  ;;  %11270 = vmatprep.subr.bf16.mxu1 %v17441_v32  ;;  %v17377_v43 = vcombine.high %v8402_v4, %v8410_v35  ;;  %v8130_v41 = vld [vmem:[%s21340_s8 + $0x508] sm:$0xff]  ;;  %v17376_v22 = vcombine.low %v8402_v4, %v8410_v35  ;;  %v8059_v4 = vld [vmem:[%s21340_s8 + $0x2d0] sm:$0xff] }
0x1846   : > { %v8138_v9 = vld [vmem:[%s21340_s8 + $0x548] sm:$0xff]  ;;  %v8307_v35 = vld [vmem:[%s21340_s8 + $0xa90] sm:$0xff] }
0x1847   : > { %v8386_v12 = vld [vmem:[%s21340_s8 + $0xd08] sm:$0xff]  ;;  %v17105_v23 = vcombine.high %v8130_v41, %v8138_v9  ;;  %v17104_v39 = vcombine.low %v8130_v41, %v8138_v9  ;;  %v8035_v9 = vld [vmem:[%s21340_s8 + $0x210] sm:$0xff] }
0x1848   : > { %11228 = vmatpush2.bf16.msra.mxu0 %v17184_v17  ;;  %11271 = vmatpush2.bf16.msra.mxu1 %v17440_v54  ;;  %v8394_v5 = vld [vmem:[%s21340_s8 + $0xd48] sm:$0xff] }
0x1849   : > { %11229 = vmatprep.subr.bf16.mxu0 %v17169_v24  ;;  %11272 = vmatprep.subr.bf16.mxu1 %v17425_v45  ;;  %v17361_v28 = vcombine.high %v8386_v12, %v8394_v5  ;;  %v8114_v16 = vld [vmem:[%s21340_s8 + $0x488] sm:$0xff]  ;;  %v17360_v44 = vcombine.low %v8386_v12, %v8394_v5  ;;  %v8043_v12 = vld [vmem:[%s21340_s8 + $0x250] sm:$0xff] }
0x184a   : > { %v8122_v58 = vld [vmem:[%s21340_s8 + $0x4c8] sm:$0xff]  ;;  %v8291_v5 = vld [vmem:[%s21340_s8 + $0xa10] sm:$0xff] }
0x184b   : > { %v8370_v36 = vld [vmem:[%s21340_s8 + $0xc88] sm:$0xff]  ;;  %v17089_v32 = vcombine.high %v8114_v16, %v8122_v58  ;;  %v17088_v54 = vcombine.low %v8114_v16, %v8122_v58  ;;  %v8019_v58 = vld [vmem:[%s21340_s8 + $0x190] sm:$0xff] }
0x184c   : > { %11230 = vmatpush2.bf16.msra.mxu0 %v17168_v30  ;;  %11273 = vmatpush2.bf16.msra.mxu1 %v17424_v56  ;;  %v8378_v49 = vld [vmem:[%s21340_s8 + $0xcc8] sm:$0xff]  ;;  %v8347_v30 = vld [vmem:[%s21340_s8 + $0xbd0] sm:$0xff] }
0x184d   : > { %11231 = vmatprep.subr.bf16.mxu0 %v17153_v19  ;;  %11274 = vmatprep.subr.bf16.mxu1 %v17409_v57  ;;  %v17345_v42 = vcombine.high %v8370_v36, %v8378_v49  ;;  %v8098_v3 = vld [vmem:[%s21340_s8 + $0x408] sm:$0xff]  ;;  %v17344_v24 = vcombine.low %v8370_v36, %v8378_v49  ;;  %v17059_v57 = vcombine.high %v8083_v46, %v8091_v8  ;;  %v8027_v36 = vld [vmem:[%s21340_s8 + $0x1d0] sm:$0xff] }
0x184e   : > { %v8106_v51 = vld [vmem:[%s21340_s8 + $0x448] sm:$0xff]  ;;  %v17315_v59 = vcombine.high %v8339_v37, %v8347_v30  ;;  %v8275_v49 = vld [vmem:[%s21340_s8 + $0x990] sm:$0xff] }
0x184f   : > { %v8354_v38 = vld [vmem:[%s21340_s8 + $0xc08] sm:$0xff]  ;;  %v17073_v45 = vcombine.high %v8098_v3, %v8106_v51  ;;  %v17072_v56 = vcombine.low %v8098_v3, %v8106_v51  ;;  %v8003_v51 = vld [vmem:[%s21340_s8 + $0x110] sm:$0xff] }
0x1850   : > { %11232 = vmatpush2.bf16.msra.mxu0 %v17152_v1  ;;  %11275 = vmatpush2.bf16.msra.mxu1 %v17408_v20  ;;  %v8362_v17 = vld [vmem:[%s21340_s8 + $0xc48] sm:$0xff]  ;;  %v8331_v1 = vld [vmem:[%s21340_s8 + $0xb50] sm:$0xff]  ;;  %v17058_v20 = vcombine.low %v8083_v46, %v8091_v8 }
0x1851   : > { %11233 = vmatprep.subr.bf16.mxu0 %v17137_v25  ;;  %11276 = vmatprep.subr.bf16.mxu1 %v17393_v34  ;;  %v17329_v62 = vcombine.high %v8354_v38, %v8362_v17  ;;  %v17328_v19 = vcombine.low %v8354_v38, %v8362_v17  ;;  %v17314_v25 = vcombine.low %v8339_v37, %v8347_v30  ;;  %v8011_v38 = vld [vmem:[%s21340_s8 + $0x150] sm:$0xff] }
0x1852   : > { %v17043_v34 = vcombine.high %v8067_v18, %v8075_v61  ;;  %v17299_v40 = vcombine.high %v8323_v0, %v8331_v1  ;;  %v8259_v17 = vld [vmem:[%s21340_s8 + $0x910] sm:$0xff] }
0x1853   : > { %v7987_v8 = vld [vmem:[%s21340_s8 + $0x90] sm:$0xff] }
0x1854   : > { %11234 = vmatpush2.bf16.msra.mxu0 %v17136_v52  ;;  %11277 = vmatpush2.bf16.msra.mxu1 %v17392_v47  ;;  %v8315_v52 = vld [vmem:[%s21340_s8 + $0xad0] sm:$0xff]  ;;  %v17042_v47 = vcombine.low %v8067_v18, %v8075_v61 }
0x1855   : > { %11235 = vmatprep.subr.bf16.mxu0 %v17121_v27  ;;  %11278 = vmatprep.subr.bf16.mxu1 %v17377_v43  ;;  %v17298_v27 = vcombine.low %v8323_v0, %v8331_v1  ;;  %v17027_v43 = vcombine.high %v8051_v33, %v8059_v4  ;;  %v17283_v41 = vcombine.high %v8307_v35, %v8315_v52  ;;  %v7995_v37 = vld [vmem:[%s21340_s8 + $0xd0] sm:$0xff] }
0x1856   : > { %v8243_v30 = vld [vmem:[%s21340_s8 + $0x890] sm:$0xff] }
0x1857   : > { %v7971_v61 = vld [vmem:[%s21340_s8 + $0x10] sm:$0xff] }
0x1858   : > { %11236 = vmatpush2.bf16.msra.mxu0 %v17120_v48  ;;  %11279 = vmatpush2.bf16.msra.mxu1 %v17376_v22  ;;  %v8299_v48 = vld [vmem:[%s21340_s8 + $0xa50] sm:$0xff]  ;;  %v17026_v22 = vcombine.low %v8051_v33, %v8059_v4 }
0x1859   : > { %11237 = vmatprep.subr.bf16.mxu0 %v17105_v23  ;;  %11280 = vmatprep.subr.bf16.mxu1 %v17361_v28  ;;  %v17282_v23 = vcombine.low %v8307_v35, %v8315_v52  ;;  %v17011_v28 = vcombine.high %v8035_v9, %v8043_v12  ;;  %v17267_v16 = vcombine.high %v8291_v5, %v8299_v48  ;;  %v7979_v0 = vld [vmem:[%s21340_s8 + $0x50] sm:$0xff] }
0x185a   : > { %v8227_v1 = vld [vmem:[%s21340_s8 + $0x810] sm:$0xff] }
0x185b   : > { %v8211_v4 = vld [vmem:[%s21340_s8 + $0x790] sm:$0xff] }
0x185c   : > { %11238 = vmatpush2.bf16.msra.mxu0 %v17104_v39  ;;  %11281 = vmatpush2.bf16.msra.mxu1 %v17360_v44  ;;  %v8283_v39 = vld [vmem:[%s21340_s8 + $0x9d0] sm:$0xff]  ;;  %v17010_v44 = vcombine.low %v8035_v9, %v8043_v12 }
0x185d   : > { %11239 = vmatprep.subr.bf16.mxu0 %v17089_v32  ;;  %11282 = vmatprep.subr.bf16.mxu1 %v17345_v42  ;;  %v17266_v32 = vcombine.low %v8291_v5, %v8299_v48  ;;  %v16995_v42 = vcombine.high %v8019_v58, %v8027_v36  ;;  %v17251_v3 = vcombine.high %v8275_v49, %v8283_v39  ;;  %v8219_v35 = vld [vmem:[%s21340_s8 + $0x7d0] sm:$0xff] }
0x185e   : > { %v8467_v52 = vld [vmem:[%s21340_s8 + $0xf90] sm:$0xff] }
0x185f   : > { %v8195_v12 = vld [vmem:[%s21340_s8 + $0x710] sm:$0xff] }
0x1860   : > { %11240 = vmatpush2.bf16.msra.mxu0 %v17088_v54  ;;  %11283 = vmatpush2.bf16.msra.mxu1 %v17344_v24  ;;  %v8267_v54 = vld [vmem:[%s21340_s8 + $0x950] sm:$0xff]  ;;  %v16994_v24 = vcombine.low %v8019_v58, %v8027_v36 }
0x1861   : > { %11241 = vmatprep.subr.bf16.mxu0 %v17073_v45  ;;  %11284 = vmatprep.subr.bf16.mxu1 %v17329_v62  ;;  %v17250_v45 = vcombine.low %v8275_v49, %v8283_v39  ;;  %v16979_v62 = vcombine.high %v8003_v51, %v8011_v38  ;;  %v17235_v46 = vcombine.high %v8259_v17, %v8267_v54  ;;  %v8203_v5 = vld [vmem:[%s21340_s8 + $0x750] sm:$0xff] }
0x1862   : > { %v8451_v48 = vld [vmem:[%s21340_s8 + $0xf10] sm:$0xff] }
0x1863   : > { %v8179_v36 = vld [vmem:[%s21340_s8 + $0x690] sm:$0xff] }
0x1864   : > { %11242 = vmatpush2.bf16.msra.mxu0 %v17072_v56  ;;  %11285 = vmatpush2.bf16.msra.mxu1 %v17328_v19  ;;  %v8251_v56 = vld [vmem:[%s21340_s8 + $0x8d0] sm:$0xff]  ;;  %v16978_v19 = vcombine.low %v8003_v51, %v8011_v38 }
0x1865   : > { %11297 = vmatprep.subr.bf16.mxu0 %v17059_v57  ;;  %11340 = vmatprep.subr.bf16.mxu1 %v17315_v59  ;;  %v17234_v57 = vcombine.low %v8259_v17, %v8267_v54  ;;  %v16963_v59 = vcombine.high %v7987_v8, %v7995_v37  ;;  %v17219_v18 = vcombine.high %v8243_v30, %v8251_v56  ;;  %v8187_v49 = vld [vmem:[%s21340_s8 + $0x6d0] sm:$0xff] }
0x1866   : > { %v8435_v39 = vld [vmem:[%s21340_s8 + $0xe90] sm:$0xff] }
0x1867   : > { %11244 = vmatmul.mubr.bf16.vlgmr.msra.gmra.mxu0 %v22601_v63  ;;  %11287 = vmatmul.mubr.bf16.vlgmr.msra.gmra.mxu1 %v22603_v2  ;;  %v8163_v38 = vld [vmem:[%s21340_s8 + $0x610] sm:$0xff] }
0x1868   : > { %11298 = vmatpush1.bf16.msra.mxu0 %v17058_v20  ;;  %11329 = vmatprep.mubr.bf16.mxu0 %v22597_v50  ;;  %v8235_v20 = vld [vmem:[%s21340_s8 + $0x850] sm:$0xff] }
0x1869   : > { %11341 = vmatpush1.bf16.msra.mxu1 %v17314_v25  ;;  %11372 = vmatprep.mubr.bf16.mxu1 %v22599_v7  ;;  %v16962_v25 = vcombine.low %v7987_v8, %v7995_v37  ;;  %v17203_v33 = vcombine.high %v8227_v1, %v8235_v20  ;;  %v8171_v17 = vld [vmem:[%s21340_s8 + $0x650] sm:$0xff] }
0x186a   : > { %11299 = vmatprep.subr.bf16.mxu0 %v17043_v34  ;;  %11342 = vmatprep.subr.bf16.mxu1 %v17299_v40  ;;  %v17218_v34 = vcombine.low %v8243_v30, %v8251_v56  ;;  %v16947_v40 = vcombine.high %v7971_v61, %v7979_v0  ;;  %v8419_v54 = vld [vmem:[%s21340_s8 + $0xe10] sm:$0xff] }
0x186b   : > { %v8147_v37 = vld [vmem:[%s21340_s8 + $0x590] sm:$0xff] }
0x186c   : > { %11300 = vmatpush1.bf16.msra.mxu0 %v17042_v47  ;;  %v8475_v47 = vld [vmem:[%s21340_s8 + $0xfd0] sm:$0xff] }
0x186d   : > { %11343 = vmatpush1.bf16.msra.mxu1 %v17298_v27  ;;  %11301 = vmatprep.subr.bf16.mxu0 %v17027_v43  ;;  %v16946_v27 = vcombine.low %v7971_v61, %v7979_v0  ;;  %v17202_v43 = vcombine.low %v8227_v1, %v8235_v20  ;;  %v17443_v9 = vcombine.high %v8467_v52, %v8475_v47  ;;  %v8155_v30 = vld [vmem:[%s21340_s8 + $0x5d0] sm:$0xff] }
0x186e   : > { %11344 = vmatprep.subr.bf16.mxu1 %v17283_v41  ;;  %v17187_v41 = vcombine.high %v8211_v4, %v8219_v35  ;;  %v8403_v56 = vld [vmem:[%s21340_s8 + $0xd90] sm:$0xff] }
0x186f   : > { %v8131_v0 = vld [vmem:[%s21340_s8 + $0x510] sm:$0xff] }
0x1870   : > { %11302 = vmatpush1.bf16.msra.mxu0 %v17026_v22  ;;  %v8459_v22 = vld [vmem:[%s21340_s8 + $0xf50] sm:$0xff] }
0x1871   : > { %11345 = vmatpush1.bf16.msra.mxu1 %v17282_v23  ;;  %11303 = vmatprep.subr.bf16.mxu0 %v17011_v28  ;;  %v17186_v23 = vcombine.low %v8211_v4, %v8219_v35  ;;  %v17442_v28 = vcombine.low %v8467_v52, %v8475_v47  ;;  %v17427_v58 = vcombine.high %v8451_v48, %v8459_v22  ;;  %v8139_v1 = vld [vmem:[%s21340_s8 + $0x550] sm:$0xff] }
0x1872   : > { %11346 = vmatprep.subr.bf16.mxu1 %v17267_v16  ;;  %v17171_v16 = vcombine.high %v8195_v12, %v8203_v5  ;;  %v8387_v20 = vld [vmem:[%s21340_s8 + $0xd10] sm:$0xff] }
0x1873   : > { %v8115_v35 = vld [vmem:[%s21340_s8 + $0x490] sm:$0xff] }
0x1874   : > { %11304 = vmatpush1.bf16.msra.mxu0 %v17010_v44  ;;  %v8443_v44 = vld [vmem:[%s21340_s8 + $0xed0] sm:$0xff] }
0x1875   : > { %11347 = vmatpush1.bf16.msra.mxu1 %v17266_v32  ;;  %11305 = vmatprep.subr.bf16.mxu0 %v16995_v42  ;;  %v17170_v32 = vcombine.low %v8195_v12, %v8203_v5  ;;  %v17426_v42 = vcombine.low %v8451_v48, %v8459_v22  ;;  %v17411_v51 = vcombine.high %v8435_v39, %v8443_v44  ;;  %v8123_v52 = vld [vmem:[%s21340_s8 + $0x4d0] sm:$0xff] }
0x1876   : > { %11348 = vmatprep.subr.bf16.mxu1 %v17251_v3  ;;  %v17155_v3 = vcombine.high %v8179_v36, %v8187_v49  ;;  %v8371_v47 = vld [vmem:[%s21340_s8 + $0xc90] sm:$0xff] }
0x1877   : > { %v8099_v5 = vld [vmem:[%s21340_s8 + $0x410] sm:$0xff] }
0x1878   : > { %11306 = vmatpush1.bf16.msra.mxu0 %v16994_v24  ;;  %v8427_v24 = vld [vmem:[%s21340_s8 + $0xe50] sm:$0xff] }
0x1879   : > { %11349 = vmatpush1.bf16.msra.mxu1 %v17250_v45  ;;  %11307 = vmatprep.subr.bf16.mxu0 %v16979_v62  ;;  %v17154_v45 = vcombine.low %v8179_v36, %v8187_v49  ;;  %v17410_v62 = vcombine.low %v8435_v39, %v8443_v44  ;;  %v17395_v8 = vcombine.high %v8419_v54, %v8427_v24  ;;  %v8107_v48 = vld [vmem:[%s21340_s8 + $0x450] sm:$0xff]  ;;  %v8084_v49 = vld [vmem:[%s21340_s8 + $0x398] sm:$0xff] }
0x187a   : > { %11350 = vmatprep.subr.bf16.mxu1 %v17235_v46  ;;  %v17139_v46 = vcombine.high %v8163_v38, %v8171_v17  ;;  %v8355_v22 = vld [vmem:[%s21340_s8 + $0xc10] sm:$0xff]  ;;  %v8092_v39 = vld [vmem:[%s21340_s8 + $0x3d8] sm:$0xff] }
0x187b   : > { %v8340_v44 = vld [vmem:[%s21340_s8 + $0xb98] sm:$0xff] }
0x187c   : > { %11308 = vmatpush1.bf16.msra.mxu0 %v16978_v19  ;;  %v8411_v19 = vld [vmem:[%s21340_s8 + $0xdd0] sm:$0xff] }
0x187d   : > { %11351 = vmatpush1.bf16.msra.mxu1 %v17234_v57  ;;  %11309 = vmatprep.subr.bf16.mxu0 %v16963_v59  ;;  %v17138_v57 = vcombine.low %v8163_v38, %v8171_v17  ;;  %v17394_v59 = vcombine.low %v8419_v54, %v8427_v24  ;;  %v17379_v61 = vcombine.high %v8403_v56, %v8411_v19  ;;  %v8068_v17 = vld [vmem:[%s21340_s8 + $0x318] sm:$0xff] }
0x187e   : > { %11352 = vmatprep.subr.bf16.mxu1 %v17219_v18  ;;  %v17123_v18 = vcombine.high %v8147_v37, %v8155_v30  ;;  %v8076_v54 = vld [vmem:[%s21340_s8 + $0x358] sm:$0xff]  ;;  %v17060_v24 = vcombine.low %v8084_v49, %v8092_v39 }
0x1880   : > { %11310 = vmatpush1.bf16.msra.mxu0 %v16962_v25  ;;  %v8395_v25 = vld [vmem:[%s21340_s8 + $0xd50] sm:$0xff] }
0x1881   : > { %11353 = vmatpush1.bf16.msra.mxu1 %v17218_v34  ;;  %11311 = vmatprep.subr.bf16.mxu0 %v16947_v40  ;;  %v17122_v34 = vcombine.low %v8147_v37, %v8155_v30  ;;  %v17378_v40 = vcombine.low %v8403_v56, %v8411_v19  ;;  %v17363_v4 = vcombine.high %v8387_v20, %v8395_v25  ;;  %v8052_v37 = vld [vmem:[%s21340_s8 + $0x298] sm:$0xff] }
0x1882   : > { %11354 = vmatprep.subr.bf16.mxu1 %v17203_v33  ;;  %v17107_v33 = vcombine.high %v8131_v0, %v8139_v1  ;;  %v8060_v30 = vld [vmem:[%s21340_s8 + $0x2d8] sm:$0xff] }
0x1883   : > { %v8308_v19 = vld [vmem:[%s21340_s8 + $0xa98] sm:$0xff] }
0x1884   : > { %11312 = vmatpush1.bf16.msra.mxu0 %v16946_v27  ;;  %v8379_v27 = vld [vmem:[%s21340_s8 + $0xcd0] sm:$0xff] }
0x1885   : > { %11355 = vmatpush1.bf16.msra.mxu1 %v17202_v43  ;;  %11313 = vmatprep.subr.bf16.mxu0 %v17187_v41  ;;  %v17106_v43 = vcombine.low %v8131_v0, %v8139_v1  ;;  %v17362_v41 = vcombine.low %v8387_v20, %v8395_v25  ;;  %v17347_v12 = vcombine.high %v8371_v47, %v8379_v27  ;;  %v8036_v1 = vld [vmem:[%s21340_s8 + $0x218] sm:$0xff] }
0x1886   : > { %11356 = vmatprep.subr.bf16.mxu1 %v17443_v9  ;;  %v17091_v9 = vcombine.high %v8115_v35, %v8123_v52  ;;  %v8044_v20 = vld [vmem:[%s21340_s8 + $0x258] sm:$0xff] }
0x1887   : > { %v8292_v25 = vld [vmem:[%s21340_s8 + $0xa18] sm:$0xff] }
0x1888   : > { %11314 = vmatpush2.bf16.msra.mxu0 %v17186_v23  ;;  %v8363_v23 = vld [vmem:[%s21340_s8 + $0xc50] sm:$0xff] }
0x1889   : > { %11357 = vmatpush2.bf16.msra.mxu1 %v17442_v28  ;;  %11315 = vmatprep.subr.bf16.mxu0 %v17171_v16  ;;  %v17090_v28 = vcombine.low %v8115_v35, %v8123_v52  ;;  %v17346_v16 = vcombine.low %v8371_v47, %v8379_v27  ;;  %v17331_v36 = vcombine.high %v8355_v22, %v8363_v23  ;;  %v8020_v52 = vld [vmem:[%s21340_s8 + $0x198] sm:$0xff] }
0x188a   : > { %11358 = vmatprep.subr.bf16.mxu1 %v17427_v58  ;;  %v17075_v58 = vcombine.high %v8099_v5, %v8107_v48  ;;  %v8028_v47 = vld [vmem:[%s21340_s8 + $0x1d8] sm:$0xff] }
0x188b   : > { %v8276_v27 = vld [vmem:[%s21340_s8 + $0x998] sm:$0xff] }
0x188c   : > { %11316 = vmatpush2.bf16.msra.mxu0 %v17170_v32  ;;  %v8348_v32 = vld [vmem:[%s21340_s8 + $0xbd8] sm:$0xff] }
0x188d   : > { %11359 = vmatpush2.bf16.msra.mxu1 %v17426_v42  ;;  %11317 = vmatprep.subr.bf16.mxu0 %v17155_v3  ;;  %v17074_v42 = vcombine.low %v8099_v5, %v8107_v48  ;;  %v17330_v3 = vcombine.low %v8355_v22, %v8363_v23  ;;  %v17317_v38 = vcombine.high %v8340_v44, %v8348_v32  ;;  %v8004_v48 = vld [vmem:[%s21340_s8 + $0x118] sm:$0xff] }
0x188e   : > { %11360 = vmatprep.subr.bf16.mxu1 %v17411_v51  ;;  %v17061_v51 = vcombine.high %v8084_v49, %v8092_v39  ;;  %v8012_v22 = vld [vmem:[%s21340_s8 + $0x158] sm:$0xff] }
0x188f   : > { %v8260_v23 = vld [vmem:[%s21340_s8 + $0x918] sm:$0xff] }
0x1890   : > { %11318 = vmatpush2.bf16.msra.mxu0 %v17154_v45  ;;  %v8324_v45 = vld [vmem:[%s21340_s8 + $0xb18] sm:$0xff] }
0x1891   : > { %11361 = vmatpush2.bf16.msra.mxu1 %v17410_v62  ;;  %11319 = vmatprep.subr.bf16.mxu0 %v17139_v46  ;;  %v8332_v62 = vld [vmem:[%s21340_s8 + $0xb58] sm:$0xff]  ;;  %v17316_v46 = vcombine.low %v8340_v44, %v8348_v32 }
0x1892   : > { %11362 = vmatprep.subr.bf16.mxu1 %v17395_v8  ;;  %v17045_v8 = vcombine.high %v8068_v17, %v8076_v54  ;;  %v17301_v56 = vcombine.high %v8324_v45, %v8332_v62  ;;  %v7988_v39 = vld [vmem:[%s21340_s8 + $0x98] sm:$0xff] }
0x1893   : > { %v7996_v44 = vld [vmem:[%s21340_s8 + $0xd8] sm:$0xff] }
0x1894   : > { %11320 = vmatpush2.bf16.msra.mxu0 %v17138_v57  ;;  %v8316_v57 = vld [vmem:[%s21340_s8 + $0xad8] sm:$0xff] }
0x1895   : > { %11363 = vmatpush2.bf16.msra.mxu1 %v17394_v59  ;;  %11321 = vmatprep.subr.bf16.mxu0 %v17123_v18  ;;  %v17044_v59 = vcombine.low %v8068_v17, %v8076_v54  ;;  %v17300_v18 = vcombine.low %v8324_v45, %v8332_v62  ;;  %v17285_v0 = vcombine.high %v8308_v19, %v8316_v57  ;;  %v8244_v32 = vld [vmem:[%s21340_s8 + $0x898] sm:$0xff] }
0x1896   : > { %11364 = vmatprep.subr.bf16.mxu1 %v17379_v61  ;;  %v17029_v61 = vcombine.high %v8052_v37, %v8060_v30  ;;  %v7972_v54 = vld [vmem:[%s21340_s8 + $0x18] sm:$0xff] }
0x1897   : > { %v8228_v45 = vld [vmem:[%s21340_s8 + $0x818] sm:$0xff] }
0x1898   : > { %11322 = vmatpush2.bf16.msra.mxu0 %v17122_v34  ;;  %v8300_v34 = vld [vmem:[%s21340_s8 + $0xa58] sm:$0xff] }
0x1899   : > { %11365 = vmatpush2.bf16.msra.mxu1 %v17378_v40  ;;  %11323 = vmatprep.subr.bf16.mxu0 %v17107_v33  ;;  %v17028_v40 = vcombine.low %v8052_v37, %v8060_v30  ;;  %v17284_v33 = vcombine.low %v8308_v19, %v8316_v57  ;;  %v17269_v35 = vcombine.high %v8292_v25, %v8300_v34  ;;  %v8236_v62 = vld [vmem:[%s21340_s8 + $0x858] sm:$0xff] }
0x189a   : > { %11366 = vmatprep.subr.bf16.mxu1 %v17363_v4  ;;  %v17013_v4 = vcombine.high %v8036_v1, %v8044_v20  ;;  %v17205_v30 = vcombine.high %v8228_v45, %v8236_v62  ;;  %v8220_v19 = vld [vmem:[%s21340_s8 + $0x7d8] sm:$0xff] }
0x189b   : > { %v8468_v57 = vld [vmem:[%s21340_s8 + $0xf98] sm:$0xff] }
0x189c   : > { %11324 = vmatpush2.bf16.msra.mxu0 %v17106_v43  ;;  %v8284_v43 = vld [vmem:[%s21340_s8 + $0x9d8] sm:$0xff] }
0x189d   : > { %11367 = vmatpush2.bf16.msra.mxu1 %v17362_v41  ;;  %11325 = vmatprep.subr.bf16.mxu0 %v17091_v9  ;;  %v17012_v41 = vcombine.low %v8036_v1, %v8044_v20  ;;  %v17268_v9 = vcombine.low %v8292_v25, %v8300_v34  ;;  %v17253_v5 = vcombine.high %v8276_v27, %v8284_v43  ;;  %v8196_v20 = vld [vmem:[%s21340_s8 + $0x718] sm:$0xff] }
0x189e   : > { %11368 = vmatprep.subr.bf16.mxu1 %v17347_v12  ;;  %v16997_v12 = vcombine.high %v8020_v52, %v8028_v47  ;;  %v8204_v25 = vld [vmem:[%s21340_s8 + $0x758] sm:$0xff] }
0x189f   : > { %v8452_v34 = vld [vmem:[%s21340_s8 + $0xf18] sm:$0xff] }
0x18a0   : > { %11326 = vmatpush2.bf16.msra.mxu0 %v17090_v28  ;;  %v8268_v28 = vld [vmem:[%s21340_s8 + $0x958] sm:$0xff] }
0x18a1   : > { %11369 = vmatpush2.bf16.msra.mxu1 %v17346_v16  ;;  %11327 = vmatprep.subr.bf16.mxu0 %v17075_v58  ;;  %v16996_v16 = vcombine.low %v8020_v52, %v8028_v47  ;;  %v17252_v58 = vcombine.low %v8276_v27, %v8284_v43  ;;  %v17237_v49 = vcombine.high %v8260_v23, %v8268_v28  ;;  %v8180_v47 = vld [vmem:[%s21340_s8 + $0x698] sm:$0xff] }
0x18a2   : > { %11370 = vmatprep.subr.bf16.mxu1 %v17331_v36  ;;  %v16981_v36 = vcombine.high %v8004_v48, %v8012_v22  ;;  %v8188_v27 = vld [vmem:[%s21340_s8 + $0x6d8] sm:$0xff] }
0x18a3   : > { %v8436_v43 = vld [vmem:[%s21340_s8 + $0xe98] sm:$0xff] }
0x18a4   : > { %11328 = vmatpush2.bf16.msra.mxu0 %v17074_v42  ;;  %v8252_v42 = vld [vmem:[%s21340_s8 + $0x8d8] sm:$0xff] }
0x18a5   : > { %11371 = vmatpush2.bf16.msra.mxu1 %v17330_v3  ;;  %11383 = vmatprep.subr.bf16.mxu0 %v17061_v51  ;;  %v16980_v3 = vcombine.low %v8004_v48, %v8012_v22  ;;  %v17236_v51 = vcombine.low %v8260_v23, %v8268_v28  ;;  %v17221_v17 = vcombine.high %v8244_v32, %v8252_v42  ;;  %v8164_v22 = vld [vmem:[%s21340_s8 + $0x618] sm:$0xff] }
0x18a6   : > { %11426 = vmatprep.subr.bf16.mxu1 %v17317_v38  ;;  %v16965_v38 = vcombine.high %v7988_v39, %v7996_v44  ;;  %v8172_v23 = vld [vmem:[%s21340_s8 + $0x658] sm:$0xff] }
0x18a7   : > { %11330 = vmatmul.mubr.bf16.vlgmr.msra.gmra.mxu0 %v22601_v63  ;;  %v8420_v28 = vld [vmem:[%s21340_s8 + $0xe18] sm:$0xff] }
0x18a8   : > { %11373 = vmatmul.mubr.bf16.vlgmr.msra.gmra.mxu1 %v22603_v2  ;;  %11384 = vmatpush1.bf16.msra.mxu0 %v17060_v24  ;;  %v7980_v24 = vld [vmem:[%s21340_s8 + $0x58] sm:$0xff] }
0x18a9   : > { %11415 = vmatprep.mubr.bf16.mxu0 %v22597_v50  ;;  %11427 = vmatpush1.bf16.msra.mxu1 %v17316_v46  ;;  %v16964_v46 = vcombine.low %v7988_v39, %v7996_v44  ;;  %v16949_v37 = vcombine.high %v7972_v54, %v7980_v24  ;;  %v8148_v44 = vld [vmem:[%s21340_s8 + $0x598] sm:$0xff] }
0x18aa   : > { %11458 = vmatprep.mubr.bf16.mxu1 %v22599_v7  ;;  %11385 = vmatprep.subr.bf16.mxu0 %v17045_v8  ;;  %v17220_v8 = vcombine.low %v8244_v32, %v8252_v42  ;;  %v8156_v32 = vld [vmem:[%s21340_s8 + $0x5d8] sm:$0xff] }
0x18ab   : > { %11428 = vmatprep.subr.bf16.mxu1 %v17301_v56  ;;  %v8212_v56 = vld [vmem:[%s21340_s8 + $0x798] sm:$0xff] }
0x18ac   : > { %11386 = vmatpush1.bf16.msra.mxu0 %v17044_v59  ;;  %v8476_v59 = vld [vmem:[%s21340_s8 + $0xfd8] sm:$0xff] }
0x18ad   : > { %11429 = vmatpush1.bf16.msra.mxu1 %v17300_v18  ;;  %11387 = vmatprep.subr.bf16.mxu0 %v17029_v61  ;;  %v16948_v18 = vcombine.low %v7972_v54, %v7980_v24  ;;  %v17204_v61 = vcombine.low %v8228_v45, %v8236_v62  ;;  %v17445_v1 = vcombine.high %v8468_v57, %v8476_v59  ;;  %v8404_v42 = vld [vmem:[%s21340_s8 + $0xd98] sm:$0xff] }
0x18ae   : > { %11430 = vmatprep.subr.bf16.mxu1 %v17285_v0  ;;  %v17189_v0 = vcombine.high %v8212_v56, %v8220_v19  ;;  %v8132_v24 = vld [vmem:[%s21340_s8 + $0x518] sm:$0xff] }
0x18af   : > { %v8140_v45 = vld [vmem:[%s21340_s8 + $0x558] sm:$0xff] }
0x18b0   : > { %11388 = vmatpush1.bf16.msra.mxu0 %v17028_v40  ;;  %v8460_v40 = vld [vmem:[%s21340_s8 + $0xf58] sm:$0xff] }
0x18b1   : > { %11431 = vmatpush1.bf16.msra.mxu1 %v17284_v33  ;;  %11389 = vmatprep.subr.bf16.mxu0 %v17013_v4  ;;  %v17188_v33 = vcombine.low %v8212_v56, %v8220_v19  ;;  %v17444_v4 = vcombine.low %v8468_v57, %v8476_v59  ;;  %v17429_v52 = vcombine.high %v8452_v34, %v8460_v40  ;;  %v8388_v62 = vld [vmem:[%s21340_s8 + $0xd18] sm:$0xff] }
0x18b2   : > { %11432 = vmatprep.subr.bf16.mxu1 %v17269_v35  ;;  %v17173_v35 = vcombine.high %v8196_v20, %v8204_v25  ;;  %v8116_v19 = vld [vmem:[%s21340_s8 + $0x498] sm:$0xff] }
0x18b3   : > { %v8124_v57 = vld [vmem:[%s21340_s8 + $0x4d8] sm:$0xff] }
0x18b4   : > { %11390 = vmatpush1.bf16.msra.mxu0 %v17012_v41  ;;  %v8444_v41 = vld [vmem:[%s21340_s8 + $0xed8] sm:$0xff] }
0x18b5   : > { %11433 = vmatpush1.bf16.msra.mxu1 %v17268_v9  ;;  %11391 = vmatprep.subr.bf16.mxu0 %v16997_v12  ;;  %v17172_v9 = vcombine.low %v8196_v20, %v8204_v25  ;;  %v17428_v12 = vcombine.low %v8452_v34, %v8460_v40  ;;  %v17413_v48 = vcombine.high %v8436_v43, %v8444_v41  ;;  %v8372_v59 = vld [vmem:[%s21340_s8 + $0xc98] sm:$0xff] }
0x18b6   : > { %11434 = vmatprep.subr.bf16.mxu1 %v17253_v5  ;;  %v17157_v5 = vcombine.high %v8180_v47, %v8188_v27  ;;  %v8100_v25 = vld [vmem:[%s21340_s8 + $0x418] sm:$0xff] }
0x18b7   : > { %v8108_v34 = vld [vmem:[%s21340_s8 + $0x458] sm:$0xff] }
0x18b8   : > { %11392 = vmatpush1.bf16.msra.mxu0 %v16996_v16  ;;  %v8428_v16 = vld [vmem:[%s21340_s8 + $0xe58] sm:$0xff] }
0x18b9   : > { %11435 = vmatpush1.bf16.msra.mxu1 %v17252_v58  ;;  %11393 = vmatprep.subr.bf16.mxu0 %v16981_v36  ;;  %v17156_v58 = vcombine.low %v8180_v47, %v8188_v27  ;;  %v17412_v36 = vcombine.low %v8436_v43, %v8444_v41  ;;  %v17397_v39 = vcombine.high %v8420_v28, %v8428_v16  ;;  %v8356_v40 = vld [vmem:[%s21340_s8 + $0xc18] sm:$0xff]  ;;  %v8085_v27 = vld [vmem:[%s21340_s8 + $0x3a0] sm:$0xff] }
0x18ba   : > { %11436 = vmatprep.subr.bf16.mxu1 %v17237_v49  ;;  %v17141_v49 = vcombine.high %v8164_v22, %v8172_v23  ;;  %v8093_v43 = vld [vmem:[%s21340_s8 + $0x3e0] sm:$0xff] }
0x18bb   : > { %v8341_v41 = vld [vmem:[%s21340_s8 + $0xba0] sm:$0xff] }
0x18bc   : > { %11394 = vmatpush1.bf16.msra.mxu0 %v16980_v3  ;;  %v8412_v3 = vld [vmem:[%s21340_s8 + $0xdd8] sm:$0xff] }
0x18bd   : > { %11437 = vmatpush1.bf16.msra.mxu1 %v17236_v51  ;;  %11395 = vmatprep.subr.bf16.mxu0 %v16965_v38  ;;  %v17140_v51 = vcombine.low %v8164_v22, %v8172_v23  ;;  %v17396_v38 = vcombine.low %v8420_v28, %v8428_v16  ;;  %v17381_v54 = vcombine.high %v8404_v42, %v8412_v3  ;;  %v22814_v22 = vld [vmem:[%s21347_s29] sm:$0xff] }
0x18be   : > { %11438 = vmatprep.subr.bf16.mxu1 %v17221_v17  ;;  %v17125_v17 = vcombine.high %v8148_v44, %v8156_v32  ;;  %v8069_v28 = vld [vmem:[%s21340_s8 + $0x320] sm:$0xff] }
0x18bf   : > { %v8077_v16 = vld [vmem:[%s21340_s8 + $0x360] sm:$0xff] }
0x18c0   : > { %11396 = vmatpush1.bf16.msra.mxu0 %v16964_v46  ;;  %v8396_v46 = vld [vmem:[%s21340_s8 + $0xd58] sm:$0xff] }
0x18c1   : > { %11439 = vmatpush1.bf16.msra.mxu1 %v17220_v8  ;;  %11397 = vmatprep.subr.bf16.mxu0 %v16949_v37  ;;  %v17124_v8 = vcombine.low %v8148_v44, %v8156_v32  ;;  %v17380_v37 = vcombine.low %v8404_v42, %v8412_v3  ;;  %v17365_v56 = vcombine.high %v8388_v62, %v8396_v46  ;;  %v8053_v42 = vld [vmem:[%s21340_s8 + $0x2a0] sm:$0xff] }
0x18c2   : > { %11440 = vmatprep.subr.bf16.mxu1 %v17205_v30  ;;  %v17109_v30 = vcombine.high %v8132_v24, %v8140_v45  ;;  %v17047_v32 = vcombine.high %v8069_v28, %v8077_v16  ;;  %v8061_v3 = vld [vmem:[%s21340_s8 + $0x2e0] sm:$0xff] }
0x18c4   : > { %11398 = vmatpush1.bf16.msra.mxu0 %v16948_v18  ;;  %v8380_v18 = vld [vmem:[%s21340_s8 + $0xcd8] sm:$0xff] }
0x18c5   : > { %11441 = vmatpush1.bf16.msra.mxu1 %v17204_v61  ;;  %11399 = vmatprep.subr.bf16.mxu0 %v17189_v0  ;;  %v17108_v61 = vcombine.low %v8132_v24, %v8140_v45  ;;  %v17364_v0 = vcombine.low %v8388_v62, %v8396_v46  ;;  %v17349_v20 = vcombine.high %v8372_v59, %v8380_v18  ;;  %v8317_v24 = vld [vmem:[%s21340_s8 + $0xae0] sm:$0xff] }
0x18c6   : > { %11442 = vmatprep.subr.bf16.mxu1 %v17445_v1  ;;  %v17093_v1 = vcombine.high %v8116_v19, %v8124_v57  ;;  %v17046_v62 = vcombine.low %v8069_v28, %v8077_v16  ;;  %v8005_v16 = vld [vmem:[%s21340_s8 + $0x120] sm:$0xff] }
0x18c8   : > { %11400 = vmatpush2.bf16.msra.mxu0 %v17188_v33  ;;  %v8364_v33 = vld [vmem:[%s21340_s8 + $0xc58] sm:$0xff] }
0x18c9   : > { %11443 = vmatpush2.bf16.msra.mxu1 %v17444_v4  ;;  %11401 = vmatprep.subr.bf16.mxu0 %v17173_v35  ;;  %v17092_v4 = vcombine.low %v8116_v19, %v8124_v57  ;;  %v17348_v35 = vcombine.low %v8372_v59, %v8380_v18  ;;  %v17333_v47 = vcombine.high %v8356_v40, %v8364_v33  ;;  %v8037_v57 = vld [vmem:[%s21340_s8 + $0x220] sm:$0xff] }
0x18ca   : > { %11444 = vmatprep.subr.bf16.mxu1 %v17429_v52  ;;  %v17077_v52 = vcombine.high %v8100_v25, %v8108_v34  ;;  %v8045_v59 = vld [vmem:[%s21340_s8 + $0x260] sm:$0xff] }
0x18cc   : > { %11402 = vmatpush2.bf16.msra.mxu0 %v17172_v9  ;;  %v8349_v9 = vld [vmem:[%s21340_s8 + $0xbe0] sm:$0xff] }
0x18cd   : > { %11445 = vmatpush2.bf16.msra.mxu1 %v17428_v12  ;;  %11403 = vmatprep.subr.bf16.mxu0 %v17157_v5  ;;  %v17076_v12 = vcombine.low %v8100_v25, %v8108_v34  ;;  %v17332_v5 = vcombine.low %v8356_v40, %v8364_v33  ;;  %v17319_v23 = vcombine.high %v8341_v41, %v8349_v9 }
0x18ce   : > { %11446 = vmatprep.subr.bf16.mxu1 %v17413_v48  ;;  %v17063_v48 = vcombine.high %v8085_v27, %v8093_v43  ;;  %v17318_v44 = vcombine.low %v8341_v41, %v8349_v9  ;;  %v17030_v25 = vcombine.low %v8053_v42, %v8061_v3  ;;  %v17015_v33 = vcombine.high %v8037_v57, %v8045_v59  ;;  %v8285_v41 = vld [vmem:[%s21340_s8 + $0x9e0] sm:$0xff] }
0x18d0   : > { %11404 = vmatpush2.bf16.msra.mxu0 %v17156_v58  ;;  %v17062_v58 = vcombine.low %v8085_v27, %v8093_v43  ;;  %v8029_v27 = vld [vmem:[%s21340_s8 + $0x1e0] sm:$0xff] }
0x18d1   : > { %11447 = vmatpush2.bf16.msra.mxu1 %v17412_v36  ;;  %11405 = vmatprep.subr.bf16.mxu0 %v17141_v49  ;;  %v8488_v36 = vrot.slane %v22814_v22, %v21508_v14  ;;  %v8325_v49 = vld [vmem:[%s21340_s8 + $0xb20] sm:$0xff] }
0x18d2   : > { %11448 = vmatprep.subr.bf16.mxu1 %v17397_v39  ;;  %v8333_v39 = vld [vmem:[%s21340_s8 + $0xb60] sm:$0xff] }
0x18d3   : > { %v8277_v43 = vld [vmem:[%s21340_s8 + $0x9a0] sm:$0xff] }
0x18d4   : > { %11406 = vmatpush2.bf16.msra.mxu0 %v17140_v51  ;;  %v17255_v28 = vcombine.high %v8277_v43, %v8285_v41 }
0x18d5   : > { %11449 = vmatpush2.bf16.msra.mxu1 %v17396_v38  ;;  %11407 = vmatprep.subr.bf16.mxu0 %v17125_v17  ;;  %v17303_v17 = vcombine.high %v8325_v49, %v8333_v39 }
0x18d6   : > { %11450 = vmatprep.subr.bf16.mxu1 %v17381_v54  ;;  %v8309_v54 = vld [vmem:[%s21340_s8 + $0xaa0] sm:$0xff] }
0x18d7   : > { %v17287_v19 = vcombine.high %v8309_v54, %v8317_v24  ;;  %v17286_v40 = vcombine.low %v8309_v54, %v8317_v24 }
0x18d8   : > { %11408 = vmatpush2.bf16.msra.mxu0 %v17124_v8 }
0x18d9   : > { %11451 = vmatpush2.bf16.msra.mxu1 %v17380_v37  ;;  %11409 = vmatprep.subr.bf16.mxu0 %v17109_v30  ;;  %v17302_v37 = vcombine.low %v8325_v49, %v8333_v39  ;;  %v17031_v30 = vcombine.high %v8053_v42, %v8061_v3  ;;  %v8269_v49 = vld [vmem:[%s21340_s8 + $0x960] sm:$0xff] }
0x18da   : > { %11452 = vmatprep.subr.bf16.mxu1 %v17365_v56  ;;  %v7989_v3 = vld [vmem:[%s21340_s8 + $0xa0] sm:$0xff] }
0x18dc   : > { %11410 = vmatpush2.bf16.msra.mxu0 %v17108_v61  ;;  %v8293_v61 = vld [vmem:[%s21340_s8 + $0xa20] sm:$0xff] }
0x18dd   : > { %11453 = vmatpush2.bf16.msra.mxu1 %v17364_v0  ;;  %11411 = vmatprep.subr.bf16.mxu0 %v17093_v1  ;;  %v8301_v0 = vld [vmem:[%s21340_s8 + $0xa60] sm:$0xff] }
0x18de   : > { %11454 = vmatprep.subr.bf16.mxu1 %v17349_v20 }
0x18e0   : > { %11412 = vmatpush2.bf16.msra.mxu0 %v17092_v4 }
0x18e1   : > { %11455 = vmatpush2.bf16.msra.mxu1 %v17348_v35  ;;  %11413 = vmatprep.subr.bf16.mxu0 %v17077_v52  ;;  %v17271_v52 = vcombine.high %v8293_v61, %v8301_v0 }
0x18e2   : > { %11456 = vmatprep.subr.bf16.mxu1 %v17333_v47  ;;  %v8021_v47 = vld [vmem:[%s21340_s8 + $0x1a0] sm:$0xff] }
0x18e3   : > { %v16998_v39 = vcombine.low %v8021_v47, %v8029_v27 }
0x18e4   : > { %11414 = vmatpush2.bf16.msra.mxu0 %v17076_v12  ;;  %v17014_v12 = vcombine.low %v8037_v57, %v8045_v59  ;;  %v8237_v57 = vld [vmem:[%s21340_s8 + $0x860] sm:$0xff] }
0x18e5   : > { %11457 = vmatpush2.bf16.msra.mxu1 %v17332_v5  ;;  %11469 = vmatprep.subr.bf16.mxu0 %v17063_v48  ;;  %v17270_v5 = vcombine.low %v8293_v61, %v8301_v0  ;;  %v16999_v48 = vcombine.high %v8021_v47, %v8029_v27 }
0x18e6   : > { %11512 = vmatprep.subr.bf16.mxu1 %v17319_v23 }
0x18e7   : > { %11416 = vmatmul.mubr.bf16.vlgmr.msra.gmra.mxu0 %v22601_v63  ;;  %v11159_v51 = vpop.f32.mrf.mxu0  ;;  %v11202_v38 = vpop.f32.mrf.mxu1 }
0x18e8   : > { %11459 = vmatmul.mubr.bf16.vlgmr.msra.gmra.mxu1 %v22603_v2  ;;  %v11160_v45 = vadd.f32 %v11159_v51, %v8488_v36  ;;  %11470 = vmatpush1.bf16.msra.mxu0 %v17062_v58  ;;  %v8013_v58 = vld [vmem:[%s21340_s8 + $0x160] sm:$0xff] }
0x18e9   : > { %11501 = vmatprep.mubr.bf16.mxu0 %v22597_v50  ;;  %11513 = vmatpush1.bf16.msra.mxu1 %v17318_v44  ;;  %v22829_v46 = vpop.f32.mrf.mxu0  ;;  %v22831_v8 = vpop.f32.mrf.mxu1  ;;  %v17254_v44 = vcombine.low %v8277_v43, %v8285_v41  ;;  %v7997_v51 = vld [vmem:[%s21340_s8 + $0xe0] sm:$0xff]  ;;  %v16982_v54 = vcombine.low %v8005_v16, %v8013_v58 }
0x18ea   : > { %v22833_v56 = vadd.f32 %v11202_v38, %v11160_v45  ;;  %11544 = vmatprep.mubr.bf16.mxu1 %v22599_v7  ;;  %11471 = vmatprep.subr.bf16.mxu0 %v17047_v32  ;;  %v16983_v32 = vcombine.high %v8005_v16, %v8013_v58  ;;  %v8245_v38 = vld [vmem:[%s21340_s8 + $0x8a0] sm:$0xff]  ;;  %v16967_v45 = vcombine.high %v7989_v3, %v7997_v51 }
0x18eb   : > { %11514 = vmatprep.subr.bf16.mxu1 %v17303_v17  ;;  %v11163_v18 = vpop.f32.mrf.mxu0  ;;  %v11206_v34 = vpop.f32.mrf.mxu1  ;;  %v8253_v17 = vld [vmem:[%s21340_s8 + $0x8e0] sm:$0xff]  ;;  %v16966_v59 = vcombine.low %v7989_v3, %v7997_v51 }
0x18ec   : > { %v17454_v1 = vmul.f32 -1.702, %v22833_v56  ;;  %v11164_v20 = vadd.f32 %v11163_v18, %v8488_v36  ;;  %11472 = vmatpush1.bf16.msra.mxu0 %v17046_v62  ;;  %v8261_v36 = vld [vmem:[%s21340_s8 + $0x920] sm:$0xff]  ;;  %v17223_v62 = vcombine.high %v8245_v38, %v8253_v17  ;;  %v17222_v61 = vcombine.low %v8245_v38, %v8253_v17 }
0x18ed   : > { %11515 = vmatpush1.bf16.msra.mxu1 %v17302_v37  ;;  %11473 = vmatprep.subr.bf16.mxu0 %v17031_v30  ;;  %v17239_v42 = vcombine.high %v8261_v36, %v8269_v49  ;;  %v17238_v24 = vcombine.low %v8261_v36, %v8269_v49  ;;  %v7973_v37 = vld [vmem:[%s21340_s8 + $0x20] sm:$0xff] }
0x18ee   : > { %v11877_v4 = vmul.f32 1.442695, %v17454_v1  ;;  %v22841_v35 = vadd.f32 %v11206_v34, %v11164_v20  ;;  %11516 = vmatprep.subr.bf16.mxu1 %v17287_v19  ;;  %v7981_v30 = vld [vmem:[%s21340_s8 + $0x60] sm:$0xff] }
0x18ef   : > { %v8229_v19 = vld [vmem:[%s21340_s8 + $0x820] sm:$0xff]  ;;  %v16951_v0 = vcombine.high %v7973_v37, %v7981_v30 }
0x18f0   : > { %19944 = vpow2.f32 %v11877_v4  ;;  %v17470_v9 = vmul.f32 -1.702, %v22841_v35  ;;  %11474 = vmatpush1.bf16.msra.mxu0 %v17030_v25  ;;  %v17207_v20 = vcombine.high %v8229_v19, %v8237_v57  ;;  %v8213_v25 = vld [vmem:[%s21340_s8 + $0x7a0] sm:$0xff]  ;;  %v16950_v4 = vcombine.low %v7973_v37, %v7981_v30 }
0x18f1   : > { %11517 = vmatpush1.bf16.msra.mxu1 %v17286_v40  ;;  %11475 = vmatprep.subr.bf16.mxu0 %v17015_v33  ;;  %v8221_v34 = vld [vmem:[%s21340_s8 + $0x7e0] sm:$0xff]  ;;  %v17206_v47 = vcombine.low %v8229_v19, %v8237_v57 }
0x18f2   : > { %v11909_v23 = vmul.f32 1.442695, %v17470_v9  ;;  %11518 = vmatprep.subr.bf16.mxu1 %v17271_v52  ;;  %v8469_v40 = vld [vmem:[%s21340_s8 + $0xfa0] sm:$0xff]  ;;  %v17191_v27 = vcombine.high %v8213_v25, %v8221_v34 }
0x18f3   : > { %v8477_v33 = vld [vmem:[%s21340_s8 + $0xfe0] sm:$0xff] }
0x18f4   : > { %19946 = vpow2.f32 %v11909_v23  ;;  %11476 = vmatpush1.bf16.msra.mxu0 %v17014_v12  ;;  %v17447_v41 = vcombine.high %v8469_v40, %v8477_v33  ;;  %v8197_v9 = vld [vmem:[%s21340_s8 + $0x720] sm:$0xff]  ;;  %v17190_v23 = vcombine.low %v8213_v25, %v8221_v34 }
0x18f5   : > { %11519 = vmatpush1.bf16.msra.mxu1 %v17270_v5  ;;  %11477 = vmatprep.subr.bf16.mxu0 %v16999_v48  ;;  %v8205_v12 = vld [vmem:[%s21340_s8 + $0x760] sm:$0xff] }
0x18f6   : > { %11520 = vmatprep.subr.bf16.mxu1 %v17255_v28  ;;  %v8453_v5 = vld [vmem:[%s21340_s8 + $0xf20] sm:$0xff]  ;;  %v17446_v28 = vcombine.low %v8469_v40, %v8477_v33  ;;  %v17175_v16 = vcombine.high %v8197_v9, %v8205_v12 }
0x18f7   : > { %v8461_v48 = vld [vmem:[%s21340_s8 + $0xf60] sm:$0xff] }
0x18f8   : > { %11478 = vmatpush1.bf16.msra.mxu0 %v16998_v39  ;;  %v17431_v58 = vcombine.high %v8453_v5, %v8461_v48  ;;  %v8181_v36 = vld [vmem:[%s21340_s8 + $0x6a0] sm:$0xff] }
0x18f9   : > { %11521 = vmatpush1.bf16.msra.mxu1 %v17254_v44  ;;  %11479 = vmatprep.subr.bf16.mxu0 %v16983_v32  ;;  %v8189_v49 = vld [vmem:[%s21340_s8 + $0x6e0] sm:$0xff]  ;;  %v17174_v32 = vcombine.low %v8197_v9, %v8205_v12 }
0x18fa   : > { %11522 = vmatprep.subr.bf16.mxu1 %v17239_v42  ;;  %v8437_v39 = vld [vmem:[%s21340_s8 + $0xea0] sm:$0xff]  ;;  %v17430_v42 = vcombine.low %v8453_v5, %v8461_v48  ;;  %v17159_v3 = vcombine.high %v8181_v36, %v8189_v49 }
0x18fb   : > { %v8445_v44 = vld [vmem:[%s21340_s8 + $0xee0] sm:$0xff] }
0x18fc   : > { %11480 = vmatpush1.bf16.msra.mxu0 %v16982_v54  ;;  %v17415_v51 = vcombine.high %v8437_v39, %v8445_v44  ;;  %v8165_v38 = vld [vmem:[%s21340_s8 + $0x620] sm:$0xff] }
0x18fd   : > { %v19945_v18 = vpop.eup %19944  ;;  %11523 = vmatpush1.bf16.msra.mxu1 %v17238_v24  ;;  %11481 = vmatprep.subr.bf16.mxu0 %v16967_v45  ;;  %v8173_v17 = vld [vmem:[%s21340_s8 + $0x660] sm:$0xff]  ;;  %v17158_v45 = vcombine.low %v8181_v36, %v8189_v49 }
0x18fe   : > { %v11941_v1 = vadd.f32 1.0, %v19945_v18  ;;  %11524 = vmatprep.subr.bf16.mxu1 %v17223_v62  ;;  %v8421_v54 = vld [vmem:[%s21340_s8 + $0xe20] sm:$0xff]  ;;  %v17414_v62 = vcombine.low %v8437_v39, %v8445_v44  ;;  %v17143_v37 = vcombine.high %v8165_v38, %v8173_v17 }
0x18ff   : > { %v8429_v24 = vld [vmem:[%s21340_s8 + $0xe60] sm:$0xff] }
0x1900   : > { %11482 = vmatpush1.bf16.msra.mxu0 %v16966_v59  ;;  %19948 = vrcp.f32 %v11941_v1  ;;  %v17399_v30 = vcombine.high %v8421_v54, %v8429_v24  ;;  %v8149_v19 = vld [vmem:[%s21340_s8 + $0x5a0] sm:$0xff] }
0x1901   : > { %v19947_v52 = vpop.eup %19946  ;;  %11525 = vmatpush1.bf16.msra.mxu1 %v17222_v61  ;;  %11483 = vmatprep.subr.bf16.mxu0 %v16951_v0  ;;  %v8157_v57 = vld [vmem:[%s21340_s8 + $0x5e0] sm:$0xff]  ;;  %v17142_v0 = vcombine.low %v8165_v38, %v8173_v17  ;;  %v8086_v17 = vld [vmem:[%s21340_s8 + $0x3a8] sm:$0xff] }
0x1902   : > { %v11957_v43 = vadd.f32 1.0, %v19947_v52  ;;  %11526 = vmatprep.subr.bf16.mxu1 %v17207_v20  ;;  %v8405_v18 = vld [vmem:[%s21340_s8 + $0xda0] sm:$0xff]  ;;  %v17398_v20 = vcombine.low %v8421_v54, %v8429_v24  ;;  %v17127_v25 = vcombine.high %v8149_v19, %v8157_v57  ;;  %v8094_v54 = vld [vmem:[%s21340_s8 + $0x3e8] sm:$0xff] }
0x1903   : > { %v8413_v61 = vld [vmem:[%s21340_s8 + $0xde0] sm:$0xff]  ;;  %v8342_v24 = vld [vmem:[%s21340_s8 + $0xba8] sm:$0xff] }
0x1904   : > { %19950 = vrcp.f32 %v11957_v43  ;;  %11484 = vmatpush1.bf16.msra.mxu0 %v16950_v4  ;;  %v17383_v33 = vcombine.high %v8405_v18, %v8413_v61  ;;  %v8133_v4 = vld [vmem:[%s21340_s8 + $0x520] sm:$0xff]  ;;  %v17382_v9 = vcombine.low %v8405_v18, %v8413_v61  ;;  %v8496_v18 = vrot.slane %v22814_v22, %v21511_v15 }
0x1905   : > { %11527 = vmatpush1.bf16.msra.mxu1 %v17206_v47  ;;  %11485 = vmatprep.subr.bf16.mxu0 %v17191_v27  ;;  %v8141_v52 = vld [vmem:[%s21340_s8 + $0x560] sm:$0xff]  ;;  %v17064_v61 = vcombine.low %v8086_v17, %v8094_v54 }
0x1906   : > { %11528 = vmatprep.subr.bf16.mxu1 %v17447_v41  ;;  %v8389_v47 = vld [vmem:[%s21340_s8 + $0xd20] sm:$0xff]  ;;  %v17126_v41 = vcombine.low %v8149_v19, %v8157_v57  ;;  %v8070_v57 = vld [vmem:[%s21340_s8 + $0x328] sm:$0xff] }
0x1907   : > { %v8397_v27 = vld [vmem:[%s21340_s8 + $0xd60] sm:$0xff] }
0x1908   : > { %11486 = vmatpush2.bf16.msra.mxu0 %v17190_v23  ;;  %v8117_v12 = vld [vmem:[%s21340_s8 + $0x4a0] sm:$0xff] }
0x1909   : > { %11529 = vmatpush2.bf16.msra.mxu1 %v17446_v28  ;;  %11487 = vmatprep.subr.bf16.mxu0 %v17175_v16  ;;  %v8125_v5 = vld [vmem:[%s21340_s8 + $0x4e0] sm:$0xff]  ;;  %v17110_v28 = vcombine.low %v8133_v4, %v8141_v52  ;;  %v17366_v16 = vcombine.low %v8389_v47, %v8397_v27 }
0x190a   : > { %11530 = vmatprep.subr.bf16.mxu1 %v17431_v58  ;;  %v8373_v48 = vld [vmem:[%s21340_s8 + $0xca0] sm:$0xff]  ;;  %v17095_v58 = vcombine.high %v8117_v12, %v8125_v5 }
0x190b   : > { %v8381_v23 = vld [vmem:[%s21340_s8 + $0xce0] sm:$0xff] }
0x190c   : > { %11488 = vmatpush2.bf16.msra.mxu0 %v17174_v32  ;;  %v17351_v36 = vcombine.high %v8373_v48, %v8381_v23  ;;  %v8101_v49 = vld [vmem:[%s21340_s8 + $0x420] sm:$0xff] }
0x190d   : > { %11531 = vmatpush2.bf16.msra.mxu1 %v17430_v42  ;;  %11489 = vmatprep.subr.bf16.mxu0 %v17159_v3  ;;  %v19949_v59 = vpop.eup %19948  ;;  %v8109_v39 = vld [vmem:[%s21340_s8 + $0x460] sm:$0xff]  ;;  %v17094_v42 = vcombine.low %v8117_v12, %v8125_v5  ;;  %v17350_v3 = vcombine.low %v8373_v48, %v8381_v23 }
0x190e   : > { %11532 = vmatprep.subr.bf16.mxu1 %v17415_v51  ;;  %v12037_v34 = vmul.f32 %v19949_v59, %v22833_v56  ;;  %v17111_v56 = vcombine.high %v8133_v4, %v8141_v52  ;;  %v8357_v44 = vld [vmem:[%s21340_s8 + $0xc20] sm:$0xff]  ;;  %v17079_v51 = vcombine.high %v8101_v49, %v8109_v39  ;;  %v8078_v59 = vld [vmem:[%s21340_s8 + $0x368] sm:$0xff] }
0x190f   : > { %v8365_v32 = vld [vmem:[%s21340_s8 + $0xc60] sm:$0xff]  ;;  %v8062_v4 = vld [vmem:[%s21340_s8 + $0x2e8] sm:$0xff] }
0x1910   : > { %11490 = vmatpush2.bf16.msra.mxu0 %v17158_v45  ;;  %v17335_v38 = vcombine.high %v8357_v44, %v8365_v32  ;;  %v8350_v45 = vld [vmem:[%s21340_s8 + $0xbe8] sm:$0xff] }
0x1911   : > { %v19951_v1 = vpop.eup %19950  ;;  %11533 = vmatpush2.bf16.msra.mxu1 %v17414_v62  ;;  %11491 = vmatprep.subr.bf16.mxu0 %v17143_v37  ;;  %v17078_v62 = vcombine.low %v8101_v49, %v8109_v39  ;;  %v17334_v37 = vcombine.low %v8357_v44, %v8365_v32  ;;  %v17321_v19 = vcombine.high %v8342_v24, %v8350_v45  ;;  %v8294_v39 = vld [vmem:[%s21340_s8 + $0xa28] sm:$0xff] }
0x1912   : > { %v12053_v40 = vmul.f32 %v19951_v1, %v22841_v35  ;;  %11534 = vmatprep.subr.bf16.mxu1 %v17399_v30  ;;  %v17367_v35 = vcombine.high %v8389_v47, %v8397_v27  ;;  %v17065_v30 = vcombine.high %v8086_v17, %v8094_v54  ;;  %v8334_v1 = vld [vmem:[%s21340_s8 + $0xb68] sm:$0xff] }
0x1913   : > { %v8302_v44 = vld [vmem:[%s21340_s8 + $0xa68] sm:$0xff] }
0x1914   : > { %v22886_v43 = vpack.c.bf16 %v12053_v40, %v12037_v34  ;;  %11492 = vmatpush2.bf16.msra.mxu0 %v17142_v0  ;;  %v8326_v0 = vld [vmem:[%s21340_s8 + $0xb28] sm:$0xff]  ;;  %v17320_v34 = vcombine.low %v8342_v24, %v8350_v45  ;;  %v17049_v40 = vcombine.high %v8070_v57, %v8078_v59  ;;  %v17273_v45 = vcombine.high %v8294_v39, %v8302_v44 }
0x1915   : > { %11535 = vmatpush2.bf16.msra.mxu1 %v17398_v20  ;;  %11493 = vmatprep.subr.bf16.mxu0 %v17127_v25  ;;  %v22906_v20 = vpop.f32.mrf.mxu0  ;;  %v22908_v25 = vpop.f32.mrf.mxu1  ;;  %v17305_v27 = vcombine.high %v8326_v0, %v8334_v1  ;;  %v17304_v48 = vcombine.low %v8326_v0, %v8334_v1 }
0x1916   : > { %11536 = vmatprep.subr.bf16.mxu1 %v17383_v33  ;;  %v8054_v33 = vld [vmem:[%s21340_s8 + $0x2a8] sm:$0xff] }
0x1917   : > { %v17033_v23 = vcombine.high %v8054_v33, %v8062_v4 }
0x1918   : > { %11494 = vmatpush2.bf16.msra.mxu0 %v17126_v41  ;;  %v8310_v41 = vld [vmem:[%s21340_s8 + $0xaa8] sm:$0xff] }
0x1919   : > { %11537 = vmatpush2.bf16.msra.mxu1 %v17382_v9  ;;  %11495 = vmatprep.subr.bf16.mxu0 %v17111_v56  ;;  %v8318_v9 = vld [vmem:[%s21340_s8 + $0xae8] sm:$0xff] }
0x191a   : > { %11538 = vmatprep.subr.bf16.mxu1 %v17367_v35  ;;  %v17048_v35 = vcombine.low %v8070_v57, %v8078_v59 }
0x191c   : > { %11496 = vmatpush2.bf16.msra.mxu0 %v17110_v28 }
0x191d   : > { %11539 = vmatpush2.bf16.msra.mxu1 %v17366_v16  ;;  %11497 = vmatprep.subr.bf16.mxu0 %v17095_v58  ;;  %v17289_v16 = vcombine.high %v8310_v41, %v8318_v9  ;;  %v8038_v58 = vld [vmem:[%s21340_s8 + $0x228] sm:$0xff] }
0x191e   : > { %11540 = vmatprep.subr.bf16.mxu1 %v17351_v36  ;;  %v8046_v36 = vld [vmem:[%s21340_s8 + $0x268] sm:$0xff] }
0x191f   : > { %v17017_v17 = vcombine.high %v8038_v58, %v8046_v36  ;;  %v17016_v59 = vcombine.low %v8038_v58, %v8046_v36 }
0x1920   : > { %11498 = vmatpush2.bf16.msra.mxu0 %v17094_v42 }
0x1921   : > { %11541 = vmatpush2.bf16.msra.mxu1 %v17350_v3  ;;  %11499 = vmatprep.subr.bf16.mxu0 %v17079_v51  ;;  %v17032_v3 = vcombine.low %v8054_v33, %v8062_v4  ;;  %v8262_v33 = vld [vmem:[%s21340_s8 + $0x928] sm:$0xff] }
0x1922   : > { %11542 = vmatprep.subr.bf16.mxu1 %v17335_v38  ;;  %v17288_v38 = vcombine.low %v8310_v41, %v8318_v9  ;;  %v8270_v4 = vld [vmem:[%s21340_s8 + $0x968] sm:$0xff] }
0x1923   : > { %v17241_v41 = vcombine.high %v8262_v33, %v8270_v4  ;;  %v7990_v9 = vld [vmem:[%s21340_s8 + $0xa8] sm:$0xff] }
0x1924   : > { %11500 = vmatpush2.bf16.msra.mxu0 %v17078_v62  ;;  %v8022_v62 = vld [vmem:[%s21340_s8 + $0x1a8] sm:$0xff] }
0x1925   : > { %11543 = vmatpush2.bf16.msra.mxu1 %v17334_v37  ;;  %11555 = vmatprep.subr.bf16.mxu0 %v17065_v30  ;;  %v8030_v37 = vld [vmem:[%s21340_s8 + $0x1e8] sm:$0xff] }
0x1926   : > { %11598 = vmatprep.subr.bf16.mxu1 %v17321_v19  ;;  %v8278_v30 = vld [vmem:[%s21340_s8 + $0x9a8] sm:$0xff] }
0x1927   : > { %v11245_v52 = vpop.f32.mrf.mxu0  ;;  %v11288_v47 = vpop.f32.mrf.mxu1  ;;  %11502 = vmatmul.mubr.bf16.vlgmr.msra.gmra.mxu0 %v22601_v63  ;;  %v8286_v19 = vld [vmem:[%s21340_s8 + $0x9e8] sm:$0xff] }
0x1928   : > { %v11246_v56 = vadd.f32 %v11245_v52, %v8496_v18  ;;  %11545 = vmatmul.mubr.bf16.vlgmr.msra.gmra.mxu1 %v22603_v2  ;;  %11556 = vmatpush1.bf16.msra.mxu0 %v17064_v61  ;;  %v17001_v61 = vcombine.high %v8022_v62, %v8030_v37  ;;  %v17257_v1 = vcombine.high %v8278_v30, %v8286_v19 }
0x1929   : > { %11587 = vmatprep.mubr.bf16.mxu0 %v22597_v50  ;;  %11599 = vmatpush1.bf16.msra.mxu1 %v17320_v34  ;;  %v22917_v12 = vpop.f32.mrf.mxu0  ;;  %v22919_v5 = vpop.f32.mrf.mxu1  ;;  %v8006_v34 = vld [vmem:[%s21340_s8 + $0x128] sm:$0xff]  ;;  %v17000_v52 = vcombine.low %v8022_v62, %v8030_v37 }
0x192a   : > { %v22921_v28 = vadd.f32 %v11288_v47, %v11246_v56  ;;  %11630 = vmatprep.mubr.bf16.mxu1 %v22599_v7  ;;  %11557 = vmatprep.subr.bf16.mxu0 %v17049_v40  ;;  %v8014_v40 = vld [vmem:[%s21340_s8 + $0x168] sm:$0xff]  ;;  %v17256_v47 = vcombine.low %v8278_v30, %v8286_v19 }
0x192b   : > { %v11249_v49 = vpop.f32.mrf.mxu0  ;;  %11600 = vmatprep.subr.bf16.mxu1 %v17305_v27  ;;  %v11292_v51 = vpop.f32.mrf.mxu1  ;;  %v16985_v27 = vcombine.high %v8006_v34, %v8014_v40  ;;  %v7998_v56 = vld [vmem:[%s21340_s8 + $0xe8] sm:$0xff] }
0x192c   : > { %v17456_v32 = vmul.f32 -1.702, %v22921_v28  ;;  %v11250_v42 = vadd.f32 %v11249_v49, %v8496_v18  ;;  %11558 = vmatpush1.bf16.msra.mxu0 %v17048_v35  ;;  %v17272_v18 = vcombine.low %v8294_v39, %v8302_v44  ;;  %v8246_v35 = vld [vmem:[%s21340_s8 + $0x8a8] sm:$0xff]  ;;  %v16969_v58 = vcombine.high %v7990_v9, %v7998_v56 }
0x192d   : > { %11601 = vmatpush1.bf16.msra.mxu1 %v17304_v48  ;;  %11559 = vmatprep.subr.bf16.mxu0 %v17033_v23  ;;  %v8254_v48 = vld [vmem:[%s21340_s8 + $0x8e8] sm:$0xff]  ;;  %v16984_v23 = vcombine.low %v8006_v34, %v8014_v40 }
0x192e   : > { %v11881_v54 = vmul.f32 1.442695, %v17456_v32  ;;  %v22929_v24 = vadd.f32 %v11292_v51, %v11250_v42  ;;  %11602 = vmatprep.subr.bf16.mxu1 %v17289_v16  ;;  %v17240_v16 = vcombine.low %v8262_v33, %v8270_v4  ;;  %v17225_v36 = vcombine.high %v8246_v35, %v8254_v48  ;;  %v7974_v49 = vld [vmem:[%s21340_s8 + $0x28] sm:$0xff] }
0x192f   : > { %v7982_v39 = vld [vmem:[%s21340_s8 + $0x68] sm:$0xff]  ;;  %v16968_v42 = vcombine.low %v7990_v9, %v7998_v56  ;;  %v17224_v51 = vcombine.low %v8246_v35, %v8254_v48 }
0x1930   : > { %19952 = vpow2.f32 %v11881_v54  ;;  %v17472_v57 = vmul.f32 -1.702, %v22929_v24  ;;  %11560 = vmatpush1.bf16.msra.mxu0 %v17032_v3  ;;  %v8230_v44 = vld [vmem:[%s21340_s8 + $0x828] sm:$0xff]  ;;  %v16952_v19 = vcombine.low %v7974_v49, %v7982_v39 }
0x1931   : > { %11603 = vmatpush1.bf16.msra.mxu1 %v17288_v38  ;;  %11561 = vmatprep.subr.bf16.mxu0 %v17017_v17  ;;  %v8238_v32 = vld [vmem:[%s21340_s8 + $0x868] sm:$0xff]  ;;  %v16953_v38 = vcombine.high %v7974_v49, %v7982_v39 }
0x1932   : > { %v11913_v0 = vmul.f32 1.442695, %v17472_v57  ;;  %11604 = vmatprep.subr.bf16.mxu1 %v17273_v45  ;;  %v17209_v54 = vcombine.high %v8230_v44, %v8238_v32  ;;  %v8214_v45 = vld [vmem:[%s21340_s8 + $0x7a8] sm:$0xff] }
0x1933   : > { %v8222_v62 = vld [vmem:[%s21340_s8 + $0x7e8] sm:$0xff] }
0x1934   : > { %19954 = vpow2.f32 %v11913_v0  ;;  %11562 = vmatpush1.bf16.msra.mxu0 %v17016_v59  ;;  %v8470_v37 = vld [vmem:[%s21340_s8 + $0xfa8] sm:$0xff]  ;;  %v17208_v59 = vcombine.low %v8230_v44, %v8238_v32  ;;  %v17192_v4 = vcombine.low %v8214_v45, %v8222_v62 }
0x1935   : > { %11605 = vmatpush1.bf16.msra.mxu1 %v17272_v18  ;;  %11563 = vmatprep.subr.bf16.mxu0 %v17001_v61  ;;  %v8478_v30 = vld [vmem:[%s21340_s8 + $0xfe8] sm:$0xff]  ;;  %v17193_v18 = vcombine.high %v8214_v45, %v8222_v62 }
0x1936   : > { %11606 = vmatprep.subr.bf16.mxu1 %v17257_v1  ;;  %v17449_v0 = vcombine.high %v8470_v37, %v8478_v30  ;;  %v8198_v1 = vld [vmem:[%s21340_s8 + $0x728] sm:$0xff] }
0x1937   : > { %v8206_v34 = vld [vmem:[%s21340_s8 + $0x768] sm:$0xff] }
0x1938   : > { %11564 = vmatpush1.bf16.msra.mxu0 %v17000_v52  ;;  %v8454_v40 = vld [vmem:[%s21340_s8 + $0xf28] sm:$0xff]  ;;  %v17448_v52 = vcombine.low %v8470_v37, %v8478_v30  ;;  %v17176_v48 = vcombine.low %v8198_v1, %v8206_v34 }
0x1939   : > { %11607 = vmatpush1.bf16.msra.mxu1 %v17256_v47  ;;  %11565 = vmatprep.subr.bf16.mxu0 %v16985_v27  ;;  %v8462_v33 = vld [vmem:[%s21340_s8 + $0xf68] sm:$0xff]  ;;  %v17177_v47 = vcombine.high %v8198_v1, %v8206_v34 }
0x193a   : > { %11608 = vmatprep.subr.bf16.mxu1 %v17241_v41  ;;  %v17433_v27 = vcombine.high %v8454_v40, %v8462_v33  ;;  %v8182_v41 = vld [vmem:[%s21340_s8 + $0x6a8] sm:$0xff] }
0x193b   : > { %v8190_v9 = vld [vmem:[%s21340_s8 + $0x6e8] sm:$0xff] }
0x193c   : > { %11566 = vmatpush1.bf16.msra.mxu0 %v16984_v23  ;;  %v8438_v56 = vld [vmem:[%s21340_s8 + $0xea8] sm:$0xff]  ;;  %v17432_v23 = vcombine.low %v8454_v40, %v8462_v33  ;;  %v17160_v32 = vcombine.low %v8182_v41, %v8190_v9 }
0x193d   : > { %v19953_v3 = vpop.eup %19952  ;;  %11609 = vmatpush1.bf16.msra.mxu1 %v17240_v16  ;;  %11567 = vmatprep.subr.bf16.mxu0 %v16969_v58  ;;  %v8446_v35 = vld [vmem:[%s21340_s8 + $0xee8] sm:$0xff]  ;;  %v17161_v16 = vcombine.high %v8182_v41, %v8190_v9 }
0x193e   : > { %v11943_v17 = vadd.f32 1.0, %v19953_v3  ;;  %11610 = vmatprep.subr.bf16.mxu1 %v17225_v36  ;;  %v17417_v58 = vcombine.high %v8438_v56, %v8446_v35  ;;  %v8166_v36 = vld [vmem:[%s21340_s8 + $0x628] sm:$0xff] }
0x193f   : > { %v8174_v49 = vld [vmem:[%s21340_s8 + $0x668] sm:$0xff] }
0x1940   : > { %11568 = vmatpush1.bf16.msra.mxu0 %v16968_v42  ;;  %19956 = vrcp.f32 %v11943_v17  ;;  %v8422_v39 = vld [vmem:[%s21340_s8 + $0xe28] sm:$0xff]  ;;  %v17416_v42 = vcombine.low %v8438_v56, %v8446_v35  ;;  %v17145_v3 = vcombine.high %v8166_v36, %v8174_v49  ;;  %v17144_v37 = vcombine.low %v8166_v36, %v8174_v49 }
0x1941   : > { %v19955_v57 = vpop.eup %19954  ;;  %11611 = vmatpush1.bf16.msra.mxu1 %v17224_v51  ;;  %11569 = vmatprep.subr.bf16.mxu0 %v16953_v38  ;;  %v8430_v44 = vld [vmem:[%s21340_s8 + $0xe68] sm:$0xff] }
0x1942   : > { %v11959_v61 = vadd.f32 1.0, %v19955_v57  ;;  %11612 = vmatprep.subr.bf16.mxu1 %v17209_v54  ;;  %v17401_v51 = vcombine.high %v8422_v39, %v8430_v44  ;;  %v8150_v38 = vld [vmem:[%s21340_s8 + $0x5a8] sm:$0xff] }
0x1943   : > { %v8158_v17 = vld [vmem:[%s21340_s8 + $0x5e8] sm:$0xff] }
0x1944   : > { %19958 = vrcp.f32 %v11959_v61  ;;  %11570 = vmatpush1.bf16.msra.mxu0 %v16952_v19  ;;  %v8406_v45 = vld [vmem:[%s21340_s8 + $0xda8] sm:$0xff]  ;;  %v17400_v19 = vcombine.low %v8422_v39, %v8430_v44  ;;  %v17129_v57 = vcombine.high %v8150_v38, %v8158_v17 }
0x1945   : > { %11613 = vmatpush1.bf16.msra.mxu1 %v17208_v59  ;;  %11571 = vmatprep.subr.bf16.mxu0 %v17193_v18  ;;  %v8414_v62 = vld [vmem:[%s21340_s8 + $0xde8] sm:$0xff] }
0x1946   : > { %11614 = vmatprep.subr.bf16.mxu1 %v17449_v0  ;;  %v17385_v61 = vcombine.high %v8406_v45, %v8414_v62  ;;  %v8134_v0 = vld [vmem:[%s21340_s8 + $0x528] sm:$0xff] }
0x1947   : > { %v8142_v1 = vld [vmem:[%s21340_s8 + $0x568] sm:$0xff] }
0x1948   : > { %11572 = vmatpush2.bf16.msra.mxu0 %v17192_v4  ;;  %v8390_v34 = vld [vmem:[%s21340_s8 + $0xd28] sm:$0xff]  ;;  %v17128_v4 = vcombine.low %v8150_v38, %v8158_v17  ;;  %v17112_v56 = vcombine.low %v8134_v0, %v8142_v1  ;;  %v8343_v38 = vld [vmem:[%s21340_s8 + $0xbb0] sm:$0xff] }
0x1949   : > { %11615 = vmatpush2.bf16.msra.mxu1 %v17448_v52  ;;  %11573 = vmatprep.subr.bf16.mxu0 %v17177_v47  ;;  %v8398_v40 = vld [vmem:[%s21340_s8 + $0xd68] sm:$0xff]  ;;  %v17384_v52 = vcombine.low %v8406_v45, %v8414_v62  ;;  %v8351_v17 = vld [vmem:[%s21340_s8 + $0xbf0] sm:$0xff]  ;;  %v8503_v45 = vsub.s32 4, %v21497_v6 }
0x194a   : > { %11616 = vmatprep.subr.bf16.mxu1 %v17433_v27  ;;  %v8118_v47 = vld [vmem:[%s21340_s8 + $0x4a8] sm:$0xff]  ;;  %v17368_v35 = vcombine.low %v8390_v34, %v8398_v40 }
0x194b   : > { %v8126_v27 = vld [vmem:[%s21340_s8 + $0x4e8] sm:$0xff] }
0x194c   : > { %11574 = vmatpush2.bf16.msra.mxu0 %v17176_v48  ;;  %v8374_v41 = vld [vmem:[%s21340_s8 + $0xca8] sm:$0xff]  ;;  %v17097_v48 = vcombine.high %v8118_v47, %v8126_v27  ;;  %v17096_v39 = vcombine.low %v8118_v47, %v8126_v27  ;;  %v8311_v47 = vld [vmem:[%s21340_s8 + $0xab0] sm:$0xff] }
0x194d   : > { %11617 = vmatpush2.bf16.msra.mxu1 %v17432_v23  ;;  %11575 = vmatprep.subr.bf16.mxu0 %v17161_v16  ;;  %v19957_v54 = vpop.eup %19956  ;;  %v8382_v9 = vld [vmem:[%s21340_s8 + $0xce8] sm:$0xff]  ;;  %v8319_v27 = vld [vmem:[%s21340_s8 + $0xaf0] sm:$0xff] }
0x194e   : > { %11618 = vmatprep.subr.bf16.mxu1 %v17417_v58  ;;  %v12039_v59 = vmul.f32 %v19957_v54, %v22921_v28  ;;  %v17113_v28 = vcombine.high %v8134_v0, %v8142_v1  ;;  %v17353_v23 = vcombine.high %v8374_v41, %v8382_v9  ;;  %v8102_v16 = vld [vmem:[%s21340_s8 + $0x428] sm:$0xff]  ;;  %v17352_v44 = vcombine.low %v8374_v41, %v8382_v9  ;;  %v8335_v0 = vld [vmem:[%s21340_s8 + $0xb70] sm:$0xff]  ;;  %v22996_v1 = vpop.f32.mrf.mxu0 }
0x194f   : > { %v8110_v58 = vld [vmem:[%s21340_s8 + $0x468] sm:$0xff] }
0x1950   : > { %11576 = vmatpush2.bf16.msra.mxu0 %v17160_v32  ;;  %v8358_v36 = vld [vmem:[%s21340_s8 + $0xc28] sm:$0xff]  ;;  %v17081_v32 = vcombine.high %v8102_v16, %v8110_v58  ;;  %v17080_v54 = vcombine.low %v8102_v16, %v8110_v58 }
0x1951   : > { %v19959_v30 = vpop.eup %19958  ;;  %11619 = vmatpush2.bf16.msra.mxu1 %v17416_v42  ;;  %11577 = vmatprep.subr.bf16.mxu0 %v17145_v3  ;;  %v8366_v49 = vld [vmem:[%s21340_s8 + $0xc68] sm:$0xff]  ;;  %v8087_v3 = vld [vmem:[%s21340_s8 + $0x3b0] sm:$0xff] }
0x1952   : > { %v12055_v18 = vmul.f32 %v19959_v30, %v22929_v24  ;;  %11620 = vmatprep.subr.bf16.mxu1 %v17401_v51  ;;  %v17369_v24 = vcombine.high %v8390_v34, %v8398_v40  ;;  %v17337_v42 = vcombine.high %v8358_v36, %v8366_v49  ;;  %v8095_v51 = vld [vmem:[%s21340_s8 + $0x3f0] sm:$0xff]  ;;  %v17336_v62 = vcombine.low %v8358_v36, %v8366_v49  ;;  %v22998_v40 = vpop.f32.mrf.mxu1 }
0x1953   : > { %v17323_v30 = vcombine.high %v8343_v38, %v8351_v17  ;;  %v17322_v34 = vcombine.low %v8343_v38, %v8351_v17  ;;  %v17291_v36 = vcombine.high %v8311_v47, %v8319_v27  ;;  %v8039_v49 = vld [vmem:[%s21340_s8 + $0x230] sm:$0xff] }
0x1954   : > { %v22974_v33 = vpack.c.bf16 %v12055_v18, %v12039_v59  ;;  %11578 = vmatpush2.bf16.msra.mxu0 %v17144_v37  ;;  %v17067_v37 = vcombine.high %v8087_v3, %v8095_v51  ;;  %v8504_v59 = vrot.slane %v22814_v22, %v8503_v45  ;;  %v17066_v18 = vcombine.low %v8087_v3, %v8095_v51 }
0x1955   : > { %11621 = vmatpush2.bf16.msra.mxu1 %v17400_v19  ;;  %11579 = vmatprep.subr.bf16.mxu0 %v17129_v57  ;;  %v8071_v19 = vld [vmem:[%s21340_s8 + $0x330] sm:$0xff] }
0x1956   : > { %11622 = vmatprep.subr.bf16.mxu1 %v17385_v61  ;;  %v8079_v57 = vld [vmem:[%s21340_s8 + $0x370] sm:$0xff] }
0x1957   : > { %v8327_v61 = vld [vmem:[%s21340_s8 + $0xb30] sm:$0xff] }
0x1958   : > { %11580 = vmatpush2.bf16.msra.mxu0 %v17128_v4  ;;  %v17051_v4 = vcombine.high %v8071_v19, %v8079_v57  ;;  %v17307_v22 = vcombine.high %v8327_v61, %v8335_v0 }
0x1959   : > { %11623 = vmatpush2.bf16.msra.mxu1 %v17384_v52  ;;  %11581 = vmatprep.subr.bf16.mxu0 %v17113_v28  ;;  %v8055_v52 = vld [vmem:[%s21340_s8 + $0x2b0] sm:$0xff] }
0x195a   : > { %11624 = vmatprep.subr.bf16.mxu1 %v17369_v24  ;;  %v8063_v28 = vld [vmem:[%s21340_s8 + $0x2f0] sm:$0xff] }
0x195b   : > { %v17034_v38 = vcombine.low %v8055_v52, %v8063_v28 }
0x195c   : > { %11582 = vmatpush2.bf16.msra.mxu0 %v17112_v56  ;;  %v17050_v56 = vcombine.low %v8071_v19, %v8079_v57  ;;  %v8023_v57 = vld [vmem:[%s21340_s8 + $0x1b0] sm:$0xff] }
0x195d   : > { %11625 = vmatpush2.bf16.msra.mxu1 %v17368_v35  ;;  %11583 = vmatprep.subr.bf16.mxu0 %v17097_v48  ;;  %v17306_v48 = vcombine.low %v8327_v61, %v8335_v0  ;;  %v8279_v61 = vld [vmem:[%s21340_s8 + $0x9b0] sm:$0xff] }
0x195e   : > { %11626 = vmatprep.subr.bf16.mxu1 %v17353_v23  ;;  %v17035_v23 = vcombine.high %v8055_v52, %v8063_v28 }
0x1960   : > { %11584 = vmatpush2.bf16.msra.mxu0 %v17096_v39  ;;  %v8047_v39 = vld [vmem:[%s21340_s8 + $0x270] sm:$0xff] }
0x1961   : > { %11627 = vmatpush2.bf16.msra.mxu1 %v17352_v44  ;;  %11585 = vmatprep.subr.bf16.mxu0 %v17081_v32  ;;  %v8295_v32 = vld [vmem:[%s21340_s8 + $0xa30] sm:$0xff] }
0x1962   : > { %11628 = vmatprep.subr.bf16.mxu1 %v17337_v42  ;;  %v8303_v42 = vld [vmem:[%s21340_s8 + $0xa70] sm:$0xff] }
0x1963   : > { %v17275_v19 = vcombine.high %v8295_v32, %v8303_v42 }
0x1964   : > { %11586 = vmatpush2.bf16.msra.mxu0 %v17080_v54  ;;  %v17290_v54 = vcombine.low %v8311_v47, %v8319_v27  ;;  %v8015_v47 = vld [vmem:[%s21340_s8 + $0x170] sm:$0xff] }
0x1965   : > { %11629 = vmatpush2.bf16.msra.mxu1 %v17336_v62  ;;  %11641 = vmatprep.subr.bf16.mxu0 %v17067_v37  ;;  %v17019_v62 = vcombine.high %v8039_v49, %v8047_v39  ;;  %v8263_v27 = vld [vmem:[%s21340_s8 + $0x930] sm:$0xff] }
0x1966   : > { %11684 = vmatprep.subr.bf16.mxu1 %v17323_v30 }
0x1967   : > { %v11331_v24 = vpop.f32.mrf.mxu0  ;;  %11588 = vmatmul.mubr.bf16.vlgmr.msra.gmra.mxu0 %v22601_v63 }
0x1968   : > { %v11332_v41 = vadd.f32 %v11331_v24, %v8504_v59  ;;  %v11374_v9 = vpop.f32.mrf.mxu1  ;;  %11631 = vmatmul.mubr.bf16.vlgmr.msra.gmra.mxu1 %v22603_v2  ;;  %11642 = vmatpush1.bf16.msra.mxu0 %v17066_v18  ;;  %v8031_v18 = vld [vmem:[%s21340_s8 + $0x1f0] sm:$0xff] }
0x1969   : > { %11673 = vmatprep.mubr.bf16.mxu0 %v22597_v50  ;;  %11685 = vmatpush1.bf16.msra.mxu1 %v17322_v34  ;;  %v23007_v35 = vpop.f32.mrf.mxu0  ;;  %v17018_v34 = vcombine.low %v8039_v49, %v8047_v39  ;;  %v17003_v52 = vcombine.high %v8023_v57, %v8031_v18  ;;  %v7999_v49 = vld [vmem:[%s21340_s8 + $0xf0] sm:$0xff] }
0x196a   : > { %v23009_v16 = vadd.f32 %v11374_v9, %v11332_v41  ;;  %11716 = vmatprep.mubr.bf16.mxu1 %v22599_v7  ;;  %v23012_v58 = vpop.f32.mrf.mxu1  ;;  %11643 = vmatprep.subr.bf16.mxu0 %v17051_v4  ;;  %v17274_v4 = vcombine.low %v8295_v32, %v8303_v42  ;;  %v8271_v41 = vld [vmem:[%s21340_s8 + $0x970] sm:$0xff]  ;;  %v17002_v9 = vcombine.low %v8023_v57, %v8031_v18 }
0x196b   : > { %v11335_v44 = vpop.f32.mrf.mxu0  ;;  %11686 = vmatprep.subr.bf16.mxu1 %v17307_v22  ;;  %v8007_v22 = vld [vmem:[%s21340_s8 + $0x130] sm:$0xff]  ;;  %v17242_v42 = vcombine.low %v8263_v27, %v8271_v41 }
0x196c   : > { %v17458_v3 = vmul.f32 -1.702, %v23009_v16  ;;  %v11336_v51 = vadd.f32 %v11335_v44, %v8504_v59  ;;  %11644 = vmatpush1.bf16.msra.mxu0 %v17050_v56  ;;  %v11378_v17 = vpop.f32.mrf.mxu1  ;;  %v8287_v59 = vld [vmem:[%s21340_s8 + $0x9f0] sm:$0xff]  ;;  %v16986_v32 = vcombine.low %v8007_v22, %v8015_v47 }
0x196d   : > { %11687 = vmatpush1.bf16.msra.mxu1 %v17306_v48  ;;  %11645 = vmatprep.subr.bf16.mxu0 %v17035_v23  ;;  %v17259_v24 = vcombine.high %v8279_v61, %v8287_v59  ;;  %v17258_v56 = vcombine.low %v8279_v61, %v8287_v59  ;;  %v16987_v48 = vcombine.high %v8007_v22, %v8015_v47  ;;  %v8247_v39 = vld [vmem:[%s21340_s8 + $0x8b0] sm:$0xff] }
0x196e   : > { %v11885_v37 = vmul.f32 1.442695, %v17458_v3  ;;  %v23019_v30 = vadd.f32 %v11378_v17, %v11336_v51  ;;  %11688 = vmatprep.subr.bf16.mxu1 %v17291_v36  ;;  %v17243_v23 = vcombine.high %v8263_v27, %v8271_v41  ;;  %v7991_v36 = vld [vmem:[%s21340_s8 + $0xb0] sm:$0xff] }
0x196f   : > { %v8255_v44 = vld [vmem:[%s21340_s8 + $0x8f0] sm:$0xff]  ;;  %v16971_v3 = vcombine.high %v7991_v36, %v7999_v49 }
0x1970   : > { %19960 = vpow2.f32 %v11885_v37  ;;  %v17474_v0 = vmul.f32 -1.702, %v23019_v30  ;;  %11646 = vmatpush1.bf16.msra.mxu0 %v17034_v38  ;;  %v17227_v51 = vcombine.high %v8247_v39, %v8255_v44  ;;  %v7975_v38 = vld [vmem:[%s21340_s8 + $0x30] sm:$0xff]  ;;  %v16970_v37 = vcombine.low %v7991_v36, %v7999_v49 }
0x1971   : > { %11689 = vmatpush1.bf16.msra.mxu1 %v17290_v54  ;;  %11647 = vmatprep.subr.bf16.mxu0 %v17019_v62  ;;  %v7983_v17 = vld [vmem:[%s21340_s8 + $0x70] sm:$0xff]  ;;  %v17226_v57 = vcombine.low %v8247_v39, %v8255_v44 }
0x1972   : > { %v11917_v28 = vmul.f32 1.442695, %v17474_v0  ;;  %11690 = vmatprep.subr.bf16.mxu1 %v17275_v19  ;;  %v8231_v54 = vld [vmem:[%s21340_s8 + $0x830] sm:$0xff]  ;;  %v16955_v18 = vcombine.high %v7975_v38, %v7983_v17 }
0x1973   : > { %v8239_v62 = vld [vmem:[%s21340_s8 + $0x870] sm:$0xff] }
0x1974   : > { %19962 = vpow2.f32 %v11917_v28  ;;  %11648 = vmatpush1.bf16.msra.mxu0 %v17018_v34  ;;  %v17211_v59 = vcombine.high %v8231_v54, %v8239_v62  ;;  %v8215_v0 = vld [vmem:[%s21340_s8 + $0x7b0] sm:$0xff]  ;;  %v16954_v28 = vcombine.low %v7975_v38, %v7983_v17  ;;  %v17210_v22 = vcombine.low %v8231_v54, %v8239_v62 }
0x1975   : > { %11691 = vmatpush1.bf16.msra.mxu1 %v17274_v4  ;;  %11649 = vmatprep.subr.bf16.mxu0 %v17003_v52  ;;  %v8223_v34 = vld [vmem:[%s21340_s8 + $0x7f0] sm:$0xff] }
0x1976   : > { %11692 = vmatprep.subr.bf16.mxu1 %v17259_v24  ;;  %v8471_v4 = vld [vmem:[%s21340_s8 + $0xfb0] sm:$0xff]  ;;  %v17195_v47 = vcombine.high %v8215_v0, %v8223_v34  ;;  %v17194_v36 = vcombine.low %v8215_v0, %v8223_v34 }
0x1977   : > { %v8479_v52 = vld [vmem:[%s21340_s8 + $0xff0] sm:$0xff] }
0x1978   : > { %11650 = vmatpush1.bf16.msra.mxu0 %v17002_v9  ;;  %v17451_v41 = vcombine.high %v8471_v4, %v8479_v52  ;;  %v8199_v9 = vld [vmem:[%s21340_s8 + $0x730] sm:$0xff]  ;;  %v17450_v49 = vcombine.low %v8471_v4, %v8479_v52 }
0x1979   : > { %11693 = vmatpush1.bf16.msra.mxu1 %v17258_v56  ;;  %11651 = vmatprep.subr.bf16.mxu0 %v16987_v48  ;;  %v8207_v56 = vld [vmem:[%s21340_s8 + $0x770] sm:$0xff] }
0x197a   : > { %11694 = vmatprep.subr.bf16.mxu1 %v17243_v23  ;;  %v8455_v48 = vld [vmem:[%s21340_s8 + $0xf30] sm:$0xff]  ;;  %v17179_v39 = vcombine.high %v8199_v9, %v8207_v56  ;;  %v17178_v38 = vcombine.low %v8199_v9, %v8207_v56 }
0x197b   : > { %v8463_v23 = vld [vmem:[%s21340_s8 + $0xf70] sm:$0xff] }
0x197c   : > { %11652 = vmatpush1.bf16.msra.mxu0 %v16986_v32  ;;  %v17435_v44 = vcombine.high %v8455_v48, %v8463_v23  ;;  %v8183_v32 = vld [vmem:[%s21340_s8 + $0x6b0] sm:$0xff]  ;;  %v17434_v17 = vcombine.low %v8455_v48, %v8463_v23 }
0x197d   : > { %v19961_v19 = vpop.eup %19960  ;;  %11695 = vmatpush1.bf16.msra.mxu1 %v17242_v42  ;;  %11653 = vmatprep.subr.bf16.mxu0 %v16971_v3  ;;  %v8191_v42 = vld [vmem:[%s21340_s8 + $0x6f0] sm:$0xff] }
0x197e   : > { %v11945_v61 = vadd.f32 1.0, %v19961_v19  ;;  %11696 = vmatprep.subr.bf16.mxu1 %v17227_v51  ;;  %v8439_v3 = vld [vmem:[%s21340_s8 + $0xeb0] sm:$0xff]  ;;  %v17163_v54 = vcombine.high %v8183_v32, %v8191_v42 }
0x197f   : > { %v8447_v51 = vld [vmem:[%s21340_s8 + $0xef0] sm:$0xff] }
0x1980   : > { %11654 = vmatpush1.bf16.msra.mxu0 %v16970_v37  ;;  %19964 = vrcp.f32 %v11945_v61  ;;  %v17419_v62 = vcombine.high %v8439_v3, %v8447_v51  ;;  %v8167_v37 = vld [vmem:[%s21340_s8 + $0x630] sm:$0xff]  ;;  %v17162_v61 = vcombine.low %v8183_v32, %v8191_v42 }
0x1981   : > { %v19963_v24 = vpop.eup %19962  ;;  %11697 = vmatpush1.bf16.msra.mxu1 %v17226_v57  ;;  %11655 = vmatprep.subr.bf16.mxu0 %v16955_v18  ;;  %v8175_v19 = vld [vmem:[%s21340_s8 + $0x670] sm:$0xff] }
0x1982   : > { %v11961_v27 = vadd.f32 1.0, %v19963_v24  ;;  %11698 = vmatprep.subr.bf16.mxu1 %v17211_v59  ;;  %v8423_v57 = vld [vmem:[%s21340_s8 + $0xe30] sm:$0xff]  ;;  %v17418_v59 = vcombine.low %v8439_v3, %v8447_v51  ;;  %v17147_v0 = vcombine.high %v8167_v37, %v8175_v19 }
0x1983   : > { %v8431_v18 = vld [vmem:[%s21340_s8 + $0xe70] sm:$0xff] }
0x1984   : > { %19966 = vrcp.f32 %v11961_v27  ;;  %11656 = vmatpush1.bf16.msra.mxu0 %v16954_v28  ;;  %v17403_v34 = vcombine.high %v8423_v57, %v8431_v18  ;;  %v8151_v4 = vld [vmem:[%s21340_s8 + $0x5b0] sm:$0xff] }
0x1985   : > { %11699 = vmatpush1.bf16.msra.mxu1 %v17210_v22  ;;  %11657 = vmatprep.subr.bf16.mxu0 %v17195_v47  ;;  %v8159_v52 = vld [vmem:[%s21340_s8 + $0x5f0] sm:$0xff]  ;;  %v17146_v47 = vcombine.low %v8167_v37, %v8175_v19 }
0x1986   : > { %11700 = vmatprep.subr.bf16.mxu1 %v17451_v41  ;;  %v8407_v24 = vld [vmem:[%s21340_s8 + $0xdb0] sm:$0xff]  ;;  %v17402_v41 = vcombine.low %v8423_v57, %v8431_v18  ;;  %v17131_v9 = vcombine.high %v8151_v4, %v8159_v52  ;;  %v17130_v42 = vcombine.low %v8151_v4, %v8159_v52 }
0x1987   : > { %v8415_v22 = vld [vmem:[%s21340_s8 + $0xdf0] sm:$0xff] }
0x1988   : > { %11658 = vmatpush2.bf16.msra.mxu0 %v17194_v36  ;;  %v17387_v23 = vcombine.high %v8407_v24, %v8415_v22  ;;  %v8135_v36 = vld [vmem:[%s21340_s8 + $0x530] sm:$0xff]  ;;  %v17386_v3 = vcombine.low %v8407_v24, %v8415_v22  ;;  %v8088_v24 = vld [vmem:[%s21340_s8 + $0x3b8] sm:$0xff] }
0x1989   : > { %11701 = vmatpush2.bf16.msra.mxu1 %v17450_v49  ;;  %11659 = vmatprep.subr.bf16.mxu0 %v17179_v39  ;;  %v8143_v49 = vld [vmem:[%s21340_s8 + $0x570] sm:$0xff]  ;;  %v8096_v22 = vld [vmem:[%s21340_s8 + $0x3f8] sm:$0xff] }
0x198a   : > { %11702 = vmatprep.subr.bf16.mxu1 %v17435_v44  ;;  %v8391_v39 = vld [vmem:[%s21340_s8 + $0xd30] sm:$0xff] }
0x198b   : > { %v8399_v44 = vld [vmem:[%s21340_s8 + $0xd70] sm:$0xff] }
0x198c   : > { %11660 = vmatpush2.bf16.msra.mxu0 %v17178_v38  ;;  %v8119_v51 = vld [vmem:[%s21340_s8 + $0x4b0] sm:$0xff]  ;;  %v17370_v37 = vcombine.low %v8391_v39, %v8399_v44 }
0x198d   : > { %11703 = vmatpush2.bf16.msra.mxu1 %v17434_v17  ;;  %11661 = vmatprep.subr.bf16.mxu0 %v17163_v54  ;;  %v19965_v28 = vpop.eup %19964  ;;  %v8127_v38 = vld [vmem:[%s21340_s8 + $0x4f0] sm:$0xff] }
0x198e   : > { %11704 = vmatprep.subr.bf16.mxu1 %v17419_v62  ;;  %v12041_v56 = vmul.f32 %v19965_v28, %v23009_v16  ;;  %v17115_v16 = vcombine.high %v8135_v36, %v8143_v49  ;;  %v8375_v17 = vld [vmem:[%s21340_s8 + $0xcb0] sm:$0xff]  ;;  %v17114_v62 = vcombine.low %v8135_v36, %v8143_v49  ;;  %v17099_v19 = vcombine.high %v8119_v51, %v8127_v38  ;;  %v8072_v36 = vld [vmem:[%s21340_s8 + $0x338] sm:$0xff] }
0x198f   : > { %v8383_v54 = vld [vmem:[%s21340_s8 + $0xcf0] sm:$0xff]  ;;  %v8080_v49 = vld [vmem:[%s21340_s8 + $0x378] sm:$0xff] }
0x1990   : > { %11662 = vmatpush2.bf16.msra.mxu0 %v17162_v61  ;;  %v17355_v57 = vcombine.high %v8375_v17, %v8383_v54  ;;  %v8103_v18 = vld [vmem:[%s21340_s8 + $0x430] sm:$0xff]  ;;  %v17354_v4 = vcombine.low %v8375_v17, %v8383_v54  ;;  %v17053_v17 = vcombine.high %v8072_v36, %v8080_v49  ;;  %v8056_v54 = vld [vmem:[%s21340_s8 + $0x2b8] sm:$0xff] }
0x1991   : > { %v19967_v27 = vpop.eup %19966  ;;  %11705 = vmatpush2.bf16.msra.mxu1 %v17418_v59  ;;  %11663 = vmatprep.subr.bf16.mxu0 %v17147_v0  ;;  %v8111_v61 = vld [vmem:[%s21340_s8 + $0x470] sm:$0xff] }
0x1992   : > { %v12057_v48 = vmul.f32 %v19967_v27, %v23019_v30  ;;  %11706 = vmatprep.subr.bf16.mxu1 %v17403_v34  ;;  %v17371_v30 = vcombine.high %v8391_v39, %v8399_v44  ;;  %v8359_v59 = vld [vmem:[%s21340_s8 + $0xc30] sm:$0xff]  ;;  %v17098_v34 = vcombine.low %v8119_v51, %v8127_v38  ;;  %v17083_v52 = vcombine.high %v8103_v18, %v8111_v61  ;;  %v8352_v27 = vld [vmem:[%s21340_s8 + $0xbf8] sm:$0xff]  ;;  %v23091_v38 = vpop.f32.mrf.mxu1 }
0x1993   : > { %v8367_v0 = vld [vmem:[%s21340_s8 + $0xc70] sm:$0xff] }
0x1994   : > { %v23064_v32 = vpack.c.bf16 %v12057_v48, %v12041_v56  ;;  %11664 = vmatpush2.bf16.msra.mxu0 %v17146_v47  ;;  %v17339_v28 = vcombine.high %v8359_v59, %v8367_v0  ;;  %v8344_v47 = vld [vmem:[%s21340_s8 + $0xbb8] sm:$0xff]  ;;  %v17338_v56 = vcombine.low %v8359_v59, %v8367_v0  ;;  %v17069_v48 = vcombine.high %v8088_v24, %v8096_v22  ;;  %v23082_v39 = vld [vmem:[%s21347_s29] sm:$0xff] }
0x1995   : > { %11707 = vmatpush2.bf16.msra.mxu1 %v17402_v41  ;;  %11665 = vmatprep.subr.bf16.mxu0 %v17131_v9  ;;  %v17082_v41 = vcombine.low %v8103_v18, %v8111_v61  ;;  %v8511_v9 = vsub.s32 6, %v21497_v6  ;;  %v17324_v51 = vcombine.low %v8344_v47, %v8352_v27  ;;  %v8320_v18 = vld [vmem:[%s21340_s8 + $0xaf8] sm:$0xff]  ;;  %v17052_v0 = vcombine.low %v8072_v36, %v8080_v49 }
0x1996   : > { %11708 = vmatprep.subr.bf16.mxu1 %v17387_v23  ;;  %v17325_v23 = vcombine.high %v8344_v47, %v8352_v27  ;;  %v8040_v27 = vld [vmem:[%s21340_s8 + $0x238] sm:$0xff] }
0x1997   : > { %v8512_v44 = vrot.slane %v23082_v39, %v8511_v9 }
0x1998   : > { %11666 = vmatpush2.bf16.msra.mxu0 %v17130_v42  ;;  %v17068_v42 = vcombine.low %v8088_v24, %v8096_v22 }
0x1999   : > { %11709 = vmatpush2.bf16.msra.mxu1 %v17386_v3  ;;  %11667 = vmatprep.subr.bf16.mxu0 %v17115_v16  ;;  %v8328_v3 = vld [vmem:[%s21340_s8 + $0xb38] sm:$0xff] }
0x199a   : > { %11710 = vmatprep.subr.bf16.mxu1 %v17371_v30  ;;  %v8336_v16 = vld [vmem:[%s21340_s8 + $0xb78] sm:$0xff]  ;;  %v23089_v30 = vpop.f32.mrf.mxu0 }
0x199c   : > { %11668 = vmatpush2.bf16.msra.mxu0 %v17114_v62  ;;  %v8064_v62 = vld [vmem:[%s21340_s8 + $0x2f8] sm:$0xff] }
0x199d   : > { %11711 = vmatpush2.bf16.msra.mxu1 %v17370_v37  ;;  %11669 = vmatprep.subr.bf16.mxu0 %v17099_v19  ;;  %v17309_v19 = vcombine.high %v8328_v3, %v8336_v16  ;;  %v17036_v49 = vcombine.low %v8056_v54, %v8064_v62 }
0x199e   : > { %11712 = vmatprep.subr.bf16.mxu1 %v17355_v57  ;;  %v8312_v57 = vld [vmem:[%s21340_s8 + $0xab8] sm:$0xff] }
0x199f   : > { %v17293_v47 = vcombine.high %v8312_v57, %v8320_v18 }
0x19a0   : > { %11670 = vmatpush2.bf16.msra.mxu0 %v17098_v34 }
0x19a1   : > { %11713 = vmatpush2.bf16.msra.mxu1 %v17354_v4  ;;  %11671 = vmatprep.subr.bf16.mxu0 %v17083_v52  ;;  %v17308_v4 = vcombine.low %v8328_v3, %v8336_v16  ;;  %v17037_v52 = vcombine.high %v8056_v54, %v8064_v62  ;;  %v17292_v3 = vcombine.low %v8312_v57, %v8320_v18  ;;  %v8280_v62 = vld [vmem:[%s21340_s8 + $0x9b8] sm:$0xff] }
0x19a2   : > { %11714 = vmatprep.subr.bf16.mxu1 %v17339_v28  ;;  %v8492_v28 = vrot.slane %v23082_v39, %v21502_v11 }
0x19a4   : > { %11672 = vmatpush2.bf16.msra.mxu0 %v17082_v41  ;;  %v8048_v41 = vld [vmem:[%s21340_s8 + $0x278] sm:$0xff]  ;;  %v11166_v54 = vadd.f32 %v22906_v20, %v8492_v28 }
0x19a5   : > { %11715 = vmatpush2.bf16.msra.mxu1 %v17338_v56  ;;  %11727 = vmatprep.subr.bf16.mxu0 %v17069_v48  ;;  %v8296_v56 = vld [vmem:[%s21340_s8 + $0xa38] sm:$0xff]  ;;  %v17021_v16 = vcombine.high %v8040_v27, %v8048_v41 }
0x19a6   : > { %11770 = vmatprep.subr.bf16.mxu1 %v17325_v23  ;;  %v8304_v48 = vld [vmem:[%s21340_s8 + $0xa78] sm:$0xff] }
0x19a7   : > { %v11417_v37 = vpop.f32.mrf.mxu0  ;;  %11674 = vmatmul.mubr.bf16.vlgmr.msra.gmra.mxu0 %v22601_v63 }
0x19a8   : > { %v11418_v61 = vadd.f32 %v11417_v37, %v8512_v44  ;;  %v11460_v59 = vpop.f32.mrf.mxu1  ;;  %11717 = vmatmul.mubr.bf16.vlgmr.msra.gmra.mxu1 %v22603_v2  ;;  %11728 = vmatpush1.bf16.msra.mxu0 %v17068_v42 }
0x19a9   : > { %11759 = vmatprep.mubr.bf16.mxu0 %v22597_v50  ;;  %11771 = vmatpush1.bf16.msra.mxu1 %v17324_v51  ;;  %v23100_v34 = vpop.f32.mrf.mxu0  ;;  %v11162_v51 = vadd.f32 %v22829_v46, %v8492_v28  ;;  %v17020_v46 = vcombine.low %v8040_v27, %v8048_v41  ;;  %v8264_v27 = vld [vmem:[%s21340_s8 + $0x938] sm:$0xff] }
0x19aa   : > { %v23104_v24 = vadd.f32 %v11460_v59, %v11418_v61  ;;  %11802 = vmatprep.mubr.bf16.mxu1 %v22599_v7  ;;  %v23107_v22 = vpop.f32.mrf.mxu1  ;;  %11729 = vmatprep.subr.bf16.mxu0 %v17053_v17  ;;  %v8500_v7 = vrot.slane %v23082_v39, %v21505_v13  ;;  %v8032_v61 = vld [vmem:[%s21340_s8 + $0x1f8] sm:$0xff] }
0x19ab   : > { %v11421_v50 = vpop.f32.mrf.mxu0  ;;  %11772 = vmatprep.subr.bf16.mxu1 %v17309_v19  ;;  %v17277_v19 = vcombine.high %v8296_v56, %v8304_v48  ;;  %v8288_v59 = vld [vmem:[%s21340_s8 + $0x9f8] sm:$0xff]  ;;  %v23128_v20 = vadd.f32 %v22831_v8, %v11162_v51 }
0x19ac   : > { %v17460_v23 = vmul.f32 -1.702, %v23104_v24  ;;  %v11422_v36 = vadd.f32 %v11421_v50, %v8512_v44  ;;  %11730 = vmatpush1.bf16.msra.mxu0 %v17052_v0  ;;  %v11464_v42 = vpop.f32.mrf.mxu1  ;;  %v8024_v44 = vld [vmem:[%s21340_s8 + $0x1b8] sm:$0xff]  ;;  %v11252_v0 = vadd.f32 %v22996_v1, %v8500_v7  ;;  %v11248_v18 = vadd.f32 %v22917_v12, %v8500_v7 }
0x19ad   : > { %11773 = vmatpush1.bf16.msra.mxu1 %v17308_v4  ;;  %11731 = vmatprep.subr.bf16.mxu0 %v17037_v52  ;;  %v17276_v4 = vcombine.low %v8296_v56, %v8304_v48  ;;  %v17005_v52 = vcombine.high %v8024_v44, %v8032_v61  ;;  %v8008_v1 = vld [vmem:[%s21340_s8 + $0x138] sm:$0xff]  ;;  %v17004_v8 = vcombine.low %v8024_v44, %v8032_v61 }
0x19ae   : > { %v11889_v17 = vmul.f32 1.442695, %v17460_v23  ;;  %v23117_v37 = vadd.f32 %v11464_v42, %v11422_v36  ;;  %11774 = vmatprep.subr.bf16.mxu1 %v17293_v47  ;;  %v17261_v47 = vcombine.high %v8280_v62, %v8288_v59  ;;  %v8016_v50 = vld [vmem:[%s21340_s8 + $0x178] sm:$0xff]  ;;  %v23133_v23 = vadd.f32 %v22908_v25, %v11166_v54 }
0x19af   : > { %v8272_v41 = vld [vmem:[%s21340_s8 + $0x978] sm:$0xff]  ;;  %v23138_v12 = vadd.f32 %v22998_v40, %v11252_v0  ;;  %v23141_v56 = vadd.f32 %v22919_v5, %v11248_v18  ;;  %v17260_v48 = vcombine.low %v8280_v62, %v8288_v59  ;;  %v16989_v36 = vcombine.high %v8008_v1, %v8016_v50 }
0x19b0   : > { %19968 = vpow2.f32 %v11889_v17  ;;  %v17476_v57 = vmul.f32 -1.702, %v23117_v37  ;;  %11732 = vmatpush1.bf16.msra.mxu0 %v17036_v49  ;;  %v17455_v25 = vmul.f32 -1.702, %v23128_v20  ;;  %v17245_v49 = vcombine.high %v8264_v27, %v8272_v41  ;;  %v7992_v7 = vld [vmem:[%s21340_s8 + $0xb8] sm:$0xff] }
0x19b1   : > { %11775 = vmatpush1.bf16.msra.mxu1 %v17292_v3  ;;  %11733 = vmatprep.subr.bf16.mxu0 %v17021_v16  ;;  %v8000_v42 = vld [vmem:[%s21340_s8 + $0xf8] sm:$0xff]  ;;  %v17471_v40 = vmul.f32 -1.702, %v23133_v23  ;;  %v17473_v5 = vmul.f32 -1.702, %v23138_v12  ;;  %v16988_v51 = vcombine.low %v8008_v1, %v8016_v50 }
0x19b2   : > { %v11921_v28 = vmul.f32 1.442695, %v17476_v57  ;;  %11776 = vmatprep.subr.bf16.mxu1 %v17277_v19  ;;  %v8248_v3 = vld [vmem:[%s21340_s8 + $0x8b8] sm:$0xff]  ;;  %v17457_v17 = vmul.f32 -1.702, %v23141_v56  ;;  %v17244_v19 = vcombine.low %v8264_v27, %v8272_v41  ;;  %v16973_v44 = vcombine.high %v7992_v7, %v8000_v42 }
0x19b3   : > { %v8256_v16 = vld [vmem:[%s21340_s8 + $0x8f8] sm:$0xff]  ;;  %v11879_v61 = vmul.f32 1.442695, %v17455_v25  ;;  %v11911_v0 = vmul.f32 1.442695, %v17471_v40 }
0x19b4   : > { %19970 = vpow2.f32 %v11921_v28  ;;  %11734 = vmatpush1.bf16.msra.mxu0 %v17020_v46  ;;  %v17229_v54 = vcombine.high %v8248_v3, %v8256_v16  ;;  %v7976_v62 = vld [vmem:[%s21340_s8 + $0x38] sm:$0xff]  ;;  %v11915_v18 = vmul.f32 1.442695, %v17473_v5  ;;  %v11883_v28 = vmul.f32 1.442695, %v17457_v17 }
0x19b5   : > { %11777 = vmatpush1.bf16.msra.mxu1 %v17276_v4  ;;  %11735 = vmatprep.subr.bf16.mxu0 %v17005_v52  ;;  %v7984_v59 = vld [vmem:[%s21340_s8 + $0x78] sm:$0xff]  ;;  %v16972_v4 = vcombine.low %v7992_v7, %v8000_v42  ;;  %19972 = vpow2.f32 %v11879_v61 }
0x19b6   : > { %11778 = vmatprep.subr.bf16.mxu1 %v17261_v47  ;;  %v8232_v57 = vld [vmem:[%s21340_s8 + $0x838] sm:$0xff]  ;;  %v17228_v47 = vcombine.low %v8248_v3, %v8256_v16  ;;  %v16957_v1 = vcombine.high %v7976_v62, %v7984_v59  ;;  %19974 = vpow2.f32 %v11911_v0  ;;  %v16956_v25 = vcombine.low %v7976_v62, %v7984_v59 }
0x19b7   : > { %v8240_v46 = vld [vmem:[%s21340_s8 + $0x878] sm:$0xff]  ;;  %19976 = vpow2.f32 %v11915_v18 }
0x19b8   : > { %11736 = vmatpush1.bf16.msra.mxu0 %v17004_v8  ;;  %v17213_v27 = vcombine.high %v8232_v57, %v8240_v46  ;;  %v8216_v41 = vld [vmem:[%s21340_s8 + $0x7b8] sm:$0xff]  ;;  %19978 = vpow2.f32 %v11883_v28  ;;  %v17212_v7 = vcombine.low %v8232_v57, %v8240_v46 }
0x19b9   : > { %11779 = vmatpush1.bf16.msra.mxu1 %v17260_v48  ;;  %11737 = vmatprep.subr.bf16.mxu0 %v16989_v36  ;;  %v8224_v8 = vld [vmem:[%s21340_s8 + $0x7f8] sm:$0xff] }
0x19ba   : > { %11780 = vmatprep.subr.bf16.mxu1 %v17245_v49  ;;  %v8472_v48 = vld [vmem:[%s21340_s8 + $0xfb8] sm:$0xff]  ;;  %v17197_v42 = vcombine.high %v8216_v41, %v8224_v8 }
0x19bb   : > { %v8480_v36 = vld [vmem:[%s21340_s8 + $0xff8] sm:$0xff] }
0x19bc   : > { %11738 = vmatpush1.bf16.msra.mxu0 %v16988_v51  ;;  %v17453_v3 = vcombine.high %v8472_v48, %v8480_v36  ;;  %v8200_v16 = vld [vmem:[%s21340_s8 + $0x738] sm:$0xff] }
0x19bd   : > { %v19969_v52 = vpop.eup %19968  ;;  %11781 = vmatpush1.bf16.msra.mxu1 %v17244_v19  ;;  %11739 = vmatprep.subr.bf16.mxu0 %v16973_v44  ;;  %v8208_v5 = vld [vmem:[%s21340_s8 + $0x778] sm:$0xff]  ;;  %v17196_v19 = vcombine.low %v8216_v41, %v8224_v8  ;;  %v17452_v44 = vcombine.low %v8472_v48, %v8480_v36 }
0x19be   : > { %v11947_v50 = vadd.f32 1.0, %v19969_v52  ;;  %11782 = vmatprep.subr.bf16.mxu1 %v17229_v54  ;;  %v8456_v51 = vld [vmem:[%s21340_s8 + $0xf38] sm:$0xff]  ;;  %v17181_v61 = vcombine.high %v8200_v16, %v8208_v5  ;;  %v17180_v46 = vcombine.low %v8200_v16, %v8208_v5 }
0x19bf   : > { %v8464_v17 = vld [vmem:[%s21340_s8 + $0xf78] sm:$0xff] }
0x19c0   : > { %11740 = vmatpush1.bf16.msra.mxu0 %v16972_v4  ;;  %19980 = vrcp.f32 %v11947_v50  ;;  %v17437_v54 = vcombine.high %v8456_v51, %v8464_v17  ;;  %v8184_v62 = vld [vmem:[%s21340_s8 + $0x6b8] sm:$0xff]  ;;  %v17436_v18 = vcombine.low %v8456_v51, %v8464_v17 }
0x19c1   : > { %v19971_v49 = vpop.eup %19970  ;;  %11783 = vmatpush1.bf16.msra.mxu1 %v17228_v47  ;;  %11741 = vmatprep.subr.bf16.mxu0 %v16957_v1  ;;  %v8192_v59 = vld [vmem:[%s21340_s8 + $0x6f8] sm:$0xff] }
0x19c2   : > { %v11963_v40 = vadd.f32 1.0, %v19971_v49  ;;  %11784 = vmatprep.subr.bf16.mxu1 %v17213_v27  ;;  %v8440_v0 = vld [vmem:[%s21340_s8 + $0xeb8] sm:$0xff]  ;;  %v17165_v4 = vcombine.high %v8184_v62, %v8192_v59  ;;  %v19973_v1 = vpop.eup %19972  ;;  %v17164_v8 = vcombine.low %v8184_v62, %v8192_v59 }
0x19c3   : > { %v8448_v57 = vld [vmem:[%s21340_s8 + $0xef8] sm:$0xff]  ;;  %v19975_v41 = vpop.eup %19974 }
0x19c4   : > { %19982 = vrcp.f32 %v11963_v40  ;;  %11742 = vmatpush1.bf16.msra.mxu0 %v16956_v25  ;;  %v17421_v52 = vcombine.high %v8440_v0, %v8448_v57  ;;  %v8168_v28 = vld [vmem:[%s21340_s8 + $0x638] sm:$0xff]  ;;  %v19977_v48 = vpop.eup %19976  ;;  %v17420_v36 = vcombine.low %v8440_v0, %v8448_v57  ;;  %v11958_v16 = vadd.f32 1.0, %v19975_v41 }
0x19c5   : > { %11785 = vmatpush1.bf16.msra.mxu1 %v17212_v7  ;;  %11743 = vmatprep.subr.bf16.mxu0 %v17197_v42  ;;  %v8176_v47 = vld [vmem:[%s21340_s8 + $0x678] sm:$0xff]  ;;  %v19979_v49 = vpop.eup %19978  ;;  %v11960_v17 = vadd.f32 1.0, %v19977_v48 }
0x19c6   : > { %11786 = vmatprep.subr.bf16.mxu1 %v17453_v3  ;;  %v8424_v50 = vld [vmem:[%s21340_s8 + $0xe38] sm:$0xff]  ;;  %v17149_v25 = vcombine.high %v8168_v28, %v8176_v47  ;;  %v11944_v59 = vadd.f32 1.0, %v19979_v49  ;;  %19984 = vrcp.f32 %v11958_v16 }
0x19c7   : > { %v8432_v27 = vld [vmem:[%s21340_s8 + $0xe78] sm:$0xff]  ;;  %19986 = vrcp.f32 %v11960_v17 }
0x19c8   : > { %11744 = vmatpush2.bf16.msra.mxu0 %v17196_v19  ;;  %v17405_v7 = vcombine.high %v8424_v50, %v8432_v27  ;;  %v8152_v42 = vld [vmem:[%s21340_s8 + $0x5b8] sm:$0xff]  ;;  %v17148_v19 = vcombine.low %v8168_v28, %v8176_v47 }
0x19c9   : > { %11787 = vmatpush2.bf16.msra.mxu1 %v17452_v44  ;;  %11745 = vmatprep.subr.bf16.mxu0 %v17181_v61  ;;  %v8160_v40 = vld [vmem:[%s21340_s8 + $0x5f8] sm:$0xff]  ;;  %v11942_v61 = vadd.f32 1.0, %v19973_v1 }
0x19ca   : > { %11788 = vmatprep.subr.bf16.mxu1 %v17437_v54  ;;  %v8408_v5 = vld [vmem:[%s21340_s8 + $0xdb8] sm:$0xff]  ;;  %v17404_v54 = vcombine.low %v8424_v50, %v8432_v27  ;;  %v17133_v62 = vcombine.high %v8152_v42, %v8160_v40  ;;  %v17132_v1 = vcombine.low %v8152_v42, %v8160_v40 }
0x19cb   : > { %v8416_v51 = vld [vmem:[%s21340_s8 + $0xdf8] sm:$0xff]  ;;  %19988 = vrcp.f32 %v11942_v61 }
0x19cc   : > { %11746 = vmatpush2.bf16.msra.mxu0 %v17180_v46  ;;  %v17389_v46 = vcombine.high %v8408_v5, %v8416_v51  ;;  %v8400_v28 = vld [vmem:[%s21340_s8 + $0xd78] sm:$0xff]  ;;  %19990 = vrcp.f32 %v11944_v59 }
0x19cd   : > { %11789 = vmatpush2.bf16.msra.mxu1 %v17436_v18  ;;  %11747 = vmatprep.subr.bf16.mxu0 %v17165_v4  ;;  %v19981_v3 = vpop.eup %19980  ;;  %v8136_v18 = vld [vmem:[%s21340_s8 + $0x538] sm:$0xff] }
0x19ce   : > { %11790 = vmatprep.subr.bf16.mxu1 %v17421_v52  ;;  %v12043_v0 = vmul.f32 %v19981_v3, %v23104_v24  ;;  %v8144_v4 = vld [vmem:[%s21340_s8 + $0x578] sm:$0xff]  ;;  %v17388_v24 = vcombine.low %v8408_v5, %v8416_v51 }
0x19cf   : > { %v8392_v52 = vld [vmem:[%s21340_s8 + $0xd38] sm:$0xff] }
0x19d0   : > { %11748 = vmatpush2.bf16.msra.mxu0 %v17164_v8  ;;  %v17373_v50 = vcombine.high %v8392_v52, %v8400_v28  ;;  %v8120_v27 = vld [vmem:[%s21340_s8 + $0x4b8] sm:$0xff] }
0x19d1   : > { %v19983_v44 = vpop.eup %19982  ;;  %11791 = vmatpush2.bf16.msra.mxu1 %v17420_v36  ;;  %11749 = vmatprep.subr.bf16.mxu0 %v17149_v25  ;;  %v8128_v41 = vld [vmem:[%s21340_s8 + $0x4f8] sm:$0xff]  ;;  %v17116_v36 = vcombine.low %v8136_v18, %v8144_v4  ;;  %v17372_v25 = vcombine.low %v8392_v52, %v8400_v28 }
0x19d2   : > { %v12059_v57 = vmul.f32 %v19983_v44, %v23117_v37  ;;  %11792 = vmatprep.subr.bf16.mxu1 %v17405_v7  ;;  %v17117_v37 = vcombine.high %v8136_v18, %v8144_v4  ;;  %v8376_v8 = vld [vmem:[%s21340_s8 + $0xcb8] sm:$0xff]  ;;  %v17101_v49 = vcombine.high %v8120_v27, %v8128_v41  ;;  %v17100_v5 = vcombine.low %v8120_v27, %v8128_v41 }
0x19d3   : > { %v8384_v48 = vld [vmem:[%s21340_s8 + $0xcf8] sm:$0xff]  ;;  %v19985_v44 = vpop.eup %19984  ;;  %v8507_v41 = vsub.s32 5, %v21497_v6 }
0x19d4   : > { %v23181_v47 = vpack.c.bf16 %v12059_v57, %v12043_v0  ;;  %11750 = vmatpush2.bf16.msra.mxu0 %v17148_v19  ;;  %v17357_v7 = vcombine.high %v8376_v8, %v8384_v48  ;;  %v8104_v42 = vld [vmem:[%s21340_s8 + $0x438] sm:$0xff]  ;;  %v17356_v51 = vcombine.low %v8376_v8, %v8384_v48  ;;  %v19106_v0 = vld [vmem:[%s21350_s25 + $0xe4] ss:$16 sps:$4 sm:$0xff]   ;;  %v12054_v4 = vmul.f32 %v19985_v44, %v23133_v23  ;;  %v11466_v23 = vpop.f32.mrf.mxu1  ;;  %v19116_v44 = vld [vmem:[%s21350_s25 + $0xa0] ss:$16 sps:$4 sm:$0xff]  }
0x19d5   : > { %11793 = vmatpush2.bf16.msra.mxu1 %v17404_v54  ;;  %11751 = vmatprep.subr.bf16.mxu0 %v17133_v62  ;;  %v8112_v40 = vld [vmem:[%s21340_s8 + $0x478] sm:$0xff]  ;;  %v19987_v54 = vpop.eup %19986 }
0x19d6   : > { %11794 = vmatprep.subr.bf16.mxu1 %v17389_v46  ;;  %v8360_v3 = vld [vmem:[%s21340_s8 + $0xc38] sm:$0xff]  ;;  %v17085_v17 = vcombine.high %v8104_v42, %v8112_v40  ;;  %v17084_v61 = vcombine.low %v8104_v42, %v8112_v40  ;;  %v19109_v46 = vld [vmem:[%s21350_s25 + $0x2e4] ss:$16 sps:$4 sm:$0xff]   ;;  %v12056_v52 = vmul.f32 %v19987_v54, %v23138_v12 }
0x19d7   : > { %v8368_v16 = vld [vmem:[%s21340_s8 + $0xc78] sm:$0xff]  ;;  %v19112_v12 = vld [vmem:[%s21350_s25 + $0xc4] ss:$16 sps:$4 sm:$0xff]  }
0x19d8   : > { %11752 = vmatpush2.bf16.msra.mxu0 %v17132_v1  ;;  %v17341_v19 = vcombine.high %v8360_v3, %v8368_v16  ;;  %v17340_v62 = vcombine.low %v8360_v3, %v8368_v16  ;;  %v23192_v59 = vld [vmem:[%s21347_s29 + $0x8] sm:$0xff]  ;;  %v19989_v57 = vpop.eup %19988  ;;  %v19104_v1 = vld [vmem:[%s21350_s25 + $0xe0] ss:$16 sps:$4 sm:$0xff]   ;;  %v19118_v40 = vld [vmem:[%s21350_s25 + $0xa4] ss:$16 sps:$4 sm:$0xff]   ;;  %v8508_v3 = vrot.slane %v23082_v39, %v8507_v41 }
0x19d9   : > { %11795 = vmatpush2.bf16.msra.mxu1 %v17388_v24  ;;  %11753 = vmatprep.subr.bf16.mxu0 %v17117_v37  ;;  %v19991_v18 = vpop.eup %19990  ;;  %v8520_v28 = vrot.slane %v23192_v59, %v21508_v14  ;;  %v12038_v24 = vmul.f32 %v19989_v57, %v23128_v20  ;;  %v11423_v37 = vpop.f32.mrf.mxu0  ;;  %v19115_v20 = vld [vmem:[%s21350_s25 + $0x2c4] ss:$16 sps:$4 sm:$0xff]  }
0x19da   : > { %11796 = vmatprep.subr.bf16.mxu1 %v17373_v50  ;;  %v19107_v50 = vld [vmem:[%s21350_s25 + $0x2e0] ss:$16 sps:$4 sm:$0xff]   ;;  %v12040_v27 = vmul.f32 %v19991_v18, %v23141_v56  ;;  %v11334_v57 = vadd.f32 %v23007_v35, %v8508_v3 }
0x19db   : > { %v23207_v48 = vpack.c.bf16 %v12054_v4, %v12038_v24  ;;  %v19127_v4 = vld [vmem:[%s21350_s25 + $0x284] ss:$16 sps:$4 sm:$0xff]   ;;  %v19125_v35 = vld [vmem:[%s21350_s25 + $0x280] ss:$16 sps:$4 sm:$0xff]  }
0x19dc   : > { %11754 = vmatpush2.bf16.msra.mxu0 %v17116_v36  ;;  %v23211_v56 = vpack.c.bf16 %v12056_v52, %v12040_v27  ;;  %v11338_v52 = vadd.f32 %v23089_v30, %v8508_v3  ;;  %v23247_v27 = vadd.f32 %v23012_v58, %v11334_v57  ;;  %v19131_v58 = vld [vmem:[%s21350_s25 + $0x260] ss:$16 sps:$4 sm:$0xff]   ;;  %v19142_v3 = vld [vmem:[%s21350_s25 + $0x24] ss:$16 sps:$4 sm:$0xff]  }
0x19dd   : > { %11797 = vmatpush2.bf16.msra.mxu1 %v17372_v25  ;;  %11755 = vmatprep.subr.bf16.mxu0 %v17101_v49  ;;  %v19110_v49 = vld [vmem:[%s21350_s25 + $0xc0] ss:$16 sps:$4 sm:$0xff]  }
0x19de   : > { %11798 = vmatprep.subr.bf16.mxu1 %v17357_v7  ;;  %v8515_v7 = vsub.s32 7, %v21497_v6  ;;  %v19415_v6 = vld [vmem:[%s21350_s25 + $0xe84] ss:$16 sps:$4 sm:$0xff]  }
0x19e0   : > { %11756 = vmatpush2.bf16.msra.mxu0 %v17100_v5  ;;  %v19121_v5 = vld [vmem:[%s21350_s25 + $0x2a4] ss:$16 sps:$4 sm:$0xff]  }
0x19e1   : > { %11799 = vmatpush2.bf16.msra.mxu1 %v17356_v51  ;;  %11757 = vmatprep.subr.bf16.mxu0 %v17085_v17 }
0x19e2   : > { %11800 = vmatprep.subr.bf16.mxu1 %v17341_v19 }
0x19e4   : > { %11758 = vmatpush2.bf16.msra.mxu0 %v17084_v61  ;;  %v8516_v61 = vrot.slane %v23082_v39, %v8515_v7 }
0x19e5   : > { %11801 = vmatpush2.bf16.msra.mxu1 %v17340_v62  ;;  %15157 = vmatprep.subr.bf16.mxu0 %v19106_v0  ;;  %v19119_v62 = vld [vmem:[%s21350_s25 + $0x2a0] ss:$16 sps:$4 sm:$0xff]   ;;  %v19124_v0 = vld [vmem:[%s21350_s25 + $0x84] ss:$16 sps:$4 sm:$0xff]  }
0x19e6   : > { %15200 = vmatprep.subr.bf16.mxu1 %v19109_v46  ;;  %v11420_v24 = vadd.f32 %v23100_v34, %v8516_v61  ;;  %v19128_v34 = vld [vmem:[%s21350_s25 + $0x60] ss:$16 sps:$4 sm:$0xff]  }
0x19e7   : > { %v11503_v8 = vpop.f32.mrf.mxu0  ;;  %11760 = vmatmul.mubr.bf16.vlgmr.msra.gmra.mxu0 %v22601_v63  ;;  %v19113_v63 = vld [vmem:[%s21350_s25 + $0x2c0] ss:$16 sps:$4 sm:$0xff]  }
0x19e8   : > { %v11504_v36 = vadd.f32 %v11503_v8, %v8520_v28  ;;  %v11546_v25 = vpop.f32.mrf.mxu1  ;;  %11803 = vmatmul.mubr.bf16.vlgmr.msra.gmra.mxu1 %v22603_v2  ;;  %15158 = vmatpush1.bf16.msra.mxu0 %v19104_v1  ;;  %v19122_v1 = vld [vmem:[%s21350_s25 + $0x80] ss:$16 sps:$4 sm:$0xff]  }
0x19e9   : > { %15189 = vmatprep.mubr.bf16.mxu0 %v23207_v48  ;;  %15201 = vmatpush1.bf16.msra.mxu1 %v19107_v50  ;;  %v23216_v42 = vpop.f32.mrf.mxu0  ;;  %v19130_v50 = vld [vmem:[%s21350_s25 + $0x64] ss:$16 sps:$4 sm:$0xff]  }
0x19ea   : > { %v23223_v2 = vadd.f32 %v11546_v25, %v11504_v36  ;;  %15232 = vmatprep.mubr.bf16.mxu1 %v23211_v56  ;;  %v23226_v16 = vpop.f32.mrf.mxu1  ;;  %15159 = vmatprep.subr.bf16.mxu0 %v19112_v12  ;;  %v23251_v12 = vadd.f32 %v23091_v38, %v11338_v52  ;;  %v19136_v36 = vld [vmem:[%s21350_s25 + $0x44] ss:$16 sps:$4 sm:$0xff]   ;;  %v17459_v25 = vmul.f32 -1.702, %v23247_v27 }
0x19eb   : > { %v11507_v51 = vpop.f32.mrf.mxu0  ;;  %15202 = vmatprep.subr.bf16.mxu1 %v19115_v20  ;;  %v23257_v20 = vadd.f32 %v23107_v22, %v11420_v24  ;;  %v19139_v38 = vld [vmem:[%s21350_s25 + $0x244] ss:$16 sps:$4 sm:$0xff]  }
0x19ec   : > { %v17462_v17 = vmul.f32 -1.702, %v23223_v2  ;;  %v11508_v19 = vadd.f32 %v11507_v51, %v8520_v28  ;;  %15160 = vmatpush1.bf16.msra.mxu0 %v19110_v49  ;;  %v11550_v54 = vpop.f32.mrf.mxu1  ;;  %v11424_v28 = vadd.f32 %v11423_v37, %v8516_v61  ;;  %v19133_v37 = vld [vmem:[%s21350_s25 + $0x264] ss:$16 sps:$4 sm:$0xff]  }
0x19ed   : > { %15203 = vmatpush1.bf16.msra.mxu1 %v19113_v63  ;;  %15161 = vmatprep.subr.bf16.mxu0 %v19118_v40  ;;  %v19134_v63 = vld [vmem:[%s21350_s25 + $0x40] ss:$16 sps:$4 sm:$0xff]   ;;  %v17461_v22 = vmul.f32 -1.702, %v23257_v20  ;;  %v19145_v51 = vld [vmem:[%s21350_s25 + $0x224] ss:$16 sps:$4 sm:$0xff]  }
0x19ee   : > { %v11893_v46 = vmul.f32 1.442695, %v17462_v17  ;;  %v23237_v18 = vadd.f32 %v11550_v54, %v11508_v19  ;;  %15204 = vmatprep.subr.bf16.mxu1 %v19121_v5  ;;  %v23253_v8 = vadd.f32 %v11466_v23, %v11424_v28  ;;  %v17475_v23 = vmul.f32 -1.702, %v23251_v12  ;;  %v19137_v40 = vld [vmem:[%s21350_s25 + $0x240] ss:$16 sps:$4 sm:$0xff]  }
0x19ef   : > { %v11887_v5 = vmul.f32 1.442695, %v17459_v25  ;;  %v11891_v54 = vmul.f32 1.442695, %v17461_v22  ;;  %v19149_v28 = vld [vmem:[%s21350_s25 + $0x200] ss:$16 sps:$4 sm:$0xff]  }
0x19f0   : > { %19992 = vpow2.f32 %v11893_v46  ;;  %v17478_v39 = vmul.f32 -1.702, %v23237_v18  ;;  %15162 = vmatpush1.bf16.msra.mxu0 %v19116_v44  ;;  %v17477_v49 = vmul.f32 -1.702, %v23253_v8  ;;  %v11919_v17 = vmul.f32 1.442695, %v17475_v23 }
0x19f1   : > { %15205 = vmatpush1.bf16.msra.mxu1 %v19119_v62  ;;  %15163 = vmatprep.subr.bf16.mxu0 %v19124_v0  ;;  %v19140_v44 = vld [vmem:[%s21350_s25 + $0x20] ss:$16 sps:$4 sm:$0xff]   ;;  %v19148_v0 = vld [vmem:[%s21350_s25 + $0x4] ss:$16 sps:$4 sm:$0xff]  }
0x19f2   : > { %v11925_v30 = vmul.f32 1.442695, %v17478_v39  ;;  %15206 = vmatprep.subr.bf16.mxu1 %v19127_v4  ;;  %v11923_v19 = vmul.f32 1.442695, %v17477_v49  ;;  %v19143_v62 = vld [vmem:[%s21350_s25 + $0x220] ss:$16 sps:$4 sm:$0xff]  }
0x19f3   : > { %v19151_v46 = vld [vmem:[%s21350_s25 + $0x204] ss:$16 sps:$4 sm:$0xff]   ;;  %v19146_v4 = vld [vmem:[%s21350_s25] ss:$16 sps:$4 sm:$0xff]  }
0x19f4   : > { %19994 = vpow2.f32 %v11925_v30  ;;  %15164 = vmatpush1.bf16.msra.mxu0 %v19122_v1  ;;  %v19154_v39 = vld [vmem:[%s21350_s25 + $0x1e4] ss:$16 sps:$4 sm:$0xff]   ;;  %v19164_v49 = vld [vmem:[%s21350_s25 + $0x1a0] ss:$16 sps:$4 sm:$0xff]  }
0x19f5   : > { %15207 = vmatpush1.bf16.msra.mxu1 %v19125_v35  ;;  %15165 = vmatprep.subr.bf16.mxu0 %v19130_v50  ;;  %19996 = vpow2.f32 %v11887_v5  ;;  %v19157_v24 = vld [vmem:[%s21350_s25 + $0x3e4] ss:$16 sps:$4 sm:$0xff]   ;;  %v19152_v35 = vld [vmem:[%s21350_s25 + $0x1e0] ss:$16 sps:$4 sm:$0xff]  }
0x19f6   : > { %15208 = vmatprep.subr.bf16.mxu1 %v19133_v37  ;;  %19998 = vpow2.f32 %v11919_v17  ;;  %v19155_v50 = vld [vmem:[%s21350_s25 + $0x3e0] ss:$16 sps:$4 sm:$0xff]   ;;  %v19160_v30 = vld [vmem:[%s21350_s25 + $0x1c4] ss:$16 sps:$4 sm:$0xff]  }
0x19f7   : > { %20000 = vpow2.f32 %v11923_v19  ;;  %v19163_v37 = vld [vmem:[%s21350_s25 + $0x3c4] ss:$16 sps:$4 sm:$0xff]   ;;  %v19167_v22 = vld [vmem:[%s21350_s25 + $0x3a0] ss:$16 sps:$4 sm:$0xff]  }
0x19f8   : > { %15166 = vmatpush1.bf16.msra.mxu0 %v19128_v34  ;;  %20002 = vpow2.f32 %v11891_v54  ;;  %v19158_v34 = vld [vmem:[%s21350_s25 + $0x1c0] ss:$16 sps:$4 sm:$0xff]   ;;  %v19169_v25 = vld [vmem:[%s21350_s25 + $0x3a4] ss:$16 sps:$4 sm:$0xff]  }
0x19f9   : > { %15209 = vmatpush1.bf16.msra.mxu1 %v19131_v58  ;;  %15167 = vmatprep.subr.bf16.mxu0 %v19136_v36  ;;  %v19161_v58 = vld [vmem:[%s21350_s25 + $0x3c0] ss:$16 sps:$4 sm:$0xff]   ;;  %v19166_v36 = vld [vmem:[%s21350_s25 + $0x1a4] ss:$16 sps:$4 sm:$0xff]  }
0x19fa   : > { %15210 = vmatprep.subr.bf16.mxu1 %v19139_v38  ;;  %v19175_v5 = vld [vmem:[%s21350_s25 + $0x384] ss:$16 sps:$4 sm:$0xff]  }
0x19fc   : > { %15168 = vmatpush1.bf16.msra.mxu0 %v19134_v63 }
0x19fd   : > { %v19993_v61 = vpop.eup %19992  ;;  %15211 = vmatpush1.bf16.msra.mxu1 %v19137_v40  ;;  %15169 = vmatprep.subr.bf16.mxu0 %v19142_v3  ;;  %v19172_v40 = vld [vmem:[%s21350_s25 + $0x184] ss:$16 sps:$4 sm:$0xff]  }
0x19fe   : > { %v11949_v57 = vadd.f32 1.0, %v19993_v61  ;;  %15212 = vmatprep.subr.bf16.mxu1 %v19145_v51 }
0x1a00   : > { %15170 = vmatpush1.bf16.msra.mxu0 %v19140_v44  ;;  %20004 = vrcp.f32 %v11949_v57  ;;  %v19170_v44 = vld [vmem:[%s21350_s25 + $0x180] ss:$16 sps:$4 sm:$0xff]  }
0x1a01   : > { %v19995_v52 = vpop.eup %19994  ;;  %15213 = vmatpush1.bf16.msra.mxu1 %v19143_v62  ;;  %15171 = vmatprep.subr.bf16.mxu0 %v19148_v0  ;;  %v19173_v62 = vld [vmem:[%s21350_s25 + $0x380] ss:$16 sps:$4 sm:$0xff]   ;;  %v19178_v0 = vld [vmem:[%s21350_s25 + $0x164] ss:$16 sps:$4 sm:$0xff]  }
0x1a02   : > { %v11965_v1 = vadd.f32 1.0, %v19995_v52  ;;  %15214 = vmatprep.subr.bf16.mxu1 %v19151_v46  ;;  %v19997_v38 = vpop.eup %19996  ;;  %v19181_v52 = vld [vmem:[%s21350_s25 + $0x364] ss:$16 sps:$4 sm:$0xff]  }
0x1a03   : > { %v19999_v23 = vpop.eup %19998  ;;  %v11946_v54 = vadd.f32 1.0, %v19997_v38  ;;  %v19194_v38 = vld [vmem:[%s21350_s25 + $0x100] ss:$16 sps:$4 sm:$0xff]  }
0x1a04   : > { %20006 = vrcp.f32 %v11965_v1  ;;  %15172 = vmatpush1.bf16.msra.mxu0 %v19146_v4  ;;  %v20001_v63 = vpop.eup %20000  ;;  %v11962_v17 = vadd.f32 1.0, %v19999_v23  ;;  %v19184_v1 = vld [vmem:[%s21350_s25 + $0x144] ss:$16 sps:$4 sm:$0xff]  }
0x1a05   : > { %15215 = vmatpush1.bf16.msra.mxu1 %v19149_v28  ;;  %15173 = vmatprep.subr.bf16.mxu0 %v19154_v39  ;;  %v20003_v3 = vpop.eup %20002  ;;  %v11964_v19 = vadd.f32 1.0, %v20001_v63  ;;  %v19176_v39 = vld [vmem:[%s21350_s25 + $0x160] ss:$16 sps:$4 sm:$0xff]   ;;  %v19202_v63 = vld [vmem:[%s21350_s25 + $0x4e4] ss:$16 sps:$4 sm:$0xff]  }
0x1a06   : > { %15216 = vmatprep.subr.bf16.mxu1 %v19157_v24  ;;  %v11948_v57 = vadd.f32 1.0, %v20003_v3  ;;  %20008 = vrcp.f32 %v11962_v17  ;;  %v19182_v24 = vld [vmem:[%s21350_s25 + $0x140] ss:$16 sps:$4 sm:$0xff]   ;;  %v8528_v17 = vrot.slane %v23192_v59, %v21511_v15 }
0x1a07   : > { %20010 = vrcp.f32 %v11964_v19  ;;  %v19200_v19 = vld [vmem:[%s21350_s25 + $0x4e0] ss:$16 sps:$4 sm:$0xff]  }
0x1a08   : > { %15174 = vmatpush2.bf16.msra.mxu0 %v19152_v35  ;;  %20012 = vrcp.f32 %v11946_v54  ;;  %v19185_v35 = vld [vmem:[%s21350_s25 + $0x340] ss:$16 sps:$4 sm:$0xff]  }
0x1a09   : > { %15217 = vmatpush2.bf16.msra.mxu1 %v19155_v50  ;;  %15175 = vmatprep.subr.bf16.mxu0 %v19160_v30  ;;  %20014 = vrcp.f32 %v11948_v57  ;;  %v19190_v50 = vld [vmem:[%s21350_s25 + $0x124] ss:$16 sps:$4 sm:$0xff]   ;;  %v19203_v54 = vld [vmem:[%s21350_s25 + $0x6e0] ss:$16 sps:$4 sm:$0xff]  }
0x1a0a   : > { %15218 = vmatprep.subr.bf16.mxu1 %v19163_v37  ;;  %v19193_v30 = vld [vmem:[%s21350_s25 + $0x324] ss:$16 sps:$4 sm:$0xff]   ;;  %v19188_v37 = vld [vmem:[%s21350_s25 + $0x120] ss:$16 sps:$4 sm:$0xff]  }
0x1a0c   : > { %15176 = vmatpush2.bf16.msra.mxu0 %v19158_v34  ;;  %v19191_v34 = vld [vmem:[%s21350_s25 + $0x320] ss:$16 sps:$4 sm:$0xff]  }
0x1a0d   : > { %15219 = vmatpush2.bf16.msra.mxu1 %v19161_v58  ;;  %15177 = vmatprep.subr.bf16.mxu0 %v19166_v36  ;;  %v20005_v51 = vpop.eup %20004  ;;  %v19196_v58 = vld [vmem:[%s21350_s25 + $0x104] ss:$16 sps:$4 sm:$0xff]  }
0x1a0e   : > { %15220 = vmatprep.subr.bf16.mxu1 %v19169_v25  ;;  %v12045_v46 = vmul.f32 %v20005_v51, %v23223_v2  ;;  %v19179_v2 = vld [vmem:[%s21350_s25 + $0x360] ss:$16 sps:$4 sm:$0xff]   ;;  %v19199_v36 = vld [vmem:[%s21350_s25 + $0x304] ss:$16 sps:$4 sm:$0xff]  }
0x1a10   : > { %15178 = vmatpush2.bf16.msra.mxu0 %v19164_v49  ;;  %v19197_v49 = vld [vmem:[%s21350_s25 + $0x300] ss:$16 sps:$4 sm:$0xff]  }
0x1a11   : > { %v20007_v61 = vpop.eup %20006  ;;  %15221 = vmatpush2.bf16.msra.mxu1 %v19167_v22  ;;  %15179 = vmatprep.subr.bf16.mxu0 %v19172_v40  ;;  %v19205_v40 = vld [vmem:[%s21350_s25 + $0x6e4] ss:$16 sps:$4 sm:$0xff]  }
0x1a12   : > { %v12061_v4 = vmul.f32 %v20007_v61, %v23237_v18  ;;  %15222 = vmatprep.subr.bf16.mxu1 %v19175_v5  ;;  %v19187_v18 = vld [vmem:[%s21350_s25 + $0x344] ss:$16 sps:$4 sm:$0xff]   ;;  %v11509_v61 = vpop.f32.mrf.mxu0 }
0x1a13   : > { %v20009_v25 = vpop.eup %20008 }
0x1a14   : > { %v23296_v28 = vpack.c.bf16 %v12061_v4, %v12045_v46  ;;  %15180 = vmatpush2.bf16.msra.mxu0 %v19170_v44  ;;  %v20011_v23 = vpop.eup %20010  ;;  %v12058_v5 = vmul.f32 %v20009_v25, %v23251_v12  ;;  %v19208_v12 = vld [vmem:[%s21350_s25 + $0x4c4] ss:$16 sps:$4 sm:$0xff]  }
0x1a15   : > { %15223 = vmatpush2.bf16.msra.mxu1 %v19173_v62  ;;  %15181 = vmatprep.subr.bf16.mxu0 %v19178_v0  ;;  %v20013_v22 = vpop.eup %20012  ;;  %v12060_v51 = vmul.f32 %v20011_v23, %v23253_v8  ;;  %v11552_v0 = vpop.f32.mrf.mxu1  ;;  %v19211_v46 = vld [vmem:[%s21350_s25 + $0x6c4] ss:$16 sps:$4 sm:$0xff]   ;;  %v19215_v23 = vld [vmem:[%s21350_s25 + $0x6a0] ss:$16 sps:$4 sm:$0xff]  }
0x1a16   : > { %15224 = vmatprep.subr.bf16.mxu1 %v19181_v52  ;;  %v20015_v3 = vpop.eup %20014  ;;  %v12042_v44 = vmul.f32 %v20013_v22, %v23247_v27 }
0x1a17   : > { %v12044_v62 = vmul.f32 %v20015_v3, %v23257_v20  ;;  %v19206_v20 = vld [vmem:[%s21350_s25 + $0x4c0] ss:$16 sps:$4 sm:$0xff]   ;;  %v19223_v3 = vld [vmem:[%s21350_s25 + $0x684] ss:$16 sps:$4 sm:$0xff]  }
0x1a18   : > { %15182 = vmatpush2.bf16.msra.mxu0 %v19176_v39  ;;  %v23324_v57 = vpack.c.bf16 %v12058_v5, %v12042_v44 }
0x1a19   : > { %15225 = vmatpush2.bf16.msra.mxu1 %v19179_v2  ;;  %15183 = vmatprep.subr.bf16.mxu0 %v19184_v1  ;;  %v23328_v52 = vpack.c.bf16 %v12060_v51, %v12044_v62  ;;  %v19209_v2 = vld [vmem:[%s21350_s25 + $0x6c0] ss:$16 sps:$4 sm:$0xff]   ;;  %v19214_v1 = vld [vmem:[%s21350_s25 + $0x4a4] ss:$16 sps:$4 sm:$0xff]  }
0x1a1a   : > { %15226 = vmatprep.subr.bf16.mxu1 %v19187_v18  ;;  %v8524_v18 = vrot.slane %v23192_v59, %v21502_v11 }
0x1a1c   : > { %15184 = vmatpush2.bf16.msra.mxu0 %v19182_v24  ;;  %v11510_v5 = vadd.f32 %v11509_v61, %v8524_v18  ;;  %v19229_v61 = vld [vmem:[%s21350_s25 + $0x664] ss:$16 sps:$4 sm:$0xff]  }
0x1a1d   : > { %15227 = vmatpush2.bf16.msra.mxu1 %v19185_v35  ;;  %15185 = vmatprep.subr.bf16.mxu0 %v19190_v50  ;;  %v19217_v50 = vld [vmem:[%s21350_s25 + $0x6a4] ss:$16 sps:$4 sm:$0xff]  }
0x1a1e   : > { %15228 = vmatprep.subr.bf16.mxu1 %v19193_v30 }
0x1a20   : > { %15186 = vmatpush2.bf16.msra.mxu0 %v19188_v37 }
0x1a21   : > { %15229 = vmatpush2.bf16.msra.mxu1 %v19191_v34  ;;  %15187 = vmatprep.subr.bf16.mxu0 %v19196_v58  ;;  %v19212_v58 = vld [vmem:[%s21350_s25 + $0x4a0] ss:$16 sps:$4 sm:$0xff]  }
0x1a22   : > { %15230 = vmatprep.subr.bf16.mxu1 %v19199_v36  ;;  %v8532_v36 = vrot.slane %v23192_v59, %v21505_v13 }
0x1a24   : > { %15188 = vmatpush2.bf16.msra.mxu0 %v19194_v38 }
0x1a25   : > { %15231 = vmatpush2.bf16.msra.mxu1 %v19197_v49  ;;  %15243 = vmatprep.subr.bf16.mxu0 %v19202_v63  ;;  %v19220_v49 = vld [vmem:[%s21350_s25 + $0x484] ss:$16 sps:$4 sm:$0xff]   ;;  %v11506_v63 = vadd.f32 %v23216_v42, %v8524_v18 }
0x1a26   : > { %15286 = vmatprep.subr.bf16.mxu1 %v19205_v40  ;;  %v19226_v42 = vld [vmem:[%s21350_s25 + $0x464] ss:$16 sps:$4 sm:$0xff]  }
0x1a27   : > { %v11589_v8 = vpop.f32.mrf.mxu0  ;;  %15190 = vmatmul.mubr.bf16.vlgmr.msra.gmra.mxu0 %v22886_v43  ;;  %v23355_v62 = vadd.f32 %v23226_v16, %v11506_v63  ;;  %v19227_v16 = vld [vmem:[%s21350_s25 + $0x660] ss:$16 sps:$4 sm:$0xff]  }
0x1a28   : > { %v11590_v4 = vadd.f32 %v11589_v8, %v8528_v17  ;;  %v11632_v27 = vpop.f32.mrf.mxu1  ;;  %15233 = vmatmul.mubr.bf16.vlgmr.msra.gmra.mxu1 %v22974_v33  ;;  %15244 = vmatpush1.bf16.msra.mxu0 %v19200_v19  ;;  %v19218_v19 = vld [vmem:[%s21350_s25 + $0x480] ss:$16 sps:$4 sm:$0xff]   ;;  %v23358_v8 = vadd.f32 %v11552_v0, %v11510_v5  ;;  %v19235_v0 = vld [vmem:[%s21350_s25 + $0x644] ss:$16 sps:$4 sm:$0xff]  }
0x1a29   : > { %15275 = vmatprep.mubr.bf16.mxu0 %v23324_v57  ;;  %15287 = vmatpush1.bf16.msra.mxu1 %v19203_v54  ;;  %v11591_v39 = vpop.f32.mrf.mxu0  ;;  %v19221_v54 = vld [vmem:[%s21350_s25 + $0x680] ss:$16 sps:$4 sm:$0xff]   ;;  %v19247_v5 = vld [vmem:[%s21350_s25 + $0x604] ss:$16 sps:$4 sm:$0xff]  }
0x1a2a   : > { %v23336_v24 = vadd.f32 %v11632_v27, %v11590_v4  ;;  %15318 = vmatprep.mubr.bf16.mxu1 %v23328_v52  ;;  %v11634_v35 = vpop.f32.mrf.mxu1  ;;  %15245 = vmatprep.subr.bf16.mxu0 %v19208_v12  ;;  %v11592_v44 = vadd.f32 %v11591_v39, %v8532_v36  ;;  %v19224_v27 = vld [vmem:[%s21350_s25 + $0x460] ss:$16 sps:$4 sm:$0xff]   ;;  %v19232_v39 = vld [vmem:[%s21350_s25 + $0x444] ss:$16 sps:$4 sm:$0xff]  }
0x1a2b   : > { %v11593_v30 = vpop.f32.mrf.mxu0  ;;  %15288 = vmatprep.subr.bf16.mxu1 %v19211_v46  ;;  %v19239_v63 = vld [vmem:[%s21350_s25 + $0x620] ss:$16 sps:$4 sm:$0xff]  }
0x1a2c   : > { %v17464_v37 = vmul.f32 -1.702, %v23336_v24  ;;  %v11594_v34 = vadd.f32 %v11593_v30, %v8528_v17  ;;  %15246 = vmatpush1.bf16.msra.mxu0 %v19206_v20  ;;  %v11636_v25 = vpop.f32.mrf.mxu1  ;;  %v23363_v20 = vadd.f32 %v11634_v35, %v11592_v44  ;;  %v19233_v30 = vld [vmem:[%s21350_s25 + $0x640] ss:$16 sps:$4 sm:$0xff]   ;;  %v19250_v44 = vld [vmem:[%s21350_s25 + $0x5e4] ss:$16 sps:$4 sm:$0xff]  }
0x1a2d   : > { %15289 = vmatpush1.bf16.msra.mxu1 %v19209_v2  ;;  %v11595_v38 = vpop.f32.mrf.mxu0  ;;  %15247 = vmatprep.subr.bf16.mxu0 %v19214_v1  ;;  %v17463_v2 = vmul.f32 -1.702, %v23355_v62  ;;  %v17479_v1 = vmul.f32 -1.702, %v23358_v8 }
0x1a2e   : > { %v11897_v22 = vmul.f32 1.442695, %v17464_v37  ;;  %v23347_v40 = vadd.f32 %v11636_v25, %v11594_v34  ;;  %15290 = vmatprep.subr.bf16.mxu1 %v19217_v50  ;;  %v11596_v17 = vadd.f32 %v11595_v38, %v8532_v36  ;;  %v11638_v46 = vpop.f32.mrf.mxu1  ;;  %v19230_v50 = vld [vmem:[%s21350_s25 + $0x440] ss:$16 sps:$4 sm:$0xff]   ;;  %v17465_v35 = vmul.f32 -1.702, %v23363_v20 }
0x1a2f   : > { %v19238_v37 = vld [vmem:[%s21350_s25 + $0x424] ss:$16 sps:$4 sm:$0xff]   ;;  %v11895_v34 = vmul.f32 1.442695, %v17463_v2  ;;  %v11927_v36 = vmul.f32 1.442695, %v17479_v1 }
0x1a30   : > { %20016 = vpow2.f32 %v11897_v22  ;;  %v17480_v51 = vmul.f32 -1.702, %v23347_v40  ;;  %15248 = vmatpush1.bf16.msra.mxu0 %v19212_v58  ;;  %v23360_v4 = vadd.f32 %v11638_v46, %v11596_v17  ;;  %v19241_v58 = vld [vmem:[%s21350_s25 + $0x624] ss:$16 sps:$4 sm:$0xff]   ;;  %v19236_v38 = vld [vmem:[%s21350_s25 + $0x420] ss:$16 sps:$4 sm:$0xff]  }
0x1a31   : > { %15291 = vmatpush1.bf16.msra.mxu1 %v19215_v23  ;;  %15249 = vmatprep.subr.bf16.mxu0 %v19220_v49  ;;  %v11899_v49 = vmul.f32 1.442695, %v17465_v35  ;;  %v19244_v22 = vld [vmem:[%s21350_s25 + $0x404] ss:$16 sps:$4 sm:$0xff]  }
0x1a32   : > { %v11929_v12 = vmul.f32 1.442695, %v17480_v51  ;;  %15292 = vmatprep.subr.bf16.mxu1 %v19223_v3  ;;  %v17481_v18 = vmul.f32 -1.702, %v23360_v4  ;;  %v19242_v51 = vld [vmem:[%s21350_s25 + $0x400] ss:$16 sps:$4 sm:$0xff]  }
0x1a33   : > { %v19256_v46 = vld [vmem:[%s21350_s25 + $0x5c4] ss:$16 sps:$4 sm:$0xff]  }
0x1a34   : > { %20018 = vpow2.f32 %v11929_v12  ;;  %15250 = vmatpush1.bf16.msra.mxu0 %v19218_v19  ;;  %v11931_v25 = vmul.f32 1.442695, %v17481_v18  ;;  %v19245_v19 = vld [vmem:[%s21350_s25 + $0x600] ss:$16 sps:$4 sm:$0xff]   ;;  %v19262_v2 = vld [vmem:[%s21350_s25 + $0x5a4] ss:$16 sps:$4 sm:$0xff]  }
0x1a35   : > { %15293 = vmatpush1.bf16.msra.mxu1 %v19221_v54  ;;  %15251 = vmatprep.subr.bf16.mxu0 %v19226_v42  ;;  %20020 = vpow2.f32 %v11895_v34  ;;  %v19253_v42 = vld [vmem:[%s21350_s25 + $0x7e4] ss:$16 sps:$4 sm:$0xff]   ;;  %v19248_v12 = vld [vmem:[%s21350_s25 + $0x5e0] ss:$16 sps:$4 sm:$0xff]  }
0x1a36   : > { %15294 = vmatprep.subr.bf16.mxu1 %v19229_v61  ;;  %20022 = vpow2.f32 %v11927_v36  ;;  %v19251_v61 = vld [vmem:[%s21350_s25 + $0x7e0] ss:$16 sps:$4 sm:$0xff]  }
0x1a37   : > { %20024 = vpow2.f32 %v11931_v25 }
0x1a38   : > { %15252 = vmatpush1.bf16.msra.mxu0 %v19224_v27  ;;  %20026 = vpow2.f32 %v11899_v49  ;;  %v19259_v27 = vld [vmem:[%s21350_s25 + $0x7c4] ss:$16 sps:$4 sm:$0xff]  }
0x1a39   : > { %15295 = vmatpush1.bf16.msra.mxu1 %v19227_v16  ;;  %15253 = vmatprep.subr.bf16.mxu0 %v19232_v39  ;;  %v19254_v16 = vld [vmem:[%s21350_s25 + $0x5c0] ss:$16 sps:$4 sm:$0xff]  }
0x1a3a   : > { %15296 = vmatprep.subr.bf16.mxu1 %v19235_v0  ;;  %v19257_v39 = vld [vmem:[%s21350_s25 + $0x7c0] ss:$16 sps:$4 sm:$0xff]   ;;  %v19265_v0 = vld [vmem:[%s21350_s25 + $0x7a4] ss:$16 sps:$4 sm:$0xff]  }
0x1a3c   : > { %15254 = vmatpush1.bf16.msra.mxu0 %v19230_v50  ;;  %v19260_v50 = vld [vmem:[%s21350_s25 + $0x5a0] ss:$16 sps:$4 sm:$0xff]  }
0x1a3d   : > { %v20017_v23 = vpop.eup %20016  ;;  %15297 = vmatpush1.bf16.msra.mxu1 %v19233_v30  ;;  %15255 = vmatprep.subr.bf16.mxu0 %v19238_v37  ;;  %v19263_v30 = vld [vmem:[%s21350_s25 + $0x7a0] ss:$16 sps:$4 sm:$0xff]   ;;  %v19268_v37 = vld [vmem:[%s21350_s25 + $0x584] ss:$16 sps:$4 sm:$0xff]  }
0x1a3e   : > { %v11951_v3 = vadd.f32 1.0, %v20017_v23  ;;  %15298 = vmatprep.subr.bf16.mxu1 %v19241_v58  ;;  %v19271_v58 = vld [vmem:[%s21350_s25 + $0x784] ss:$16 sps:$4 sm:$0xff]   ;;  %v19266_v23 = vld [vmem:[%s21350_s25 + $0x580] ss:$16 sps:$4 sm:$0xff]  }
0x1a40   : > { %15256 = vmatpush1.bf16.msra.mxu0 %v19236_v38  ;;  %20028 = vrcp.f32 %v11951_v3  ;;  %v19274_v3 = vld [vmem:[%s21350_s25 + $0x564] ss:$16 sps:$4 sm:$0xff]  }
0x1a41   : > { %v20019_v17 = vpop.eup %20018  ;;  %15299 = vmatpush1.bf16.msra.mxu1 %v19239_v63  ;;  %15257 = vmatprep.subr.bf16.mxu0 %v19244_v22  ;;  %v19269_v22 = vld [vmem:[%s21350_s25 + $0x780] ss:$16 sps:$4 sm:$0xff]  }
0x1a42   : > { %v11967_v54 = vadd.f32 1.0, %v20019_v17  ;;  %15300 = vmatprep.subr.bf16.mxu1 %v19247_v5  ;;  %v20021_v1 = vpop.eup %20020 }
0x1a43   : > { %v20023_v18 = vpop.eup %20022  ;;  %v11950_v63 = vadd.f32 1.0, %v20021_v1 }
0x1a44   : > { %20030 = vrcp.f32 %v11967_v54  ;;  %15258 = vmatpush1.bf16.msra.mxu0 %v19242_v51  ;;  %v20025_v35 = vpop.eup %20024  ;;  %v11966_v25 = vadd.f32 1.0, %v20023_v18  ;;  %v19272_v54 = vld [vmem:[%s21350_s25 + $0x560] ss:$16 sps:$4 sm:$0xff]  }
0x1a45   : > { %15301 = vmatpush1.bf16.msra.mxu1 %v19245_v19  ;;  %15259 = vmatprep.subr.bf16.mxu0 %v19250_v44  ;;  %v20027_v34 = vpop.eup %20026  ;;  %v11968_v38 = vadd.f32 1.0, %v20025_v35  ;;  %v19277_v19 = vld [vmem:[%s21350_s25 + $0x764] ss:$16 sps:$4 sm:$0xff]   ;;  %v19290_v18 = vld [vmem:[%s21350_s25 + $0x500] ss:$16 sps:$4 sm:$0xff]  }
0x1a46   : > { %15302 = vmatprep.subr.bf16.mxu1 %v19253_v42  ;;  %v11952_v51 = vadd.f32 1.0, %v20027_v34  ;;  %20032 = vrcp.f32 %v11966_v25  ;;  %v19280_v42 = vld [vmem:[%s21350_s25 + $0x544] ss:$16 sps:$4 sm:$0xff]   ;;  %v19293_v35 = vld [vmem:[%s21350_s25 + $0x700] ss:$16 sps:$4 sm:$0xff]  }
0x1a47   : > { %20034 = vrcp.f32 %v11968_v38  ;;  %v19301_v34 = vld [vmem:[%s21350_s25 + $0xae4] ss:$16 sps:$4 sm:$0xff]   ;;  %v8536_v38 = vrot.slane %v23192_v59, %v8503_v45 }
0x1a48   : > { %15260 = vmatpush2.bf16.msra.mxu0 %v19248_v12  ;;  %20036 = vrcp.f32 %v11950_v63  ;;  %v19278_v12 = vld [vmem:[%s21350_s25 + $0x540] ss:$16 sps:$4 sm:$0xff]  }
0x1a49   : > { %15303 = vmatpush2.bf16.msra.mxu1 %v19251_v61  ;;  %15261 = vmatprep.subr.bf16.mxu0 %v19256_v46  ;;  %20038 = vrcp.f32 %v11952_v51  ;;  %v19281_v61 = vld [vmem:[%s21350_s25 + $0x740] ss:$16 sps:$4 sm:$0xff]   ;;  %v19286_v46 = vld [vmem:[%s21350_s25 + $0x524] ss:$16 sps:$4 sm:$0xff]  }
0x1a4a   : > { %15304 = vmatprep.subr.bf16.mxu1 %v19259_v27  ;;  %v19289_v27 = vld [vmem:[%s21350_s25 + $0x724] ss:$16 sps:$4 sm:$0xff]   ;;  %v19299_v63 = vld [vmem:[%s21350_s25 + $0xae0] ss:$16 sps:$4 sm:$0xff]  }
0x1a4c   : > { %15262 = vmatpush2.bf16.msra.mxu0 %v19254_v16  ;;  %v19284_v16 = vld [vmem:[%s21350_s25 + $0x520] ss:$16 sps:$4 sm:$0xff]  }
0x1a4d   : > { %15305 = vmatpush2.bf16.msra.mxu1 %v19257_v39  ;;  %15263 = vmatprep.subr.bf16.mxu0 %v19262_v2  ;;  %v20029_v36 = vpop.eup %20028  ;;  %v19287_v39 = vld [vmem:[%s21350_s25 + $0x720] ss:$16 sps:$4 sm:$0xff]   ;;  %v19292_v2 = vld [vmem:[%s21350_s25 + $0x504] ss:$16 sps:$4 sm:$0xff]  }
0x1a4e   : > { %15306 = vmatprep.subr.bf16.mxu1 %v19265_v0  ;;  %v12047_v5 = vmul.f32 %v20029_v36, %v23336_v24  ;;  %v19275_v24 = vld [vmem:[%s21350_s25 + $0x760] ss:$16 sps:$4 sm:$0xff]   ;;  %v19295_v0 = vld [vmem:[%s21350_s25 + $0x704] ss:$16 sps:$4 sm:$0xff]  }
0x1a50   : > { %15264 = vmatpush2.bf16.msra.mxu0 %v19260_v50 }
0x1a51   : > { %v20031_v49 = vpop.eup %20030  ;;  %15307 = vmatpush2.bf16.msra.mxu1 %v19263_v30  ;;  %15265 = vmatprep.subr.bf16.mxu0 %v19268_v37  ;;  %v19298_v30 = vld [vmem:[%s21350_s25 + $0x8e4] ss:$16 sps:$4 sm:$0xff]  }
0x1a52   : > { %v12063_v17 = vmul.f32 %v20031_v49, %v23347_v40  ;;  %15308 = vmatprep.subr.bf16.mxu1 %v19271_v58  ;;  %v19283_v40 = vld [vmem:[%s21350_s25 + $0x744] ss:$16 sps:$4 sm:$0xff]  }
0x1a53   : > { %v20033_v1 = vpop.eup %20032 }
0x1a54   : > { %v23402_v44 = vpack.c.bf16 %v12063_v17, %v12047_v5  ;;  %15266 = vmatpush2.bf16.msra.mxu0 %v19266_v23  ;;  %v20035_v50 = vpop.eup %20034  ;;  %v12062_v36 = vmul.f32 %v20033_v1, %v23358_v8  ;;  %v19296_v23 = vld [vmem:[%s21350_s25 + $0x8e0] ss:$16 sps:$4 sm:$0xff]   ;;  %v19304_v8 = vld [vmem:[%s21350_s25 + $0x8c4] ss:$16 sps:$4 sm:$0xff]  }
0x1a55   : > { %15309 = vmatpush2.bf16.msra.mxu1 %v19269_v22  ;;  %15267 = vmatprep.subr.bf16.mxu0 %v19274_v3  ;;  %v20037_v37 = vpop.eup %20036  ;;  %v12064_v25 = vmul.f32 %v20035_v50, %v23360_v4  ;;  %v19307_v5 = vld [vmem:[%s21350_s25 + $0xac4] ss:$16 sps:$4 sm:$0xff]   ;;  %v19302_v17 = vld [vmem:[%s21350_s25 + $0x8c0] ss:$16 sps:$4 sm:$0xff]  }
0x1a56   : > { %15310 = vmatprep.subr.bf16.mxu1 %v19277_v19  ;;  %v20039_v58 = vpop.eup %20038  ;;  %v12046_v49 = vmul.f32 %v20037_v37, %v23355_v62  ;;  %v19305_v19 = vld [vmem:[%s21350_s25 + $0xac0] ss:$16 sps:$4 sm:$0xff]   ;;  %v19316_v1 = vld [vmem:[%s21350_s25 + $0x884] ss:$16 sps:$4 sm:$0xff]  }
0x1a57   : > { %v12048_v22 = vmul.f32 %v20039_v58, %v23363_v20  ;;  %v19322_v58 = vld [vmem:[%s21350_s25 + $0x864] ss:$16 sps:$4 sm:$0xff]  }
0x1a58   : > { %15268 = vmatpush2.bf16.msra.mxu0 %v19272_v54  ;;  %v23431_v4 = vpack.c.bf16 %v12062_v36, %v12046_v49  ;;  %v19310_v54 = vld [vmem:[%s21350_s25 + $0x8a4] ss:$16 sps:$4 sm:$0xff]   ;;  %v19320_v49 = vld [vmem:[%s21350_s25 + $0x860] ss:$16 sps:$4 sm:$0xff]  }
0x1a59   : > { %15311 = vmatpush2.bf16.msra.mxu1 %v19275_v24  ;;  %15269 = vmatprep.subr.bf16.mxu0 %v19280_v42  ;;  %v23435_v62 = vpack.c.bf16 %v12064_v25, %v12048_v22  ;;  %v19323_v22 = vld [vmem:[%s21350_s25 + $0xa60] ss:$16 sps:$4 sm:$0xff]  }
0x1a5a   : > { %15312 = vmatprep.subr.bf16.mxu1 %v19283_v40  ;;  %v19313_v40 = vld [vmem:[%s21350_s25 + $0xaa4] ss:$16 sps:$4 sm:$0xff]  }
0x1a5c   : > { %15270 = vmatpush2.bf16.msra.mxu0 %v19278_v12 }
0x1a5d   : > { %15313 = vmatpush2.bf16.msra.mxu1 %v19281_v61  ;;  %15271 = vmatprep.subr.bf16.mxu0 %v19286_v46 }
0x1a5e   : > { %15314 = vmatprep.subr.bf16.mxu1 %v19289_v27  ;;  %v19308_v27 = vld [vmem:[%s21350_s25 + $0x8a0] ss:$16 sps:$4 sm:$0xff]  }
0x1a60   : > { %15272 = vmatpush2.bf16.msra.mxu0 %v19284_v16  ;;  %v8540_v16 = vrot.slane %v23192_v59, %v8507_v41  ;;  %v19314_v59 = vld [vmem:[%s21350_s25 + $0x880] ss:$16 sps:$4 sm:$0xff]  }
0x1a61   : > { %15315 = vmatpush2.bf16.msra.mxu1 %v19287_v39  ;;  %15273 = vmatprep.subr.bf16.mxu0 %v19292_v2 }
0x1a62   : > { %15316 = vmatprep.subr.bf16.mxu1 %v19295_v0  ;;  %v19311_v0 = vld [vmem:[%s21350_s25 + $0xaa0] ss:$16 sps:$4 sm:$0xff]  }
0x1a64   : > { %15274 = vmatpush2.bf16.msra.mxu0 %v19290_v18 }
0x1a65   : > { %15317 = vmatpush2.bf16.msra.mxu1 %v19293_v35  ;;  %15329 = vmatprep.subr.bf16.mxu0 %v19298_v30  ;;  %v19319_v35 = vld [vmem:[%s21350_s25 + $0xa84] ss:$16 sps:$4 sm:$0xff]  }
0x1a66   : > { %15372 = vmatprep.subr.bf16.mxu1 %v19301_v34  ;;  %v19317_v34 = vld [vmem:[%s21350_s25 + $0xa80] ss:$16 sps:$4 sm:$0xff]  }
0x1a67   : > { %v11675_v3 = vpop.f32.mrf.mxu0  ;;  %15276 = vmatmul.mubr.bf16.vlgmr.msra.gmra.mxu0 %v23064_v32 }
0x1a68   : > { %v11676_v45 = vadd.f32 %v11675_v3, %v8536_v38  ;;  %v11718_v51 = vpop.f32.mrf.mxu1  ;;  %15319 = vmatmul.mubr.bf16.vlgmr.msra.gmra.mxu1 %v23181_v47  ;;  %15330 = vmatpush1.bf16.msra.mxu0 %v19296_v23  ;;  %v19331_v3 = vld [vmem:[%s21350_s25 + $0xa44] ss:$16 sps:$4 sm:$0xff]  }
0x1a69   : > { %15361 = vmatprep.mubr.bf16.mxu0 %v23431_v4  ;;  %15373 = vmatpush1.bf16.msra.mxu1 %v19299_v63  ;;  %v11677_v20 = vpop.f32.mrf.mxu0 }
0x1a6a   : > { %v23441_v24 = vadd.f32 %v11718_v51, %v11676_v45  ;;  %15404 = vmatprep.mubr.bf16.mxu1 %v23435_v62  ;;  %v11720_v42 = vpop.f32.mrf.mxu1  ;;  %15331 = vmatprep.subr.bf16.mxu0 %v19304_v8  ;;  %v11678_v41 = vadd.f32 %v11677_v20, %v8540_v16  ;;  %v19328_v8 = vld [vmem:[%s21350_s25 + $0x844] ss:$16 sps:$4 sm:$0xff]   ;;  %v19326_v45 = vld [vmem:[%s21350_s25 + $0x840] ss:$16 sps:$4 sm:$0xff]  }
0x1a6b   : > { %v11679_v12 = vpop.f32.mrf.mxu0  ;;  %15374 = vmatprep.subr.bf16.mxu1 %v19307_v5  ;;  %v19334_v20 = vld [vmem:[%s21350_s25 + $0x824] ss:$16 sps:$4 sm:$0xff]  }
0x1a6c   : > { %v17466_v61 = vmul.f32 -1.702, %v23441_v24  ;;  %v11680_v46 = vadd.f32 %v11679_v12, %v8536_v38  ;;  %15332 = vmatpush1.bf16.msra.mxu0 %v19302_v17  ;;  %v11722_v39 = vpop.f32.mrf.mxu1  ;;  %v19325_v38 = vld [vmem:[%s21350_s25 + $0xa64] ss:$16 sps:$4 sm:$0xff]   ;;  %v23463_v63 = vadd.f32 %v11720_v42, %v11678_v41  ;;  %v19329_v17 = vld [vmem:[%s21350_s25 + $0xa40] ss:$16 sps:$4 sm:$0xff]  }
0x1a6d   : > { %15375 = vmatpush1.bf16.msra.mxu1 %v19305_v19  ;;  %v11681_v2 = vpop.f32.mrf.mxu0  ;;  %15333 = vmatprep.subr.bf16.mxu0 %v19310_v54  ;;  %v19337_v19 = vld [vmem:[%s21350_s25 + $0xa24] ss:$16 sps:$4 sm:$0xff]   ;;  %v19332_v42 = vld [vmem:[%s21350_s25 + $0x820] ss:$16 sps:$4 sm:$0xff]  }
0x1a6e   : > { %v11901_v18 = vmul.f32 1.442695, %v17466_v61  ;;  %v23452_v50 = vadd.f32 %v11722_v39, %v11680_v46  ;;  %15376 = vmatprep.subr.bf16.mxu1 %v19313_v40  ;;  %v11682_v30 = vadd.f32 %v11681_v2, %v8540_v16  ;;  %v11724_v25 = vpop.f32.mrf.mxu1  ;;  %v17467_v51 = vmul.f32 -1.702, %v23463_v63  ;;  %v19335_v61 = vld [vmem:[%s21350_s25 + $0xa20] ss:$16 sps:$4 sm:$0xff]  }
0x1a6f   : > { %v19340_v46 = vld [vmem:[%s21350_s25 + $0x804] ss:$16 sps:$4 sm:$0xff]   ;;  %v19338_v39 = vld [vmem:[%s21350_s25 + $0x800] ss:$16 sps:$4 sm:$0xff]  }
0x1a70   : > { %20040 = vpow2.f32 %v11901_v18  ;;  %v17482_v37 = vmul.f32 -1.702, %v23452_v50  ;;  %15334 = vmatpush1.bf16.msra.mxu0 %v19308_v27  ;;  %v23460_v23 = vadd.f32 %v11724_v25, %v11682_v30  ;;  %v11903_v12 = vmul.f32 1.442695, %v17467_v51  ;;  %v19343_v16 = vld [vmem:[%s21350_s25 + $0xa04] ss:$16 sps:$4 sm:$0xff]  }
0x1a71   : > { %15377 = vmatpush1.bf16.msra.mxu1 %v19311_v0  ;;  %15335 = vmatprep.subr.bf16.mxu0 %v19316_v1  ;;  %v19341_v0 = vld [vmem:[%s21350_s25 + $0xa00] ss:$16 sps:$4 sm:$0xff]   ;;  %v19346_v1 = vld [vmem:[%s21350_s25 + $0x9e4] ss:$16 sps:$4 sm:$0xff]  }
0x1a72   : > { %v11933_v36 = vmul.f32 1.442695, %v17482_v37  ;;  %15378 = vmatprep.subr.bf16.mxu1 %v19319_v35  ;;  %v17483_v5 = vmul.f32 -1.702, %v23460_v23  ;;  %v19349_v35 = vld [vmem:[%s21350_s25 + $0xbe4] ss:$16 sps:$4 sm:$0xff]  }
0x1a73   : > { %v19344_v30 = vld [vmem:[%s21350_s25 + $0x9e0] ss:$16 sps:$4 sm:$0xff]   ;;  %v19355_v41 = vld [vmem:[%s21350_s25 + $0xbc4] ss:$16 sps:$4 sm:$0xff]  }
0x1a74   : > { %20042 = vpow2.f32 %v11933_v36  ;;  %15336 = vmatpush1.bf16.msra.mxu0 %v19314_v59  ;;  %v11935_v54 = vmul.f32 1.442695, %v17483_v5  ;;  %v19347_v37 = vld [vmem:[%s21350_s25 + $0xbe0] ss:$16 sps:$4 sm:$0xff]   ;;  %v19352_v59 = vld [vmem:[%s21350_s25 + $0x9c4] ss:$16 sps:$4 sm:$0xff]  }
0x1a75   : > { %15379 = vmatpush1.bf16.msra.mxu1 %v19317_v34  ;;  %15337 = vmatprep.subr.bf16.mxu0 %v19322_v58  ;;  %v19350_v34 = vld [vmem:[%s21350_s25 + $0x9c0] ss:$16 sps:$4 sm:$0xff]   ;;  %v19358_v36 = vld [vmem:[%s21350_s25 + $0x9a4] ss:$16 sps:$4 sm:$0xff]  }
0x1a76   : > { %15380 = vmatprep.subr.bf16.mxu1 %v19325_v38  ;;  %20044 = vpow2.f32 %v11935_v54  ;;  %v19353_v58 = vld [vmem:[%s21350_s25 + $0xbc0] ss:$16 sps:$4 sm:$0xff]   ;;  %v19361_v25 = vld [vmem:[%s21350_s25 + $0xba4] ss:$16 sps:$4 sm:$0xff]  }
0x1a77   : > { %20046 = vpow2.f32 %v11903_v12  ;;  %v19367_v5 = vld [vmem:[%s21350_s25 + $0xb84] ss:$16 sps:$4 sm:$0xff]   ;;  %v19365_v54 = vld [vmem:[%s21350_s25 + $0xb80] ss:$16 sps:$4 sm:$0xff]  }
0x1a78   : > { %15338 = vmatpush1.bf16.msra.mxu0 %v19320_v49  ;;  %v19356_v49 = vld [vmem:[%s21350_s25 + $0x9a0] ss:$16 sps:$4 sm:$0xff]  }
0x1a79   : > { %15381 = vmatpush1.bf16.msra.mxu1 %v19323_v22  ;;  %15339 = vmatprep.subr.bf16.mxu0 %v19328_v8  ;;  %v19359_v22 = vld [vmem:[%s21350_s25 + $0xba0] ss:$16 sps:$4 sm:$0xff]   ;;  %v19364_v8 = vld [vmem:[%s21350_s25 + $0x984] ss:$16 sps:$4 sm:$0xff]  }
0x1a7a   : > { %15382 = vmatprep.subr.bf16.mxu1 %v19331_v3 }
0x1a7c   : > { %15340 = vmatpush1.bf16.msra.mxu0 %v19326_v45 }
0x1a7d   : > { %v20041_v40 = vpop.eup %20040  ;;  %15383 = vmatpush1.bf16.msra.mxu1 %v19329_v17  ;;  %15341 = vmatprep.subr.bf16.mxu0 %v19334_v20  ;;  %v19362_v17 = vld [vmem:[%s21350_s25 + $0x980] ss:$16 sps:$4 sm:$0xff]  }
0x1a7e   : > { %v11953_v27 = vadd.f32 1.0, %v20041_v40  ;;  %15384 = vmatprep.subr.bf16.mxu1 %v19337_v19 }
0x1a80   : > { %15342 = vmatpush1.bf16.msra.mxu0 %v19332_v42  ;;  %20048 = vrcp.f32 %v11953_v27  ;;  %v19370_v42 = vld [vmem:[%s21350_s25 + $0x964] ss:$16 sps:$4 sm:$0xff]   ;;  %v19368_v27 = vld [vmem:[%s21350_s25 + $0x960] ss:$16 sps:$4 sm:$0xff]  }
0x1a81   : > { %v20043_v2 = vpop.eup %20042  ;;  %15385 = vmatpush1.bf16.msra.mxu1 %v19335_v61  ;;  %15343 = vmatprep.subr.bf16.mxu0 %v19340_v46  ;;  %v19373_v61 = vld [vmem:[%s21350_s25 + $0xb64] ss:$16 sps:$4 sm:$0xff]  }
0x1a82   : > { %v11969_v18 = vadd.f32 1.0, %v20043_v2  ;;  %15386 = vmatprep.subr.bf16.mxu1 %v19343_v16  ;;  %v19371_v16 = vld [vmem:[%s21350_s25 + $0xb60] ss:$16 sps:$4 sm:$0xff]  }
0x1a83   : > { %v20045_v38 = vpop.eup %20044  ;;  %v19377_v2 = vld [vmem:[%s21350_s25 + $0xb40] ss:$16 sps:$4 sm:$0xff]  }
0x1a84   : > { %20050 = vrcp.f32 %v11969_v18  ;;  %15344 = vmatpush1.bf16.msra.mxu0 %v19338_v39  ;;  %v20047_v3 = vpop.eup %20046  ;;  %v11970_v51 = vadd.f32 1.0, %v20045_v38  ;;  %v19374_v39 = vld [vmem:[%s21350_s25 + $0x940] ss:$16 sps:$4 sm:$0xff]  }
0x1a85   : > { %15387 = vmatpush1.bf16.msra.mxu1 %v19341_v0  ;;  %15345 = vmatprep.subr.bf16.mxu0 %v19346_v1  ;;  %v11954_v19 = vadd.f32 1.0, %v20047_v3  ;;  %v19382_v0 = vld [vmem:[%s21350_s25 + $0x924] ss:$16 sps:$4 sm:$0xff]   ;;  %v19380_v18 = vld [vmem:[%s21350_s25 + $0x920] ss:$16 sps:$4 sm:$0xff]   ;;  %v20082_v3 = vld [vmem:[%s21347_s29 + $0x8] sm:$0xff] }
0x1a86   : > { %15388 = vmatprep.subr.bf16.mxu1 %v19349_v35  ;;  %20052 = vrcp.f32 %v11970_v51  ;;  %v19385_v1 = vld [vmem:[%s21350_s25 + $0xb24] ss:$16 sps:$4 sm:$0xff]   ;;  %v19383_v35 = vld [vmem:[%s21350_s25 + $0xb20] ss:$16 sps:$4 sm:$0xff]  }
0x1a87   : > { %20054 = vrcp.f32 %v11954_v19  ;;  %v19403_v51 = vld [vmem:[%s21350_s25 + $0xec4] ss:$16 sps:$4 sm:$0xff]  }
0x1a88   : > { %15346 = vmatpush2.bf16.msra.mxu0 %v19344_v30  ;;  %v19388_v30 = vld [vmem:[%s21350_s25 + $0x904] ss:$16 sps:$4 sm:$0xff]  }
0x1a89   : > { %15389 = vmatpush2.bf16.msra.mxu1 %v19347_v37  ;;  %15347 = vmatprep.subr.bf16.mxu0 %v19352_v59  ;;  %v19391_v37 = vld [vmem:[%s21350_s25 + $0xb04] ss:$16 sps:$4 sm:$0xff]  }
0x1a8a   : > { %15390 = vmatprep.subr.bf16.mxu1 %v19355_v41  ;;  %v19386_v41 = vld [vmem:[%s21350_s25 + $0x900] ss:$16 sps:$4 sm:$0xff]  }
0x1a8c   : > { %15348 = vmatpush2.bf16.msra.mxu0 %v19350_v34  ;;  %v19389_v34 = vld [vmem:[%s21350_s25 + $0xb00] ss:$16 sps:$4 sm:$0xff]  }
0x1a8d   : > { %15391 = vmatpush2.bf16.msra.mxu1 %v19353_v58  ;;  %15349 = vmatprep.subr.bf16.mxu0 %v19358_v36  ;;  %v20049_v45 = vpop.eup %20048  ;;  %v19394_v58 = vld [vmem:[%s21350_s25 + $0xce4] ss:$16 sps:$4 sm:$0xff]  }
0x1a8e   : > { %15392 = vmatprep.subr.bf16.mxu1 %v19361_v25  ;;  %v12049_v40 = vmul.f32 %v20049_v45, %v23441_v24  ;;  %v19376_v24 = vld [vmem:[%s21350_s25 + $0x944] ss:$16 sps:$4 sm:$0xff]  }
0x1a8f   : > { %v19397_v25 = vld [vmem:[%s21350_s25 + $0xee4] ss:$16 sps:$4 sm:$0xff]  }
0x1a90   : > { %15350 = vmatpush2.bf16.msra.mxu0 %v19356_v49  ;;  %v19392_v49 = vld [vmem:[%s21350_s25 + $0xce0] ss:$16 sps:$4 sm:$0xff]   ;;  %v19400_v45 = vld [vmem:[%s21350_s25 + $0xcc4] ss:$16 sps:$4 sm:$0xff]  }
0x1a91   : > { %v20051_v20 = vpop.eup %20050  ;;  %15393 = vmatpush2.bf16.msra.mxu1 %v19359_v22  ;;  %15351 = vmatprep.subr.bf16.mxu0 %v19364_v8  ;;  %v19395_v8 = vld [vmem:[%s21350_s25 + $0xee0] ss:$16 sps:$4 sm:$0xff]  }
0x1a92   : > { %v12065_v12 = vmul.f32 %v20051_v20, %v23452_v50  ;;  %15394 = vmatprep.subr.bf16.mxu1 %v19367_v5  ;;  %v19379_v50 = vld [vmem:[%s21350_s25 + $0xb44] ss:$16 sps:$4 sm:$0xff]   ;;  %v8548_v5 = vrot.slane %v20082_v3, %v8515_v7 }
0x1a93   : > { %v20053_v59 = vpop.eup %20052  ;;  %v19406_v7 = vld [vmem:[%s21350_s25 + $0xca4] ss:$16 sps:$4 sm:$0xff]  }
0x1a94   : > { %v23500_v46 = vpack.c.bf16 %v12065_v12, %v12049_v40  ;;  %15352 = vmatpush2.bf16.msra.mxu0 %v19362_v17  ;;  %v20055_v36 = vpop.eup %20054  ;;  %v12066_v38 = vmul.f32 %v20053_v59, %v23460_v23  ;;  %v19409_v12 = vld [vmem:[%s21350_s25 + $0xea4] ss:$16 sps:$4 sm:$0xff]  }
0x1a95   : > { %15395 = vmatpush2.bf16.msra.mxu1 %v19365_v54  ;;  %15353 = vmatprep.subr.bf16.mxu0 %v19370_v42  ;;  %v12050_v22 = vmul.f32 %v20055_v36, %v23463_v63  ;;  %v19398_v63 = vld [vmem:[%s21350_s25 + $0xcc0] ss:$16 sps:$4 sm:$0xff]  }
0x1a96   : > { %15396 = vmatprep.subr.bf16.mxu1 %v19373_v61  ;;  %v19401_v54 = vld [vmem:[%s21350_s25 + $0xec0] ss:$16 sps:$4 sm:$0xff]  }
0x1a97   : > { %v23528_v23 = vpack.c.bf16 %v12066_v38, %v12050_v22  ;;  %v19421_v38 = vld [vmem:[%s21350_s25 + $0xe64] ss:$16 sps:$4 sm:$0xff]  }
0x1a98   : > { %15354 = vmatpush2.bf16.msra.mxu0 %v19368_v27  ;;  %v8544_v27 = vrot.slane %v20082_v3, %v8511_v9  ;;  %v19419_v3 = vld [vmem:[%s21350_s25 + $0xe60] ss:$16 sps:$4 sm:$0xff]  }
0x1a99   : > { %15397 = vmatpush2.bf16.msra.mxu1 %v19371_v16  ;;  %15355 = vmatprep.subr.bf16.mxu0 %v19376_v24 }
0x1a9a   : > { %15398 = vmatprep.subr.bf16.mxu1 %v19379_v50  ;;  %v19404_v50 = vld [vmem:[%s21350_s25 + $0xca0] ss:$16 sps:$4 sm:$0xff]  }
0x1a9c   : > { %15356 = vmatpush2.bf16.msra.mxu0 %v19374_v39 }
0x1a9d   : > { %15399 = vmatpush2.bf16.msra.mxu1 %v19377_v2  ;;  %15357 = vmatprep.subr.bf16.mxu0 %v19382_v0  ;;  %v19407_v2 = vld [vmem:[%s21350_s25 + $0xea0] ss:$16 sps:$4 sm:$0xff]   ;;  %v19412_v0 = vld [vmem:[%s21350_s25 + $0xc84] ss:$16 sps:$4 sm:$0xff]  }
0x1a9e   : > { %15400 = vmatprep.subr.bf16.mxu1 %v19385_v1 }
0x1aa0   : > { %15358 = vmatpush2.bf16.msra.mxu0 %v19380_v18 }
0x1aa1   : > { %15401 = vmatpush2.bf16.msra.mxu1 %v19383_v35  ;;  %15359 = vmatprep.subr.bf16.mxu0 %v19388_v30 }
0x1aa2   : > { %15402 = vmatprep.subr.bf16.mxu1 %v19391_v37 }
0x1aa4   : > { %15360 = vmatpush2.bf16.msra.mxu0 %v19386_v41  ;;  %v19410_v41 = vld [vmem:[%s21350_s25 + $0xc80] ss:$16 sps:$4 sm:$0xff]  }
0x1aa5   : > { %15403 = vmatpush2.bf16.msra.mxu1 %v19389_v34  ;;  %15415 = vmatprep.subr.bf16.mxu0 %v19394_v58  ;;  %v19413_v34 = vld [vmem:[%s21350_s25 + $0xe80] ss:$16 sps:$4 sm:$0xff]   ;;  %v19418_v58 = vld [vmem:[%s21350_s25 + $0xc64] ss:$16 sps:$4 sm:$0xff]  }
0x1aa6   : > { %15458 = vmatprep.subr.bf16.mxu1 %v19397_v25 }
0x1aa7   : > { %v11761_v17 = vpop.f32.mrf.mxu0  ;;  %15362 = vmatmul.mubr.bf16.vlgmr.msra.gmra.mxu0 %v23296_v28 }
0x1aa8   : > { %v11804_v20 = vpop.f32.mrf.mxu1  ;;  %15405 = vmatmul.mubr.bf16.vlgmr.msra.gmra.mxu1 %v23402_v44  ;;  %15416 = vmatpush1.bf16.msra.mxu0 %v19392_v49  ;;  %v11762_v30 = vadd.f32 %v11761_v17, %v8544_v27 }
0x1aa9   : > { %15447 = vmatprep.mubr.bf16.mxu0 %v23528_v23  ;;  %15459 = vmatpush1.bf16.msra.mxu1 %v19395_v8  ;;  %v11763_v19 = vpop.f32.mrf.mxu0  ;;  %v19416_v8 = vld [vmem:[%s21350_s25 + $0xc60] ss:$16 sps:$4 sm:$0xff]  }
0x1aaa   : > { %v11764_v42 = vadd.f32 %v11763_v19, %v8548_v5  ;;  %v11806_v40 = vpop.f32.mrf.mxu1  ;;  %15417 = vmatprep.subr.bf16.mxu0 %v19400_v45  ;;  %15460 = vmatprep.subr.bf16.mxu1 %v19403_v51  ;;  %v23554_v49 = vadd.f32 %v11804_v20, %v11762_v30  ;;  %v19427_v51 = vld [vmem:[%s21350_s25 + $0xe44] ss:$16 sps:$4 sm:$0xff]   ;;  %v19422_v20 = vld [vmem:[%s21350_s25 + $0xc40] ss:$16 sps:$4 sm:$0xff]  }
0x1aab   : > { %v11765_v61 = vpop.f32.mrf.mxu0  ;;  %v19430_v19 = vld [vmem:[%s21350_s25 + $0xc24] ss:$16 sps:$4 sm:$0xff]  }
0x1aac   : > { %v23538_v16 = vadd.f32 %v11806_v40, %v11764_v42  ;;  %v11808_v24 = vpop.f32.mrf.mxu1  ;;  %15418 = vmatpush1.bf16.msra.mxu0 %v19398_v63  ;;  %v11766_v18 = vadd.f32 %v11765_v61, %v8544_v27  ;;  %v17468_v17 = vmul.f32 -1.702, %v23554_v49  ;;  %v19425_v63 = vld [vmem:[%s21350_s25 + $0xe40] ss:$16 sps:$4 sm:$0xff]   ;;  %v19436_v61 = vld [vmem:[%s21350_s25 + $0xc04] ss:$16 sps:$4 sm:$0xff]  }
0x1aad   : > { %15461 = vmatpush1.bf16.msra.mxu1 %v19401_v54  ;;  %v11767_v39 = vpop.f32.mrf.mxu0  ;;  %15419 = vmatprep.subr.bf16.mxu0 %v19406_v7  ;;  %v19433_v7 = vld [vmem:[%s21350_s25 + $0xe24] ss:$16 sps:$4 sm:$0xff]   ;;  %v19428_v40 = vld [vmem:[%s21350_s25 + $0xc20] ss:$16 sps:$4 sm:$0xff]  }
0x1aae   : > { %v17469_v1 = vmul.f32 -1.702, %v23538_v16  ;;  %v11768_v35 = vadd.f32 %v11767_v39, %v8548_v5  ;;  %15462 = vmatprep.subr.bf16.mxu1 %v19409_v12  ;;  %v11810_v9 = vpop.f32.mrf.mxu1  ;;  %v23550_v36 = vadd.f32 %v11808_v24, %v11766_v18  ;;  %v19424_v5 = vld [vmem:[%s21350_s25 + $0xc44] ss:$16 sps:$4 sm:$0xff]   ;;  %v11905_v42 = vmul.f32 1.442695, %v17468_v17 }
0x1aaf   : > { %v19431_v12 = vld [vmem:[%s21350_s25 + $0xe20] ss:$16 sps:$4 sm:$0xff]   ;;  %v19439_v27 = vld [vmem:[%s21350_s25 + $0xe04] ss:$16 sps:$4 sm:$0xff]  }
0x1ab0   : > { %v11907_v37 = vmul.f32 1.442695, %v17469_v1  ;;  %v23545_v59 = vadd.f32 %v11810_v9, %v11768_v35  ;;  %15420 = vmatpush1.bf16.msra.mxu0 %v19404_v50  ;;  %v17484_v45 = vmul.f32 -1.702, %v23550_v36  ;;  %v19434_v39 = vld [vmem:[%s21350_s25 + $0xc00] ss:$16 sps:$4 sm:$0xff]  }
0x1ab1   : > { %15463 = vmatpush1.bf16.msra.mxu1 %v19407_v2  ;;  %15421 = vmatprep.subr.bf16.mxu0 %v19412_v0  ;;  %v19437_v2 = vld [vmem:[%s21350_s25 + $0xe00] ss:$16 sps:$4 sm:$0xff]   ;;  %v19442_v0 = vld [vmem:[%s21350_s25 + $0xde4] ss:$16 sps:$4 sm:$0xff]  }
0x1ab2   : > { %20056 = vpow2.f32 %v11907_v37  ;;  %v17485_v25 = vmul.f32 -1.702, %v23545_v59  ;;  %15464 = vmatprep.subr.bf16.mxu1 %v19415_v6  ;;  %v11937_v54 = vmul.f32 1.442695, %v17484_v45  ;;  %v19445_v1 = vld [vmem:[%s21350_s25 + $0xfe4] ss:$16 sps:$4 sm:$0xff]  }
0x1ab3   : > { %v19440_v6 = vld [vmem:[%s21350_s25 + $0xde0] ss:$16 sps:$4 sm:$0xff]   ;;  %v19448_v30 = vld [vmem:[%s21350_s25 + $0xdc4] ss:$16 sps:$4 sm:$0xff]  }
0x1ab4   : > { %v11939_v22 = vmul.f32 1.442695, %v17485_v25  ;;  %15422 = vmatpush1.bf16.msra.mxu0 %v19410_v41  ;;  %v19443_v9 = vld [vmem:[%s21350_s25 + $0xfe0] ss:$16 sps:$4 sm:$0xff]   ;;  %v19451_v37 = vld [vmem:[%s21350_s25 + $0xfc4] ss:$16 sps:$4 sm:$0xff]  }
0x1ab5   : > { %15465 = vmatpush1.bf16.msra.mxu1 %v19413_v34  ;;  %15423 = vmatprep.subr.bf16.mxu0 %v19418_v58  ;;  %v19446_v41 = vld [vmem:[%s21350_s25 + $0xdc0] ss:$16 sps:$4 sm:$0xff]   ;;  %v19454_v58 = vld [vmem:[%s21350_s25 + $0xda4] ss:$16 sps:$4 sm:$0xff]  }
0x1ab6   : > { %20058 = vpow2.f32 %v11939_v22  ;;  %15466 = vmatprep.subr.bf16.mxu1 %v19421_v38  ;;  %v19449_v34 = vld [vmem:[%s21350_s25 + $0xfc0] ss:$16 sps:$4 sm:$0xff]   ;;  %v19457_v25 = vld [vmem:[%s21350_s25 + $0xfa4] ss:$16 sps:$4 sm:$0xff]  }
0x1ab7   : > { %20060 = vpow2.f32 %v11937_v54  ;;  %v19452_v22 = vld [vmem:[%s21350_s25 + $0xda0] ss:$16 sps:$4 sm:$0xff]   ;;  %v19466_v54 = vld [vmem:[%s21350_s25 + $0xd64] ss:$16 sps:$4 sm:$0xff]  }
0x1ab8   : > { %15424 = vmatpush1.bf16.msra.mxu0 %v19416_v8  ;;  %20062 = vpow2.f32 %v11905_v42 }
0x1ab9   : > { %15467 = vmatpush1.bf16.msra.mxu1 %v19419_v3  ;;  %15425 = vmatprep.subr.bf16.mxu0 %v19424_v5  ;;  %v19455_v3 = vld [vmem:[%s21350_s25 + $0xfa0] ss:$16 sps:$4 sm:$0xff]   ;;  %v19460_v5 = vld [vmem:[%s21350_s25 + $0xd84] ss:$16 sps:$4 sm:$0xff]  }
0x1aba   : > { %15468 = vmatprep.subr.bf16.mxu1 %v19427_v51  ;;  %v19463_v51 = vld [vmem:[%s21350_s25 + $0xf84] ss:$16 sps:$4 sm:$0xff]  }
0x1abc   : > { %15426 = vmatpush1.bf16.msra.mxu0 %v19422_v20  ;;  %v19458_v20 = vld [vmem:[%s21350_s25 + $0xd80] ss:$16 sps:$4 sm:$0xff]  }
0x1abd   : > { %15469 = vmatpush1.bf16.msra.mxu1 %v19425_v63  ;;  %15427 = vmatprep.subr.bf16.mxu0 %v19430_v19  ;;  %v19461_v19 = vld [vmem:[%s21350_s25 + $0xf80] ss:$16 sps:$4 sm:$0xff]  }
0x1abe   : > { %15470 = vmatprep.subr.bf16.mxu1 %v19433_v7  ;;  %v19469_v7 = vld [vmem:[%s21350_s25 + $0xf64] ss:$16 sps:$4 sm:$0xff]  }
0x1abf   : > { %v20057_v24 = vpop.eup %20056 }
0x1ac0   : > { %v11956_v50 = vadd.f32 1.0, %v20057_v24  ;;  %15428 = vmatpush1.bf16.msra.mxu0 %v19428_v40  ;;  %v19472_v24 = vld [vmem:[%s21350_s25 + $0xd44] ss:$16 sps:$4 sm:$0xff]  }
0x1ac1   : > { %15471 = vmatpush1.bf16.msra.mxu1 %v19431_v12  ;;  %15429 = vmatprep.subr.bf16.mxu0 %v19436_v61  ;;  %v19464_v61 = vld [vmem:[%s21350_s25 + $0xd60] ss:$16 sps:$4 sm:$0xff]  }
0x1ac2   : > { %15472 = vmatprep.subr.bf16.mxu1 %v19439_v27  ;;  %20064 = vrcp.f32 %v11956_v50  ;;  %v19467_v27 = vld [vmem:[%s21350_s25 + $0xf60] ss:$16 sps:$4 sm:$0xff]  }
0x1ac3   : > { %v20059_v18 = vpop.eup %20058 }
0x1ac4   : > { %v11972_v35 = vadd.f32 1.0, %v20059_v18  ;;  %15430 = vmatpush1.bf16.msra.mxu0 %v19434_v39  ;;  %v20061_v38 = vpop.eup %20060  ;;  %v19475_v39 = vld [vmem:[%s21350_s25 + $0xf44] ss:$16 sps:$4 sm:$0xff]   ;;  %v19479_v18 = vld [vmem:[%s21350_s25 + $0xf20] ss:$16 sps:$4 sm:$0xff]  }
0x1ac5   : > { %15473 = vmatpush1.bf16.msra.mxu1 %v19437_v2  ;;  %15431 = vmatprep.subr.bf16.mxu0 %v19442_v0  ;;  %v20063_v8 = vpop.eup %20062  ;;  %v11971_v45 = vadd.f32 1.0, %v20061_v38  ;;  %v19478_v2 = vld [vmem:[%s21350_s25 + $0xd24] ss:$16 sps:$4 sm:$0xff]  }
0x1ac6   : > { %20066 = vrcp.f32 %v11972_v35  ;;  %15474 = vmatprep.subr.bf16.mxu1 %v19445_v1  ;;  %v11955_v17 = vadd.f32 1.0, %v20063_v8  ;;  %v19481_v0 = vld [vmem:[%s21350_s25 + $0xf24] ss:$16 sps:$4 sm:$0xff]   ;;  %v19476_v1 = vld [vmem:[%s21350_s25 + $0xd20] ss:$16 sps:$4 sm:$0xff]  }
0x1ac7   : > { %20068 = vrcp.f32 %v11971_v45  ;;  %v19484_v35 = vld [vmem:[%s21350_s25 + $0xd04] ss:$16 sps:$4 sm:$0xff]   ;;  %v19491_v8 = vld [vmem:[%s21350_s25 + $0x2e8] ss:$16 sps:$4 sm:$0xff]  }
0x1ac8   : > { %15432 = vmatpush2.bf16.msra.mxu0 %v19440_v6  ;;  %20070 = vrcp.f32 %v11955_v17  ;;  %v19487_v6 = vld [vmem:[%s21350_s25 + $0xf04] ss:$16 sps:$4 sm:$0xff]   ;;  %v19497_v45 = vld [vmem:[%s21350_s25 + $0x2c8] ss:$16 sps:$4 sm:$0xff]   ;;  %v19505_v17 = vld [vmem:[%s21350_s25 + $0x2ac] ss:$16 sps:$4 sm:$0xff]  }
0x1ac9   : > { %15475 = vmatpush2.bf16.msra.mxu1 %v19443_v9  ;;  %15433 = vmatprep.subr.bf16.mxu0 %v19448_v30  ;;  %v19482_v30 = vld [vmem:[%s21350_s25 + $0xd00] ss:$16 sps:$4 sm:$0xff]  }
0x1aca   : > { %15476 = vmatprep.subr.bf16.mxu1 %v19451_v37 }
0x1acc   : > { %15434 = vmatpush2.bf16.msra.mxu0 %v19446_v41  ;;  %v19485_v41 = vld [vmem:[%s21350_s25 + $0xf00] ss:$16 sps:$4 sm:$0xff]  }
0x1acd   : > { %15477 = vmatpush2.bf16.msra.mxu1 %v19449_v34  ;;  %15435 = vmatprep.subr.bf16.mxu0 %v19454_v58  ;;  %v19490_v34 = vld [vmem:[%s21350_s25 + $0xec] ss:$16 sps:$4 sm:$0xff]  }
0x1ace   : > { %15478 = vmatprep.subr.bf16.mxu1 %v19457_v25  ;;  %v19493_v25 = vld [vmem:[%s21350_s25 + $0x2ec] ss:$16 sps:$4 sm:$0xff]  }
0x1acf   : > { %v20065_v63 = vpop.eup %20064 }
0x1ad0   : > { %15436 = vmatpush2.bf16.msra.mxu0 %v19452_v22  ;;  %v12052_v40 = vmul.f32 %v20065_v63, %v23538_v16  ;;  %v19470_v16 = vld [vmem:[%s21350_s25 + $0xd40] ss:$16 sps:$4 sm:$0xff]   ;;  %v19488_v22 = vld [vmem:[%s21350_s25 + $0xe8] ss:$16 sps:$4 sm:$0xff]  }
0x1ad1   : > { %15479 = vmatpush2.bf16.msra.mxu1 %v19455_v3  ;;  %15437 = vmatprep.subr.bf16.mxu0 %v19460_v5  ;;  %v19496_v5 = vld [vmem:[%s21350_s25 + $0xcc] ss:$16 sps:$4 sm:$0xff]   ;;  %v19503_v63 = vld [vmem:[%s21350_s25 + $0x2a8] ss:$16 sps:$4 sm:$0xff]  }
0x1ad2   : > { %15480 = vmatprep.subr.bf16.mxu1 %v19463_v51  ;;  %v19502_v51 = vld [vmem:[%s21350_s25 + $0xac] ss:$16 sps:$4 sm:$0xff]  }
0x1ad3   : > { %v20067_v42 = vpop.eup %20066 }
0x1ad4   : > { %v12068_v12 = vmul.f32 %v20067_v42, %v23545_v59  ;;  %15438 = vmatpush2.bf16.msra.mxu0 %v19458_v20  ;;  %v19473_v59 = vld [vmem:[%s21350_s25 + $0xf40] ss:$16 sps:$4 sm:$0xff]   ;;  %v20069_v9 = vpop.eup %20068  ;;  %v19500_v20 = vld [vmem:[%s21350_s25 + $0xa8] ss:$16 sps:$4 sm:$0xff]   ;;  %v19517_v42 = vld [vmem:[%s21350_s25 + $0x26c] ss:$16 sps:$4 sm:$0xff]  }
0x1ad5   : > { %15481 = vmatpush2.bf16.msra.mxu1 %v19461_v19  ;;  %15439 = vmatprep.subr.bf16.mxu0 %v19466_v54  ;;  %v20071_v37 = vpop.eup %20070  ;;  %v12067_v58 = vmul.f32 %v20069_v9, %v23550_v36  ;;  %v19499_v36 = vld [vmem:[%s21350_s25 + $0x2cc] ss:$16 sps:$4 sm:$0xff]   ;;  %v19509_v54 = vld [vmem:[%s21350_s25 + $0x288] ss:$16 sps:$4 sm:$0xff]  }
0x1ad6   : > { %15482 = vmatprep.subr.bf16.mxu1 %v19469_v7  ;;  %v23595_v50 = vpack.c.bf16 %v12068_v12, %v12052_v40  ;;  %v12051_v38 = vmul.f32 %v20071_v37, %v23554_v49  ;;  %v19494_v49 = vld [vmem:[%s21350_s25 + $0xc8] ss:$16 sps:$4 sm:$0xff]   ;;  %v19511_v19 = vld [vmem:[%s21350_s25 + $0x28c] ss:$16 sps:$4 sm:$0xff]  }
0x1ad7   : > { %v19514_v7 = vld [vmem:[%s21350_s25 + $0x6c] ss:$16 sps:$4 sm:$0xff]   ;;  %v19512_v40 = vld [vmem:[%s21350_s25 + $0x68] ss:$16 sps:$4 sm:$0xff]  }
0x1ad8   : > { %15440 = vmatpush2.bf16.msra.mxu0 %v19464_v61  ;;  %15490 = vmatprep.mubr.bf16.mxu1 %v23595_v50  ;;  %v23615_v3 = vpack.c.bf16 %v12067_v58, %v12051_v38  ;;  %v19515_v12 = vld [vmem:[%s21350_s25 + $0x268] ss:$16 sps:$4 sm:$0xff]   ;;  %v19520_v61 = vld [vmem:[%s21350_s25 + $0x4c] ss:$16 sps:$4 sm:$0xff]  }
0x1ad9   : > { %15483 = vmatpush2.bf16.msra.mxu1 %v19467_v27  ;;  %15441 = vmatprep.subr.bf16.mxu0 %v19472_v24  ;;  %v19523_v27 = vld [vmem:[%s21350_s25 + $0x24c] ss:$16 sps:$4 sm:$0xff]   ;;  %v19518_v24 = vld [vmem:[%s21350_s25 + $0x48] ss:$16 sps:$4 sm:$0xff]  }
0x1ada   : > { %15484 = vmatprep.subr.bf16.mxu1 %v19475_v39  ;;  %v19521_v39 = vld [vmem:[%s21350_s25 + $0x248] ss:$16 sps:$4 sm:$0xff]   ;;  %v19538_v9 = vld [vmem:[%s21350_s25 + $0x1ec] ss:$16 sps:$4 sm:$0xff]  }
0x1adb   : > { %v19536_v37 = vld [vmem:[%s21350_s25 + $0x1e8] ss:$16 sps:$4 sm:$0xff]   ;;  %v19547_v58 = vld [vmem:[%s21350_s25 + $0x3cc] ss:$16 sps:$4 sm:$0xff]  }
0x1adc   : > { %15442 = vmatpush2.bf16.msra.mxu0 %v19470_v16  ;;  %v19526_v16 = vld [vmem:[%s21350_s25 + $0x2c] ss:$16 sps:$4 sm:$0xff]   ;;  %v19545_v38 = vld [vmem:[%s21350_s25 + $0x3c8] ss:$16 sps:$4 sm:$0xff]  }
0x1add   : > { %15485 = vmatpush2.bf16.msra.mxu1 %v19473_v59  ;;  %15443 = vmatprep.subr.bf16.mxu0 %v19478_v2  ;;  %v19529_v59 = vld [vmem:[%s21350_s25 + $0x22c] ss:$16 sps:$4 sm:$0xff]   ;;  %v19524_v2 = vld [vmem:[%s21350_s25 + $0x28] ss:$16 sps:$4 sm:$0xff]  }
0x1ade   : > { %15486 = vmatprep.subr.bf16.mxu1 %v19481_v0  ;;  %v19527_v0 = vld [vmem:[%s21350_s25 + $0x228] ss:$16 sps:$4 sm:$0xff]  }
0x1ae0   : > { %15444 = vmatpush2.bf16.msra.mxu0 %v19476_v1  ;;  %v19532_v1 = vld [vmem:[%s21350_s25 + $0xc] ss:$16 sps:$4 sm:$0xff]  }
0x1ae1   : > { %15487 = vmatpush2.bf16.msra.mxu1 %v19479_v18  ;;  %15445 = vmatprep.subr.bf16.mxu0 %v19484_v35  ;;  %v19535_v18 = vld [vmem:[%s21350_s25 + $0x20c] ss:$16 sps:$4 sm:$0xff]   ;;  %v19530_v35 = vld [vmem:[%s21350_s25 + $0x8] ss:$16 sps:$4 sm:$0xff]  }
0x1ae2   : > { %15488 = vmatprep.subr.bf16.mxu1 %v19487_v6  ;;  %v19533_v6 = vld [vmem:[%s21350_s25 + $0x208] ss:$16 sps:$4 sm:$0xff]  }
0x1ae4   : > { %15446 = vmatpush2.bf16.msra.mxu0 %v19482_v30  ;;  %v19541_v30 = vld [vmem:[%s21350_s25 + $0x3ec] ss:$16 sps:$4 sm:$0xff]  }
0x1ae5   : > { %15489 = vmatpush2.bf16.msra.mxu1 %v19485_v41  ;;  %15501 = vmatprep.subr.bf16.mxu0 %v19490_v34  ;;  %v19539_v41 = vld [vmem:[%s21350_s25 + $0x3e8] ss:$16 sps:$4 sm:$0xff]   ;;  %v19544_v34 = vld [vmem:[%s21350_s25 + $0x1cc] ss:$16 sps:$4 sm:$0xff]  }
0x1ae6   : > { %15544 = vmatprep.subr.bf16.mxu1 %v19493_v25  ;;  %v19542_v25 = vld [vmem:[%s21350_s25 + $0x1c8] ss:$16 sps:$4 sm:$0xff]  }
0x1ae7   : > { %15448 = vmatmul.mubr.bf16.vlgmr.msra.gmra.mxu0 %v23500_v46 }
0x1ae8   : > { %15491 = vmatmul.mubr.bf16.vlgmr.msra.gmra.mxu1 %v23615_v3  ;;  %15502 = vmatpush1.bf16.msra.mxu0 %v19488_v22  ;;  %v19550_v22 = vld [vmem:[%s21350_s25 + $0x1ac] ss:$16 sps:$4 sm:$0xff]  }
0x1ae9   : > { %15533 = vmatprep.mubr.bf16.mxu0 %v23207_v48  ;;  %15545 = vmatpush1.bf16.msra.mxu1 %v19491_v8  ;;  %v19508_v48 = vld [vmem:[%s21350_s25 + $0x8c] ss:$16 sps:$4 sm:$0xff]  }
0x1aea   : > { %15576 = vmatprep.mubr.bf16.mxu1 %v23211_v56  ;;  %15503 = vmatprep.subr.bf16.mxu0 %v19496_v5  ;;  %v19506_v56 = vld [vmem:[%s21350_s25 + $0x88] ss:$16 sps:$4 sm:$0xff]   ;;  %v19553_v8 = vld [vmem:[%s21350_s25 + $0x3ac] ss:$16 sps:$4 sm:$0xff]  }
0x1aeb   : > { %15546 = vmatprep.subr.bf16.mxu1 %v19499_v36  ;;  %v19548_v5 = vld [vmem:[%s21350_s25 + $0x1a8] ss:$16 sps:$4 sm:$0xff]  }
0x1aec   : > { %15504 = vmatpush1.bf16.msra.mxu0 %v19494_v49  ;;  %v19551_v36 = vld [vmem:[%s21350_s25 + $0x3a8] ss:$16 sps:$4 sm:$0xff]   ;;  %v19556_v49 = vld [vmem:[%s21350_s25 + $0x18c] ss:$16 sps:$4 sm:$0xff]  }
0x1aed   : > { %15547 = vmatpush1.bf16.msra.mxu1 %v19497_v45  ;;  %15505 = vmatprep.subr.bf16.mxu0 %v19502_v51  ;;  %v19559_v45 = vld [vmem:[%s21350_s25 + $0x38c] ss:$16 sps:$4 sm:$0xff]   ;;  %v19554_v51 = vld [vmem:[%s21350_s25 + $0x188] ss:$16 sps:$4 sm:$0xff]  }
0x1aee   : > { %15548 = vmatprep.subr.bf16.mxu1 %v19505_v17  ;;  %v19557_v17 = vld [vmem:[%s21350_s25 + $0x388] ss:$16 sps:$4 sm:$0xff]  }
0x1af0   : > { %15506 = vmatpush1.bf16.msra.mxu0 %v19500_v20  ;;  %v19562_v20 = vld [vmem:[%s21350_s25 + $0x16c] ss:$16 sps:$4 sm:$0xff]  }
0x1af1   : > { %15549 = vmatpush1.bf16.msra.mxu1 %v19503_v63  ;;  %15507 = vmatprep.subr.bf16.mxu0 %v19508_v48  ;;  %v19565_v63 = vld [vmem:[%s21350_s25 + $0x36c] ss:$16 sps:$4 sm:$0xff]   ;;  %v19560_v48 = vld [vmem:[%s21350_s25 + $0x168] ss:$16 sps:$4 sm:$0xff]  }
0x1af2   : > { %15550 = vmatprep.subr.bf16.mxu1 %v19511_v19  ;;  %v19563_v19 = vld [vmem:[%s21350_s25 + $0x368] ss:$16 sps:$4 sm:$0xff]  }
0x1af4   : > { %15508 = vmatpush1.bf16.msra.mxu0 %v19506_v56  ;;  %v19568_v56 = vld [vmem:[%s21350_s25 + $0x14c] ss:$16 sps:$4 sm:$0xff]  }
0x1af5   : > { %15551 = vmatpush1.bf16.msra.mxu1 %v19509_v54  ;;  %15509 = vmatprep.subr.bf16.mxu0 %v19514_v7  ;;  %v19571_v54 = vld [vmem:[%s21350_s25 + $0x34c] ss:$16 sps:$4 sm:$0xff]   ;;  %v19566_v7 = vld [vmem:[%s21350_s25 + $0x148] ss:$16 sps:$4 sm:$0xff]  }
0x1af6   : > { %15552 = vmatprep.subr.bf16.mxu1 %v19517_v42  ;;  %v19569_v42 = vld [vmem:[%s21350_s25 + $0x348] ss:$16 sps:$4 sm:$0xff]  }
0x1af8   : > { %15510 = vmatpush1.bf16.msra.mxu0 %v19512_v40  ;;  %v19574_v40 = vld [vmem:[%s21350_s25 + $0x12c] ss:$16 sps:$4 sm:$0xff]  }
0x1af9   : > { %15553 = vmatpush1.bf16.msra.mxu1 %v19515_v12  ;;  %15511 = vmatprep.subr.bf16.mxu0 %v19520_v61  ;;  %v19577_v12 = vld [vmem:[%s21350_s25 + $0x32c] ss:$16 sps:$4 sm:$0xff]   ;;  %v19572_v61 = vld [vmem:[%s21350_s25 + $0x128] ss:$16 sps:$4 sm:$0xff]  }
0x1afa   : > { %15554 = vmatprep.subr.bf16.mxu1 %v19523_v27  ;;  %v19575_v27 = vld [vmem:[%s21350_s25 + $0x328] ss:$16 sps:$4 sm:$0xff]  }
0x1afc   : > { %15512 = vmatpush1.bf16.msra.mxu0 %v19518_v24  ;;  %v19580_v24 = vld [vmem:[%s21350_s25 + $0x10c] ss:$16 sps:$4 sm:$0xff]  }
0x1afd   : > { %15555 = vmatpush1.bf16.msra.mxu1 %v19521_v39  ;;  %15513 = vmatprep.subr.bf16.mxu0 %v19526_v16  ;;  %v19583_v39 = vld [vmem:[%s21350_s25 + $0x30c] ss:$16 sps:$4 sm:$0xff]   ;;  %v19578_v16 = vld [vmem:[%s21350_s25 + $0x108] ss:$16 sps:$4 sm:$0xff]  }
0x1afe   : > { %15556 = vmatprep.subr.bf16.mxu1 %v19529_v59  ;;  %v19581_v59 = vld [vmem:[%s21350_s25 + $0x308] ss:$16 sps:$4 sm:$0xff]  }
0x1b00   : > { %15514 = vmatpush1.bf16.msra.mxu0 %v19524_v2  ;;  %v19586_v2 = vld [vmem:[%s21350_s25 + $0x4ec] ss:$16 sps:$4 sm:$0xff]  }
0x1b01   : > { %15557 = vmatpush1.bf16.msra.mxu1 %v19527_v0  ;;  %15515 = vmatprep.subr.bf16.mxu0 %v19532_v1  ;;  %v19589_v0 = vld [vmem:[%s21350_s25 + $0x6ec] ss:$16 sps:$4 sm:$0xff]   ;;  %v19584_v1 = vld [vmem:[%s21350_s25 + $0x4e8] ss:$16 sps:$4 sm:$0xff]  }
0x1b02   : > { %15558 = vmatprep.subr.bf16.mxu1 %v19535_v18  ;;  %v19587_v18 = vld [vmem:[%s21350_s25 + $0x6e8] ss:$16 sps:$4 sm:$0xff]  }
0x1b04   : > { %15516 = vmatpush1.bf16.msra.mxu0 %v19530_v35  ;;  %v19592_v35 = vld [vmem:[%s21350_s25 + $0x4cc] ss:$16 sps:$4 sm:$0xff]  }
0x1b05   : > { %15559 = vmatpush1.bf16.msra.mxu1 %v19533_v6  ;;  %15517 = vmatprep.subr.bf16.mxu0 %v19538_v9  ;;  %v19595_v6 = vld [vmem:[%s21350_s25 + $0x6cc] ss:$16 sps:$4 sm:$0xff]   ;;  %v19590_v9 = vld [vmem:[%s21350_s25 + $0x4c8] ss:$16 sps:$4 sm:$0xff]  }
0x1b06   : > { %15560 = vmatprep.subr.bf16.mxu1 %v19541_v30  ;;  %v19593_v30 = vld [vmem:[%s21350_s25 + $0x6c8] ss:$16 sps:$4 sm:$0xff]  }
0x1b08   : > { %15518 = vmatpush2.bf16.msra.mxu0 %v19536_v37  ;;  %v19598_v37 = vld [vmem:[%s21350_s25 + $0x4ac] ss:$16 sps:$4 sm:$0xff]  }
0x1b09   : > { %15561 = vmatpush2.bf16.msra.mxu1 %v19539_v41  ;;  %15519 = vmatprep.subr.bf16.mxu0 %v19544_v34  ;;  %v19599_v41 = vld [vmem:[%s21350_s25 + $0x6a8] ss:$16 sps:$4 sm:$0xff]   ;;  %v19607_v34 = vld [vmem:[%s21350_s25 + $0x68c] ss:$16 sps:$4 sm:$0xff]  }
0x1b0a   : > { %15562 = vmatprep.subr.bf16.mxu1 %v19547_v58  ;;  %v19605_v58 = vld [vmem:[%s21350_s25 + $0x688] ss:$16 sps:$4 sm:$0xff]  }
0x1b0c   : > { %15520 = vmatpush2.bf16.msra.mxu0 %v19542_v25  ;;  %v19610_v25 = vld [vmem:[%s21350_s25 + $0x46c] ss:$16 sps:$4 sm:$0xff]  }
0x1b0d   : > { %15563 = vmatpush2.bf16.msra.mxu1 %v19545_v38  ;;  %15521 = vmatprep.subr.bf16.mxu0 %v19550_v22  ;;  %v19613_v38 = vld [vmem:[%s21350_s25 + $0x66c] ss:$16 sps:$4 sm:$0xff]   ;;  %v19608_v22 = vld [vmem:[%s21350_s25 + $0x468] ss:$16 sps:$4 sm:$0xff]  }
0x1b0e   : > { %15564 = vmatprep.subr.bf16.mxu1 %v19553_v8  ;;  %v19611_v8 = vld [vmem:[%s21350_s25 + $0x668] ss:$16 sps:$4 sm:$0xff]  }
0x1b10   : > { %15522 = vmatpush2.bf16.msra.mxu0 %v19548_v5  ;;  %v19616_v5 = vld [vmem:[%s21350_s25 + $0x44c] ss:$16 sps:$4 sm:$0xff]  }
0x1b11   : > { %15565 = vmatpush2.bf16.msra.mxu1 %v19551_v36  ;;  %15523 = vmatprep.subr.bf16.mxu0 %v19556_v49  ;;  %v19619_v36 = vld [vmem:[%s21350_s25 + $0x64c] ss:$16 sps:$4 sm:$0xff]   ;;  %v19614_v49 = vld [vmem:[%s21350_s25 + $0x448] ss:$16 sps:$4 sm:$0xff]  }
0x1b12   : > { %15566 = vmatprep.subr.bf16.mxu1 %v19559_v45  ;;  %v19617_v45 = vld [vmem:[%s21350_s25 + $0x648] ss:$16 sps:$4 sm:$0xff]  }
0x1b14   : > { %15524 = vmatpush2.bf16.msra.mxu0 %v19554_v51  ;;  %v19622_v51 = vld [vmem:[%s21350_s25 + $0x42c] ss:$16 sps:$4 sm:$0xff]  }
0x1b15   : > { %15567 = vmatpush2.bf16.msra.mxu1 %v19557_v17  ;;  %15525 = vmatprep.subr.bf16.mxu0 %v19562_v20  ;;  %v19625_v17 = vld [vmem:[%s21350_s25 + $0x62c] ss:$16 sps:$4 sm:$0xff]   ;;  %v19620_v20 = vld [vmem:[%s21350_s25 + $0x428] ss:$16 sps:$4 sm:$0xff]  }
0x1b16   : > { %15568 = vmatprep.subr.bf16.mxu1 %v19565_v63  ;;  %v19623_v63 = vld [vmem:[%s21350_s25 + $0x628] ss:$16 sps:$4 sm:$0xff]  }
0x1b18   : > { %15526 = vmatpush2.bf16.msra.mxu0 %v19560_v48  ;;  %v19628_v48 = vld [vmem:[%s21350_s25 + $0x40c] ss:$16 sps:$4 sm:$0xff]  }
0x1b19   : > { %15569 = vmatpush2.bf16.msra.mxu1 %v19563_v19  ;;  %15527 = vmatprep.subr.bf16.mxu0 %v19568_v56  ;;  %v19631_v19 = vld [vmem:[%s21350_s25 + $0x60c] ss:$16 sps:$4 sm:$0xff]   ;;  %v19626_v56 = vld [vmem:[%s21350_s25 + $0x408] ss:$16 sps:$4 sm:$0xff]  }
0x1b1a   : > { %15570 = vmatprep.subr.bf16.mxu1 %v19571_v54  ;;  %v19629_v54 = vld [vmem:[%s21350_s25 + $0x608] ss:$16 sps:$4 sm:$0xff]  }
0x1b1c   : > { %15528 = vmatpush2.bf16.msra.mxu0 %v19566_v7  ;;  %v19634_v7 = vld [vmem:[%s21350_s25 + $0x5ec] ss:$16 sps:$4 sm:$0xff]  }
0x1b1d   : > { %15571 = vmatpush2.bf16.msra.mxu1 %v19569_v42  ;;  %15529 = vmatprep.subr.bf16.mxu0 %v19574_v40  ;;  %v19637_v42 = vld [vmem:[%s21350_s25 + $0x7ec] ss:$16 sps:$4 sm:$0xff]   ;;  %v19632_v40 = vld [vmem:[%s21350_s25 + $0x5e8] ss:$16 sps:$4 sm:$0xff]  }
0x1b1e   : > { %15572 = vmatprep.subr.bf16.mxu1 %v19577_v12  ;;  %v19635_v12 = vld [vmem:[%s21350_s25 + $0x7e8] ss:$16 sps:$4 sm:$0xff]  }
0x1b20   : > { %15530 = vmatpush2.bf16.msra.mxu0 %v19572_v61  ;;  %v19640_v61 = vld [vmem:[%s21350_s25 + $0x5cc] ss:$16 sps:$4 sm:$0xff]  }
0x1b21   : > { %15573 = vmatpush2.bf16.msra.mxu1 %v19575_v27  ;;  %15531 = vmatprep.subr.bf16.mxu0 %v19580_v24  ;;  %v19643_v27 = vld [vmem:[%s21350_s25 + $0x7cc] ss:$16 sps:$4 sm:$0xff]   ;;  %v19638_v24 = vld [vmem:[%s21350_s25 + $0x5c8] ss:$16 sps:$4 sm:$0xff]  }
0x1b22   : > { %15574 = vmatprep.subr.bf16.mxu1 %v19583_v39  ;;  %v19641_v39 = vld [vmem:[%s21350_s25 + $0x7c8] ss:$16 sps:$4 sm:$0xff]  }
0x1b24   : > { %15532 = vmatpush2.bf16.msra.mxu0 %v19578_v16  ;;  %v19646_v16 = vld [vmem:[%s21350_s25 + $0x5ac] ss:$16 sps:$4 sm:$0xff]  }
0x1b25   : > { %15575 = vmatpush2.bf16.msra.mxu1 %v19581_v59  ;;  %15587 = vmatprep.subr.bf16.mxu0 %v19586_v2  ;;  %v19649_v59 = vld [vmem:[%s21350_s25 + $0x7ac] ss:$16 sps:$4 sm:$0xff]   ;;  %v19644_v2 = vld [vmem:[%s21350_s25 + $0x5a8] ss:$16 sps:$4 sm:$0xff]  }
0x1b26   : > { %15630 = vmatprep.subr.bf16.mxu1 %v19589_v0  ;;  %v19647_v0 = vld [vmem:[%s21350_s25 + $0x7a8] ss:$16 sps:$4 sm:$0xff]  }
0x1b27   : > { %15534 = vmatmul.mubr.bf16.vlgmr.msra.gmra.mxu0 %v22886_v43  ;;  %v19601_v43 = vld [vmem:[%s21350_s25 + $0x6ac] ss:$16 sps:$4 sm:$0xff]  }
0x1b28   : > { %15577 = vmatmul.mubr.bf16.vlgmr.msra.gmra.mxu1 %v22974_v33  ;;  %15588 = vmatpush1.bf16.msra.mxu0 %v19584_v1  ;;  %v19596_v33 = vld [vmem:[%s21350_s25 + $0x4a8] ss:$16 sps:$4 sm:$0xff]   ;;  %v19652_v1 = vld [vmem:[%s21350_s25 + $0x58c] ss:$16 sps:$4 sm:$0xff]  }
0x1b29   : > { %15619 = vmatprep.mubr.bf16.mxu0 %v23324_v57  ;;  %15631 = vmatpush1.bf16.msra.mxu1 %v19587_v18  ;;  %v19604_v57 = vld [vmem:[%s21350_s25 + $0x48c] ss:$16 sps:$4 sm:$0xff]  }
0x1b2a   : > { %15662 = vmatprep.mubr.bf16.mxu1 %v23328_v52  ;;  %15589 = vmatprep.subr.bf16.mxu0 %v19592_v35  ;;  %v19602_v52 = vld [vmem:[%s21350_s25 + $0x488] ss:$16 sps:$4 sm:$0xff]   ;;  %v19655_v18 = vld [vmem:[%s21350_s25 + $0x78c] ss:$16 sps:$4 sm:$0xff]  }
0x1b2b   : > { %15632 = vmatprep.subr.bf16.mxu1 %v19595_v6  ;;  %v19650_v35 = vld [vmem:[%s21350_s25 + $0x588] ss:$16 sps:$4 sm:$0xff]  }
0x1b2c   : > { %15590 = vmatpush1.bf16.msra.mxu0 %v19590_v9  ;;  %v19653_v6 = vld [vmem:[%s21350_s25 + $0x788] ss:$16 sps:$4 sm:$0xff]   ;;  %v19658_v9 = vld [vmem:[%s21350_s25 + $0x56c] ss:$16 sps:$4 sm:$0xff]  }
0x1b2d   : > { %15633 = vmatpush1.bf16.msra.mxu1 %v19593_v30  ;;  %15591 = vmatprep.subr.bf16.mxu0 %v19598_v37  ;;  %v19661_v30 = vld [vmem:[%s21350_s25 + $0x76c] ss:$16 sps:$4 sm:$0xff]   ;;  %v19656_v37 = vld [vmem:[%s21350_s25 + $0x568] ss:$16 sps:$4 sm:$0xff]  }
0x1b2e   : > { %15634 = vmatprep.subr.bf16.mxu1 %v19601_v43  ;;  %v19659_v43 = vld [vmem:[%s21350_s25 + $0x768] ss:$16 sps:$4 sm:$0xff]  }
0x1b30   : > { %15592 = vmatpush1.bf16.msra.mxu0 %v19596_v33  ;;  %v19664_v33 = vld [vmem:[%s21350_s25 + $0x54c] ss:$16 sps:$4 sm:$0xff]  }
0x1b31   : > { %15635 = vmatpush1.bf16.msra.mxu1 %v19599_v41  ;;  %15593 = vmatprep.subr.bf16.mxu0 %v19604_v57  ;;  %v19667_v41 = vld [vmem:[%s21350_s25 + $0x74c] ss:$16 sps:$4 sm:$0xff]   ;;  %v19662_v57 = vld [vmem:[%s21350_s25 + $0x548] ss:$16 sps:$4 sm:$0xff]  }
0x1b32   : > { %15636 = vmatprep.subr.bf16.mxu1 %v19607_v34  ;;  %v19665_v34 = vld [vmem:[%s21350_s25 + $0x748] ss:$16 sps:$4 sm:$0xff]  }
0x1b34   : > { %15594 = vmatpush1.bf16.msra.mxu0 %v19602_v52  ;;  %v19670_v52 = vld [vmem:[%s21350_s25 + $0x52c] ss:$16 sps:$4 sm:$0xff]  }
0x1b35   : > { %15637 = vmatpush1.bf16.msra.mxu1 %v19605_v58  ;;  %15595 = vmatprep.subr.bf16.mxu0 %v19610_v25  ;;  %v19673_v58 = vld [vmem:[%s21350_s25 + $0x72c] ss:$16 sps:$4 sm:$0xff]   ;;  %v19668_v25 = vld [vmem:[%s21350_s25 + $0x528] ss:$16 sps:$4 sm:$0xff]  }
0x1b36   : > { %15638 = vmatprep.subr.bf16.mxu1 %v19613_v38  ;;  %v19671_v38 = vld [vmem:[%s21350_s25 + $0x728] ss:$16 sps:$4 sm:$0xff]  }
0x1b38   : > { %15596 = vmatpush1.bf16.msra.mxu0 %v19608_v22  ;;  %v19676_v22 = vld [vmem:[%s21350_s25 + $0x50c] ss:$16 sps:$4 sm:$0xff]  }
0x1b39   : > { %15639 = vmatpush1.bf16.msra.mxu1 %v19611_v8  ;;  %15597 = vmatprep.subr.bf16.mxu0 %v19616_v5  ;;  %v19679_v8 = vld [vmem:[%s21350_s25 + $0x70c] ss:$16 sps:$4 sm:$0xff]   ;;  %v19674_v5 = vld [vmem:[%s21350_s25 + $0x508] ss:$16 sps:$4 sm:$0xff]  }
0x1b3a   : > { %15640 = vmatprep.subr.bf16.mxu1 %v19619_v36  ;;  %v19677_v36 = vld [vmem:[%s21350_s25 + $0x708] ss:$16 sps:$4 sm:$0xff]  }
0x1b3c   : > { %15598 = vmatpush1.bf16.msra.mxu0 %v19614_v49  ;;  %v19682_v49 = vld [vmem:[%s21350_s25 + $0x8ec] ss:$16 sps:$4 sm:$0xff]  }
0x1b3d   : > { %15641 = vmatpush1.bf16.msra.mxu1 %v19617_v45  ;;  %15599 = vmatprep.subr.bf16.mxu0 %v19622_v51  ;;  %v19685_v45 = vld [vmem:[%s21350_s25 + $0xaec] ss:$16 sps:$4 sm:$0xff]   ;;  %v19680_v51 = vld [vmem:[%s21350_s25 + $0x8e8] ss:$16 sps:$4 sm:$0xff]  }
0x1b3e   : > { %15642 = vmatprep.subr.bf16.mxu1 %v19625_v17  ;;  %v19683_v17 = vld [vmem:[%s21350_s25 + $0xae8] ss:$16 sps:$4 sm:$0xff]  }
0x1b40   : > { %15600 = vmatpush1.bf16.msra.mxu0 %v19620_v20  ;;  %v19688_v20 = vld [vmem:[%s21350_s25 + $0x8cc] ss:$16 sps:$4 sm:$0xff]  }
0x1b41   : > { %15643 = vmatpush1.bf16.msra.mxu1 %v19623_v63  ;;  %15601 = vmatprep.subr.bf16.mxu0 %v19628_v48  ;;  %v19691_v63 = vld [vmem:[%s21350_s25 + $0xacc] ss:$16 sps:$4 sm:$0xff]   ;;  %v19686_v48 = vld [vmem:[%s21350_s25 + $0x8c8] ss:$16 sps:$4 sm:$0xff]  }
0x1b42   : > { %15644 = vmatprep.subr.bf16.mxu1 %v19631_v19  ;;  %v19689_v19 = vld [vmem:[%s21350_s25 + $0xac8] ss:$16 sps:$4 sm:$0xff]  }
0x1b44   : > { %15602 = vmatpush1.bf16.msra.mxu0 %v19626_v56  ;;  %v19694_v56 = vld [vmem:[%s21350_s25 + $0x8ac] ss:$16 sps:$4 sm:$0xff]  }
0x1b45   : > { %15645 = vmatpush1.bf16.msra.mxu1 %v19629_v54  ;;  %15603 = vmatprep.subr.bf16.mxu0 %v19634_v7  ;;  %v19695_v54 = vld [vmem:[%s21350_s25 + $0xaa8] ss:$16 sps:$4 sm:$0xff]   ;;  %v19703_v7 = vld [vmem:[%s21350_s25 + $0xa8c] ss:$16 sps:$4 sm:$0xff]  }
0x1b46   : > { %15646 = vmatprep.subr.bf16.mxu1 %v19637_v42  ;;  %v19701_v42 = vld [vmem:[%s21350_s25 + $0xa88] ss:$16 sps:$4 sm:$0xff]  }
0x1b48   : > { %15604 = vmatpush2.bf16.msra.mxu0 %v19632_v40  ;;  %v19706_v40 = vld [vmem:[%s21350_s25 + $0x86c] ss:$16 sps:$4 sm:$0xff]  }
0x1b49   : > { %15647 = vmatpush2.bf16.msra.mxu1 %v19635_v12  ;;  %15605 = vmatprep.subr.bf16.mxu0 %v19640_v61  ;;  %v19709_v12 = vld [vmem:[%s21350_s25 + $0xa6c] ss:$16 sps:$4 sm:$0xff]   ;;  %v19704_v61 = vld [vmem:[%s21350_s25 + $0x868] ss:$16 sps:$4 sm:$0xff]  }
0x1b4a   : > { %15648 = vmatprep.subr.bf16.mxu1 %v19643_v27  ;;  %v19707_v27 = vld [vmem:[%s21350_s25 + $0xa68] ss:$16 sps:$4 sm:$0xff]  }
0x1b4c   : > { %15606 = vmatpush2.bf16.msra.mxu0 %v19638_v24  ;;  %v19712_v24 = vld [vmem:[%s21350_s25 + $0x84c] ss:$16 sps:$4 sm:$0xff]  }
0x1b4d   : > { %15649 = vmatpush2.bf16.msra.mxu1 %v19641_v39  ;;  %15607 = vmatprep.subr.bf16.mxu0 %v19646_v16  ;;  %v19715_v39 = vld [vmem:[%s21350_s25 + $0xa4c] ss:$16 sps:$4 sm:$0xff]   ;;  %v19710_v16 = vld [vmem:[%s21350_s25 + $0x848] ss:$16 sps:$4 sm:$0xff]  }
0x1b4e   : > { %15650 = vmatprep.subr.bf16.mxu1 %v19649_v59  ;;  %v19713_v59 = vld [vmem:[%s21350_s25 + $0xa48] ss:$16 sps:$4 sm:$0xff]  }
0x1b50   : > { %15608 = vmatpush2.bf16.msra.mxu0 %v19644_v2  ;;  %v19718_v2 = vld [vmem:[%s21350_s25 + $0x82c] ss:$16 sps:$4 sm:$0xff]  }
0x1b51   : > { %15651 = vmatpush2.bf16.msra.mxu1 %v19647_v0  ;;  %15609 = vmatprep.subr.bf16.mxu0 %v19652_v1  ;;  %v19721_v0 = vld [vmem:[%s21350_s25 + $0xa2c] ss:$16 sps:$4 sm:$0xff]   ;;  %v19716_v1 = vld [vmem:[%s21350_s25 + $0x828] ss:$16 sps:$4 sm:$0xff]  }
0x1b52   : > { %15652 = vmatprep.subr.bf16.mxu1 %v19655_v18  ;;  %v23780_v18 = vpop.f32.mrf.mxu0 }
0x1b54   : > { %15610 = vmatpush2.bf16.msra.mxu0 %v19650_v35  ;;  %v19719_v35 = vld [vmem:[%s21350_s25 + $0xa28] ss:$16 sps:$4 sm:$0xff]  }
0x1b55   : > { %15653 = vmatpush2.bf16.msra.mxu1 %v19653_v6  ;;  %15611 = vmatprep.subr.bf16.mxu0 %v19658_v9  ;;  %v19724_v6 = vld [vmem:[%s21350_s25 + $0x80c] ss:$16 sps:$4 sm:$0xff]   ;;  %v23784_v9 = vpop.f32.mrf.mxu1 }
0x1b56   : > { %15654 = vmatprep.subr.bf16.mxu1 %v19661_v30  ;;  %v19727_v30 = vld [vmem:[%s21350_s25 + $0xa0c] ss:$16 sps:$4 sm:$0xff]  }
0x1b58   : > { %15612 = vmatpush2.bf16.msra.mxu0 %v19656_v37  ;;  %v19722_v37 = vld [vmem:[%s21350_s25 + $0x808] ss:$16 sps:$4 sm:$0xff]  }
0x1b59   : > { %15655 = vmatpush2.bf16.msra.mxu1 %v19659_v43  ;;  %15613 = vmatprep.subr.bf16.mxu0 %v19664_v33  ;;  %v23788_v43 = vpop.f32.mrf.mxu0  ;;  %v19725_v33 = vld [vmem:[%s21350_s25 + $0xa08] ss:$16 sps:$4 sm:$0xff]  }
0x1b5a   : > { %15656 = vmatprep.subr.bf16.mxu1 %v19667_v41  ;;  %v19730_v41 = vld [vmem:[%s21350_s25 + $0x9ec] ss:$16 sps:$4 sm:$0xff]  }
0x1b5c   : > { %15614 = vmatpush2.bf16.msra.mxu0 %v19662_v57  ;;  %v23792_v57 = vpop.f32.mrf.mxu1 }
0x1b5d   : > { %15657 = vmatpush2.bf16.msra.mxu1 %v19665_v34  ;;  %15615 = vmatprep.subr.bf16.mxu0 %v19670_v52  ;;  %v19733_v34 = vld [vmem:[%s21350_s25 + $0xbec] ss:$16 sps:$4 sm:$0xff]   ;;  %v19728_v52 = vld [vmem:[%s21350_s25 + $0x9e8] ss:$16 sps:$4 sm:$0xff]  }
0x1b5e   : > { %15658 = vmatprep.subr.bf16.mxu1 %v19673_v58  ;;  %v23796_v58 = vpop.f32.mrf.mxu0 }
0x1b60   : > { %15616 = vmatpush2.bf16.msra.mxu0 %v19668_v25  ;;  %v19731_v25 = vld [vmem:[%s21350_s25 + $0xbe8] ss:$16 sps:$4 sm:$0xff]  }
0x1b61   : > { %15659 = vmatpush2.bf16.msra.mxu1 %v19671_v38  ;;  %15617 = vmatprep.subr.bf16.mxu0 %v19676_v22  ;;  %v19736_v38 = vld [vmem:[%s21350_s25 + $0x9cc] ss:$16 sps:$4 sm:$0xff]   ;;  %v23800_v22 = vpop.f32.mrf.mxu1 }
0x1b62   : > { %15660 = vmatprep.subr.bf16.mxu1 %v19679_v8  ;;  %v19739_v8 = vld [vmem:[%s21350_s25 + $0xbcc] ss:$16 sps:$4 sm:$0xff]  }
0x1b64   : > { %15618 = vmatpush2.bf16.msra.mxu0 %v19674_v5  ;;  %v19734_v5 = vld [vmem:[%s21350_s25 + $0x9c8] ss:$16 sps:$4 sm:$0xff]  }
0x1b65   : > { %15661 = vmatpush2.bf16.msra.mxu1 %v19677_v36  ;;  %15673 = vmatprep.subr.bf16.mxu0 %v19682_v49  ;;  %v23804_v36 = vpop.f32.mrf.mxu0  ;;  %v19737_v49 = vld [vmem:[%s21350_s25 + $0xbc8] ss:$16 sps:$4 sm:$0xff]  }
0x1b66   : > { %15716 = vmatprep.subr.bf16.mxu1 %v19685_v45  ;;  %v19742_v45 = vld [vmem:[%s21350_s25 + $0x9ac] ss:$16 sps:$4 sm:$0xff]  }
0x1b67   : > { %15620 = vmatmul.mubr.bf16.vlgmr.msra.gmra.mxu0 %v23064_v32  ;;  %v19697_v32 = vld [vmem:[%s21350_s25 + $0xaac] ss:$16 sps:$4 sm:$0xff]  }
0x1b68   : > { %15663 = vmatmul.mubr.bf16.vlgmr.msra.gmra.mxu1 %v23181_v47  ;;  %15674 = vmatpush1.bf16.msra.mxu0 %v19680_v51  ;;  %v19692_v47 = vld [vmem:[%s21350_s25 + $0x8a8] ss:$16 sps:$4 sm:$0xff]   ;;  %v15240_v51 = vpop.f32.mrf.mxu1 }
0x1b69   : > { %15705 = vmatprep.mubr.bf16.mxu0 %v23431_v4  ;;  %15717 = vmatpush1.bf16.msra.mxu1 %v19683_v17  ;;  %v19700_v4 = vld [vmem:[%s21350_s25 + $0x88c] ss:$16 sps:$4 sm:$0xff]  }
0x1b6a   : > { %15748 = vmatprep.mubr.bf16.mxu1 %v23435_v62  ;;  %15675 = vmatprep.subr.bf16.mxu0 %v19688_v20  ;;  %v19698_v62 = vld [vmem:[%s21350_s25 + $0x888] ss:$16 sps:$4 sm:$0xff]   ;;  %v19745_v17 = vld [vmem:[%s21350_s25 + $0xbac] ss:$16 sps:$4 sm:$0xff]   ;;  %v15277_v20 = vpop.f32.mrf.mxu0 }
0x1b6b   : > { %15718 = vmatprep.subr.bf16.mxu1 %v19691_v63  ;;  %v15320_v63 = vpop.f32.mrf.mxu1 }
0x1b6c   : > { %15676 = vmatpush1.bf16.msra.mxu0 %v19686_v48  ;;  %v19740_v48 = vld [vmem:[%s21350_s25 + $0x9a8] ss:$16 sps:$4 sm:$0xff]  }
0x1b6d   : > { %15719 = vmatpush1.bf16.msra.mxu1 %v19689_v19  ;;  %15677 = vmatprep.subr.bf16.mxu0 %v19694_v56  ;;  %v19743_v19 = vld [vmem:[%s21350_s25 + $0xba8] ss:$16 sps:$4 sm:$0xff]   ;;  %v19748_v56 = vld [vmem:[%s21350_s25 + $0x98c] ss:$16 sps:$4 sm:$0xff]  }
0x1b6e   : > { %15720 = vmatprep.subr.bf16.mxu1 %v19697_v32  ;;  %v19751_v32 = vld [vmem:[%s21350_s25 + $0xb8c] ss:$16 sps:$4 sm:$0xff]  }
0x1b70   : > { %15678 = vmatpush1.bf16.msra.mxu0 %v19692_v47  ;;  %v15279_v47 = vpop.f32.mrf.mxu0 }
0x1b71   : > { %15721 = vmatpush1.bf16.msra.mxu1 %v19695_v54  ;;  %15679 = vmatprep.subr.bf16.mxu0 %v19700_v4  ;;  %v15322_v54 = vpop.f32.mrf.mxu1  ;;  %v19746_v4 = vld [vmem:[%s21350_s25 + $0x988] ss:$16 sps:$4 sm:$0xff]  }
0x1b72   : > { %15722 = vmatprep.subr.bf16.mxu1 %v19703_v7  ;;  %v19749_v7 = vld [vmem:[%s21350_s25 + $0xb88] ss:$16 sps:$4 sm:$0xff]  }
0x1b74   : > { %15680 = vmatpush1.bf16.msra.mxu0 %v19698_v62  ;;  %v19754_v62 = vld [vmem:[%s21350_s25 + $0x96c] ss:$16 sps:$4 sm:$0xff]  }
0x1b75   : > { %15723 = vmatpush1.bf16.msra.mxu1 %v19701_v42  ;;  %15681 = vmatprep.subr.bf16.mxu0 %v19706_v40  ;;  %v19757_v42 = vld [vmem:[%s21350_s25 + $0xb6c] ss:$16 sps:$4 sm:$0xff]   ;;  %v15281_v40 = vpop.f32.mrf.mxu0 }
0x1b76   : > { %15724 = vmatprep.subr.bf16.mxu1 %v19709_v12  ;;  %v15324_v12 = vpop.f32.mrf.mxu1 }
0x1b78   : > { %15682 = vmatpush1.bf16.msra.mxu0 %v19704_v61  ;;  %v19752_v61 = vld [vmem:[%s21350_s25 + $0x968] ss:$16 sps:$4 sm:$0xff]  }
0x1b79   : > { %15725 = vmatpush1.bf16.msra.mxu1 %v19707_v27  ;;  %15683 = vmatprep.subr.bf16.mxu0 %v19712_v24  ;;  %v19755_v27 = vld [vmem:[%s21350_s25 + $0xb68] ss:$16 sps:$4 sm:$0xff]   ;;  %v19760_v24 = vld [vmem:[%s21350_s25 + $0x94c] ss:$16 sps:$4 sm:$0xff]  }
0x1b7a   : > { %15726 = vmatprep.subr.bf16.mxu1 %v19715_v39  ;;  %v19763_v39 = vld [vmem:[%s21350_s25 + $0xb4c] ss:$16 sps:$4 sm:$0xff]  }
0x1b7c   : > { %15684 = vmatpush1.bf16.msra.mxu0 %v19710_v16  ;;  %v15283_v16 = vpop.f32.mrf.mxu0 }
0x1b7d   : > { %15727 = vmatpush1.bf16.msra.mxu1 %v19713_v59  ;;  %15685 = vmatprep.subr.bf16.mxu0 %v19718_v2  ;;  %v15326_v59 = vpop.f32.mrf.mxu1  ;;  %v19758_v2 = vld [vmem:[%s21350_s25 + $0x948] ss:$16 sps:$4 sm:$0xff]  }
0x1b7e   : > { %15728 = vmatprep.subr.bf16.mxu1 %v19721_v0  ;;  %v15363_v0 = vpop.f32.mrf.mxu0 }
0x1b80   : > { %15686 = vmatpush1.bf16.msra.mxu0 %v19716_v1  ;;  %v19761_v1 = vld [vmem:[%s21350_s25 + $0xb48] ss:$16 sps:$4 sm:$0xff]  }
0x1b81   : > { %15729 = vmatpush1.bf16.msra.mxu1 %v19719_v35  ;;  %15687 = vmatprep.subr.bf16.mxu0 %v19724_v6  ;;  %v19766_v35 = vld [vmem:[%s21350_s25 + $0x92c] ss:$16 sps:$4 sm:$0xff]   ;;  %v15235_v6 = vadd.f32 %v23784_v9, %v23780_v18  ;;  %v15239_v18 = vadd.f32 %v23800_v22, %v23796_v58 }
0x1b82   : > { %15730 = vmatprep.subr.bf16.mxu1 %v19727_v30  ;;  %v15406_v30 = vpop.f32.mrf.mxu1 }
0x1b84   : > { %15688 = vmatpush1.bf16.msra.mxu0 %v19722_v37  ;;  %v19769_v37 = vld [vmem:[%s21350_s25 + $0xb2c] ss:$16 sps:$4 sm:$0xff]  }
0x1b85   : > { %15731 = vmatpush1.bf16.msra.mxu1 %v19725_v33  ;;  %15689 = vmatprep.subr.bf16.mxu0 %v19730_v41  ;;  %v15237_v33 = vadd.f32 %v23792_v57, %v23788_v43  ;;  %v15278_v41 = vadd.f32 %v15277_v20, %v15235_v6  ;;  %v15241_v43 = vadd.f32 %v15240_v51, %v23804_v36  ;;  %v19773_v20 = vld [vmem:[%s21350_s25 + $0xb08] ss:$16 sps:$4 sm:$0xff]   ;;  %v19790_v6 = vld [vmem:[%s21350_s25 + $0xcac] ss:$16 sps:$4 sm:$0xff]  }
0x1b86   : > { %15732 = vmatprep.subr.bf16.mxu1 %v19733_v34  ;;  %v19764_v34 = vld [vmem:[%s21350_s25 + $0x928] ss:$16 sps:$4 sm:$0xff]  }
0x1b87   : > { %v15280_v9 = vadd.f32 %v15279_v47, %v15237_v33  ;;  %v15321_v57 = vadd.f32 %v15320_v63, %v15278_v41  ;;  %v15284_v58 = vadd.f32 %v15283_v16, %v15241_v43  ;;  %v19776_v63 = vld [vmem:[%s21350_s25 + $0xce8] ss:$16 sps:$4 sm:$0xff]  }
0x1b88   : > { %15690 = vmatpush2.bf16.msra.mxu0 %v19728_v52  ;;  %v15365_v52 = vpop.f32.mrf.mxu0 }
0x1b89   : > { %15733 = vmatpush2.bf16.msra.mxu1 %v19731_v25  ;;  %15691 = vmatprep.subr.bf16.mxu0 %v19736_v38  ;;  %v19767_v25 = vld [vmem:[%s21350_s25 + $0xb28] ss:$16 sps:$4 sm:$0xff]   ;;  %v19772_v38 = vld [vmem:[%s21350_s25 + $0x90c] ss:$16 sps:$4 sm:$0xff]   ;;  %v15364_v22 = vadd.f32 %v15363_v0, %v15321_v57 }
0x1b8a   : > { %15734 = vmatprep.subr.bf16.mxu1 %v19739_v8  ;;  %v15408_v8 = vpop.f32.mrf.mxu1  ;;  %v19799_v57 = vld [vmem:[%s21350_s25 + $0xe8c] ss:$16 sps:$4 sm:$0xff]  }
0x1b8c   : > { %15692 = vmatpush2.bf16.msra.mxu0 %v19734_v5  ;;  %v19775_v5 = vld [vmem:[%s21350_s25 + $0xb0c] ss:$16 sps:$4 sm:$0xff]  }
0x1b8d   : > { %15735 = vmatpush2.bf16.msra.mxu1 %v19737_v49  ;;  %15693 = vmatprep.subr.bf16.mxu0 %v19742_v45  ;;  %v15282_v49 = vadd.f32 %v15281_v40, %v15239_v18  ;;  %v19770_v45 = vld [vmem:[%s21350_s25 + $0x908] ss:$16 sps:$4 sm:$0xff]   ;;  %v23844_v40 = vld [vmem:[%s1030_s21] sm:$0xf] }
0x1b8e   : > { %15736 = vmatprep.subr.bf16.mxu1 %v19745_v17  ;;  %v15367_v17 = vpop.f32.mrf.mxu0  ;;  %v15858_v0 = vrot.slane %v23844_v40, %v21508_v14  ;;  %v15862_v14 = vrot.slane %v23844_v40, %v21502_v11 }
0x1b8f   : > { %v15325_v36 = vadd.f32 %v15324_v12, %v15282_v49 }
0x1b90   : > { %15694 = vmatpush2.bf16.msra.mxu0 %v19740_v48  ;;  %v19778_v48 = vld [vmem:[%s21350_s25 + $0xcec] ss:$16 sps:$4 sm:$0xff]   ;;  %v15369_v47 = vpop.f32.mrf.mxu0 }
0x1b91   : > { %15737 = vmatpush2.bf16.msra.mxu1 %v19743_v19  ;;  %15695 = vmatprep.subr.bf16.mxu0 %v19748_v56  ;;  %v15323_v19 = vadd.f32 %v15322_v54, %v15280_v9  ;;  %v15410_v56 = vpop.f32.mrf.mxu1  ;;  %v15368_v54 = vadd.f32 %v15367_v17, %v15325_v36  ;;  %v19791_v9 = vld [vmem:[%s21350_s25 + $0xea8] ss:$16 sps:$4 sm:$0xff]  }
0x1b92   : > { %15738 = vmatprep.subr.bf16.mxu1 %v19751_v32  ;;  %v19781_v32 = vld [vmem:[%s21350_s25 + $0xeec] ss:$16 sps:$4 sm:$0xff]   ;;  %v19803_v36 = vld [vmem:[%s21350_s25 + $0xe68] ss:$16 sps:$4 sm:$0xff]  }
0x1b93   : > { %v15366_v51 = vadd.f32 %v15365_v52, %v15323_v19  ;;  %v19802_v19 = vld [vmem:[%s21350_s25 + $0xc6c] ss:$16 sps:$4 sm:$0xff]  }
0x1b94   : > { %15696 = vmatpush2.bf16.msra.mxu0 %v19746_v4  ;;  %v19779_v4 = vld [vmem:[%s21350_s25 + $0xee8] ss:$16 sps:$4 sm:$0xff]  }
0x1b95   : > { %15739 = vmatpush2.bf16.msra.mxu1 %v19749_v7  ;;  %15697 = vmatprep.subr.bf16.mxu0 %v19754_v62  ;;  %v15327_v7 = vadd.f32 %v15326_v59, %v15284_v58  ;;  %v15407_v62 = vadd.f32 %v15406_v30, %v15364_v22  ;;  %v19782_v59 = vld [vmem:[%s21350_s25 + $0xcc8] ss:$16 sps:$4 sm:$0xff]  }
0x1b96   : > { %15740 = vmatprep.subr.bf16.mxu1 %v19757_v42  ;;  %v15412_v42 = vpop.f32.mrf.mxu1 }
0x1b98   : > { %15698 = vmatpush2.bf16.msra.mxu0 %v19752_v61  ;;  %v19784_v61 = vld [vmem:[%s21350_s25 + $0xccc] ss:$16 sps:$4 sm:$0xff]  }
0x1b99   : > { %15741 = vmatpush2.bf16.msra.mxu1 %v19755_v27  ;;  %15699 = vmatprep.subr.bf16.mxu0 %v19760_v24  ;;  %v19787_v27 = vld [vmem:[%s21350_s25 + $0xecc] ss:$16 sps:$4 sm:$0xff]   ;;  %v15409_v24 = vadd.f32 %v15408_v8, %v15366_v51 }
0x1b9a   : > { %15742 = vmatprep.subr.bf16.mxu1 %v19763_v39  ;;  %v15370_v39 = vadd.f32 %v15369_v47, %v15327_v7  ;;  %v19796_v8 = vld [vmem:[%s21350_s25 + $0xc8c] ss:$16 sps:$4 sm:$0xff]   ;;  %v19809_v47 = vld [vmem:[%s21350_s25 + $0xe48] ss:$16 sps:$4 sm:$0xff]  }
0x1b9b   : > { %v19808_v51 = vld [vmem:[%s21350_s25 + $0xc4c] ss:$16 sps:$4 sm:$0xff]  }
0x1b9c   : > { %15700 = vmatpush2.bf16.msra.mxu0 %v19758_v2  ;;  %v19817_v7 = vld [vmem:[%s21350_s25 + $0xe2c] ss:$16 sps:$4 sm:$0xff]  }
0x1b9d   : > { %15743 = vmatpush2.bf16.msra.mxu1 %v19761_v1  ;;  %15701 = vmatprep.subr.bf16.mxu0 %v19766_v35  ;;  %v19785_v35 = vld [vmem:[%s21350_s25 + $0xec8] ss:$16 sps:$4 sm:$0xff]  }
0x1b9e   : > { %15744 = vmatprep.subr.bf16.mxu1 %v19769_v37 }
0x1ba0   : > { %15702 = vmatpush2.bf16.msra.mxu0 %v19764_v34 }
0x1ba1   : > { %15745 = vmatpush2.bf16.msra.mxu1 %v19767_v25  ;;  %15703 = vmatprep.subr.bf16.mxu0 %v19772_v38 }
0x1ba2   : > { %15746 = vmatprep.subr.bf16.mxu1 %v19775_v5 }
0x1ba4   : > { %15704 = vmatpush2.bf16.msra.mxu0 %v19770_v45 }
0x1ba5   : > { %15747 = vmatpush2.bf16.msra.mxu1 %v19773_v20  ;;  %15759 = vmatprep.subr.bf16.mxu0 %v19778_v48  ;;  %v19794_v48 = vld [vmem:[%s21350_s25 + $0xc88] ss:$16 sps:$4 sm:$0xff]  }
0x1ba6   : > { %15802 = vmatprep.subr.bf16.mxu1 %v19781_v32  ;;  %v19800_v32 = vld [vmem:[%s21350_s25 + $0xc68] ss:$16 sps:$4 sm:$0xff]  }
0x1ba7   : > { %v15449_v12 = vpop.f32.mrf.mxu0  ;;  %15706 = vmatmul.mubr.bf16.vlgmr.msra.gmra.mxu0 %v23296_v28  ;;  %v15411_v28 = vadd.f32 %v15410_v56, %v15368_v54  ;;  %v19815_v54 = vld [vmem:[%s21350_s25 + $0xe28] ss:$16 sps:$4 sm:$0xff]  }
0x1ba8   : > { %v15450_v16 = vadd.f32 %v15449_v12, %v15407_v62  ;;  %v15492_v2 = vpop.f32.mrf.mxu1  ;;  %15749 = vmatmul.mubr.bf16.vlgmr.msra.gmra.mxu1 %v23402_v44  ;;  %15760 = vmatpush1.bf16.msra.mxu0 %v19776_v63  ;;  %v19793_v44 = vld [vmem:[%s21350_s25 + $0xeac] ss:$16 sps:$4 sm:$0xff]   ;;  %v19806_v63 = vld [vmem:[%s21350_s25 + $0xc48] ss:$16 sps:$4 sm:$0xff]  }
0x1ba9   : > { %15791 = vmatprep.mubr.bf16.mxu0 %v23528_v23  ;;  %15803 = vmatpush1.bf16.msra.mxu1 %v19779_v4  ;;  %v15451_v1 = vpop.f32.mrf.mxu0  ;;  %v15413_v23 = vadd.f32 %v15412_v42, %v15370_v39  ;;  %v19814_v4 = vld [vmem:[%s21350_s25 + $0xc2c] ss:$16 sps:$4 sm:$0xff]   ;;  %v19812_v62 = vld [vmem:[%s21350_s25 + $0xc28] ss:$16 sps:$4 sm:$0xff]  }
0x1baa   : > { %v15493_v30 = vadd.f32 %v15492_v2, %v15450_v16  ;;  %15834 = vmatprep.mubr.bf16.mxu1 %v23595_v50  ;;  %v15452_v37 = vadd.f32 %v15451_v1, %v15409_v24  ;;  %v15494_v33 = vpop.f32.mrf.mxu1  ;;  %15761 = vmatprep.subr.bf16.mxu0 %v19784_v61  ;;  %v19788_v50 = vld [vmem:[%s21350_s25 + $0xca8] ss:$16 sps:$4 sm:$0xff]   ;;  %v19820_v42 = vld [vmem:[%s21350_s25 + $0xc0c] ss:$16 sps:$4 sm:$0xff]  }
0x1bab   : > { %v15453_v41 = vpop.f32.mrf.mxu0  ;;  %15804 = vmatprep.subr.bf16.mxu1 %v19787_v27  ;;  %v19823_v61 = vld [vmem:[%s21350_s25 + $0xe0c] ss:$16 sps:$4 sm:$0xff]   ;;  %v19818_v12 = vld [vmem:[%s21350_s25 + $0xc08] ss:$16 sps:$4 sm:$0xff]  }
0x1bac   : > { %v15845_v34 = vadd.f32 %v15493_v30, %v22427_v26  ;;  %v15495_v52 = vadd.f32 %v15494_v33, %v15452_v37  ;;  %v15454_v25 = vadd.f32 %v15453_v41, %v15411_v28  ;;  %v15496_v38 = vpop.f32.mrf.mxu1  ;;  %15762 = vmatpush1.bf16.msra.mxu0 %v19782_v59  ;;  %v19821_v27 = vld [vmem:[%s21350_s25 + $0xe08] ss:$16 sps:$4 sm:$0xff]   ;;  %v19826_v24 = vld [vmem:[%s21350_s25 + $0xdec] ss:$16 sps:$4 sm:$0xff]  }
0x1bad   : > { %15805 = vmatpush1.bf16.msra.mxu1 %v19785_v35  ;;  %v15455_v18 = vpop.f32.mrf.mxu0  ;;  %15763 = vmatprep.subr.bf16.mxu0 %v19790_v6  ;;  %v19829_v39 = vld [vmem:[%s21350_s25 + $0xfec] ss:$16 sps:$4 sm:$0xff]   ;;  %v19824_v16 = vld [vmem:[%s21350_s25 + $0xde8] ss:$16 sps:$4 sm:$0xff]  }
0x1bae   : > { %v23864_v5 = vadd.f32 %v15858_v0, %v15845_v34  ;;  %v15846_v11 = vadd.f32 %v15495_v52, %v22425_v21  ;;  %v15497_v43 = vadd.f32 %v15496_v38, %v15454_v25  ;;  %v15456_v26 = vadd.f32 %v15455_v18, %v15413_v23  ;;  %15806 = vmatprep.subr.bf16.mxu1 %v19793_v44  ;;  %v15498_v49 = vpop.f32.mrf.mxu1  ;;  %v19797_v21 = vld [vmem:[%s21350_s25 + $0xe88] ss:$16 sps:$4 sm:$0xff]   ;;  %v19832_v59 = vld [vmem:[%s21350_s25 + $0xdcc] ss:$16 sps:$4 sm:$0xff]  }
0x1baf   : > { %v19827_v2 = vld [vmem:[%s21350_s25 + $0xfe8] ss:$16 sps:$4 sm:$0xff]   ;;  %v19838_v6 = vld [vmem:[%s21350_s25 + $0xdac] ss:$16 sps:$4 sm:$0xff]  }
0x1bb0   : > { %15883 = vst [vmem:[#allocation2 + $0x30] sm:$0xff] %v23864_v5  ;;  %v23869_v45 = vadd.f32 %v15862_v14, %v15846_v11  ;;  %v15849_v17 = vadd.f32 %v15497_v43, %v22435_v53  ;;  %v15499_v20 = vadd.f32 %v15498_v49, %v15456_v26  ;;  %15764 = vmatpush1.bf16.msra.mxu0 %v19788_v50  ;;  %v19805_v53 = vld [vmem:[%s21350_s25 + $0xe6c] ss:$16 sps:$4 sm:$0xff]   ;;  %v19830_v1 = vld [vmem:[%s21350_s25 + $0xdc8] ss:$16 sps:$4 sm:$0xff]  }
0x1bb1   : > { %15807 = vmatpush1.bf16.msra.mxu1 %v19791_v9  ;;  %15765 = vmatprep.subr.bf16.mxu0 %v19796_v8  ;;  %v19833_v35 = vld [vmem:[%s21350_s25 + $0xfc8] ss:$16 sps:$4 sm:$0xff]   ;;  %v19841_v28 = vld [vmem:[%s21350_s25 + $0xfac] ss:$16 sps:$4 sm:$0xff]  }
0x1bb2   : > { %15884 = vst [vmem:[#allocation2] sm:$0xff] %v23869_v45  ;;  %v23876_v58 = vadd.f32 %v15858_v0, %v15849_v17  ;;  %v15850_v22 = vadd.f32 %v15499_v20, %v22429_v10  ;;  %15808 = vmatprep.subr.bf16.mxu1 %v19799_v57  ;;  %v19811_v10 = vld [vmem:[%s21350_s25 + $0xe4c] ss:$16 sps:$4 sm:$0xff]   ;;  %v19836_v30 = vld [vmem:[%s21350_s25 + $0xda8] ss:$16 sps:$4 sm:$0xff]  }
0x1bb3   : > { %v19835_v0 = vld [vmem:[%s21350_s25 + $0xfcc] ss:$16 sps:$4 sm:$0xff]   ;;  %v19839_v37 = vld [vmem:[%s21350_s25 + $0xfa8] ss:$16 sps:$4 sm:$0xff]  }
0x1bb4   : > { %15887 = vst [vmem:[#allocation2 + $0x8] sm:$0xff] %v23876_v58  ;;  %v23881_v56 = vadd.f32 %v15862_v14, %v15850_v22  ;;  %15766 = vmatpush1.bf16.msra.mxu0 %v19794_v48  ;;  %v19844_v33 = vld [vmem:[%s21350_s25 + $0xd8c] ss:$16 sps:$4 sm:$0xff]   ;;  %v19842_v14 = vld [vmem:[%s21350_s25 + $0xd88] ss:$16 sps:$4 sm:$0xff]  }
0x1bb5   : > { %15809 = vmatpush1.bf16.msra.mxu1 %v19797_v21  ;;  %15767 = vmatprep.subr.bf16.mxu0 %v19802_v19  ;;  %v19847_v44 = vld [vmem:[%s21350_s25 + $0xf8c] ss:$16 sps:$4 sm:$0xff]   ;;  %v19845_v41 = vld [vmem:[%s21350_s25 + $0xf88] ss:$16 sps:$4 sm:$0xff]  }
0x1bb6   : > { %15888 = vst [vmem:[#allocation2 + $0x20] sm:$0xff] %v23881_v56  ;;  %15810 = vmatprep.subr.bf16.mxu1 %v19805_v53  ;;  %v19850_v23 = vld [vmem:[%s21350_s25 + $0xd6c] ss:$16 sps:$4 sm:$0xff]   ;;  %v19848_v52 = vld [vmem:[%s21350_s25 + $0xd68] ss:$16 sps:$4 sm:$0xff]  }
0x1bb7   : > { %v19853_v34 = vld [vmem:[%s21350_s25 + $0xf6c] ss:$16 sps:$4 sm:$0xff]   ;;  %v19851_v25 = vld [vmem:[%s21350_s25 + $0xf68] ss:$16 sps:$4 sm:$0xff]  }
0x1bb8   : > { %15768 = vmatpush1.bf16.msra.mxu0 %v19800_v32  ;;  %v19856_v38 = vld [vmem:[%s21350_s25 + $0xd4c] ss:$16 sps:$4 sm:$0xff]   ;;  %v19854_v18 = vld [vmem:[%s21350_s25 + $0xd48] ss:$16 sps:$4 sm:$0xff]  }
0x1bb9   : > { %15811 = vmatpush1.bf16.msra.mxu1 %v19803_v36  ;;  %15769 = vmatprep.subr.bf16.mxu0 %v19808_v51  ;;  %v19859_v50 = vld [vmem:[%s21350_s25 + $0xf4c] ss:$16 sps:$4 sm:$0xff]   ;;  %v19857_v9 = vld [vmem:[%s21350_s25 + $0xf48] ss:$16 sps:$4 sm:$0xff]  }
0x1bba   : > { %15812 = vmatprep.subr.bf16.mxu1 %v19811_v10  ;;  %v19862_v8 = vld [vmem:[%s21350_s25 + $0xd2c] ss:$16 sps:$4 sm:$0xff]   ;;  %v19860_v43 = vld [vmem:[%s21350_s25 + $0xd28] ss:$16 sps:$4 sm:$0xff]  }
0x1bbb   : > { %v19865_v11 = vld [vmem:[%s21350_s25 + $0xf2c] ss:$16 sps:$4 sm:$0xff]   ;;  %v19863_v26 = vld [vmem:[%s21350_s25 + $0xf28] ss:$16 sps:$4 sm:$0xff]  }
0x1bbc   : > { %15770 = vmatpush1.bf16.msra.mxu0 %v19806_v63  ;;  %v19868_v57 = vld [vmem:[%s21350_s25 + $0xd0c] ss:$16 sps:$4 sm:$0xff]   ;;  %v19866_v17 = vld [vmem:[%s21350_s25 + $0xd08] ss:$16 sps:$4 sm:$0xff]  }
0x1bbd   : > { %15813 = vmatpush1.bf16.msra.mxu1 %v19809_v47  ;;  %15771 = vmatprep.subr.bf16.mxu0 %v19814_v4  ;;  %v19871_v49 = vld [vmem:[%s21350_s25 + $0xf0c] ss:$16 sps:$4 sm:$0xff]   ;;  %v19869_v20 = vld [vmem:[%s21350_s25 + $0xf08] ss:$16 sps:$4 sm:$0xff]  }
0x1bbe   : > { %15814 = vmatprep.subr.bf16.mxu1 %v19817_v7 }
0x1bc0   : > { %15772 = vmatpush1.bf16.msra.mxu0 %v19812_v62 }
0x1bc1   : > { %15815 = vmatpush1.bf16.msra.mxu1 %v19815_v54  ;;  %15773 = vmatprep.subr.bf16.mxu0 %v19820_v42 }
0x1bc2   : > { %15816 = vmatprep.subr.bf16.mxu1 %v19823_v61 }
0x1bc4   : > { %15774 = vmatpush1.bf16.msra.mxu0 %v19818_v12 }
0x1bc5   : > { %15817 = vmatpush1.bf16.msra.mxu1 %v19821_v27  ;;  %15775 = vmatprep.subr.bf16.mxu0 %v19826_v24 }
0x1bc6   : > { %15818 = vmatprep.subr.bf16.mxu1 %v19829_v39 }
0x1bc8   : > { %15776 = vmatpush2.bf16.msra.mxu0 %v19824_v16 }
0x1bc9   : > { %15819 = vmatpush2.bf16.msra.mxu1 %v19827_v2  ;;  %15777 = vmatprep.subr.bf16.mxu0 %v19832_v59 }
0x1bca   : > { %15820 = vmatprep.subr.bf16.mxu1 %v19835_v0 }
0x1bcc   : > { %15778 = vmatpush2.bf16.msra.mxu0 %v19830_v1 }
0x1bcd   : > { %15821 = vmatpush2.bf16.msra.mxu1 %v19833_v35  ;;  %15779 = vmatprep.subr.bf16.mxu0 %v19838_v6 }
0x1bce   : > { %15822 = vmatprep.subr.bf16.mxu1 %v19841_v28 }
0x1bd0   : > { %15780 = vmatpush2.bf16.msra.mxu0 %v19836_v30 }
0x1bd1   : > { %15823 = vmatpush2.bf16.msra.mxu1 %v19839_v37  ;;  %15781 = vmatprep.subr.bf16.mxu0 %v19844_v33 }
0x1bd2   : > { %15824 = vmatprep.subr.bf16.mxu1 %v19847_v44 }
0x1bd4   : > { %15782 = vmatpush2.bf16.msra.mxu0 %v19842_v14 }
0x1bd5   : > { %15825 = vmatpush2.bf16.msra.mxu1 %v19845_v41  ;;  %15783 = vmatprep.subr.bf16.mxu0 %v19850_v23 }
0x1bd6   : > { %15826 = vmatprep.subr.bf16.mxu1 %v19853_v34 }
0x1bd8   : > { %15784 = vmatpush2.bf16.msra.mxu0 %v19848_v52 }
0x1bd9   : > { %15827 = vmatpush2.bf16.msra.mxu1 %v19851_v25  ;;  %15785 = vmatprep.subr.bf16.mxu0 %v19856_v38 }
0x1bda   : > { %15828 = vmatprep.subr.bf16.mxu1 %v19859_v50 }
0x1bdc   : > { %15786 = vmatpush2.bf16.msra.mxu0 %v19854_v18 }
0x1bdd   : > { %15829 = vmatpush2.bf16.msra.mxu1 %v19857_v9  ;;  %15787 = vmatprep.subr.bf16.mxu0 %v19862_v8 }
0x1bde   : > { %15830 = vmatprep.subr.bf16.mxu1 %v19865_v11 }
0x1be0   : > { %15788 = vmatpush2.bf16.msra.mxu0 %v19860_v43 }
0x1be1   : > { %15831 = vmatpush2.bf16.msra.mxu1 %v19863_v26  ;;  %15789 = vmatprep.subr.bf16.mxu0 %v19868_v57  ;;  %v15866_v26 = vrot.slane %v23844_v40, %v21511_v15 }
0x1be2   : > { %15832 = vmatprep.subr.bf16.mxu1 %v19871_v49 }
0x1be4   : > { %15790 = vmatpush2.bf16.msra.mxu0 %v19866_v17  ;;  %v15870_v17 = vrot.slane %v23844_v40, %v21505_v13 }
0x1be5   : > { %15833 = vmatpush2.bf16.msra.mxu1 %v19869_v20 }
0x1be7   : > { %15792 = vmatmul.mubr.bf16.vlgmr.msra.gmra.mxu0 %v23500_v46  ;;  %v15535_v48 = vpop.f32.mrf.mxu0 }
0x1be8   : > { %15835 = vmatmul.mubr.bf16.vlgmr.msra.gmra.mxu1 %v23615_v3  ;;  %v15578_v21 = vpop.f32.mrf.mxu1 }
0x1be9   : > { %v15537_v19 = vpop.f32.mrf.mxu0  ;;  %v15579_v46 = vadd.f32 %v15578_v21, %v15535_v48 }
0x1bea   : > { %v15580_v22 = vpop.f32.mrf.mxu1 }
0x1beb   : > { %v15539_v53 = vpop.f32.mrf.mxu0  ;;  %v15581_v3 = vadd.f32 %v15580_v22, %v15537_v19 }
0x1bec   : > { %v15582_v32 = vpop.f32.mrf.mxu1 }
0x1bed   : > { %v15541_v36 = vpop.f32.mrf.mxu0  ;;  %v15583_v39 = vadd.f32 %v15582_v32, %v15539_v53 }
0x1bee   : > { %v15584_v51 = vpop.f32.mrf.mxu1 }
0x1bef   : > { %v15585_v59 = vadd.f32 %v15584_v51, %v15541_v36 }
0x1c27   : > { %v15621_v10 = vpop.f32.mrf.mxu0 }
0x1c28   : > { %v15664_v63 = vpop.f32.mrf.mxu1  ;;  %v15622_v27 = vadd.f32 %v15621_v10, %v15579_v46 }
0x1c29   : > { %v15623_v47 = vpop.f32.mrf.mxu0 }
0x1c2a   : > { %v15666_v4 = vpop.f32.mrf.mxu1  ;;  %v15624_v16 = vadd.f32 %v15623_v47, %v15581_v3  ;;  %v15665_v0 = vadd.f32 %v15664_v63, %v15622_v27 }
0x1c2b   : > { %v15625_v7 = vpop.f32.mrf.mxu0 }
0x1c2c   : > { %v15668_v62 = vpop.f32.mrf.mxu1  ;;  %v15626_v1 = vadd.f32 %v15625_v7, %v15583_v39  ;;  %v15667_v6 = vadd.f32 %v15666_v4, %v15624_v16 }
0x1c2d   : > { %v15627_v54 = vpop.f32.mrf.mxu0 }
0x1c2e   : > { %v15670_v42 = vpop.f32.mrf.mxu1  ;;  %v15628_v28 = vadd.f32 %v15627_v54, %v15585_v59  ;;  %v15669_v33 = vadd.f32 %v15668_v62, %v15626_v1 }
0x1c30   : > { %v15671_v41 = vadd.f32 %v15670_v42, %v15628_v28 }
0x1c67   : > { %v15707_v61 = vpop.f32.mrf.mxu0 }
0x1c68   : > { %v15750_v12 = vpop.f32.mrf.mxu1  ;;  %v15708_v30 = vadd.f32 %v15707_v61, %v15665_v0 }
0x1c69   : > { %v15709_v24 = vpop.f32.mrf.mxu0 }
0x1c6a   : > { %v15752_v2 = vpop.f32.mrf.mxu1  ;;  %v15710_v44 = vadd.f32 %v15709_v24, %v15667_v6  ;;  %v15751_v23 = vadd.f32 %v15750_v12, %v15708_v30 }
0x1c6b   : > { %v15711_v35 = vpop.f32.mrf.mxu0 }
0x1c6c   : > { %v15754_v37 = vpop.f32.mrf.mxu1  ;;  %v15712_v34 = vadd.f32 %v15711_v35, %v15669_v33  ;;  %v15753_v38 = vadd.f32 %v15752_v2, %v15710_v44 }
0x1c6d   : > { %v15713_v14 = vpop.f32.mrf.mxu0 }
0x1c6e   : > { %v15756_v52 = vpop.f32.mrf.mxu1  ;;  %v15714_v50 = vadd.f32 %v15713_v14, %v15671_v41  ;;  %v15755_v11 = vadd.f32 %v15754_v37, %v15712_v34 }
0x1c70   : > { %v15757_v48 = vadd.f32 %v15756_v52, %v15714_v50 }
0x1ca7   : > { %v15793_v25 = vpop.f32.mrf.mxu0 }
0x1ca8   : > { %v15794_v18 = vadd.f32 %v15793_v25, %v15751_v23  ;;  %v15836_v9 = vpop.f32.mrf.mxu1 }
0x1ca9   : > { %v15795_v8 = vpop.f32.mrf.mxu0 }
0x1caa   : > { %v15837_v43 = vadd.f32 %v15836_v9, %v15794_v18  ;;  %v15796_v57 = vadd.f32 %v15795_v8, %v15753_v38  ;;  %v15838_v49 = vpop.f32.mrf.mxu1 }
0x1cab   : > { %v15797_v20 = vpop.f32.mrf.mxu0 }
0x1cac   : > { %v15847_v21 = vadd.f32 %v15837_v43, %v22431_v29  ;;  %v15839_v19 = vadd.f32 %v15838_v49, %v15796_v57  ;;  %v15798_v22 = vadd.f32 %v15797_v20, %v15755_v11  ;;  %v15840_v53 = vpop.f32.mrf.mxu1 }
0x1cad   : > { %v15799_v32 = vpop.f32.mrf.mxu0 }
0x1cae   : > { %v15877_v36 = vadd.f32 %v15866_v26, %v15847_v21  ;;  %v15848_v51 = vadd.f32 %v15839_v19, %v22437_v31  ;;  %v15841_v10 = vadd.f32 %v15840_v53, %v15798_v22  ;;  %v15800_v63 = vadd.f32 %v15799_v32, %v15757_v48  ;;  %v15842_v47 = vpop.f32.mrf.mxu1 }
0x1cb0   : > { %15885 = vst [vmem:[#allocation2 + $0x18] sm:$0xff] %v15877_v36  ;;  %v15878_v15 = vadd.f32 %v15870_v17, %v15848_v51  ;;  %v15851_v4 = vadd.f32 %v15841_v10, %v22440_v55  ;;  %v15843_v7 = vadd.f32 %v15842_v47, %v15800_v63 }
0x1cb2   : > { %15886 = vst [vmem:[#allocation2 + $0x10] sm:$0xff] %v15878_v15  ;;  %v15881_v13 = vadd.f32 %v15866_v26, %v15851_v4  ;;  %v15852_v40 = vadd.f32 %v15843_v7, %v22445_v60  ;;  %15894 = sbr.rel (%p17998_p6) target bundleno = 7358 (0x1cbe), region = 168 }
0x1cb4   : > { %15889 = vst [vmem:[#allocation2 + $0x28] sm:$0xff] %v15881_v13  ;;  %v15882_v29 = vadd.f32 %v15870_v17, %v15852_v40 }
0x1cb6   : > { %15890 = vst [vmem:[#allocation2 + $0x38] sm:$0xff] %v15882_v29 }
0x1cb7   : > { %v15895_v62 = vld [vmem:[#allocation4] sm:$0xff]  ;;  %v15896_v31 = vld [vmem:[#allocation4 + $0x8] sm:$0xff]  ;;  %v15897_v54 = vld [vmem:[#allocation4 + $0x10] sm:$0xff] }
0x1cb8   : > { %v15903_v42 = vadd.f32 %v15895_v62, %v23864_v5  ;;  %v15904_v61 = vadd.f32 %v15896_v31, %v23869_v45  ;;  %v15905_v46 = vadd.f32 %v15897_v54, %v15877_v36  ;;  %v15898_v55 = vld [vmem:[#allocation4 + $0x18] sm:$0xff]  ;;  %v15899_v12 = vld [vmem:[#allocation4 + $0x20] sm:$0xff]  ;;  %v15900_v3 = vld [vmem:[#allocation4 + $0x28] sm:$0xff] }
0x1cb9   : > { %v15906_v27 = vadd.f32 %v15898_v55, %v15878_v15  ;;  %v15907_v60 = vadd.f32 %v15899_v12, %v23876_v58  ;;  %v15908_v24 = vadd.f32 %v15900_v3, %v23881_v56  ;;  %v15901_v39 = vld [vmem:[#allocation4 + $0x30] sm:$0xff]  ;;  %v15902_v16 = vld [vmem:[#allocation4 + $0x38] sm:$0xff] }
0x1cba   : > { %15911 = vst [vmem:[#allocation31] sm:$0xff] %v15903_v42  ;;  %15912 = vst [vmem:[#allocation31 + $0x8] sm:$0xff] %v15904_v61  ;;  %v15909_v2 = vadd.f32 %v15901_v39, %v15881_v13  ;;  %v15910_v59 = vadd.f32 %v15902_v16, %v15882_v29 }
0x1cbb   : > { %15913 = vst [vmem:[#allocation31 + $0x10] sm:$0xff] %v15905_v46  ;;  %15914 = vst [vmem:[#allocation31 + $0x18] sm:$0xff] %v15906_v27 }
0x1cbc   : > { %15915 = vst [vmem:[#allocation31 + $0x20] sm:$0xff] %v15907_v60  ;;  %15916 = vst [vmem:[#allocation31 + $0x28] sm:$0xff] %v15908_v24 }
0x1cbd   : > { %15917 = vst [vmem:[#allocation31 + $0x30] sm:$0xff] %v15909_v2  ;;  %15918 = vst [vmem:[#allocation31 + $0x38] sm:$0xff] %v15910_v59 }
0x1cbe PF: > { %s24081_s25 = sld [smem:[#allocation44_spill]]  ;;  %s20647_s29 = smov [#allocation31]  }
0x1cbf   : > { %s15925_s21 = sshll.u32 %s20647_s29, 4  ;;  %s15926_s21 = int_to_ptr.vmem [resolvable:$true] %s15925_s21 }
0x1cc0   : > { %s20525_s8 = scalar_lea.vmem %s15926_s21, 1024  ;;  %p20532_p11 = scmp.lt.s32.totalorder %s15926_s21, %s15926_s21 }
0x1cc1   : > { %p20526_p8 = scmp.ne.s32.totalorder %s15926_s21, %s20525_s8  ;;  %p20533_p12 = scmp.lt.s32.totalorder %s20525_s8, %s20525_s8 }
0x1cc3   : > { %p20534_p13 = por %p20533_p12, %p20532_p11 }
0x1cc4   : > { %p18289_p7 = scmp.eq.s32.totalorder %s24081_s25, 2 }
0x1cc6   : > { %p20527_p9 = pnand %p20526_p8, %p18289_p7 }
0x1cc8   : > { %p20528_p5 = pneg %p20527_p9 }
0x1cca   : > { %p20535_p0 = pnand %p20534_p13, %p20528_p5 }
0x1ccc   : > { %20538 = shalt.err (!%p20535_p0)
}
0x1ccd   : > { %s20648_s13 = smov 512   ;;  %s20649_s18 = smov 32  }
0x1cce   : > { %s24082_s6 = sld [smem:[#allocation61_spill]] }
0x1cd4   : > { %18280 = dma.vmem_to_hbm [thread:$0]  (%p18289_p7), %s15926_s21, 1024, %s24082_s6, [#allocation6], %s20648_s13, %s20648_s13, %s20649_s18  }
0x1cd5   : > { %20602 = dma.done.wait (%p18289_p7), [#allocation6], 1024  }
0x1cd6   : > { %20604 = vsyncadd (%p18289_p7), [#allocation6], 4294966272 }
0x1cd7 PF: > { %s24083_s30 = sld [smem:[#allocation45_spill]] }
0x1cd8   : > { %s24084_s27 = sld [smem:[#allocation42_spill]] }
0x1cd9   : > { %s24085_s28 = sld [smem:[#allocation43_spill]] }
0x1cda   : > { %s24086_s29 = sld [smem:[#allocation46_spill]] }
0x1cdd   : > { %p51_p1 = scmp.ge.s32.totalorder %s24083_s30, 5  }
0x1cdf   :  { %53 = sbr.rel (!%p51_p1) target bundleno = 33 (0x21), region = 321 }
0x1ce4   :  { %15941 = vsyncpa [#allocation5], 1 }
0x1ce5   :  { %15943 = vsyncpa [#allocation5 + $0x1], 1 }
0x1ce6   :  { %15944 = vsyncpa [#allocation8], 1 }
0x1ce7   :  { %15946 = vsyncpa [#allocation8 + $0x1], 1 }
0x1ce8   :  { %15947 = vsyncpa [#allocation11], 1 }
0x1ce9   :  { %15949 = vsyncpa [#allocation11 + $0x1], 1 }
0x1cea   :  { %15950 = vsyncpa [#allocation14], 1 }
0x1ceb   :  { %15952 = vsyncpa [#allocation14 + $0x1], 1 }
0x1cec   :  { %15953 = vsyncpa [#allocation17], 1 }
0x1ced   :  { %15955 = vsyncpa [#allocation17 + $0x1], 1 }
0x1cee   :  { %15956 = vsyncpa [#allocation20], 1 }
0x1cef   :  { %15958 = vsyncpa [#allocation20 + $0x1], 1 }
0x1cf0   :  { %15959 = vsyncpa [#allocation23], 1 }
0x1cf1   :  { %15961 = vsyncpa [#allocation23 + $0x1], 1 }
0x1cf2   :  { %15962 = vsyncpa [#allocation26], 1 }
0x1cf3   :  { %15964 = vsyncpa [#allocation26 + $0x1], 1 }
0x1cf4   :  { %15965 = vsyncpa [#allocation29], 1 }
0x1cf5   :  { %15967 = vsyncpa [#allocation29 + $0x1], 1 }
0x1cf6   :  { %15968 = vsyncpa [#allocation6], 1 }
0x1cf7   :  { %15970 = vsyncpa [#allocation6 + $0x1], 1 }

</bundles_post_ra>
